<compile_context>
chip_gen: v6e
topology: v6e:2x2x1
jax: 0.10.0
libtpu: 0.0.40
codegen_flags: <defaults>
</compile_context>

<pallas_src>
import functools
import math

import numpy as np
import jax
import jax.numpy as jnp
from jax.experimental import pallas as pl
from jax.experimental.pallas import tpu as pltpu

PT_FEATURE_SIZE = 40
SMILESCLen = 64
BN_EPS = 1e-5

# Static (never traced) channel configuration.
SEQ_CHS = ((128, 32), (32, 64), (64, 64), (64, 128))   # DilatedConvBlockA x4
PKT_CHS = ((128, 32), (32, 64), (64, 64))               # Conv1d(k=3)+BN+PReLU x3
SMI_CHS = ((128, 32), (32, 64), (64, 128))              # DilatedConvBlockB x3
SEQ_ADDS = tuple(ci == co for ci, co in SEQ_CHS)         # residual iff nIn == nOut
SMI_ADDS = tuple(ci == co for ci, co in SMI_CHS)

BLOCKA_DILS = (1, 2, 4, 8, 16)
BLOCKB_DILS = (1, 2, 4, 8)
BLOCKA_SHIFTS = (-16, -8, -4, -2, -1, 0, 1, 2, 4, 8, 16)
BLOCKB_SHIFTS = (-8, -4, -2, -1, 0, 1, 2, 4, 8)

_VMEM = pl.BlockSpec(memory_space=pltpu.MemorySpace.VMEM)
_SMEM = pl.BlockSpec(memory_space=pltpu.MemorySpace.SMEM)


def _vmem_full(a):
    """Whole-array VMEM block (constant index_map across the batch grid)."""
    zeros = (0,) * a.ndim
    return pl.BlockSpec(a.shape, lambda b, _z=zeros: _z)


# ----------------------------------------------------------------------------
# Pallas kernels
# ----------------------------------------------------------------------------
def _dilated_branch_kernel(*refs, shifts, adds, has_embed):
    """[Linear embed] + N DilatedConvBlocks + AdaptiveMaxPool1d(1), per batch row.

    refs = (x, [embed_w, embed_b],
            {w1, b1, a1(SMEM), wcomb, bn_scale, bn_shift, a2(SMEM)} x N,
            out, scratch)
    """
    scr_ref = refs[-1]
    o_ref = refs[-2]
    x_ref = refs[0]
    prm = refs[1:-2]
    maxs = max(shifts)

    # Zero the shift halo once; the middle rows are rewritten per block.
    scr_ref[...] = jnp.zeros(scr_ref.shape, jnp.float32)

    x = x_ref[0]                                      # (L, C_in) f32
    idx = 0
    if has_embed:
        x = jnp.dot(x.astype(jnp.bfloat16), prm[0][...],
                    preferred_element_type=jnp.float32) + prm[1][...]
        idx = 2
    L = x.shape[0]

    for add_res in adds:
        w1 = prm[idx][...]                            # (c_in, n) bf16
        b1 = prm[idx + 1][...]                        # (1, n)
        a1 = prm[idx + 2][0]                          # PReLU alpha (SMEM scalar)
        wc_ref = prm[idx + 3]                         # (S, n, n_out) bf16
        s2 = prm[idx + 4][...]                        # (1, n_out) folded BN scale
        t2 = prm[idx + 5][...]                        # (1, n_out) folded BN shift
        a2 = prm[idx + 6][0]
        idx += 7
        n = w1.shape[1]

        # c1 (1x1 conv) with folded BN, PReLU epilogue.
        o1 = jnp.dot(x.astype(jnp.bfloat16), w1,
                     preferred_element_type=jnp.float32) + b1
        o1 = jnp.where(o1 > 0, o1, a1 * o1)

        # Keep o1 in the zero-padded VMEM scratch; shifted taps are read back.
        scr_ref[maxs:maxs + L, :n] = o1

        # All dilated branches + cumulative adds + concat folded into wcomb.
        y = x if add_res else 0.0                     # residual added pre-BN
        for si, s in enumerate(shifts):
            tap = scr_ref[maxs + s:maxs + s + L, :n].astype(jnp.bfloat16)
            y = y + jnp.dot(tap, wc_ref[si], preferred_element_type=jnp.float32)

        y = y * s2 + t2                               # br2 BatchNorm (eval)
        x = jnp.where(y > 0, y, a2 * y)               # br2 PReLU

    o_ref[0] = jnp.max(x, axis=0, keepdims=True)      # AdaptiveMaxPool1d(1)


def _pkt_branch_kernel(*refs, n_layers):
    """3x (Conv1d(k=3, no pad) + folded BN + PReLU) + AdaptiveMaxPool1d(1)."""
    scr_ref = refs[-1]
    o_ref = refs[-2]
    x_ref = refs[0]
    prm = refs[1:-2]

    x = x_ref[0]                                      # (L, 128) f32
    L = x.shape[0]
    idx = 0
    for _ in range(n_layers):
        w_ref = prm[idx]                              # (3, c_in, c_out) bf16
        b = prm[idx + 1][...]                         # (1, c_out)
        a = prm[idx + 2][0]                           # SMEM scalar
        idx += 3
        cin = w_ref.shape[1]
        lout = L - 2
        scr_ref[:L, :cin] = x
        y = b
        for k in range(3):
            tap = scr_ref[k:k + lout, :cin].astype(jnp.bfloat16)
            y = y + jnp.dot(tap, w_ref[k], preferred_element_type=jnp.float32)
        x = jnp.where(y > 0, y, a * y)
        L = lout
    o_ref[0] = jnp.max(x, axis=0, keepdims=True)


def _encoder_kernel(trg_ref, src_ref, wq_ref, bq_ref, wk_ref, bk_ref,
                    wv_ref, bv_ref, wfc_ref, bfc_ref, g_ref, be_ref,
                    w1_ref, b1_ref, w2_ref, b2_ref, o_ref, *, n_heads, inv_scale):
    """LN(trg + outproj(MHA(trg, src, src))) then LN(x + FFN(x)), fused per batch."""
    trg = trg_ref[0]                                  # (Lq, D) f32
    src = src_ref[0]                                  # (Lk, D) f32
    D = trg.shape[-1]
    dh = D // n_heads
    g = g_ref[...]
    be = be_ref[...]

    def layernorm(v):
        m = jnp.mean(v, axis=-1, keepdims=True)
        var = jnp.mean(jnp.square(v - m), axis=-1, keepdims=True)
        return (v - m) * jax.lax.rsqrt(var + 1e-5) * g + be

    # Lane-dense (D-wide) Q / K / V projections; heads are split only for scores.
    q = jnp.dot(trg.astype(jnp.bfloat16), wq_ref[...],
                preferred_element_type=jnp.float32) + bq_ref[...]
    k = jnp.dot(src.astype(jnp.bfloat16), wk_ref[...],
                preferred_element_type=jnp.float32) + bk_ref[...]
    v = jnp.dot(src.astype(jnp.bfloat16), wv_ref[...],
                preferred_element_type=jnp.float32) + bv_ref[...]

    ddims = (((1,), (1,)), ((), ()))                  # contract last dims (K^T)
    ctxs = []
    for h in range(n_heads):
        qh = q[:, h * dh:(h + 1) * dh].astype(jnp.bfloat16)
        kh = k[:, h * dh:(h + 1) * dh].astype(jnp.bfloat16)
        vh = v[:, h * dh:(h + 1) * dh].astype(jnp.bfloat16)
        s = jax.lax.dot_general(qh, kh, ddims,
                                preferred_element_type=jnp.float32) * inv_scale
        s = s - jnp.max(s, axis=-1, keepdims=True)
        p = jnp.exp(s)
        p = p * pl.reciprocal(jnp.sum(p, axis=-1, keepdims=True), approx=True)
        ctxs.append(jnp.dot(p.astype(jnp.bfloat16), vh,
                            preferred_element_type=jnp.float32))
    ctx = jnp.concatenate(ctxs, axis=-1)              # (Lq, D) lane-dense

    y = trg + jnp.dot(ctx.astype(jnp.bfloat16), wfc_ref[...],
                      preferred_element_type=jnp.float32) + bfc_ref[...]
    x1 = layernorm(y)

    hmid = jnp.dot(x1.astype(jnp.bfloat16), w1_ref[...],
                   preferred_element_type=jnp.float32) + b1_ref[...]
    hmid = jnp.maximum(hmid, 0.0)
    y2 = x1 + jnp.dot(hmid.astype(jnp.bfloat16), w2_ref[...],
                      preferred_element_type=jnp.float32) + b2_ref[...]
    o_ref[0] = layernorm(y2)


def _linear_kernel(x_ref, w_ref, b_ref, o_ref):
    o_ref[...] = jnp.dot(x_ref[...].astype(jnp.bfloat16), w_ref[...],
                         preferred_element_type=jnp.float32) + b_ref[...]


def _head_kernel(s_ref, p_ref, m_ref, w1s_ref, w1p_ref, w1m_ref, b1_ref, a1_ref,
                 w2_ref, b2_ref, a2_ref, w3_ref, b3_ref, o_ref):
    """Concat (via split weights) + Linear/PReLU x2 + final Linear(128,1)."""
    h = (jnp.dot(s_ref[...].astype(jnp.bfloat16), w1s_ref[...],
                 preferred_element_type=jnp.float32)
         + jnp.dot(p_ref[...].astype(jnp.bfloat16), w1p_ref[...],
                   preferred_element_type=jnp.float32)
         + jnp.dot(m_ref[...].astype(jnp.bfloat16), w1m_ref[...],
                   preferred_element_type=jnp.float32)
         + b1_ref[...])
    a1 = a1_ref[0]
    h = jnp.where(h > 0, h, a1 * h)
    h = jnp.dot(h.astype(jnp.bfloat16), w2_ref[...],
                preferred_element_type=jnp.float32) + b2_ref[...]
    a2 = a2_ref[0]
    h = jnp.where(h > 0, h, a2 * h)
    # Linear(128, 1): degenerate-N matmul replaced by VPU multiply + lane reduce.
    o_ref[...] = jnp.sum(h * w3_ref[...], axis=-1, keepdims=True) + b3_ref[0]


# ----------------------------------------------------------------------------
# pallas_call wrappers
# ----------------------------------------------------------------------------
def dilated_branch_forward(x, blocks, embed, shifts, adds, out_c):
    B, L, c_in = x.shape
    maxs = max(shifts)
    args = [x]
    in_specs = [pl.BlockSpec((1, L, c_in), lambda b: (b, 0, 0))]
    if embed is not None:
        ew, eb = embed
        args += [ew, eb]
        in_specs += [_vmem_full(ew), _vmem_full(eb)]
    for blk in blocks:
        for key in ("w1", "b1"):
            args.append(blk[key]); in_specs.append(_vmem_full(blk[key]))
        args.append(blk["a1"]); in_specs.append(_SMEM)
        for key in ("wc", "s2", "t2"):
            args.append(blk[key]); in_specs.append(_vmem_full(blk[key]))
        args.append(blk["a2"]); in_specs.append(_SMEM)
    kern = functools.partial(_dilated_branch_kernel, shifts=shifts,
                             adds=tuple(adds), has_embed=embed is not None)
    out = pl.pallas_call(
        kern,
        out_shape=jax.ShapeDtypeStruct((B, 1, out_c), jnp.float32),
        grid=(B,),
        in_specs=in_specs,
        out_specs=pl.BlockSpec((1, 1, out_c), lambda b: (b, 0, 0)),
        scratch_shapes=[pltpu.VMEM((L + 2 * maxs, 128), jnp.float32)],
        compiler_params=pltpu.CompilerParams(
            dimension_semantics=("parallel",),
            vmem_limit_bytes=32 * 1024 * 1024),
    )(*args)
    return out.reshape(B, out_c)


def pkt_branch_forward(x, layers):
    B, L, C = x.shape
    args = [x]
    in_specs = [pl.BlockSpec((1, L, C), lambda b: (b, 0, 0))]
    for lp in layers:
        args += [lp["w"], lp["b"]]
        in_specs += [_vmem_full(lp["w"]), _vmem_full(lp["b"])]
        args.append(lp["a"]); in_specs.append(_SMEM)
    out_c = layers[-1]["b"].shape[-1]
    out = pl.pallas_call(
        functools.partial(_pkt_branch_kernel, n_layers=len(layers)),
        out_shape=jax.ShapeDtypeStruct((B, 1, out_c), jnp.float32),
        grid=(B,),
        in_specs=in_specs,
        out_specs=pl.BlockSpec((1, 1, out_c), lambda b: (b, 0, 0)),
        scratch_shapes=[pltpu.VMEM((L, 128), jnp.float32)],
        compiler_params=pltpu.CompilerParams(
            dimension_semantics=("parallel",),
            vmem_limit_bytes=32 * 1024 * 1024),
    )(*args)
    return out.reshape(B, out_c)


def encoder_forward(e, trg, src, n_heads=2):
    B, lq, d = trg.shape
    lk = src.shape[1]
    args = [trg, src, e["wq"], e["bq"], e["wk"], e["bk"], e["wv"], e["bv"],
            e["wfc"], e["bfc"], e["lng"], e["lnb"],
            e["w1"], e["b1"], e["w2"], e["b2"]]
    in_specs = ([pl.BlockSpec((1, lq, d), lambda b: (b, 0, 0)),
                 pl.BlockSpec((1, lk, d), lambda b: (b, 0, 0))] +
                [_vmem_full(a) for a in args[2:]])
    kern = functools.partial(_encoder_kernel, n_heads=n_heads,
                             inv_scale=1.0 / math.sqrt(d // n_heads))
    return pl.pallas_call(
        kern,
        out_shape=jax.ShapeDtypeStruct((B, lq, d), jnp.float32),
        grid=(B,),
        in_specs=in_specs,
        out_specs=pl.BlockSpec((1, lq, d), lambda b: (b, 0, 0)),
        compiler_params=pltpu.CompilerParams(
            dimension_semantics=("parallel",),
            vmem_limit_bytes=32 * 1024 * 1024),
    )(*args)


def pallas_linear(x, w, b):
    """x:(M,K) f32, w:(K,N) bf16, b:(1,N) f32 -> (M,N) f32."""
    M, K = x.shape
    N = w.shape[1]
    tm = None
    if M >= 128 and M % 16 == 0:            # >=2 row tiles keep both v7x TCs busy
        tm = M // 2
        if M >= 512 and M % 256 == 0:
            tm = 256
    if tm is None:
        return pl.pallas_call(
            _linear_kernel,
            out_shape=jax.ShapeDtypeStruct((M, N), jnp.float32),
            in_specs=[_VMEM, _VMEM, _VMEM], out_specs=_VMEM)(x, w, b)
    return pl.pallas_call(
        _linear_kernel,
        out_shape=jax.ShapeDtypeStruct((M, N), jnp.float32),
        grid=(M // tm,),
        in_specs=[pl.BlockSpec((tm, K), lambda i: (i, 0)),
                  pl.BlockSpec((K, N), lambda i: (0, 0)),
                  pl.BlockSpec((1, N), lambda i: (0, 0))],
        out_specs=pl.BlockSpec((tm, N), lambda i: (i, 0)),
        compiler_params=pltpu.CompilerParams(dimension_semantics=("parallel",)),
    )(x, w, b)


def head_forward(seq_f, pkt_f, smi_f, c):
    B = seq_f.shape[0]
    args = [seq_f, pkt_f, smi_f, c["w1s"], c["w1p"], c["w1m"], c["b1"], c["a1"],
            c["w2"], c["b2"], c["a2"], c["w3"], c["b3"]]
    in_specs = [_VMEM, _VMEM, _VMEM, _VMEM, _VMEM, _VMEM, _VMEM, _SMEM,
                _VMEM, _VMEM, _SMEM, _VMEM, _SMEM]
    return pl.pallas_call(
        _head_kernel,
        out_shape=jax.ShapeDtypeStruct((B, 1), jnp.float32),
        in_specs=in_specs, out_specs=_VMEM,
    )(*args)


# ----------------------------------------------------------------------------
# Synthetic raw parameters (PyTorch layouts) + one-time preprocessing
# ----------------------------------------------------------------------------
class Rng:
    def __init__(self, key):
        self.key = key

    def n(self, shape, scale=0.05):
        self.key, sub = jax.random.split(self.key)
        return (scale * jax.random.normal(sub, shape)).astype(jnp.float32)


def _alpha():
    return jnp.full((1,), 0.25, jnp.float32)           # PyTorch PReLU default


def _raw_bn(rng, c):
    return dict(g=1.0 + rng.n((c,)), b=rng.n((c,)),
                m=jnp.zeros((c,), jnp.float32), v=jnp.ones((c,), jnp.float32))


def _raw_dilated_block(rng, n_in, n_out, n_groups):
    n = n_out // n_groups
    n1 = n_out - (n_groups - 1) * n
    d_ws = [rng.n((n1, n, 3))] + [rng.n((n, n, 3)) for _ in range(n_groups - 1)]
    return dict(c1_w=rng.n((n, n_in, 1)), c1_b=rng.n((n,)),
                bn1=_raw_bn(rng, n), a1=_alpha(),
                d_ws=d_ws, bn2=_raw_bn(rng, n_out), a2=_alpha())


def _raw_encoder(rng, hid, pf):
    return dict(ln_g=1.0 + rng.n((hid,)), ln_b=rng.n((hid,)),
                wq=rng.n((hid, hid)), bq=rng.n((hid,)),
                wk=rng.n((hid, hid)), bk=rng.n((hid,)),
                wv=rng.n((hid, hid)), bv=rng.n((hid,)),
                fc=rng.n((hid, hid)), bfc=rng.n((hid,)),
                pf1=rng.n((pf, hid)), pb1=rng.n((pf,)),
                pf2=rng.n((hid, pf)), pb2=rng.n((hid,)))


def init_capla_raw(seed=0):
    rng = Rng(jax.random.PRNGKey(seed))
    raw = {}
    raw["smi_embed"] = rng.n((SMILESCLen, 128))
    raw["seq_embed_w"] = rng.n((128, PT_FEATURE_SIZE))   # nn.Linear layout (out,in)
    raw["seq_embed_b"] = rng.n((128,))
    raw["conv_seq"] = [_raw_dilated_block(rng, i, o, 5) for i, o in SEQ_CHS]
    raw["conv_pkt"] = [dict(w=rng.n((o, i, 3)), b=rng.n((o,)),
                            bn=_raw_bn(rng, o), a=_alpha()) for i, o in PKT_CHS]
    raw["conv_smi"] = [_raw_dilated_block(rng, i, o, 4) for i, o in SMI_CHS]
    raw["smi_attention_poc"] = _raw_encoder(rng, 128, 128)
    raw["cls"] = dict(w1=rng.n((256, 320)), b1=rng.n((256,)), a1=_alpha(),
                      w2=rng.n((128, 256)), b2=rng.n((128,)), a2=_alpha(),
                      w3=rng.n((1, 128)), b3=rng.n((1,)))
    return raw


def _np(x):
    return np.asarray(x, np.float32)


def _bn_fold(bn):
    scale = _np(bn["g"]) / np.sqrt(_np(bn["v"]) + BN_EPS)
    shift = _np(bn["b"]) - _np(bn["m"]) * scale
    return scale, shift


def _build_wcomb(d_ws, n, n_out, shifts, dils):
    """Fold dilated branches + cumulative adds + channel concat into one weight."""
    n_groups = len(dils)
    n1 = n_out - (n_groups - 1) * n
    widths = [n1] + [n] * (n_groups - 1)
    starts = np.concatenate([[0], np.cumsum(widths)])
    shift_idx = {s: i for i, s in enumerate(shifts)}
    wcomb = np.zeros((len(shifts), n, n_out), np.float32)
    for bi, d in enumerate(dils):
        wgt = _np(d_ws[bi])                           # (out_i, n, 3)
        groups = [0] if bi == 0 else list(range(bi, n_groups))
        for k in range(3):
            si = shift_idx[(k - 1) * d]
            tap_t = wgt[:, :, k].T                    # (n, out_i)
            for gi in groups:
                c0 = int(starts[gi])
                wcomb[si, :, c0:c0 + widths[gi]] += tap_t
    return wcomb


def _prep_dilated_block(blk, dils, shifts):
    s1, t1 = _bn_fold(blk["bn1"])
    s2, t2 = _bn_fold(blk["bn2"])
    c1_w = _np(blk["c1_w"])[:, :, 0].T                # (n_in, n)
    c1_b = _np(blk["c1_b"])
    n = c1_w.shape[1]
    n_out = s2.shape[0]
    wcomb = _build_wcomb(blk["d_ws"], n, n_out, shifts, dils)
    return dict(
        w1=jnp.asarray(c1_w * s1[None, :], jnp.bfloat16),
        b1=jnp.asarray((c1_b * s1 + t1).reshape(1, n), jnp.float32),
        a1=jnp.asarray(_np(blk["a1"]).reshape(1), jnp.float32),
        wc=jnp.asarray(wcomb, jnp.bfloat16),
        s2=jnp.asarray(s2.reshape(1, n_out), jnp.float32),
        t2=jnp.asarray(t2.reshape(1, n_out), jnp.float32),
        a2=jnp.asarray(_np(blk["a2"]).reshape(1), jnp.float32),
    )


def prepare_params(raw):
    """One-time (outside jit) preprocessing: BN folding (with running stats + eps),
    layout transposes, wcomb construction, bf16 pre-casting of MXU weights."""
    p = {}
    p["smi_embed"] = jnp.asarray(_np(raw["smi_embed"]), jnp.float32)
    p["embed_w"] = jnp.asarray(_np(raw["seq_embed_w"]).T, jnp.bfloat16)     # (40,128)
    p["embed_b"] = jnp.asarray(_np(raw["seq_embed_b"]).reshape(1, -1), jnp.float32)

    p["conv_seq"] = [_prep_dilated_block(b, BLOCKA_DILS, BLOCKA_SHIFTS)
                     for b in raw["conv_seq"]]
    p["conv_smi"] = [_prep_dilated_block(b, BLOCKB_DILS, BLOCKB_SHIFTS)
                     for b in raw["conv_smi"]]

    pkt = []
    for lp in raw["conv_pkt"]:
        sc, sh = _bn_fold(lp["bn"])
        w = np.transpose(_np(lp["w"]), (2, 1, 0)) * sc[None, None, :]        # (3,cin,cout)
        b = _np(lp["b"]) * sc + sh
        pkt.append(dict(w=jnp.asarray(w, jnp.bfloat16),
                        b=jnp.asarray(b.reshape(1, -1), jnp.float32),
                        a=jnp.asarray(_np(lp["a"]).reshape(1), jnp.float32)))
    p["conv_pkt"] = pkt

    e = raw["smi_attention_poc"]
    p["enc"] = dict(
        wq=jnp.asarray(_np(e["wq"]).T, jnp.bfloat16),
        bq=jnp.asarray(_np(e["bq"]).reshape(1, -1), jnp.float32),
        wk=jnp.asarray(_np(e["wk"]).T, jnp.bfloat16),
        bk=jnp.asarray(_np(e["bk"]).reshape(1, -1), jnp.float32),
        wv=jnp.asarray(_np(e["wv"]).T, jnp.bfloat16),
        bv=jnp.asarray(_np(e["bv"]).reshape(1, -1), jnp.float32),
        wfc=jnp.asarray(_np(e["fc"]).T, jnp.bfloat16),
        bfc=jnp.asarray(_np(e["bfc"]).reshape(1, -1), jnp.float32),
        lng=jnp.asarray(_np(e["ln_g"]).reshape(1, -1), jnp.float32),
        lnb=jnp.asarray(_np(e["ln_b"]).reshape(1, -1), jnp.float32),
        w1=jnp.asarray(_np(e["pf1"]).T, jnp.bfloat16),
        b1=jnp.asarray(_np(e["pb1"]).reshape(1, -1), jnp.float32),
        w2=jnp.asarray(_np(e["pf2"]).T, jnp.bfloat16),
        b2=jnp.asarray(_np(e["pb2"]).reshape(1, -1), jnp.float32),
    )

    c = raw["cls"]
    w1 = _np(c["w1"]).T                               # (320, 256), rows: seq|pkt|smi
    p["cls"] = dict(
        w1s=jnp.asarray(w1[:128], jnp.bfloat16),
        w1p=jnp.asarray(w1[128:192], jnp.bfloat16),
        w1m=jnp.asarray(w1[192:], jnp.bfloat16),
        b1=jnp.asarray(_np(c["b1"]).reshape(1, -1), jnp.float32),
        a1=jnp.asarray(_np(c["a1"]).reshape(1), jnp.float32),
        w2=jnp.asarray(_np(c["w2"]).T, jnp.bfloat16),
        b2=jnp.asarray(_np(c["b2"]).reshape(1, -1), jnp.float32),
        a2=jnp.asarray(_np(c["a2"]).reshape(1), jnp.float32),
        w3=jnp.asarray(_np(c["w3"]), jnp.float32),    # (1,128), f32 for VPU reduce
        b3=jnp.asarray(_np(c["b3"]).reshape(1), jnp.float32),
    )
    return p


# ----------------------------------------------------------------------------
# Full model forward (eval mode; all dropouts are identity)
# ----------------------------------------------------------------------------
def capla_forward(p, seq, pkt, smi):
    B, _, _ = seq.shape
    lp = pkt.shape[1]

    # protein sequence branch: embed + 4x DilatedConvBlockA + max pool, one kernel
    seq_feat = dilated_branch_forward(
        seq, p["conv_seq"], (p["embed_w"], p["embed_b"]),
        BLOCKA_SHIFTS, SEQ_ADDS, out_c=SEQ_CHS[-1][1])              # (B, 128)

    # pocket embedding (shared seq_embed Linear) and SMILES embedding lookup
    pkt_embed = pallas_linear(pkt.reshape(B * lp, PT_FEATURE_SIZE),
                              p["embed_w"], p["embed_b"]).reshape(B, lp, 128)
    # TODO(synk): embedding gather has no Pallas win at this size; stays in JAX.
    smi_embed = jnp.take(p["smi_embed"], smi, axis=0)               # (B, Lsmi, 128)

    # cross attention (same EncoderLayer weights applied both ways)
    smi_att = smi_embed
    smi_embed = encoder_forward(p["enc"], smi_embed, pkt_embed, n_heads=2)
    pkt_embed = encoder_forward(p["enc"], pkt_embed, smi_att, n_heads=2)

    # pocket branch: 3x (Conv1d k=3 + BN + PReLU) + max pool, one kernel
    pkt_feat = pkt_branch_forward(pkt_embed, p["conv_pkt"])         # (B, 64)

    # SMILES branch: 3x DilatedConvBlockB + max pool, one kernel
    smi_feat = dilated_branch_forward(
        smi_embed, p["conv_smi"], None,
        BLOCKB_SHIFTS, SMI_ADDS, out_c=SMI_CHS[-1][1])              # (B, 128)

    # concat + classifier (cat_dropout / classifier dropouts identity in eval)
    return head_forward(seq_feat, pkt_feat, smi_feat, p["cls"])      # (B, 1)


# ----------------------------------------------------------------------------
if __name__ == "__main__":
    raw = init_capla_raw(seed=0)
    params = prepare_params(raw)

    key = jax.random.PRNGKey(0)
    k_seq, k_pkt, k_smi = jax.random.split(key, 3)
    B, L_SEQ, L_PKT, L_SMI = 2, 64, 32, 32
    seq = jax.random.normal(k_seq, (B, L_SEQ, PT_FEATURE_SIZE), jnp.float32)
    pkt = jax.random.normal(k_pkt, (B, L_PKT, PT_FEATURE_SIZE), jnp.float32)
    smi = jax.random.randint(k_smi, (B, L_SMI), 0, SMILESCLen, jnp.int32)

    fwd = jax.jit(capla_forward)
    out = jax.block_until_ready(fwd(params, seq, pkt, smi))
    assert out.shape == (B, 1), out.shape
    print("KERNEL_OK")
</pallas_src>

<mosaic_0001>
module attributes {stable_mosaic.version = 11 : i64} {
  func.func @_encoder_kernel(%arg0: i32, %arg1: memref<1x32x128xf32, #tpu.memory_space<vmem>>, %arg2: memref<1x32x128xf32, #tpu.memory_space<vmem>>, %arg3: memref<128x128xbf16, #tpu.memory_space<vmem>>, %arg4: memref<1x128xf32, #tpu.memory_space<vmem>>, %arg5: memref<128x128xbf16, #tpu.memory_space<vmem>>, %arg6: memref<1x128xf32, #tpu.memory_space<vmem>>, %arg7: memref<128x128xbf16, #tpu.memory_space<vmem>>, %arg8: memref<1x128xf32, #tpu.memory_space<vmem>>, %arg9: memref<128x128xbf16, #tpu.memory_space<vmem>>, %arg10: memref<1x128xf32, #tpu.memory_space<vmem>>, %arg11: memref<1x128xf32, #tpu.memory_space<vmem>>, %arg12: memref<1x128xf32, #tpu.memory_space<vmem>>, %arg13: memref<128x128xbf16, #tpu.memory_space<vmem>>, %arg14: memref<1x128xf32, #tpu.memory_space<vmem>>, %arg15: memref<128x128xbf16, #tpu.memory_space<vmem>>, %arg16: memref<1x128xf32, #tpu.memory_space<vmem>>, %arg17: memref<1x32x128xf32, #tpu.memory_space<vmem>>) attributes {dimension_semantics = [#tpu.dimension_semantics<parallel>], iteration_bounds = array<i64: 2>, scalar_prefetch = 0 : i64, scratch_operands = 0 : i64, tpu.core_type = #tpu.core_type<tc>, window_params = [{transform_indices = @transform_0, window_bounds = array<i64: 1, 32, 128>}, {transform_indices = @transform_1, window_bounds = array<i64: 1, 32, 128>}, {pipeline_mode = #tpu.pipeline_mode<synchronous>, transform_indices = @transform_2, window_bounds = array<i64: 128, 128>}, {pipeline_mode = #tpu.pipeline_mode<synchronous>, transform_indices = @transform_3, window_bounds = array<i64: 1, 128>}, {pipeline_mode = #tpu.pipeline_mode<synchronous>, transform_indices = @transform_4, window_bounds = array<i64: 128, 128>}, {pipeline_mode = #tpu.pipeline_mode<synchronous>, transform_indices = @transform_5, window_bounds = array<i64: 1, 128>}, {pipeline_mode = #tpu.pipeline_mode<synchronous>, transform_indices = @transform_6, window_bounds = array<i64: 128, 128>}, {pipeline_mode = #tpu.pipeline_mode<synchronous>, transform_indices = @transform_7, window_bounds = array<i64: 1, 128>}, {pipeline_mode = #tpu.pipeline_mode<synchronous>, transform_indices = @transform_8, window_bounds = array<i64: 128, 128>}, {pipeline_mode = #tpu.pipeline_mode<synchronous>, transform_indices = @transform_9, window_bounds = array<i64: 1, 128>}, {pipeline_mode = #tpu.pipeline_mode<synchronous>, transform_indices = @transform_10, window_bounds = array<i64: 1, 128>}, {pipeline_mode = #tpu.pipeline_mode<synchronous>, transform_indices = @transform_11, window_bounds = array<i64: 1, 128>}, {pipeline_mode = #tpu.pipeline_mode<synchronous>, transform_indices = @transform_12, window_bounds = array<i64: 128, 128>}, {pipeline_mode = #tpu.pipeline_mode<synchronous>, transform_indices = @transform_13, window_bounds = array<i64: 1, 128>}, {pipeline_mode = #tpu.pipeline_mode<synchronous>, transform_indices = @transform_14, window_bounds = array<i64: 128, 128>}, {pipeline_mode = #tpu.pipeline_mode<synchronous>, transform_indices = @transform_15, window_bounds = array<i64: 1, 128>}, {transform_indices = @transform_16, window_bounds = array<i64: 1, 32, 128>}]} {
    %c0 = arith.constant 0 : index
    %c0_0 = arith.constant 0 : index
    %c0_1 = arith.constant 0 : index
    %0 = vector.load %arg1[%c0, %c0_0, %c0_1] : memref<1x32x128xf32, #tpu.memory_space<vmem>>, vector<1x32x128xf32>
    %1 = vector.shape_cast %0 : vector<1x32x128xf32> to vector<32x128xf32>
    %c0_2 = arith.constant 0 : index
    %c0_3 = arith.constant 0 : index
    %c0_4 = arith.constant 0 : index
    %2 = vector.load %arg2[%c0_2, %c0_3, %c0_4] : memref<1x32x128xf32, #tpu.memory_space<vmem>>, vector<1x32x128xf32>
    %3 = vector.shape_cast %2 : vector<1x32x128xf32> to vector<32x128xf32>
    %c0_5 = arith.constant 0 : index
    %c0_6 = arith.constant 0 : index
    %4 = vector.load %arg11[%c0_5, %c0_6] : memref<1x128xf32, #tpu.memory_space<vmem>>, vector<1x128xf32>
    %c0_7 = arith.constant 0 : index
    %c0_8 = arith.constant 0 : index
    %5 = vector.load %arg12[%c0_7, %c0_8] : memref<1x128xf32, #tpu.memory_space<vmem>>, vector<1x128xf32>
    %6 = arith.truncf %1 : vector<32x128xf32> to vector<32x128xbf16>
    %c0_9 = arith.constant 0 : index
    %c0_10 = arith.constant 0 : index
    %7 = vector.load %arg3[%c0_9, %c0_10] : memref<128x128xbf16, #tpu.memory_space<vmem>>, vector<128x128xbf16>
    %cst = arith.constant dense<0.000000e+00> : vector<32x128xf32>
    %8 = tpu.matmul %6, %7, %cst {dimension_numbers = #tpu.dot_dimension_numbers<[1], [0], [0], [1], [0, 0, 1, 1], [], []>} : vector<32x128xbf16>, vector<128x128xbf16>, vector<32x128xf32> -> vector<32x128xf32>
    %c0_11 = arith.constant 0 : index
    %c0_12 = arith.constant 0 : index
    %9 = vector.load %arg4[%c0_11, %c0_12] : memref<1x128xf32, #tpu.memory_space<vmem>>, vector<1x128xf32>
    %10 = vector.broadcast %9 : vector<1x128xf32> to vector<32x128xf32>
    %11 = arith.addf %8, %10 : vector<32x128xf32>
    %12 = arith.truncf %3 : vector<32x128xf32> to vector<32x128xbf16>
    %c0_13 = arith.constant 0 : index
    %c0_14 = arith.constant 0 : index
    %13 = vector.load %arg5[%c0_13, %c0_14] : memref<128x128xbf16, #tpu.memory_space<vmem>>, vector<128x128xbf16>
    %cst_15 = arith.constant dense<0.000000e+00> : vector<32x128xf32>
    %14 = tpu.matmul %12, %13, %cst_15 {dimension_numbers = #tpu.dot_dimension_numbers<[1], [0], [0], [1], [0, 0, 1, 1], [], []>} : vector<32x128xbf16>, vector<128x128xbf16>, vector<32x128xf32> -> vector<32x128xf32>
    %c0_16 = arith.constant 0 : index
    %c0_17 = arith.constant 0 : index
    %15 = vector.load %arg6[%c0_16, %c0_17] : memref<1x128xf32, #tpu.memory_space<vmem>>, vector<1x128xf32>
    %16 = vector.broadcast %15 : vector<1x128xf32> to vector<32x128xf32>
    %17 = arith.addf %14, %16 : vector<32x128xf32>
    %18 = arith.truncf %3 : vector<32x128xf32> to vector<32x128xbf16>
    %c0_18 = arith.constant 0 : index
    %c0_19 = arith.constant 0 : index
    %19 = vector.load %arg7[%c0_18, %c0_19] : memref<128x128xbf16, #tpu.memory_space<vmem>>, vector<128x128xbf16>
    %cst_20 = arith.constant dense<0.000000e+00> : vector<32x128xf32>
    %20 = tpu.matmul %18, %19, %cst_20 {dimension_numbers = #tpu.dot_dimension_numbers<[1], [0], [0], [1], [0, 0, 1, 1], [], []>} : vector<32x128xbf16>, vector<128x128xbf16>, vector<32x128xf32> -> vector<32x128xf32>
    %c0_21 = arith.constant 0 : index
    %c0_22 = arith.constant 0 : index
    %21 = vector.load %arg8[%c0_21, %c0_22] : memref<1x128xf32, #tpu.memory_space<vmem>>, vector<1x128xf32>
    %22 = vector.broadcast %21 : vector<1x128xf32> to vector<32x128xf32>
    %23 = arith.addf %20, %22 : vector<32x128xf32>
    %24 = vector.extract_strided_slice %11 {offsets = [0, 0], sizes = [32, 64], strides = [1, 1]} : vector<32x128xf32> to vector<32x64xf32>
    %25 = arith.truncf %24 : vector<32x64xf32> to vector<32x64xbf16>
    %26 = vector.extract_strided_slice %17 {offsets = [0, 0], sizes = [32, 64], strides = [1, 1]} : vector<32x128xf32> to vector<32x64xf32>
    %27 = arith.truncf %26 : vector<32x64xf32> to vector<32x64xbf16>
    %28 = vector.extract_strided_slice %23 {offsets = [0, 0], sizes = [32, 64], strides = [1, 1]} : vector<32x128xf32> to vector<32x64xf32>
    %29 = arith.truncf %28 : vector<32x64xf32> to vector<32x64xbf16>
    %cst_23 = arith.constant dense<0.000000e+00> : vector<32x32xf32>
    %30 = tpu.matmul %25, %27, %cst_23 {dimension_numbers = #tpu.dot_dimension_numbers<[1], [1], [0], [0], [0, 0, 1, 0], [], []>} : vector<32x64xbf16>, vector<32x64xbf16>, vector<32x32xf32> -> vector<32x32xf32>
    %cst_24 = arith.constant 1.250000e-01 : f32
    %31 = vector.broadcast %cst_24 : f32 to vector<32x32xf32>
    %32 = arith.mulf %30, %31 : vector<32x32xf32>
    %cst_25 = arith.constant dense<0xFF800000> : vector<32xf32>
    %33 = vector.multi_reduction <maximumf>, %32, %cst_25 [1] : vector<32x32xf32> to vector<32xf32>
    %34 = vector.shape_cast %33 : vector<32xf32> to vector<32x1xf32>
    %35 = vector.broadcast %34 : vector<32x1xf32> to vector<32x32xf32>
    %36 = arith.subf %32, %35 : vector<32x32xf32>
    %37 = math.exp %36 : vector<32x32xf32>
    %cst_26 = arith.constant dense<0.000000e+00> : vector<32xf32>
    %38 = vector.multi_reduction <add>, %37, %cst_26 [1] : vector<32x32xf32> to vector<32xf32>
    %39 = vector.shape_cast %38 : vector<32xf32> to vector<32x1xf32>
    %40 = tpu.reciprocal %39 {approx = true} : vector<32x1xf32> -> vector<32x1xf32>
    %41 = vector.broadcast %40 : vector<32x1xf32> to vector<32x32xf32>
    %42 = arith.mulf %37, %41 : vector<32x32xf32>
    %43 = arith.truncf %42 : vector<32x32xf32> to vector<32x32xbf16>
    %cst_27 = arith.constant dense<0.000000e+00> : vector<32x64xf32>
    %44 = tpu.matmul %43, %29, %cst_27 {dimension_numbers = #tpu.dot_dimension_numbers<[1], [0], [0], [1], [0, 0, 1, 1], [], []>} : vector<32x32xbf16>, vector<32x64xbf16>, vector<32x64xf32> -> vector<32x64xf32>
    %45 = vector.extract_strided_slice %11 {offsets = [0, 64], sizes = [32, 64], strides = [1, 1]} : vector<32x128xf32> to vector<32x64xf32>
    %46 = arith.truncf %45 : vector<32x64xf32> to vector<32x64xbf16>
    %47 = vector.extract_strided_slice %17 {offsets = [0, 64], sizes = [32, 64], strides = [1, 1]} : vector<32x128xf32> to vector<32x64xf32>
    %48 = arith.truncf %47 : vector<32x64xf32> to vector<32x64xbf16>
    %49 = vector.extract_strided_slice %23 {offsets = [0, 64], sizes = [32, 64], strides = [1, 1]} : vector<32x128xf32> to vector<32x64xf32>
    %50 = arith.truncf %49 : vector<32x64xf32> to vector<32x64xbf16>
    %cst_28 = arith.constant dense<0.000000e+00> : vector<32x32xf32>
    %51 = tpu.matmul %46, %48, %cst_28 {dimension_numbers = #tpu.dot_dimension_numbers<[1], [1], [0], [0], [0, 0, 1, 0], [], []>} : vector<32x64xbf16>, vector<32x64xbf16>, vector<32x32xf32> -> vector<32x32xf32>
    %cst_29 = arith.constant 1.250000e-01 : f32
    %52 = vector.broadcast %cst_29 : f32 to vector<32x32xf32>
    %53 = arith.mulf %51, %52 : vector<32x32xf32>
    %cst_30 = arith.constant dense<0xFF800000> : vector<32xf32>
    %54 = vector.multi_reduction <maximumf>, %53, %cst_30 [1] : vector<32x32xf32> to vector<32xf32>
    %55 = vector.shape_cast %54 : vector<32xf32> to vector<32x1xf32>
    %56 = vector.broadcast %55 : vector<32x1xf32> to vector<32x32xf32>
    %57 = arith.subf %53, %56 : vector<32x32xf32>
    %58 = math.exp %57 : vector<32x32xf32>
    %cst_31 = arith.constant dense<0.000000e+00> : vector<32xf32>
    %59 = vector.multi_reduction <add>, %58, %cst_31 [1] : vector<32x32xf32> to vector<32xf32>
    %60 = vector.shape_cast %59 : vector<32xf32> to vector<32x1xf32>
    %61 = tpu.reciprocal %60 {approx = true} : vector<32x1xf32> -> vector<32x1xf32>
    %62 = vector.broadcast %61 : vector<32x1xf32> to vector<32x32xf32>
    %63 = arith.mulf %58, %62 : vector<32x32xf32>
    %64 = arith.truncf %63 : vector<32x32xf32> to vector<32x32xbf16>
    %cst_32 = arith.constant dense<0.000000e+00> : vector<32x64xf32>
    %65 = tpu.matmul %64, %50, %cst_32 {dimension_numbers = #tpu.dot_dimension_numbers<[1], [0], [0], [1], [0, 0, 1, 1], [], []>} : vector<32x32xbf16>, vector<32x64xbf16>, vector<32x64xf32> -> vector<32x64xf32>
    %66 = tpu.concatenate %44, %65 in 1 : vector<32x64xf32>, vector<32x64xf32> -> vector<32x128xf32>
    %67 = arith.truncf %66 : vector<32x128xf32> to vector<32x128xbf16>
    %c0_33 = arith.constant 0 : index
    %c0_34 = arith.constant 0 : index
    %68 = vector.load %arg9[%c0_33, %c0_34] : memref<128x128xbf16, #tpu.memory_space<vmem>>, vector<128x128xbf16>
    %cst_35 = arith.constant dense<0.000000e+00> : vector<32x128xf32>
    %69 = tpu.matmul %67, %68, %cst_35 {dimension_numbers = #tpu.dot_dimension_numbers<[1], [0], [0], [1], [0, 0, 1, 1], [], []>} : vector<32x128xbf16>, vector<128x128xbf16>, vector<32x128xf32> -> vector<32x128xf32>
    %70 = arith.addf %1, %69 : vector<32x128xf32>
    %c0_36 = arith.constant 0 : index
    %c0_37 = arith.constant 0 : index
    %71 = vector.load %arg10[%c0_36, %c0_37] : memref<1x128xf32, #tpu.memory_space<vmem>>, vector<1x128xf32>
    %72 = vector.broadcast %71 : vector<1x128xf32> to vector<32x128xf32>
    %73 = arith.addf %70, %72 : vector<32x128xf32>
    %cst_38 = arith.constant dense<0.000000e+00> : vector<32xf32>
    %74 = vector.multi_reduction <add>, %73, %cst_38 [1] : vector<32x128xf32> to vector<32xf32>
    %75 = vector.shape_cast %74 : vector<32xf32> to vector<32x1xf32>
    %cst_39 = arith.constant 1.280000e+02 : f32
    %76 = vector.broadcast %cst_39 : f32 to vector<32x1xf32>
    %77 = arith.divf %75, %76 : vector<32x1xf32>
    %78 = vector.broadcast %77 : vector<32x1xf32> to vector<32x128xf32>
    %79 = arith.subf %73, %78 : vector<32x128xf32>
    %80 = arith.mulf %79, %79 : vector<32x128xf32>
    %cst_40 = arith.constant dense<0.000000e+00> : vector<32xf32>
    %81 = vector.multi_reduction <add>, %80, %cst_40 [1] : vector<32x128xf32> to vector<32xf32>
    %82 = vector.shape_cast %81 : vector<32xf32> to vector<32x1xf32>
    %cst_41 = arith.constant 1.280000e+02 : f32
    %83 = vector.broadcast %cst_41 : f32 to vector<32x1xf32>
    %84 = arith.divf %82, %83 : vector<32x1xf32>
    %85 = vector.broadcast %77 : vector<32x1xf32> to vector<32x128xf32>
    %86 = arith.subf %73, %85 : vector<32x128xf32>
    %cst_42 = arith.constant 9.99999974E-6 : f32
    %87 = vector.broadcast %cst_42 : f32 to vector<32x1xf32>
    %88 = arith.addf %84, %87 : vector<32x1xf32>
    %89 = math.rsqrt %88 : vector<32x1xf32>
    %90 = vector.broadcast %89 : vector<32x1xf32> to vector<32x128xf32>
    %91 = arith.mulf %86, %90 : vector<32x128xf32>
    %92 = vector.broadcast %4 : vector<1x128xf32> to vector<32x128xf32>
    %93 = arith.mulf %91, %92 : vector<32x128xf32>
    %94 = vector.broadcast %5 : vector<1x128xf32> to vector<32x128xf32>
    %95 = arith.addf %93, %94 : vector<32x128xf32>
    %96 = arith.truncf %95 : vector<32x128xf32> to vector<32x128xbf16>
    %c0_43 = arith.constant 0 : index
    %c0_44 = arith.constant 0 : index
    %97 = vector.load %arg13[%c0_43, %c0_44] : memref<128x128xbf16, #tpu.memory_space<vmem>>, vector<128x128xbf16>
    %cst_45 = arith.constant dense<0.000000e+00> : vector<32x128xf32>
    %98 = tpu.matmul %96, %97, %cst_45 {dimension_numbers = #tpu.dot_dimension_numbers<[1], [0], [0], [1], [0, 0, 1, 1], [], []>} : vector<32x128xbf16>, vector<128x128xbf16>, vector<32x128xf32> -> vector<32x128xf32>
    %c0_46 = arith.constant 0 : index
    %c0_47 = arith.constant 0 : index
    %99 = vector.load %arg14[%c0_46, %c0_47] : memref<1x128xf32, #tpu.memory_space<vmem>>, vector<1x128xf32>
    %100 = vector.broadcast %99 : vector<1x128xf32> to vector<32x128xf32>
    %101 = arith.addf %98, %100 : vector<32x128xf32>
    %cst_48 = arith.constant 0.000000e+00 : f32
    %102 = vector.broadcast %cst_48 : f32 to vector<32x128xf32>
    %103 = arith.maximumf %101, %102 : vector<32x128xf32>
    %104 = arith.truncf %103 : vector<32x128xf32> to vector<32x128xbf16>
    %c0_49 = arith.constant 0 : index
    %c0_50 = arith.constant 0 : index
    %105 = vector.load %arg15[%c0_49, %c0_50] : memref<128x128xbf16, #tpu.memory_space<vmem>>, vector<128x128xbf16>
    %cst_51 = arith.constant dense<0.000000e+00> : vector<32x128xf32>
    %106 = tpu.matmul %104, %105, %cst_51 {dimension_numbers = #tpu.dot_dimension_numbers<[1], [0], [0], [1], [0, 0, 1, 1], [], []>} : vector<32x128xbf16>, vector<128x128xbf16>, vector<32x128xf32> -> vector<32x128xf32>
    %107 = arith.addf %95, %106 : vector<32x128xf32>
    %c0_52 = arith.constant 0 : index
    %c0_53 = arith.constant 0 : index
    %108 = vector.load %arg16[%c0_52, %c0_53] : memref<1x128xf32, #tpu.memory_space<vmem>>, vector<1x128xf32>
    %109 = vector.broadcast %108 : vector<1x128xf32> to vector<32x128xf32>
    %110 = arith.addf %107, %109 : vector<32x128xf32>
    %cst_54 = arith.constant dense<0.000000e+00> : vector<32xf32>
    %111 = vector.multi_reduction <add>, %110, %cst_54 [1] : vector<32x128xf32> to vector<32xf32>
    %112 = vector.shape_cast %111 : vector<32xf32> to vector<32x1xf32>
    %cst_55 = arith.constant 1.280000e+02 : f32
    %113 = vector.broadcast %cst_55 : f32 to vector<32x1xf32>
    %114 = arith.divf %112, %113 : vector<32x1xf32>
    %115 = vector.broadcast %114 : vector<32x1xf32> to vector<32x128xf32>
    %116 = arith.subf %110, %115 : vector<32x128xf32>
    %117 = arith.mulf %116, %116 : vector<32x128xf32>
    %cst_56 = arith.constant dense<0.000000e+00> : vector<32xf32>
    %118 = vector.multi_reduction <add>, %117, %cst_56 [1] : vector<32x128xf32> to vector<32xf32>
    %119 = vector.shape_cast %118 : vector<32xf32> to vector<32x1xf32>
    %cst_57 = arith.constant 1.280000e+02 : f32
    %120 = vector.broadcast %cst_57 : f32 to vector<32x1xf32>
    %121 = arith.divf %119, %120 : vector<32x1xf32>
    %122 = vector.broadcast %114 : vector<32x1xf32> to vector<32x128xf32>
    %123 = arith.subf %110, %122 : vector<32x128xf32>
    %cst_58 = arith.constant 9.99999974E-6 : f32
    %124 = vector.broadcast %cst_58 : f32 to vector<32x1xf32>
    %125 = arith.addf %121, %124 : vector<32x1xf32>
    %126 = math.rsqrt %125 : vector<32x1xf32>
    %127 = vector.broadcast %126 : vector<32x1xf32> to vector<32x128xf32>
    %128 = arith.mulf %123, %127 : vector<32x128xf32>
    %129 = vector.broadcast %4 : vector<1x128xf32> to vector<32x128xf32>
    %130 = arith.mulf %128, %129 : vector<32x128xf32>
    %131 = vector.broadcast %5 : vector<1x128xf32> to vector<32x128xf32>
    %132 = arith.addf %130, %131 : vector<32x128xf32>
    %c0_59 = arith.constant 0 : index
    %c0_60 = arith.constant 0 : index
    %c0_61 = arith.constant 0 : index
    %133 = vector.load %arg17[%c0_59, %c0_60, %c0_61] : memref<1x32x128xf32, #tpu.memory_space<vmem>>, vector<1x32x128xf32>
    %134 = vector.shape_cast %133 : vector<1x32x128xf32> to vector<32x128xf32>
    %135 = vector.shape_cast %132 : vector<32x128xf32> to vector<1x32x128xf32>
    tpu.vector_store %arg17[%c0_59, %c0_60, %c0_61], %135 {strides = array<i32>} : memref<1x32x128xf32, #tpu.memory_space<vmem>>, vector<1x32x128xf32>,
    return
  }
  func.func @transform_0(%arg0: i32) -> (i32, i32, i32) {
    %c0_i32 = arith.constant 0 : i32
    %c0_i32_0 = arith.constant 0 : i32
    %c0_i32_1 = arith.constant 0 : i32
    return %arg0, %c0_i32, %c0_i32_0 : i32, i32, i32
  }
  func.func @transform_1(%arg0: i32) -> (i32, i32, i32) {
    %c0_i32 = arith.constant 0 : i32
    %c0_i32_0 = arith.constant 0 : i32
    %c0_i32_1 = arith.constant 0 : i32
    return %arg0, %c0_i32, %c0_i32_0 : i32, i32, i32
  }
  func.func @transform_2(%arg0: i32) -> (i32, i32) {
    %c0_i32 = arith.constant 0 : i32
    %c0_i32_0 = arith.constant 0 : i32
    %c0_i32_1 = arith.constant 0 : i32
    return %c0_i32, %c0_i32_0 : i32, i32
  }
  func.func @transform_3(%arg0: i32) -> (i32, i32) {
    %c0_i32 = arith.constant 0 : i32
    %c0_i32_0 = arith.constant 0 : i32
    %c0_i32_1 = arith.constant 0 : i32
    return %c0_i32, %c0_i32_0 : i32, i32
  }
  func.func @transform_4(%arg0: i32) -> (i32, i32) {
    %c0_i32 = arith.constant 0 : i32
    %c0_i32_0 = arith.constant 0 : i32
    %c0_i32_1 = arith.constant 0 : i32
    return %c0_i32, %c0_i32_0 : i32, i32
  }
  func.func @transform_5(%arg0: i32) -> (i32, i32) {
    %c0_i32 = arith.constant 0 : i32
    %c0_i32_0 = arith.constant 0 : i32
    %c0_i32_1 = arith.constant 0 : i32
    return %c0_i32, %c0_i32_0 : i32, i32
  }
  func.func @transform_6(%arg0: i32) -> (i32, i32) {
    %c0_i32 = arith.constant 0 : i32
    %c0_i32_0 = arith.constant 0 : i32
    %c0_i32_1 = arith.constant 0 : i32
    return %c0_i32, %c0_i32_0 : i32, i32
  }
  func.func @transform_7(%arg0: i32) -> (i32, i32) {
    %c0_i32 = arith.constant 0 : i32
    %c0_i32_0 = arith.constant 0 : i32
    %c0_i32_1 = arith.constant 0 : i32
    return %c0_i32, %c0_i32_0 : i32, i32
  }
  func.func @transform_8(%arg0: i32) -> (i32, i32) {
    %c0_i32 = arith.constant 0 : i32
    %c0_i32_0 = arith.constant 0 : i32
    %c0_i32_1 = arith.constant 0 : i32
    return %c0_i32, %c0_i32_0 : i32, i32
  }
  func.func @transform_9(%arg0: i32) -> (i32, i32) {
    %c0_i32 = arith.constant 0 : i32
    %c0_i32_0 = arith.constant 0 : i32
    %c0_i32_1 = arith.constant 0 : i32
    return %c0_i32, %c0_i32_0 : i32, i32
  }
  func.func @transform_10(%arg0: i32) -> (i32, i32) {
    %c0_i32 = arith.constant 0 : i32
    %c0_i32_0 = arith.constant 0 : i32
    %c0_i32_1 = arith.constant 0 : i32
    return %c0_i32, %c0_i32_0 : i32, i32
  }
  func.func @transform_11(%arg0: i32) -> (i32, i32) {
    %c0_i32 = arith.constant 0 : i32
    %c0_i32_0 = arith.constant 0 : i32
    %c0_i32_1 = arith.constant 0 : i32
    return %c0_i32, %c0_i32_0 : i32, i32
  }
  func.func @transform_12(%arg0: i32) -> (i32, i32) {
    %c0_i32 = arith.constant 0 : i32
    %c0_i32_0 = arith.constant 0 : i32
    %c0_i32_1 = arith.constant 0 : i32
    return %c0_i32, %c0_i32_0 : i32, i32
  }
  func.func @transform_13(%arg0: i32) -> (i32, i32) {
    %c0_i32 = arith.constant 0 : i32
    %c0_i32_0 = arith.constant 0 : i32
    %c0_i32_1 = arith.constant 0 : i32
    return %c0_i32, %c0_i32_0 : i32, i32
  }
  func.func @transform_14(%arg0: i32) -> (i32, i32) {
    %c0_i32 = arith.constant 0 : i32
    %c0_i32_0 = arith.constant 0 : i32
    %c0_i32_1 = arith.constant 0 : i32
    return %c0_i32, %c0_i32_0 : i32, i32
  }
  func.func @transform_15(%arg0: i32) -> (i32, i32) {
    %c0_i32 = arith.constant 0 : i32
    %c0_i32_0 = arith.constant 0 : i32
    %c0_i32_1 = arith.constant 0 : i32
    return %c0_i32, %c0_i32_0 : i32, i32
  }
  func.func @transform_16(%arg0: i32) -> (i32, i32, i32) {
    %c0_i32 = arith.constant 0 : i32
    %c0_i32_0 = arith.constant 0 : i32
    %c0_i32_1 = arith.constant 0 : i32
    return %arg0, %c0_i32, %c0_i32_0 : i32, i32, i32
  }
}

module attributes {stable_mosaic.version = 11 : i64} {
  func.func @_linear_kernel(%arg0: memref<64x40xf32, #tpu.memory_space<vmem>>, %arg1: memref<40x128xbf16, #tpu.memory_space<vmem>>, %arg2: memref<1x128xf32, #tpu.memory_space<vmem>>, %arg3: memref<64x128xf32, #tpu.memory_space<vmem>>) attributes {dimension_semantics = [], scalar_prefetch = 0 : i64, scratch_operands = 0 : i64, tpu.core_type = #tpu.core_type<tc>} {
    %c0 = arith.constant 0 : index
    %c0_0 = arith.constant 0 : index
    %0 = vector.load %arg0[%c0, %c0_0] : memref<64x40xf32, #tpu.memory_space<vmem>>, vector<64x40xf32>
    %1 = arith.truncf %0 : vector<64x40xf32> to vector<64x40xbf16>
    %c0_1 = arith.constant 0 : index
    %c0_2 = arith.constant 0 : index
    %2 = vector.load %arg1[%c0_1, %c0_2] : memref<40x128xbf16, #tpu.memory_space<vmem>>, vector<40x128xbf16>
    %cst = arith.constant dense<0.000000e+00> : vector<64x128xf32>
    %3 = tpu.matmul %1, %2, %cst {dimension_numbers = #tpu.dot_dimension_numbers<[1], [0], [0], [1], [0, 0, 1, 1], [], []>} : vector<64x40xbf16>, vector<40x128xbf16>, vector<64x128xf32> -> vector<64x128xf32>
    %c0_3 = arith.constant 0 : index
    %c0_4 = arith.constant 0 : index
    %4 = vector.load %arg2[%c0_3, %c0_4] : memref<1x128xf32, #tpu.memory_space<vmem>>, vector<1x128xf32>
    %5 = vector.broadcast %4 : vector<1x128xf32> to vector<64x128xf32>
    %6 = arith.addf %3, %5 : vector<64x128xf32>
    %c0_5 = arith.constant 0 : index
    %c0_6 = arith.constant 0 : index
    %7 = vector.load %arg3[%c0_5, %c0_6] : memref<64x128xf32, #tpu.memory_space<vmem>>, vector<64x128xf32>
    tpu.vector_store %arg3[%c0_5, %c0_6], %6 {strides = array<i32>} : memref<64x128xf32, #tpu.memory_space<vmem>>, vector<64x128xf32>,
    return
  }
}

module attributes {stable_mosaic.version = 11 : i64} {
  func.func @_pkt_branch_kernel(%arg0: i32, %arg1: memref<1x32x128xf32, #tpu.memory_space<vmem>>, %arg2: memref<3x128x32xbf16, #tpu.memory_space<vmem>>, %arg3: memref<1x32xf32, #tpu.memory_space<vmem>>, %arg4: memref<1xf32, #tpu.memory_space<smem>>, %arg5: memref<3x32x64xbf16, #tpu.memory_space<vmem>>, %arg6: memref<1x64xf32, #tpu.memory_space<vmem>>, %arg7: memref<1xf32, #tpu.memory_space<smem>>, %arg8: memref<3x64x64xbf16, #tpu.memory_space<vmem>>, %arg9: memref<1x64xf32, #tpu.memory_space<vmem>>, %arg10: memref<1xf32, #tpu.memory_space<smem>>, %arg11: memref<1x1x64xf32, #tpu.memory_space<vmem>>, %arg12: memref<32x128xf32, #tpu.memory_space<vmem>>) attributes {dimension_semantics = [#tpu.dimension_semantics<parallel>], iteration_bounds = array<i64: 2>, scalar_prefetch = 0 : i64, scratch_operands = 1 : i64, tpu.core_type = #tpu.core_type<tc>, window_params = [{transform_indices = @transform_0, window_bounds = array<i64: 1, 32, 128>}, {pipeline_mode = #tpu.pipeline_mode<synchronous>, transform_indices = @transform_1, window_bounds = array<i64: 3, 128, 32>}, {pipeline_mode = #tpu.pipeline_mode<synchronous>, transform_indices = @transform_2, window_bounds = array<i64: 1, 32>}, {transform_indices = @transform_3, window_bounds = array<i64: 1>}, {pipeline_mode = #tpu.pipeline_mode<synchronous>, transform_indices = @transform_4, window_bounds = array<i64: 3, 32, 64>}, {pipeline_mode = #tpu.pipeline_mode<synchronous>, transform_indices = @transform_5, window_bounds = array<i64: 1, 64>}, {transform_indices = @transform_6, window_bounds = array<i64: 1>}, {pipeline_mode = #tpu.pipeline_mode<synchronous>, transform_indices = @transform_7, window_bounds = array<i64: 3, 64, 64>}, {pipeline_mode = #tpu.pipeline_mode<synchronous>, transform_indices = @transform_8, window_bounds = array<i64: 1, 64>}, {transform_indices = @transform_9, window_bounds = array<i64: 1>}, {transform_indices = @transform_10, window_bounds = array<i64: 1, 1, 64>}]} {
    %c0 = arith.constant 0 : index
    %c0_0 = arith.constant 0 : index
    %c0_1 = arith.constant 0 : index
    %0 = vector.load %arg1[%c0, %c0_0, %c0_1] : memref<1x32x128xf32, #tpu.memory_space<vmem>>, vector<1x32x128xf32>
    %1 = vector.shape_cast %0 : vector<1x32x128xf32> to vector<32x128xf32>
    %c0_2 = arith.constant 0 : index
    %c0_3 = arith.constant 0 : index
    %2 = vector.load %arg3[%c0_2, %c0_3] : memref<1x32xf32, #tpu.memory_space<vmem>>, vector<1x32xf32>
    %c0_4 = arith.constant 0 : index
    %3 = memref.load %arg4[%c0_4] : memref<1xf32, #tpu.memory_space<smem>>
    %c0_5 = arith.constant 0 : index
    %c0_6 = arith.constant 0 : index
    %4 = vector.load %arg12[%c0_5, %c0_6] : memref<32x128xf32, #tpu.memory_space<vmem>>, vector<32x128xf32>
    tpu.vector_store %arg12[%c0_5, %c0_6], %1 {strides = array<i32>} : memref<32x128xf32, #tpu.memory_space<vmem>>, vector<32x128xf32>,
    %c0_7 = arith.constant 0 : index
    %c0_8 = arith.constant 0 : index
    %5 = vector.load %arg12[%c0_7, %c0_8] : memref<32x128xf32, #tpu.memory_space<vmem>>, vector<30x128xf32>
    %6 = arith.truncf %5 : vector<30x128xf32> to vector<30x128xbf16>
    %c0_9 = arith.constant 0 : index
    %c0_10 = arith.constant 0 : index
    %c0_11 = arith.constant 0 : index
    %7 = vector.load %arg2[%c0_9, %c0_10, %c0_11] : memref<3x128x32xbf16, #tpu.memory_space<vmem>>, vector<1x128x32xbf16>
    %8 = vector.shape_cast %7 : vector<1x128x32xbf16> to vector<128x32xbf16>
    %cst = arith.constant dense<0.000000e+00> : vector<30x32xf32>
    %9 = tpu.matmul %6, %8, %cst {dimension_numbers = #tpu.dot_dimension_numbers<[1], [0], [0], [1], [0, 0, 1, 1], [], []>} : vector<30x128xbf16>, vector<128x32xbf16>, vector<30x32xf32> -> vector<30x32xf32>
    %10 = vector.broadcast %2 : vector<1x32xf32> to vector<30x32xf32>
    %11 = arith.addf %10, %9 : vector<30x32xf32>
    %c1 = arith.constant 1 : index
    %c0_12 = arith.constant 0 : index
    %12 = vector.load %arg12[%c1, %c0_12] : memref<32x128xf32, #tpu.memory_space<vmem>>, vector<30x128xf32>
    %13 = arith.truncf %12 : vector<30x128xf32> to vector<30x128xbf16>
    %c1_13 = arith.constant 1 : index
    %c0_14 = arith.constant 0 : index
    %c0_15 = arith.constant 0 : index
    %14 = vector.load %arg2[%c1_13, %c0_14, %c0_15] : memref<3x128x32xbf16, #tpu.memory_space<vmem>>, vector<1x128x32xbf16>
    %15 = vector.shape_cast %14 : vector<1x128x32xbf16> to vector<128x32xbf16>
    %cst_16 = arith.constant dense<0.000000e+00> : vector<30x32xf32>
    %16 = tpu.matmul %13, %15, %cst_16 {dimension_numbers = #tpu.dot_dimension_numbers<[1], [0], [0], [1], [0, 0, 1, 1], [], []>} : vector<30x128xbf16>, vector<128x32xbf16>, vector<30x32xf32> -> vector<30x32xf32>
    %17 = arith.addf %11, %16 : vector<30x32xf32>
    %c2 = arith.constant 2 : index
    %c0_17 = arith.constant 0 : index
    %18 = vector.load %arg12[%c2, %c0_17] : memref<32x128xf32, #tpu.memory_space<vmem>>, vector<30x128xf32>
    %19 = arith.truncf %18 : vector<30x128xf32> to vector<30x128xbf16>
    %c2_18 = arith.constant 2 : index
    %c0_19 = arith.constant 0 : index
    %c0_20 = arith.constant 0 : index
    %20 = vector.load %arg2[%c2_18, %c0_19, %c0_20] : memref<3x128x32xbf16, #tpu.memory_space<vmem>>, vector<1x128x32xbf16>
    %21 = vector.shape_cast %20 : vector<1x128x32xbf16> to vector<128x32xbf16>
    %cst_21 = arith.constant dense<0.000000e+00> : vector<30x32xf32>
    %22 = tpu.matmul %19, %21, %cst_21 {dimension_numbers = #tpu.dot_dimension_numbers<[1], [0], [0], [1], [0, 0, 1, 1], [], []>} : vector<30x128xbf16>, vector<128x32xbf16>, vector<30x32xf32> -> vector<30x32xf32>
    %23 = arith.addf %17, %22 : vector<30x32xf32>
    %cst_22 = arith.constant 0.000000e+00 : f32
    %24 = vector.broadcast %cst_22 : f32 to vector<30x32xf32>
    %25 = arith.cmpf ogt, %23, %24 : vector<30x32xf32>
    %26 = vector.broadcast %3 : f32 to vector<30x32xf32>
    %27 = arith.mulf %26, %23 : vector<30x32xf32>
    %28 = arith.select %25, %23, %27 : vector<30x32xi1>, vector<30x32xf32>
    %c0_23 = arith.constant 0 : index
    %c0_24 = arith.constant 0 : index
    %29 = vector.load %arg6[%c0_23, %c0_24] : memref<1x64xf32, #tpu.memory_space<vmem>>, vector<1x64xf32>
    %c0_25 = arith.constant 0 : index
    %30 = memref.load %arg7[%c0_25] : memref<1xf32, #tpu.memory_space<smem>>
    %c0_26 = arith.constant 0 : index
    %c0_27 = arith.constant 0 : index
    %31 = vector.load %arg12[%c0_26, %c0_27] : memref<32x128xf32, #tpu.memory_space<vmem>>, vector<30x32xf32>
    tpu.vector_store %arg12[%c0_26, %c0_27], %28 {strides = array<i32>} : memref<32x128xf32, #tpu.memory_space<vmem>>, vector<30x32xf32>,
    %c0_28 = arith.constant 0 : index
    %c0_29 = arith.constant 0 : index
    %32 = vector.load %arg12[%c0_28, %c0_29] : memref<32x128xf32, #tpu.memory_space<vmem>>, vector<28x32xf32>
    %33 = arith.truncf %32 : vector<28x32xf32> to vector<28x32xbf16>
    %c0_30 = arith.constant 0 : index
    %c0_31 = arith.constant 0 : index
    %c0_32 = arith.constant 0 : index
    %34 = vector.load %arg5[%c0_30, %c0_31, %c0_32] : memref<3x32x64xbf16, #tpu.memory_space<vmem>>, vector<1x32x64xbf16>
    %35 = vector.shape_cast %34 : vector<1x32x64xbf16> to vector<32x64xbf16>
    %cst_33 = arith.constant dense<0.000000e+00> : vector<28x64xf32>
    %36 = tpu.matmul %33, %35, %cst_33 {dimension_numbers = #tpu.dot_dimension_numbers<[1], [0], [0], [1], [0, 0, 1, 1], [], []>} : vector<28x32xbf16>, vector<32x64xbf16>, vector<28x64xf32> -> vector<28x64xf32>
    %37 = vector.broadcast %29 : vector<1x64xf32> to vector<28x64xf32>
    %38 = arith.addf %37, %36 : vector<28x64xf32>
    %c1_34 = arith.constant 1 : index
    %c0_35 = arith.constant 0 : index
    %39 = vector.load %arg12[%c1_34, %c0_35] : memref<32x128xf32, #tpu.memory_space<vmem>>, vector<28x32xf32>
    %40 = arith.truncf %39 : vector<28x32xf32> to vector<28x32xbf16>
    %c1_36 = arith.constant 1 : index
    %c0_37 = arith.constant 0 : index
    %c0_38 = arith.constant 0 : index
    %41 = vector.load %arg5[%c1_36, %c0_37, %c0_38] : memref<3x32x64xbf16, #tpu.memory_space<vmem>>, vector<1x32x64xbf16>
    %42 = vector.shape_cast %41 : vector<1x32x64xbf16> to vector<32x64xbf16>
    %cst_39 = arith.constant dense<0.000000e+00> : vector<28x64xf32>
    %43 = tpu.matmul %40, %42, %cst_39 {dimension_numbers = #tpu.dot_dimension_numbers<[1], [0], [0], [1], [0, 0, 1, 1], [], []>} : vector<28x32xbf16>, vector<32x64xbf16>, vector<28x64xf32> -> vector<28x64xf32>
    %44 = arith.addf %38, %43 : vector<28x64xf32>
    %c2_40 = arith.constant 2 : index
    %c0_41 = arith.constant 0 : index
    %45 = vector.load %arg12[%c2_40, %c0_41] : memref<32x128xf32, #tpu.memory_space<vmem>>, vector<28x32xf32>
    %46 = arith.truncf %45 : vector<28x32xf32> to vector<28x32xbf16>
    %c2_42 = arith.constant 2 : index
    %c0_43 = arith.constant 0 : index
    %c0_44 = arith.constant 0 : index
    %47 = vector.load %arg5[%c2_42, %c0_43, %c0_44] : memref<3x32x64xbf16, #tpu.memory_space<vmem>>, vector<1x32x64xbf16>
    %48 = vector.shape_cast %47 : vector<1x32x64xbf16> to vector<32x64xbf16>
    %cst_45 = arith.constant dense<0.000000e+00> : vector<28x64xf32>
    %49 = tpu.matmul %46, %48, %cst_45 {dimension_numbers = #tpu.dot_dimension_numbers<[1], [0], [0], [1], [0, 0, 1, 1], [], []>} : vector<28x32xbf16>, vector<32x64xbf16>, vector<28x64xf32> -> vector<28x64xf32>
    %50 = arith.addf %44, %49 : vector<28x64xf32>
    %cst_46 = arith.constant 0.000000e+00 : f32
    %51 = vector.broadcast %cst_46 : f32 to vector<28x64xf32>
    %52 = arith.cmpf ogt, %50, %51 : vector<28x64xf32>
    %53 = vector.broadcast %30 : f32 to vector<28x64xf32>
    %54 = arith.mulf %53, %50 : vector<28x64xf32>
    %55 = arith.select %52, %50, %54 : vector<28x64xi1>, vector<28x64xf32>
    %c0_47 = arith.constant 0 : index
    %c0_48 = arith.constant 0 : index
    %56 = vector.load %arg9[%c0_47, %c0_48] : memref<1x64xf32, #tpu.memory_space<vmem>>, vector<1x64xf32>
    %c0_49 = arith.constant 0 : index
    %57 = memref.load %arg10[%c0_49] : memref<1xf32, #tpu.memory_space<smem>>
    %c0_50 = arith.constant 0 : index
    %c0_51 = arith.constant 0 : index
    %58 = vector.load %arg12[%c0_50, %c0_51] : memref<32x128xf32, #tpu.memory_space<vmem>>, vector<28x64xf32>
    tpu.vector_store %arg12[%c0_50, %c0_51], %55 {strides = array<i32>} : memref<32x128xf32, #tpu.memory_space<vmem>>, vector<28x64xf32>,
    %c0_52 = arith.constant 0 : index
    %c0_53 = arith.constant 0 : index
    %59 = vector.load %arg12[%c0_52, %c0_53] : memref<32x128xf32, #tpu.memory_space<vmem>>, vector<26x64xf32>
    %60 = arith.truncf %59 : vector<26x64xf32> to vector<26x64xbf16>
    %c0_54 = arith.constant 0 : index
    %c0_55 = arith.constant 0 : index
    %c0_56 = arith.constant 0 : index
    %61 = vector.load %arg8[%c0_54, %c0_55, %c0_56] : memref<3x64x64xbf16, #tpu.memory_space<vmem>>, vector<1x64x64xbf16>
    %62 = vector.shape_cast %61 : vector<1x64x64xbf16> to vector<64x64xbf16>
    %cst_57 = arith.constant dense<0.000000e+00> : vector<26x64xf32>
    %63 = tpu.matmul %60, %62, %cst_57 {dimension_numbers = #tpu.dot_dimension_numbers<[1], [0], [0], [1], [0, 0, 1, 1], [], []>} : vector<26x64xbf16>, vector<64x64xbf16>, vector<26x64xf32> -> vector<26x64xf32>
    %64 = vector.broadcast %56 : vector<1x64xf32> to vector<26x64xf32>
    %65 = arith.addf %64, %63 : vector<26x64xf32>
    %c1_58 = arith.constant 1 : index
    %c0_59 = arith.constant 0 : index
    %66 = vector.load %arg12[%c1_58, %c0_59] : memref<32x128xf32, #tpu.memory_space<vmem>>, vector<26x64xf32>
    %67 = arith.truncf %66 : vector<26x64xf32> to vector<26x64xbf16>
    %c1_60 = arith.constant 1 : index
    %c0_61 = arith.constant 0 : index
    %c0_62 = arith.constant 0 : index
    %68 = vector.load %arg8[%c1_60, %c0_61, %c0_62] : memref<3x64x64xbf16, #tpu.memory_space<vmem>>, vector<1x64x64xbf16>
    %69 = vector.shape_cast %68 : vector<1x64x64xbf16> to vector<64x64xbf16>
    %cst_63 = arith.constant dense<0.000000e+00> : vector<26x64xf32>
    %70 = tpu.matmul %67, %69, %cst_63 {dimension_numbers = #tpu.dot_dimension_numbers<[1], [0], [0], [1], [0, 0, 1, 1], [], []>} : vector<26x64xbf16>, vector<64x64xbf16>, vector<26x64xf32> -> vector<26x64xf32>
    %71 = arith.addf %65, %70 : vector<26x64xf32>
    %c2_64 = arith.constant 2 : index
    %c0_65 = arith.constant 0 : index
    %72 = vector.load %arg12[%c2_64, %c0_65] : memref<32x128xf32, #tpu.memory_space<vmem>>, vector<26x64xf32>
    %73 = arith.truncf %72 : vector<26x64xf32> to vector<26x64xbf16>
    %c2_66 = arith.constant 2 : index
    %c0_67 = arith.constant 0 : index
    %c0_68 = arith.constant 0 : index
    %74 = vector.load %arg8[%c2_66, %c0_67, %c0_68] : memref<3x64x64xbf16, #tpu.memory_space<vmem>>, vector<1x64x64xbf16>
    %75 = vector.shape_cast %74 : vector<1x64x64xbf16> to vector<64x64xbf16>
    %cst_69 = arith.constant dense<0.000000e+00> : vector<26x64xf32>
    %76 = tpu.matmul %73, %75, %cst_69 {dimension_numbers = #tpu.dot_dimension_numbers<[1], [0], [0], [1], [0, 0, 1, 1], [], []>} : vector<26x64xbf16>, vector<64x64xbf16>, vector<26x64xf32> -> vector<26x64xf32>
    %77 = arith.addf %71, %76 : vector<26x64xf32>
    %cst_70 = arith.constant 0.000000e+00 : f32
    %78 = vector.broadcast %cst_70 : f32 to vector<26x64xf32>
    %79 = arith.cmpf ogt, %77, %78 : vector<26x64xf32>
    %80 = vector.broadcast %57 : f32 to vector<26x64xf32>
    %81 = arith.mulf %80, %77 : vector<26x64xf32>
    %82 = arith.select %79, %77, %81 : vector<26x64xi1>, vector<26x64xf32>
    %cst_71 = arith.constant dense<0xFF800000> : vector<64xf32>
    %83 = vector.multi_reduction <maximumf>, %82, %cst_71 [0] : vector<26x64xf32> to vector<64xf32>
    %84 = vector.shape_cast %83 : vector<64xf32> to vector<1x64xf32>
    %c0_72 = arith.constant 0 : index
    %c0_73 = arith.constant 0 : index
    %c0_74 = arith.constant 0 : index
    %85 = vector.load %arg11[%c0_72, %c0_73, %c0_74] : memref<1x1x64xf32, #tpu.memory_space<vmem>>, vector<1x1x64xf32>
    %86 = vector.shape_cast %85 : vector<1x1x64xf32> to vector<1x64xf32>
    %87 = vector.shape_cast %84 : vector<1x64xf32> to vector<1x1x64xf32>
    tpu.vector_store %arg11[%c0_72, %c0_73, %c0_74], %87 {strides = array<i32>} : memref<1x1x64xf32, #tpu.memory_space<vmem>>, vector<1x1x64xf32>,
    return
  }
  func.func @transform_0(%arg0: i32) -> (i32, i32, i32) {
    %c0_i32 = arith.constant 0 : i32
    %c0_i32_0 = arith.constant 0 : i32
    %c0_i32_1 = arith.constant 0 : i32
    return %arg0, %c0_i32, %c0_i32_0 : i32, i32, i32
  }
  func.func @transform_1(%arg0: i32) -> (i32, i32, i32) {
    %c0_i32 = arith.constant 0 : i32
    %c0_i32_0 = arith.constant 0 : i32
    %c0_i32_1 = arith.constant 0 : i32
    %c0_i32_2 = arith.constant 0 : i32
    return %c0_i32, %c0_i32_0, %c0_i32_1 : i32, i32, i32
  }
  func.func @transform_2(%arg0: i32) -> (i32, i32) {
    %c0_i32 = arith.constant 0 : i32
    %c0_i32_0 = arith.constant 0 : i32
    %c0_i32_1 = arith.constant 0 : i32
    return %c0_i32, %c0_i32_0 : i32, i32
  }
  func.func @transform_3(%arg0: i32) -> i32 {
    %c0_i32 = arith.constant 0 : i32
    %c0_i32_0 = arith.constant 0 : i32
    return %c0_i32 : i32
  }
  func.func @transform_4(%arg0: i32) -> (i32, i32, i32) {
    %c0_i32 = arith.constant 0 : i32
    %c0_i32_0 = arith.constant 0 : i32
    %c0_i32_1 = arith.constant 0 : i32
    %c0_i32_2 = arith.constant 0 : i32
    return %c0_i32, %c0_i32_0, %c0_i32_1 : i32, i32, i32
  }
  func.func @transform_5(%arg0: i32) -> (i32, i32) {
    %c0_i32 = arith.constant 0 : i32
    %c0_i32_0 = arith.constant 0 : i32
    %c0_i32_1 = arith.constant 0 : i32
    return %c0_i32, %c0_i32_0 : i32, i32
  }
  func.func @transform_6(%arg0: i32) -> i32 {
    %c0_i32 = arith.constant 0 : i32
    %c0_i32_0 = arith.constant 0 : i32
    return %c0_i32 : i32
  }
  func.func @transform_7(%arg0: i32) -> (i32, i32, i32) {
    %c0_i32 = arith.constant 0 : i32
    %c0_i32_0 = arith.constant 0 : i32
    %c0_i32_1 = arith.constant 0 : i32
    %c0_i32_2 = arith.constant 0 : i32
    return %c0_i32, %c0_i32_0, %c0_i32_1 : i32, i32, i32
  }
  func.func @transform_8(%arg0: i32) -> (i32, i32) {
    %c0_i32 = arith.constant 0 : i32
    %c0_i32_0 = arith.constant 0 : i32
    %c0_i32_1 = arith.constant 0 : i32
    return %c0_i32, %c0_i32_0 : i32, i32
  }
  func.func @transform_9(%arg0: i32) -> i32 {
    %c0_i32 = arith.constant 0 : i32
    %c0_i32_0 = arith.constant 0 : i32
    return %c0_i32 : i32
  }
  func.func @transform_10(%arg0: i32) -> (i32, i32, i32) {
    %c0_i32 = arith.constant 0 : i32
    %c0_i32_0 = arith.constant 0 : i32
    %c0_i32_1 = arith.constant 0 : i32
    return %arg0, %c0_i32, %c0_i32_0 : i32, i32, i32
  }
}

module attributes {stable_mosaic.version = 11 : i64} {
  func.func @_dilated_branch_kernel(%arg0: i32, %arg1: memref<1x32x128xf32, #tpu.memory_space<vmem>>, %arg2: memref<128x8xbf16, #tpu.memory_space<vmem>>, %arg3: memref<1x8xf32, #tpu.memory_space<vmem>>, %arg4: memref<1xf32, #tpu.memory_space<smem>>, %arg5: memref<9x8x32xbf16, #tpu.memory_space<vmem>>, %arg6: memref<1x32xf32, #tpu.memory_space<vmem>>, %arg7: memref<1x32xf32, #tpu.memory_space<vmem>>, %arg8: memref<1xf32, #tpu.memory_space<smem>>, %arg9: memref<32x16xbf16, #tpu.memory_space<vmem>>, %arg10: memref<1x16xf32, #tpu.memory_space<vmem>>, %arg11: memref<1xf32, #tpu.memory_space<smem>>, %arg12: memref<9x16x64xbf16, #tpu.memory_space<vmem>>, %arg13: memref<1x64xf32, #tpu.memory_space<vmem>>, %arg14: memref<1x64xf32, #tpu.memory_space<vmem>>, %arg15: memref<1xf32, #tpu.memory_space<smem>>, %arg16: memref<64x32xbf16, #tpu.memory_space<vmem>>, %arg17: memref<1x32xf32, #tpu.memory_space<vmem>>, %arg18: memref<1xf32, #tpu.memory_space<smem>>, %arg19: memref<9x32x128xbf16, #tpu.memory_space<vmem>>, %arg20: memref<1x128xf32, #tpu.memory_space<vmem>>, %arg21: memref<1x128xf32, #tpu.memory_space<vmem>>, %arg22: memref<1xf32, #tpu.memory_space<smem>>, %arg23: memref<1x1x128xf32, #tpu.memory_space<vmem>>, %arg24: memref<48x128xf32, #tpu.memory_space<vmem>>) attributes {dimension_semantics = [#tpu.dimension_semantics<parallel>], iteration_bounds = array<i64: 2>, scalar_prefetch = 0 : i64, scratch_operands = 1 : i64, tpu.core_type = #tpu.core_type<tc>, window_params = [{transform_indices = @transform_0, window_bounds = array<i64: 1, 32, 128>}, {pipeline_mode = #tpu.pipeline_mode<synchronous>, transform_indices = @transform_1, window_bounds = array<i64: 128, 8>}, {pipeline_mode = #tpu.pipeline_mode<synchronous>, transform_indices = @transform_2, window_bounds = array<i64: 1, 8>}, {transform_indices = @transform_3, window_bounds = array<i64: 1>}, {pipeline_mode = #tpu.pipeline_mode<synchronous>, transform_indices = @transform_4, window_bounds = array<i64: 9, 8, 32>}, {pipeline_mode = #tpu.pipeline_mode<synchronous>, transform_indices = @transform_5, window_bounds = array<i64: 1, 32>}, {pipeline_mode = #tpu.pipeline_mode<synchronous>, transform_indices = @transform_6, window_bounds = array<i64: 1, 32>}, {transform_indices = @transform_7, window_bounds = array<i64: 1>}, {pipeline_mode = #tpu.pipeline_mode<synchronous>, transform_indices = @transform_8, window_bounds = array<i64: 32, 16>}, {pipeline_mode = #tpu.pipeline_mode<synchronous>, transform_indices = @transform_9, window_bounds = array<i64: 1, 16>}, {transform_indices = @transform_10, window_bounds = array<i64: 1>}, {pipeline_mode = #tpu.pipeline_mode<synchronous>, transform_indices = @transform_11, window_bounds = array<i64: 9, 16, 64>}, {pipeline_mode = #tpu.pipeline_mode<synchronous>, transform_indices = @transform_12, window_bounds = array<i64: 1, 64>}, {pipeline_mode = #tpu.pipeline_mode<synchronous>, transform_indices = @transform_13, window_bounds = array<i64: 1, 64>}, {transform_indices = @transform_14, window_bounds = array<i64: 1>}, {pipeline_mode = #tpu.pipeline_mode<synchronous>, transform_indices = @transform_15, window_bounds = array<i64: 64, 32>}, {pipeline_mode = #tpu.pipeline_mode<synchronous>, transform_indices = @transform_16, window_bounds = array<i64: 1, 32>}, {transform_indices = @transform_17, window_bounds = array<i64: 1>}, {pipeline_mode = #tpu.pipeline_mode<synchronous>, transform_indices = @transform_18, window_bounds = array<i64: 9, 32, 128>}, {pipeline_mode = #tpu.pipeline_mode<synchronous>, transform_indices = @transform_19, window_bounds = array<i64: 1, 128>}, {pipeline_mode = #tpu.pipeline_mode<synchronous>, transform_indices = @transform_20, window_bounds = array<i64: 1, 128>}, {transform_indices = @transform_21, window_bounds = array<i64: 1>}, {transform_indices = @transform_22, window_bounds = array<i64: 1, 1, 128>}]} {
    %cst = arith.constant 0.000000e+00 : f32
    %0 = vector.broadcast %cst : f32 to vector<48x128xf32>
    %c0 = arith.constant 0 : index
    %c0_0 = arith.constant 0 : index
    %1 = vector.load %arg24[%c0, %c0_0] : memref<48x128xf32, #tpu.memory_space<vmem>>, vector<48x128xf32>
    tpu.vector_store %arg24[%c0, %c0_0], %0 {strides = array<i32>} : memref<48x128xf32, #tpu.memory_space<vmem>>, vector<48x128xf32>,
    %c0_1 = arith.constant 0 : index
    %c0_2 = arith.constant 0 : index
    %c0_3 = arith.constant 0 : index
    %2 = vector.load %arg1[%c0_1, %c0_2, %c0_3] : memref<1x32x128xf32, #tpu.memory_space<vmem>>, vector<1x32x128xf32>
    %3 = vector.shape_cast %2 : vector<1x32x128xf32> to vector<32x128xf32>
    %c0_4 = arith.constant 0 : index
    %c0_5 = arith.constant 0 : index
    %4 = vector.load %arg2[%c0_4, %c0_5] : memref<128x8xbf16, #tpu.memory_space<vmem>>, vector<128x8xbf16>
    %c0_6 = arith.constant 0 : index
    %c0_7 = arith.constant 0 : index
    %5 = vector.load %arg3[%c0_6, %c0_7] : memref<1x8xf32, #tpu.memory_space<vmem>>, vector<1x8xf32>
    %c0_8 = arith.constant 0 : index
    %6 = memref.load %arg4[%c0_8] : memref<1xf32, #tpu.memory_space<smem>>
    %c0_9 = arith.constant 0 : index
    %c0_10 = arith.constant 0 : index
    %7 = vector.load %arg6[%c0_9, %c0_10] : memref<1x32xf32, #tpu.memory_space<vmem>>, vector<1x32xf32>
    %c0_11 = arith.constant 0 : index
    %c0_12 = arith.constant 0 : index
    %8 = vector.load %arg7[%c0_11, %c0_12] : memref<1x32xf32, #tpu.memory_space<vmem>>, vector<1x32xf32>
    %c0_13 = arith.constant 0 : index
    %9 = memref.load %arg8[%c0_13] : memref<1xf32, #tpu.memory_space<smem>>
    %10 = arith.truncf %3 : vector<32x128xf32> to vector<32x128xbf16>
    %cst_14 = arith.constant dense<0.000000e+00> : vector<32x8xf32>
    %11 = tpu.matmul %10, %4, %cst_14 {dimension_numbers = #tpu.dot_dimension_numbers<[1], [0], [0], [1], [0, 0, 1, 1], [], []>} : vector<32x128xbf16>, vector<128x8xbf16>, vector<32x8xf32> -> vector<32x8xf32>
    %12 = vector.broadcast %5 : vector<1x8xf32> to vector<32x8xf32>
    %13 = arith.addf %11, %12 : vector<32x8xf32>
    %cst_15 = arith.constant 0.000000e+00 : f32
    %14 = vector.broadcast %cst_15 : f32 to vector<32x8xf32>
    %15 = arith.cmpf ogt, %13, %14 : vector<32x8xf32>
    %16 = vector.broadcast %6 : f32 to vector<32x8xf32>
    %17 = arith.mulf %16, %13 : vector<32x8xf32>
    %18 = arith.select %15, %13, %17 : vector<32x8xi1>, vector<32x8xf32>
    %c8 = arith.constant 8 : index
    %c0_16 = arith.constant 0 : index
    %19 = vector.load %arg24[%c8, %c0_16] : memref<48x128xf32, #tpu.memory_space<vmem>>, vector<32x8xf32>
    tpu.vector_store %arg24[%c8, %c0_16], %18 {strides = array<i32>} : memref<48x128xf32, #tpu.memory_space<vmem>>, vector<32x8xf32>,
    %c0_17 = arith.constant 0 : index
    %c0_18 = arith.constant 0 : index
    %20 = vector.load %arg24[%c0_17, %c0_18] : memref<48x128xf32, #tpu.memory_space<vmem>>, vector<32x8xf32>
    %21 = arith.truncf %20 : vector<32x8xf32> to vector<32x8xbf16>
    %c0_19 = arith.constant 0 : index
    %c0_20 = arith.constant 0 : index
    %c0_21 = arith.constant 0 : index
    %22 = vector.load %arg5[%c0_19, %c0_20, %c0_21] : memref<9x8x32xbf16, #tpu.memory_space<vmem>>, vector<1x8x32xbf16>
    %23 = vector.shape_cast %22 : vector<1x8x32xbf16> to vector<8x32xbf16>
    %cst_22 = arith.constant dense<0.000000e+00> : vector<32x32xf32>
    %24 = tpu.matmul %21, %23, %cst_22 {dimension_numbers = #tpu.dot_dimension_numbers<[1], [0], [0], [1], [0, 0, 1, 1], [], []>} : vector<32x8xbf16>, vector<8x32xbf16>, vector<32x32xf32> -> vector<32x32xf32>
    %cst_23 = arith.constant 0.000000e+00 : f32
    %25 = vector.broadcast %cst_23 : f32 to vector<32x32xf32>
    %26 = arith.addf %25, %24 : vector<32x32xf32>
    %c4 = arith.constant 4 : index
    %c0_24 = arith.constant 0 : index
    %27 = vector.load %arg24[%c4, %c0_24] : memref<48x128xf32, #tpu.memory_space<vmem>>, vector<32x8xf32>
    %28 = arith.truncf %27 : vector<32x8xf32> to vector<32x8xbf16>
    %c1 = arith.constant 1 : index
    %c0_25 = arith.constant 0 : index
    %c0_26 = arith.constant 0 : index
    %29 = vector.load %arg5[%c1, %c0_25, %c0_26] : memref<9x8x32xbf16, #tpu.memory_space<vmem>>, vector<1x8x32xbf16>
    %30 = vector.shape_cast %29 : vector<1x8x32xbf16> to vector<8x32xbf16>
    %cst_27 = arith.constant dense<0.000000e+00> : vector<32x32xf32>
    %31 = tpu.matmul %28, %30, %cst_27 {dimension_numbers = #tpu.dot_dimension_numbers<[1], [0], [0], [1], [0, 0, 1, 1], [], []>} : vector<32x8xbf16>, vector<8x32xbf16>, vector<32x32xf32> -> vector<32x32xf32>
    %32 = arith.addf %26, %31 : vector<32x32xf32>
    %c6 = arith.constant 6 : index
    %c0_28 = arith.constant 0 : index
    %33 = vector.load %arg24[%c6, %c0_28] : memref<48x128xf32, #tpu.memory_space<vmem>>, vector<32x8xf32>
    %34 = arith.truncf %33 : vector<32x8xf32> to vector<32x8xbf16>
    %c2 = arith.constant 2 : index
    %c0_29 = arith.constant 0 : index
    %c0_30 = arith.constant 0 : index
    %35 = vector.load %arg5[%c2, %c0_29, %c0_30] : memref<9x8x32xbf16, #tpu.memory_space<vmem>>, vector<1x8x32xbf16>
    %36 = vector.shape_cast %35 : vector<1x8x32xbf16> to vector<8x32xbf16>
    %cst_31 = arith.constant dense<0.000000e+00> : vector<32x32xf32>
    %37 = tpu.matmul %34, %36, %cst_31 {dimension_numbers = #tpu.dot_dimension_numbers<[1], [0], [0], [1], [0, 0, 1, 1], [], []>} : vector<32x8xbf16>, vector<8x32xbf16>, vector<32x32xf32> -> vector<32x32xf32>
    %38 = arith.addf %32, %37 : vector<32x32xf32>
    %c7 = arith.constant 7 : index
    %c0_32 = arith.constant 0 : index
    %39 = vector.load %arg24[%c7, %c0_32] : memref<48x128xf32, #tpu.memory_space<vmem>>, vector<32x8xf32>
    %40 = arith.truncf %39 : vector<32x8xf32> to vector<32x8xbf16>
    %c3 = arith.constant 3 : index
    %c0_33 = arith.constant 0 : index
    %c0_34 = arith.constant 0 : index
    %41 = vector.load %arg5[%c3, %c0_33, %c0_34] : memref<9x8x32xbf16, #tpu.memory_space<vmem>>, vector<1x8x32xbf16>
    %42 = vector.shape_cast %41 : vector<1x8x32xbf16> to vector<8x32xbf16>
    %cst_35 = arith.constant dense<0.000000e+00> : vector<32x32xf32>
    %43 = tpu.matmul %40, %42, %cst_35 {dimension_numbers = #tpu.dot_dimension_numbers<[1], [0], [0], [1], [0, 0, 1, 1], [], []>} : vector<32x8xbf16>, vector<8x32xbf16>, vector<32x32xf32> -> vector<32x32xf32>
    %44 = arith.addf %38, %43 : vector<32x32xf32>
    %c8_36 = arith.constant 8 : index
    %c0_37 = arith.constant 0 : index
    %45 = vector.load %arg24[%c8_36, %c0_37] : memref<48x128xf32, #tpu.memory_space<vmem>>, vector<32x8xf32>
    %46 = arith.truncf %45 : vector<32x8xf32> to vector<32x8xbf16>
    %c4_38 = arith.constant 4 : index
    %c0_39 = arith.constant 0 : index
    %c0_40 = arith.constant 0 : index
    %47 = vector.load %arg5[%c4_38, %c0_39, %c0_40] : memref<9x8x32xbf16, #tpu.memory_space<vmem>>, vector<1x8x32xbf16>
    %48 = vector.shape_cast %47 : vector<1x8x32xbf16> to vector<8x32xbf16>
    %cst_41 = arith.constant dense<0.000000e+00> : vector<32x32xf32>
    %49 = tpu.matmul %46, %48, %cst_41 {dimension_numbers = #tpu.dot_dimension_numbers<[1], [0], [0], [1], [0, 0, 1, 1], [], []>} : vector<32x8xbf16>, vector<8x32xbf16>, vector<32x32xf32> -> vector<32x32xf32>
    %50 = arith.addf %44, %49 : vector<32x32xf32>
    %c9 = arith.constant 9 : index
    %c0_42 = arith.constant 0 : index
    %51 = vector.load %arg24[%c9, %c0_42] : memref<48x128xf32, #tpu.memory_space<vmem>>, vector<32x8xf32>
    %52 = arith.truncf %51 : vector<32x8xf32> to vector<32x8xbf16>
    %c5 = arith.constant 5 : index
    %c0_43 = arith.constant 0 : index
    %c0_44 = arith.constant 0 : index
    %53 = vector.load %arg5[%c5, %c0_43, %c0_44] : memref<9x8x32xbf16, #tpu.memory_space<vmem>>, vector<1x8x32xbf16>
    %54 = vector.shape_cast %53 : vector<1x8x32xbf16> to vector<8x32xbf16>
    %cst_45 = arith.constant dense<0.000000e+00> : vector<32x32xf32>
    %55 = tpu.matmul %52, %54, %cst_45 {dimension_numbers = #tpu.dot_dimension_numbers<[1], [0], [0], [1], [0, 0, 1, 1], [], []>} : vector<32x8xbf16>, vector<8x32xbf16>, vector<32x32xf32> -> vector<32x32xf32>
    %56 = arith.addf %50, %55 : vector<32x32xf32>
    %c10 = arith.constant 10 : index
    %c0_46 = arith.constant 0 : index
    %57 = vector.load %arg24[%c10, %c0_46] : memref<48x128xf32, #tpu.memory_space<vmem>>, vector<32x8xf32>
    %58 = arith.truncf %57 : vector<32x8xf32> to vector<32x8xbf16>
    %c6_47 = arith.constant 6 : index
    %c0_48 = arith.constant 0 : index
    %c0_49 = arith.constant 0 : index
    %59 = vector.load %arg5[%c6_47, %c0_48, %c0_49] : memref<9x8x32xbf16, #tpu.memory_space<vmem>>, vector<1x8x32xbf16>
    %60 = vector.shape_cast %59 : vector<1x8x32xbf16> to vector<8x32xbf16>
    %cst_50 = arith.constant dense<0.000000e+00> : vector<32x32xf32>
    %61 = tpu.matmul %58, %60, %cst_50 {dimension_numbers = #tpu.dot_dimension_numbers<[1], [0], [0], [1], [0, 0, 1, 1], [], []>} : vector<32x8xbf16>, vector<8x32xbf16>, vector<32x32xf32> -> vector<32x32xf32>
    %62 = arith.addf %56, %61 : vector<32x32xf32>
    %c12 = arith.constant 12 : index
    %c0_51 = arith.constant 0 : index
    %63 = vector.load %arg24[%c12, %c0_51] : memref<48x128xf32, #tpu.memory_space<vmem>>, vector<32x8xf32>
    %64 = arith.truncf %63 : vector<32x8xf32> to vector<32x8xbf16>
    %c7_52 = arith.constant 7 : index
    %c0_53 = arith.constant 0 : index
    %c0_54 = arith.constant 0 : index
    %65 = vector.load %arg5[%c7_52, %c0_53, %c0_54] : memref<9x8x32xbf16, #tpu.memory_space<vmem>>, vector<1x8x32xbf16>
    %66 = vector.shape_cast %65 : vector<1x8x32xbf16> to vector<8x32xbf16>
    %cst_55 = arith.constant dense<0.000000e+00> : vector<32x32xf32>
    %67 = tpu.matmul %64, %66, %cst_55 {dimension_numbers = #tpu.dot_dimension_numbers<[1], [0], [0], [1], [0, 0, 1, 1], [], []>} : vector<32x8xbf16>, vector<8x32xbf16>, vector<32x32xf32> -> vector<32x32xf32>
    %68 = arith.addf %62, %67 : vector<32x32xf32>
    %c16 = arith.constant 16 : index
    %c0_56 = arith.constant 0 : index
    %69 = vector.load %arg24[%c16, %c0_56] : memref<48x128xf32, #tpu.memory_space<vmem>>, vector<32x8xf32>
    %70 = arith.truncf %69 : vector<32x8xf32> to vector<32x8xbf16>
    %c8_57 = arith.constant 8 : index
    %c0_58 = arith.constant 0 : index
    %c0_59 = arith.constant 0 : index
    %71 = vector.load %arg5[%c8_57, %c0_58, %c0_59] : memref<9x8x32xbf16, #tpu.memory_space<vmem>>, vector<1x8x32xbf16>
    %72 = vector.shape_cast %71 : vector<1x8x32xbf16> to vector<8x32xbf16>
    %cst_60 = arith.constant dense<0.000000e+00> : vector<32x32xf32>
    %73 = tpu.matmul %70, %72, %cst_60 {dimension_numbers = #tpu.dot_dimension_numbers<[1], [0], [0], [1], [0, 0, 1, 1], [], []>} : vector<32x8xbf16>, vector<8x32xbf16>, vector<32x32xf32> -> vector<32x32xf32>
    %74 = arith.addf %68, %73 : vector<32x32xf32>
    %75 = vector.broadcast %7 : vector<1x32xf32> to vector<32x32xf32>
    %76 = arith.mulf %74, %75 : vector<32x32xf32>
    %77 = vector.broadcast %8 : vector<1x32xf32> to vector<32x32xf32>
    %78 = arith.addf %76, %77 : vector<32x32xf32>
    %cst_61 = arith.constant 0.000000e+00 : f32
    %79 = vector.broadcast %cst_61 : f32 to vector<32x32xf32>
    %80 = arith.cmpf ogt, %78, %79 : vector<32x32xf32>
    %81 = vector.broadcast %9 : f32 to vector<32x32xf32>
    %82 = arith.mulf %81, %78 : vector<32x32xf32>
    %83 = arith.select %80, %78, %82 : vector<32x32xi1>, vector<32x32xf32>
    %c0_62 = arith.constant 0 : index
    %c0_63 = arith.constant 0 : index
    %84 = vector.load %arg9[%c0_62, %c0_63] : memref<32x16xbf16, #tpu.memory_space<vmem>>, vector<32x16xbf16>
    %c0_64 = arith.constant 0 : index
    %c0_65 = arith.constant 0 : index
    %85 = vector.load %arg10[%c0_64, %c0_65] : memref<1x16xf32, #tpu.memory_space<vmem>>, vector<1x16xf32>
    %c0_66 = arith.constant 0 : index
    %86 = memref.load %arg11[%c0_66] : memref<1xf32, #tpu.memory_space<smem>>
    %c0_67 = arith.constant 0 : index
    %c0_68 = arith.constant 0 : index
    %87 = vector.load %arg13[%c0_67, %c0_68] : memref<1x64xf32, #tpu.memory_space<vmem>>, vector<1x64xf32>
    %c0_69 = arith.constant 0 : index
    %c0_70 = arith.constant 0 : index
    %88 = vector.load %arg14[%c0_69, %c0_70] : memref<1x64xf32, #tpu.memory_space<vmem>>, vector<1x64xf32>
    %c0_71 = arith.constant 0 : index
    %89 = memref.load %arg15[%c0_71] : memref<1xf32, #tpu.memory_space<smem>>
    %90 = arith.truncf %83 : vector<32x32xf32> to vector<32x32xbf16>
    %cst_72 = arith.constant dense<0.000000e+00> : vector<32x16xf32>
    %91 = tpu.matmul %90, %84, %cst_72 {dimension_numbers = #tpu.dot_dimension_numbers<[1], [0], [0], [1], [0, 0, 1, 1], [], []>} : vector<32x32xbf16>, vector<32x16xbf16>, vector<32x16xf32> -> vector<32x16xf32>
    %92 = vector.broadcast %85 : vector<1x16xf32> to vector<32x16xf32>
    %93 = arith.addf %91, %92 : vector<32x16xf32>
    %cst_73 = arith.constant 0.000000e+00 : f32
    %94 = vector.broadcast %cst_73 : f32 to vector<32x16xf32>
    %95 = arith.cmpf ogt, %93, %94 : vector<32x16xf32>
    %96 = vector.broadcast %86 : f32 to vector<32x16xf32>
    %97 = arith.mulf %96, %93 : vector<32x16xf32>
    %98 = arith.select %95, %93, %97 : vector<32x16xi1>, vector<32x16xf32>
    %c8_74 = arith.constant 8 : index
    %c0_75 = arith.constant 0 : index
    %99 = vector.load %arg24[%c8_74, %c0_75] : memref<48x128xf32, #tpu.memory_space<vmem>>, vector<32x16xf32>
    tpu.vector_store %arg24[%c8_74, %c0_75], %98 {strides = array<i32>} : memref<48x128xf32, #tpu.memory_space<vmem>>, vector<32x16xf32>,
    %c0_76 = arith.constant 0 : index
    %c0_77 = arith.constant 0 : index
    %100 = vector.load %arg24[%c0_76, %c0_77] : memref<48x128xf32, #tpu.memory_space<vmem>>, vector<32x16xf32>
    %101 = arith.truncf %100 : vector<32x16xf32> to vector<32x16xbf16>
    %c0_78 = arith.constant 0 : index
    %c0_79 = arith.constant 0 : index
    %c0_80 = arith.constant 0 : index
    %102 = vector.load %arg12[%c0_78, %c0_79, %c0_80] : memref<9x16x64xbf16, #tpu.memory_space<vmem>>, vector<1x16x64xbf16>
    %103 = vector.shape_cast %102 : vector<1x16x64xbf16> to vector<16x64xbf16>
    %cst_81 = arith.constant dense<0.000000e+00> : vector<32x64xf32>
    %104 = tpu.matmul %101, %103, %cst_81 {dimension_numbers = #tpu.dot_dimension_numbers<[1], [0], [0], [1], [0, 0, 1, 1], [], []>} : vector<32x16xbf16>, vector<16x64xbf16>, vector<32x64xf32> -> vector<32x64xf32>
    %cst_82 = arith.constant 0.000000e+00 : f32
    %105 = vector.broadcast %cst_82 : f32 to vector<32x64xf32>
    %106 = arith.addf %105, %104 : vector<32x64xf32>
    %c4_83 = arith.constant 4 : index
    %c0_84 = arith.constant 0 : index
    %107 = vector.load %arg24[%c4_83, %c0_84] : memref<48x128xf32, #tpu.memory_space<vmem>>, vector<32x16xf32>
    %108 = arith.truncf %107 : vector<32x16xf32> to vector<32x16xbf16>
    %c1_85 = arith.constant 1 : index
    %c0_86 = arith.constant 0 : index
    %c0_87 = arith.constant 0 : index
    %109 = vector.load %arg12[%c1_85, %c0_86, %c0_87] : memref<9x16x64xbf16, #tpu.memory_space<vmem>>, vector<1x16x64xbf16>
    %110 = vector.shape_cast %109 : vector<1x16x64xbf16> to vector<16x64xbf16>
    %cst_88 = arith.constant dense<0.000000e+00> : vector<32x64xf32>
    %111 = tpu.matmul %108, %110, %cst_88 {dimension_numbers = #tpu.dot_dimension_numbers<[1], [0], [0], [1], [0, 0, 1, 1], [], []>} : vector<32x16xbf16>, vector<16x64xbf16>, vector<32x64xf32> -> vector<32x64xf32>
    %112 = arith.addf %106, %111 : vector<32x64xf32>
    %c6_89 = arith.constant 6 : index
    %c0_90 = arith.constant 0 : index
    %113 = vector.load %arg24[%c6_89, %c0_90] : memref<48x128xf32, #tpu.memory_space<vmem>>, vector<32x16xf32>
    %114 = arith.truncf %113 : vector<32x16xf32> to vector<32x16xbf16>
    %c2_91 = arith.constant 2 : index
    %c0_92 = arith.constant 0 : index
    %c0_93 = arith.constant 0 : index
    %115 = vector.load %arg12[%c2_91, %c0_92, %c0_93] : memref<9x16x64xbf16, #tpu.memory_space<vmem>>, vector<1x16x64xbf16>
    %116 = vector.shape_cast %115 : vector<1x16x64xbf16> to vector<16x64xbf16>
    %cst_94 = arith.constant dense<0.000000e+00> : vector<32x64xf32>
    %117 = tpu.matmul %114, %116, %cst_94 {dimension_numbers = #tpu.dot_dimension_numbers<[1], [0], [0], [1], [0, 0, 1, 1], [], []>} : vector<32x16xbf16>, vector<16x64xbf16>, vector<32x64xf32> -> vector<32x64xf32>
    %118 = arith.addf %112, %117 : vector<32x64xf32>
    %c7_95 = arith.constant 7 : index
    %c0_96 = arith.constant 0 : index
    %119 = vector.load %arg24[%c7_95, %c0_96] : memref<48x128xf32, #tpu.memory_space<vmem>>, vector<32x16xf32>
    %120 = arith.truncf %119 : vector<32x16xf32> to vector<32x16xbf16>
    %c3_97 = arith.constant 3 : index
    %c0_98 = arith.constant 0 : index
    %c0_99 = arith.constant 0 : index
    %121 = vector.load %arg12[%c3_97, %c0_98, %c0_99] : memref<9x16x64xbf16, #tpu.memory_space<vmem>>, vector<1x16x64xbf16>
    %122 = vector.shape_cast %121 : vector<1x16x64xbf16> to vector<16x64xbf16>
    %cst_100 = arith.constant dense<0.000000e+00> : vector<32x64xf32>
    %123 = tpu.matmul %120, %122, %cst_100 {dimension_numbers = #tpu.dot_dimension_numbers<[1], [0], [0], [1], [0, 0, 1, 1], [], []>} : vector<32x16xbf16>, vector<16x64xbf16>, vector<32x64xf32> -> vector<32x64xf32>
    %124 = arith.addf %118, %123 : vector<32x64xf32>
    %c8_101 = arith.constant 8 : index
    %c0_102 = arith.constant 0 : index
    %125 = vector.load %arg24[%c8_101, %c0_102] : memref<48x128xf32, #tpu.memory_space<vmem>>, vector<32x16xf32>
    %126 = arith.truncf %125 : vector<32x16xf32> to vector<32x16xbf16>
    %c4_103 = arith.constant 4 : index
    %c0_104 = arith.constant 0 : index
    %c0_105 = arith.constant 0 : index
    %127 = vector.load %arg12[%c4_103, %c0_104, %c0_105] : memref<9x16x64xbf16, #tpu.memory_space<vmem>>, vector<1x16x64xbf16>
    %128 = vector.shape_cast %127 : vector<1x16x64xbf16> to vector<16x64xbf16>
    %cst_106 = arith.constant dense<0.000000e+00> : vector<32x64xf32>
    %129 = tpu.matmul %126, %128, %cst_106 {dimension_numbers = #tpu.dot_dimension_numbers<[1], [0], [0], [1], [0, 0, 1, 1], [], []>} : vector<32x16xbf16>, vector<16x64xbf16>, vector<32x64xf32> -> vector<32x64xf32>
    %130 = arith.addf %124, %129 : vector<32x64xf32>
    %c9_107 = arith.constant 9 : index
    %c0_108 = arith.constant 0 : index
    %131 = vector.load %arg24[%c9_107, %c0_108] : memref<48x128xf32, #tpu.memory_space<vmem>>, vector<32x16xf32>
    %132 = arith.truncf %131 : vector<32x16xf32> to vector<32x16xbf16>
    %c5_109 = arith.constant 5 : index
    %c0_110 = arith.constant 0 : index
    %c0_111 = arith.constant 0 : index
    %133 = vector.load %arg12[%c5_109, %c0_110, %c0_111] : memref<9x16x64xbf16, #tpu.memory_space<vmem>>, vector<1x16x64xbf16>
    %134 = vector.shape_cast %133 : vector<1x16x64xbf16> to vector<16x64xbf16>
    %cst_112 = arith.constant dense<0.000000e+00> : vector<32x64xf32>
    %135 = tpu.matmul %132, %134, %cst_112 {dimension_numbers = #tpu.dot_dimension_numbers<[1], [0], [0], [1], [0, 0, 1, 1], [], []>} : vector<32x16xbf16>, vector<16x64xbf16>, vector<32x64xf32> -> vector<32x64xf32>
    %136 = arith.addf %130, %135 : vector<32x64xf32>
    %c10_113 = arith.constant 10 : index
    %c0_114 = arith.constant 0 : index
    %137 = vector.load %arg24[%c10_113, %c0_114] : memref<48x128xf32, #tpu.memory_space<vmem>>, vector<32x16xf32>
    %138 = arith.truncf %137 : vector<32x16xf32> to vector<32x16xbf16>
    %c6_115 = arith.constant 6 : index
    %c0_116 = arith.constant 0 : index
    %c0_117 = arith.constant 0 : index
    %139 = vector.load %arg12[%c6_115, %c0_116, %c0_117] : memref<9x16x64xbf16, #tpu.memory_space<vmem>>, vector<1x16x64xbf16>
    %140 = vector.shape_cast %139 : vector<1x16x64xbf16> to vector<16x64xbf16>
    %cst_118 = arith.constant dense<0.000000e+00> : vector<32x64xf32>
    %141 = tpu.matmul %138, %140, %cst_118 {dimension_numbers = #tpu.dot_dimension_numbers<[1], [0], [0], [1], [0, 0, 1, 1], [], []>} : vector<32x16xbf16>, vector<16x64xbf16>, vector<32x64xf32> -> vector<32x64xf32>
    %142 = arith.addf %136, %141 : vector<32x64xf32>
    %c12_119 = arith.constant 12 : index
    %c0_120 = arith.constant 0 : index
    %143 = vector.load %arg24[%c12_119, %c0_120] : memref<48x128xf32, #tpu.memory_space<vmem>>, vector<32x16xf32>
    %144 = arith.truncf %143 : vector<32x16xf32> to vector<32x16xbf16>
    %c7_121 = arith.constant 7 : index
    %c0_122 = arith.constant 0 : index
    %c0_123 = arith.constant 0 : index
    %145 = vector.load %arg12[%c7_121, %c0_122, %c0_123] : memref<9x16x64xbf16, #tpu.memory_space<vmem>>, vector<1x16x64xbf16>
    %146 = vector.shape_cast %145 : vector<1x16x64xbf16> to vector<16x64xbf16>
    %cst_124 = arith.constant dense<0.000000e+00> : vector<32x64xf32>
    %147 = tpu.matmul %144, %146, %cst_124 {dimension_numbers = #tpu.dot_dimension_numbers<[1], [0], [0], [1], [0, 0, 1, 1], [], []>} : vector<32x16xbf16>, vector<16x64xbf16>, vector<32x64xf32> -> vector<32x64xf32>
    %148 = arith.addf %142, %147 : vector<32x64xf32>
    %c16_125 = arith.constant 16 : index
    %c0_126 = arith.constant 0 : index
    %149 = vector.load %arg24[%c16_125, %c0_126] : memref<48x128xf32, #tpu.memory_space<vmem>>, vector<32x16xf32>
    %150 = arith.truncf %149 : vector<32x16xf32> to vector<32x16xbf16>
    %c8_127 = arith.constant 8 : index
    %c0_128 = arith.constant 0 : index
    %c0_129 = arith.constant 0 : index
    %151 = vector.load %arg12[%c8_127, %c0_128, %c0_129] : memref<9x16x64xbf16, #tpu.memory_space<vmem>>, vector<1x16x64xbf16>
    %152 = vector.shape_cast %151 : vector<1x16x64xbf16> to vector<16x64xbf16>
    %cst_130 = arith.constant dense<0.000000e+00> : vector<32x64xf32>
    %153 = tpu.matmul %150, %152, %cst_130 {dimension_numbers = #tpu.dot_dimension_numbers<[1], [0], [0], [1], [0, 0, 1, 1], [], []>} : vector<32x16xbf16>, vector<16x64xbf16>, vector<32x64xf32> -> vector<32x64xf32>
    %154 = arith.addf %148, %153 : vector<32x64xf32>
    %155 = vector.broadcast %87 : vector<1x64xf32> to vector<32x64xf32>
    %156 = arith.mulf %154, %155 : vector<32x64xf32>
    %157 = vector.broadcast %88 : vector<1x64xf32> to vector<32x64xf32>
    %158 = arith.addf %156, %157 : vector<32x64xf32>
    %cst_131 = arith.constant 0.000000e+00 : f32
    %159 = vector.broadcast %cst_131 : f32 to vector<32x64xf32>
    %160 = arith.cmpf ogt, %158, %159 : vector<32x64xf32>
    %161 = vector.broadcast %89 : f32 to vector<32x64xf32>
    %162 = arith.mulf %161, %158 : vector<32x64xf32>
    %163 = arith.select %160, %158, %162 : vector<32x64xi1>, vector<32x64xf32>
    %c0_132 = arith.constant 0 : index
    %c0_133 = arith.constant 0 : index
    %164 = vector.load %arg16[%c0_132, %c0_133] : memref<64x32xbf16, #tpu.memory_space<vmem>>, vector<64x32xbf16>
    %c0_134 = arith.constant 0 : index
    %c0_135 = arith.constant 0 : index
    %165 = vector.load %arg17[%c0_134, %c0_135] : memref<1x32xf32, #tpu.memory_space<vmem>>, vector<1x32xf32>
    %c0_136 = arith.constant 0 : index
    %166 = memref.load %arg18[%c0_136] : memref<1xf32, #tpu.memory_space<smem>>
    %c0_137 = arith.constant 0 : index
    %c0_138 = arith.constant 0 : index
    %167 = vector.load %arg20[%c0_137, %c0_138] : memref<1x128xf32, #tpu.memory_space<vmem>>, vector<1x128xf32>
    %c0_139 = arith.constant 0 : index
    %c0_140 = arith.constant 0 : index
    %168 = vector.load %arg21[%c0_139, %c0_140] : memref<1x128xf32, #tpu.memory_space<vmem>>, vector<1x128xf32>
    %c0_141 = arith.constant 0 : index
    %169 = memref.load %arg22[%c0_141] : memref<1xf32, #tpu.memory_space<smem>>
    %170 = arith.truncf %163 : vector<32x64xf32> to vector<32x64xbf16>
    %cst_142 = arith.constant dense<0.000000e+00> : vector<32x32xf32>
    %171 = tpu.matmul %170, %164, %cst_142 {dimension_numbers = #tpu.dot_dimension_numbers<[1], [0], [0], [1], [0, 0, 1, 1], [], []>} : vector<32x64xbf16>, vector<64x32xbf16>, vector<32x32xf32> -> vector<32x32xf32>
    %172 = vector.broadcast %165 : vector<1x32xf32> to vector<32x32xf32>
    %173 = arith.addf %171, %172 : vector<32x32xf32>
    %cst_143 = arith.constant 0.000000e+00 : f32
    %174 = vector.broadcast %cst_143 : f32 to vector<32x32xf32>
    %175 = arith.cmpf ogt, %173, %174 : vector<32x32xf32>
    %176 = vector.broadcast %166 : f32 to vector<32x32xf32>
    %177 = arith.mulf %176, %173 : vector<32x32xf32>
    %178 = arith.select %175, %173, %177 : vector<32x32xi1>, vector<32x32xf32>
    %c8_144 = arith.constant 8 : index
    %c0_145 = arith.constant 0 : index
    %179 = vector.load %arg24[%c8_144, %c0_145] : memref<48x128xf32, #tpu.memory_space<vmem>>, vector<32x32xf32>
    tpu.vector_store %arg24[%c8_144, %c0_145], %178 {strides = array<i32>} : memref<48x128xf32, #tpu.memory_space<vmem>>, vector<32x32xf32>,
    %c0_146 = arith.constant 0 : index
    %c0_147 = arith.constant 0 : index
    %180 = vector.load %arg24[%c0_146, %c0_147] : memref<48x128xf32, #tpu.memory_space<vmem>>, vector<32x32xf32>
    %181 = arith.truncf %180 : vector<32x32xf32> to vector<32x32xbf16>
    %c0_148 = arith.constant 0 : index
    %c0_149 = arith.constant 0 : index
    %c0_150 = arith.constant 0 : index
    %182 = vector.load %arg19[%c0_148, %c0_149, %c0_150] : memref<9x32x128xbf16, #tpu.memory_space<vmem>>, vector<1x32x128xbf16>
    %183 = vector.shape_cast %182 : vector<1x32x128xbf16> to vector<32x128xbf16>
    %cst_151 = arith.constant dense<0.000000e+00> : vector<32x128xf32>
    %184 = tpu.matmul %181, %183, %cst_151 {dimension_numbers = #tpu.dot_dimension_numbers<[1], [0], [0], [1], [0, 0, 1, 1], [], []>} : vector<32x32xbf16>, vector<32x128xbf16>, vector<32x128xf32> -> vector<32x128xf32>
    %cst_152 = arith.constant 0.000000e+00 : f32
    %185 = vector.broadcast %cst_152 : f32 to vector<32x128xf32>
    %186 = arith.addf %185, %184 : vector<32x128xf32>
    %c4_153 = arith.constant 4 : index
    %c0_154 = arith.constant 0 : index
    %187 = vector.load %arg24[%c4_153, %c0_154] : memref<48x128xf32, #tpu.memory_space<vmem>>, vector<32x32xf32>
    %188 = arith.truncf %187 : vector<32x32xf32> to vector<32x32xbf16>
    %c1_155 = arith.constant 1 : index
    %c0_156 = arith.constant 0 : index
    %c0_157 = arith.constant 0 : index
    %189 = vector.load %arg19[%c1_155, %c0_156, %c0_157] : memref<9x32x128xbf16, #tpu.memory_space<vmem>>, vector<1x32x128xbf16>
    %190 = vector.shape_cast %189 : vector<1x32x128xbf16> to vector<32x128xbf16>
    %cst_158 = arith.constant dense<0.000000e+00> : vector<32x128xf32>
    %191 = tpu.matmul %188, %190, %cst_158 {dimension_numbers = #tpu.dot_dimension_numbers<[1], [0], [0], [1], [0, 0, 1, 1], [], []>} : vector<32x32xbf16>, vector<32x128xbf16>, vector<32x128xf32> -> vector<32x128xf32>
    %192 = arith.addf %186, %191 : vector<32x128xf32>
    %c6_159 = arith.constant 6 : index
    %c0_160 = arith.constant 0 : index
    %193 = vector.load %arg24[%c6_159, %c0_160] : memref<48x128xf32, #tpu.memory_space<vmem>>, vector<32x32xf32>
    %194 = arith.truncf %193 : vector<32x32xf32> to vector<32x32xbf16>
    %c2_161 = arith.constant 2 : index
    %c0_162 = arith.constant 0 : index
    %c0_163 = arith.constant 0 : index
    %195 = vector.load %arg19[%c2_161, %c0_162, %c0_163] : memref<9x32x128xbf16, #tpu.memory_space<vmem>>, vector<1x32x128xbf16>
    %196 = vector.shape_cast %195 : vector<1x32x128xbf16> to vector<32x128xbf16>
    %cst_164 = arith.constant dense<0.000000e+00> : vector<32x128xf32>
    %197 = tpu.matmul %194, %196, %cst_164 {dimension_numbers = #tpu.dot_dimension_numbers<[1], [0], [0], [1], [0, 0, 1, 1], [], []>} : vector<32x32xbf16>, vector<32x128xbf16>, vector<32x128xf32> -> vector<32x128xf32>
    %198 = arith.addf %192, %197 : vector<32x128xf32>
    %c7_165 = arith.constant 7 : index
    %c0_166 = arith.constant 0 : index
    %199 = vector.load %arg24[%c7_165, %c0_166] : memref<48x128xf32, #tpu.memory_space<vmem>>, vector<32x32xf32>
    %200 = arith.truncf %199 : vector<32x32xf32> to vector<32x32xbf16>
    %c3_167 = arith.constant 3 : index
    %c0_168 = arith.constant 0 : index
    %c0_169 = arith.constant 0 : index
    %201 = vector.load %arg19[%c3_167, %c0_168, %c0_169] : memref<9x32x128xbf16, #tpu.memory_space<vmem>>, vector<1x32x128xbf16>
    %202 = vector.shape_cast %201 : vector<1x32x128xbf16> to vector<32x128xbf16>
    %cst_170 = arith.constant dense<0.000000e+00> : vector<32x128xf32>
    %203 = tpu.matmul %200, %202, %cst_170 {dimension_numbers = #tpu.dot_dimension_numbers<[1], [0], [0], [1], [0, 0, 1, 1], [], []>} : vector<32x32xbf16>, vector<32x128xbf16>, vector<32x128xf32> -> vector<32x128xf32>
    %204 = arith.addf %198, %203 : vector<32x128xf32>
    %c8_171 = arith.constant 8 : index
    %c0_172 = arith.constant 0 : index
    %205 = vector.load %arg24[%c8_171, %c0_172] : memref<48x128xf32, #tpu.memory_space<vmem>>, vector<32x32xf32>
    %206 = arith.truncf %205 : vector<32x32xf32> to vector<32x32xbf16>
    %c4_173 = arith.constant 4 : index
    %c0_174 = arith.constant 0 : index
    %c0_175 = arith.constant 0 : index
    %207 = vector.load %arg19[%c4_173, %c0_174, %c0_175] : memref<9x32x128xbf16, #tpu.memory_space<vmem>>, vector<1x32x128xbf16>
    %208 = vector.shape_cast %207 : vector<1x32x128xbf16> to vector<32x128xbf16>
    %cst_176 = arith.constant dense<0.000000e+00> : vector<32x128xf32>
    %209 = tpu.matmul %206, %208, %cst_176 {dimension_numbers = #tpu.dot_dimension_numbers<[1], [0], [0], [1], [0, 0, 1, 1], [], []>} : vector<32x32xbf16>, vector<32x128xbf16>, vector<32x128xf32> -> vector<32x128xf32>
    %210 = arith.addf %204, %209 : vector<32x128xf32>
    %c9_177 = arith.constant 9 : index
    %c0_178 = arith.constant 0 : index
    %211 = vector.load %arg24[%c9_177, %c0_178] : memref<48x128xf32, #tpu.memory_space<vmem>>, vector<32x32xf32>
    %212 = arith.truncf %211 : vector<32x32xf32> to vector<32x32xbf16>
    %c5_179 = arith.constant 5 : index
    %c0_180 = arith.constant 0 : index
    %c0_181 = arith.constant 0 : index
    %213 = vector.load %arg19[%c5_179, %c0_180, %c0_181] : memref<9x32x128xbf16, #tpu.memory_space<vmem>>, vector<1x32x128xbf16>
    %214 = vector.shape_cast %213 : vector<1x32x128xbf16> to vector<32x128xbf16>
    %cst_182 = arith.constant dense<0.000000e+00> : vector<32x128xf32>
    %215 = tpu.matmul %212, %214, %cst_182 {dimension_numbers = #tpu.dot_dimension_numbers<[1], [0], [0], [1], [0, 0, 1, 1], [], []>} : vector<32x32xbf16>, vector<32x128xbf16>, vector<32x128xf32> -> vector<32x128xf32>
    %216 = arith.addf %210, %215 : vector<32x128xf32>
    %c10_183 = arith.constant 10 : index
    %c0_184 = arith.constant 0 : index
    %217 = vector.load %arg24[%c10_183, %c0_184] : memref<48x128xf32, #tpu.memory_space<vmem>>, vector<32x32xf32>
    %218 = arith.truncf %217 : vector<32x32xf32> to vector<32x32xbf16>
    %c6_185 = arith.constant 6 : index
    %c0_186 = arith.constant 0 : index
    %c0_187 = arith.constant 0 : index
    %219 = vector.load %arg19[%c6_185, %c0_186, %c0_187] : memref<9x32x128xbf16, #tpu.memory_space<vmem>>, vector<1x32x128xbf16>
    %220 = vector.shape_cast %219 : vector<1x32x128xbf16> to vector<32x128xbf16>
    %cst_188 = arith.constant dense<0.000000e+00> : vector<32x128xf32>
    %221 = tpu.matmul %218, %220, %cst_188 {dimension_numbers = #tpu.dot_dimension_numbers<[1], [0], [0], [1], [0, 0, 1, 1], [], []>} : vector<32x32xbf16>, vector<32x128xbf16>, vector<32x128xf32> -> vector<32x128xf32>
    %222 = arith.addf %216, %221 : vector<32x128xf32>
    %c12_189 = arith.constant 12 : index
    %c0_190 = arith.constant 0 : index
    %223 = vector.load %arg24[%c12_189, %c0_190] : memref<48x128xf32, #tpu.memory_space<vmem>>, vector<32x32xf32>
    %224 = arith.truncf %223 : vector<32x32xf32> to vector<32x32xbf16>
    %c7_191 = arith.constant 7 : index
    %c0_192 = arith.constant 0 : index
    %c0_193 = arith.constant 0 : index
    %225 = vector.load %arg19[%c7_191, %c0_192, %c0_193] : memref<9x32x128xbf16, #tpu.memory_space<vmem>>, vector<1x32x128xbf16>
    %226 = vector.shape_cast %225 : vector<1x32x128xbf16> to vector<32x128xbf16>
    %cst_194 = arith.constant dense<0.000000e+00> : vector<32x128xf32>
    %227 = tpu.matmul %224, %226, %cst_194 {dimension_numbers = #tpu.dot_dimension_numbers<[1], [0], [0], [1], [0, 0, 1, 1], [], []>} : vector<32x32xbf16>, vector<32x128xbf16>, vector<32x128xf32> -> vector<32x128xf32>
    %228 = arith.addf %222, %227 : vector<32x128xf32>
    %c16_195 = arith.constant 16 : index
    %c0_196 = arith.constant 0 : index
    %229 = vector.load %arg24[%c16_195, %c0_196] : memref<48x128xf32, #tpu.memory_space<vmem>>, vector<32x32xf32>
    %230 = arith.truncf %229 : vector<32x32xf32> to vector<32x32xbf16>
    %c8_197 = arith.constant 8 : index
    %c0_198 = arith.constant 0 : index
    %c0_199 = arith.constant 0 : index
    %231 = vector.load %arg19[%c8_197, %c0_198, %c0_199] : memref<9x32x128xbf16, #tpu.memory_space<vmem>>, vector<1x32x128xbf16>
    %232 = vector.shape_cast %231 : vector<1x32x128xbf16> to vector<32x128xbf16>
    %cst_200 = arith.constant dense<0.000000e+00> : vector<32x128xf32>
    %233 = tpu.matmul %230, %232, %cst_200 {dimension_numbers = #tpu.dot_dimension_numbers<[1], [0], [0], [1], [0, 0, 1, 1], [], []>} : vector<32x32xbf16>, vector<32x128xbf16>, vector<32x128xf32> -> vector<32x128xf32>
    %234 = arith.addf %228, %233 : vector<32x128xf32>
    %235 = vector.broadcast %167 : vector<1x128xf32> to vector<32x128xf32>
    %236 = arith.mulf %234, %235 : vector<32x128xf32>
    %237 = vector.broadcast %168 : vector<1x128xf32> to vector<32x128xf32>
    %238 = arith.addf %236, %237 : vector<32x128xf32>
    %cst_201 = arith.constant 0.000000e+00 : f32
    %239 = vector.broadcast %cst_201 : f32 to vector<32x128xf32>
    %240 = arith.cmpf ogt, %238, %239 : vector<32x128xf32>
    %241 = vector.broadcast %169 : f32 to vector<32x128xf32>
    %242 = arith.mulf %241, %238 : vector<32x128xf32>
    %243 = arith.select %240, %238, %242 : vector<32x128xi1>, vector<32x128xf32>
    %cst_202 = arith.constant dense<0xFF800000> : vector<128xf32>
    %244 = vector.multi_reduction <maximumf>, %243, %cst_202 [0] : vector<32x128xf32> to vector<128xf32>
    %245 = vector.shape_cast %244 : vector<128xf32> to vector<1x128xf32>
    %c0_203 = arith.constant 0 : index
    %c0_204 = arith.constant 0 : index
    %c0_205 = arith.constant 0 : index
    %246 = vector.load %arg23[%c0_203, %c0_204, %c0_205] : memref<1x1x128xf32, #tpu.memory_space<vmem>>, vector<1x1x128xf32>
    %247 = vector.shape_cast %246 : vector<1x1x128xf32> to vector<1x128xf32>
    %248 = vector.shape_cast %245 : vector<1x128xf32> to vector<1x1x128xf32>
    tpu.vector_store %arg23[%c0_203, %c0_204, %c0_205], %248 {strides = array<i32>} : memref<1x1x128xf32, #tpu.memory_space<vmem>>, vector<1x1x128xf32>,
    return
  }
  func.func @transform_0(%arg0: i32) -> (i32, i32, i32) {
    %c0_i32 = arith.constant 0 : i32
    %c0_i32_0 = arith.constant 0 : i32
    %c0_i32_1 = arith.constant 0 : i32
    return %arg0, %c0_i32, %c0_i32_0 : i32, i32, i32
  }
  func.func @transform_1(%arg0: i32) -> (i32, i32) {
    %c0_i32 = arith.constant 0 : i32
    %c0_i32_0 = arith.constant 0 : i32
    %c0_i32_1 = arith.constant 0 : i32
    return %c0_i32, %c0_i32_0 : i32, i32
  }
  func.func @transform_2(%arg0: i32) -> (i32, i32) {
    %c0_i32 = arith.constant 0 : i32
    %c0_i32_0 = arith.constant 0 : i32
    %c0_i32_1 = arith.constant 0 : i32
    return %c0_i32, %c0_i32_0 : i32, i32
  }
  func.func @transform_3(%arg0: i32) -> i32 {
    %c0_i32 = arith.constant 0 : i32
    %c0_i32_0 = arith.constant 0 : i32
    return %c0_i32 : i32
  }
  func.func @transform_4(%arg0: i32) -> (i32, i32, i32) {
    %c0_i32 = arith.constant 0 : i32
    %c0_i32_0 = arith.constant 0 : i32
    %c0_i32_1 = arith.constant 0 : i32
    %c0_i32_2 = arith.constant 0 : i32
    return %c0_i32, %c0_i32_0, %c0_i32_1 : i32, i32, i32
  }
  func.func @transform_5(%arg0: i32) -> (i32, i32) {
    %c0_i32 = arith.constant 0 : i32
    %c0_i32_0 = arith.constant 0 : i32
    %c0_i32_1 = arith.constant 0 : i32
    return %c0_i32, %c0_i32_0 : i32, i32
  }
  func.func @transform_6(%arg0: i32) -> (i32, i32) {
    %c0_i32 = arith.constant 0 : i32
    %c0_i32_0 = arith.constant 0 : i32
    %c0_i32_1 = arith.constant 0 : i32
    return %c0_i32, %c0_i32_0 : i32, i32
  }
  func.func @transform_7(%arg0: i32) -> i32 {
    %c0_i32 = arith.constant 0 : i32
    %c0_i32_0 = arith.constant 0 : i32
    return %c0_i32 : i32
  }
  func.func @transform_8(%arg0: i32) -> (i32, i32) {
    %c0_i32 = arith.constant 0 : i32
    %c0_i32_0 = arith.constant 0 : i32
    %c0_i32_1 = arith.constant 0 : i32
    return %c0_i32, %c0_i32_0 : i32, i32
  }
  func.func @transform_9(%arg0: i32) -> (i32, i32) {
    %c0_i32 = arith.constant 0 : i32
    %c0_i32_0 = arith.constant 0 : i32
    %c0_i32_1 = arith.constant 0 : i32
    return %c0_i32, %c0_i32_0 : i32, i32
  }
  func.func @transform_10(%arg0: i32) -> i32 {
    %c0_i32 = arith.constant 0 : i32
    %c0_i32_0 = arith.constant 0 : i32
    return %c0_i32 : i32
  }
  func.func @transform_11(%arg0: i32) -> (i32, i32, i32) {
    %c0_i32 = arith.constant 0 : i32
    %c0_i32_0 = arith.constant 0 : i32
    %c0_i32_1 = arith.constant 0 : i32
    %c0_i32_2 = arith.constant 0 : i32
    return %c0_i32, %c0_i32_0, %c0_i32_1 : i32, i32, i32
  }
  func.func @transform_12(%arg0: i32) -> (i32, i32) {
    %c0_i32 = arith.constant 0 : i32
    %c0_i32_0 = arith.constant 0 : i32
    %c0_i32_1 = arith.constant 0 : i32
    return %c0_i32, %c0_i32_0 : i32, i32
  }
  func.func @transform_13(%arg0: i32) -> (i32, i32) {
    %c0_i32 = arith.constant 0 : i32
    %c0_i32_0 = arith.constant 0 : i32
    %c0_i32_1 = arith.constant 0 : i32
    return %c0_i32, %c0_i32_0 : i32, i32
  }
  func.func @transform_14(%arg0: i32) -> i32 {
    %c0_i32 = arith.constant 0 : i32
    %c0_i32_0 = arith.constant 0 : i32
    return %c0_i32 : i32
  }
  func.func @transform_15(%arg0: i32) -> (i32, i32) {
    %c0_i32 = arith.constant 0 : i32
    %c0_i32_0 = arith.constant 0 : i32
    %c0_i32_1 = arith.constant 0 : i32
    return %c0_i32, %c0_i32_0 : i32, i32
  }
  func.func @transform_16(%arg0: i32) -> (i32, i32) {
    %c0_i32 = arith.constant 0 : i32
    %c0_i32_0 = arith.constant 0 : i32
    %c0_i32_1 = arith.constant 0 : i32
    return %c0_i32, %c0_i32_0 : i32, i32
  }
  func.func @transform_17(%arg0: i32) -> i32 {
    %c0_i32 = arith.constant 0 : i32
    %c0_i32_0 = arith.constant 0 : i32
    return %c0_i32 : i32
  }
  func.func @transform_18(%arg0: i32) -> (i32, i32, i32) {
    %c0_i32 = arith.constant 0 : i32
    %c0_i32_0 = arith.constant 0 : i32
    %c0_i32_1 = arith.constant 0 : i32
    %c0_i32_2 = arith.constant 0 : i32
    return %c0_i32, %c0_i32_0, %c0_i32_1 : i32, i32, i32
  }
  func.func @transform_19(%arg0: i32) -> (i32, i32) {
    %c0_i32 = arith.constant 0 : i32
    %c0_i32_0 = arith.constant 0 : i32
    %c0_i32_1 = arith.constant 0 : i32
    return %c0_i32, %c0_i32_0 : i32, i32
  }
  func.func @transform_20(%arg0: i32) -> (i32, i32) {
    %c0_i32 = arith.constant 0 : i32
    %c0_i32_0 = arith.constant 0 : i32
    %c0_i32_1 = arith.constant 0 : i32
    return %c0_i32, %c0_i32_0 : i32, i32
  }
  func.func @transform_21(%arg0: i32) -> i32 {
    %c0_i32 = arith.constant 0 : i32
    %c0_i32_0 = arith.constant 0 : i32
    return %c0_i32 : i32
  }
  func.func @transform_22(%arg0: i32) -> (i32, i32, i32) {
    %c0_i32 = arith.constant 0 : i32
    %c0_i32_0 = arith.constant 0 : i32
    %c0_i32_1 = arith.constant 0 : i32
    return %arg0, %c0_i32, %c0_i32_0 : i32, i32, i32
  }
}

module attributes {stable_mosaic.version = 11 : i64} {
  func.func @_head_kernel(%arg0: memref<2x128xf32, #tpu.memory_space<vmem>>, %arg1: memref<2x64xf32, #tpu.memory_space<vmem>>, %arg2: memref<2x128xf32, #tpu.memory_space<vmem>>, %arg3: memref<128x256xbf16, #tpu.memory_space<vmem>>, %arg4: memref<64x256xbf16, #tpu.memory_space<vmem>>, %arg5: memref<128x256xbf16, #tpu.memory_space<vmem>>, %arg6: memref<1x256xf32, #tpu.memory_space<vmem>>, %arg7: memref<1xf32, #tpu.memory_space<smem>>, %arg8: memref<256x128xbf16, #tpu.memory_space<vmem>>, %arg9: memref<1x128xf32, #tpu.memory_space<vmem>>, %arg10: memref<1xf32, #tpu.memory_space<smem>>, %arg11: memref<1x128xf32, #tpu.memory_space<vmem>>, %arg12: memref<1xf32, #tpu.memory_space<smem>>, %arg13: memref<2x1xf32, #tpu.memory_space<vmem>>) attributes {dimension_semantics = [], scalar_prefetch = 0 : i64, scratch_operands = 0 : i64, tpu.core_type = #tpu.core_type<tc>} {
    %c0 = arith.constant 0 : index
    %c0_0 = arith.constant 0 : index
    %0 = vector.load %arg0[%c0, %c0_0] : memref<2x128xf32, #tpu.memory_space<vmem>>, vector<2x128xf32>
    %1 = arith.truncf %0 : vector<2x128xf32> to vector<2x128xbf16>
    %c0_1 = arith.constant 0 : index
    %c0_2 = arith.constant 0 : index
    %2 = vector.load %arg3[%c0_1, %c0_2] : memref<128x256xbf16, #tpu.memory_space<vmem>>, vector<128x256xbf16>
    %cst = arith.constant dense<0.000000e+00> : vector<2x256xf32>
    %3 = tpu.matmul %1, %2, %cst {dimension_numbers = #tpu.dot_dimension_numbers<[1], [0], [0], [1], [0, 0, 1, 1], [], []>} : vector<2x128xbf16>, vector<128x256xbf16>, vector<2x256xf32> -> vector<2x256xf32>
    %c0_3 = arith.constant 0 : index
    %c0_4 = arith.constant 0 : index
    %4 = vector.load %arg1[%c0_3, %c0_4] : memref<2x64xf32, #tpu.memory_space<vmem>>, vector<2x64xf32>
    %5 = arith.truncf %4 : vector<2x64xf32> to vector<2x64xbf16>
    %c0_5 = arith.constant 0 : index
    %c0_6 = arith.constant 0 : index
    %6 = vector.load %arg4[%c0_5, %c0_6] : memref<64x256xbf16, #tpu.memory_space<vmem>>, vector<64x256xbf16>
    %cst_7 = arith.constant dense<0.000000e+00> : vector<2x256xf32>
    %7 = tpu.matmul %5, %6, %cst_7 {dimension_numbers = #tpu.dot_dimension_numbers<[1], [0], [0], [1], [0, 0, 1, 1], [], []>} : vector<2x64xbf16>, vector<64x256xbf16>, vector<2x256xf32> -> vector<2x256xf32>
    %8 = arith.addf %3, %7 : vector<2x256xf32>
    %c0_8 = arith.constant 0 : index
    %c0_9 = arith.constant 0 : index
    %9 = vector.load %arg2[%c0_8, %c0_9] : memref<2x128xf32, #tpu.memory_space<vmem>>, vector<2x128xf32>
    %10 = arith.truncf %9 : vector<2x128xf32> to vector<2x128xbf16>
    %c0_10 = arith.constant 0 : index
    %c0_11 = arith.constant 0 : index
    %11 = vector.load %arg5[%c0_10, %c0_11] : memref<128x256xbf16, #tpu.memory_space<vmem>>, vector<128x256xbf16>
    %cst_12 = arith.constant dense<0.000000e+00> : vector<2x256xf32>
    %12 = tpu.matmul %10, %11, %cst_12 {dimension_numbers = #tpu.dot_dimension_numbers<[1], [0], [0], [1], [0, 0, 1, 1], [], []>} : vector<2x128xbf16>, vector<128x256xbf16>, vector<2x256xf32> -> vector<2x256xf32>
    %13 = arith.addf %8, %12 : vector<2x256xf32>
    %c0_13 = arith.constant 0 : index
    %c0_14 = arith.constant 0 : index
    %14 = vector.load %arg6[%c0_13, %c0_14] : memref<1x256xf32, #tpu.memory_space<vmem>>, vector<1x256xf32>
    %15 = vector.broadcast %14 : vector<1x256xf32> to vector<2x256xf32>
    %16 = arith.addf %13, %15 : vector<2x256xf32>
    %c0_15 = arith.constant 0 : index
    %17 = memref.load %arg7[%c0_15] : memref<1xf32, #tpu.memory_space<smem>>
    %cst_16 = arith.constant 0.000000e+00 : f32
    %18 = vector.broadcast %cst_16 : f32 to vector<2x256xf32>
    %19 = arith.cmpf ogt, %16, %18 : vector<2x256xf32>
    %20 = vector.broadcast %17 : f32 to vector<2x256xf32>
    %21 = arith.mulf %20, %16 : vector<2x256xf32>
    %22 = arith.select %19, %16, %21 : vector<2x256xi1>, vector<2x256xf32>
    %23 = arith.truncf %22 : vector<2x256xf32> to vector<2x256xbf16>
    %c0_17 = arith.constant 0 : index
    %c0_18 = arith.constant 0 : index
    %24 = vector.load %arg8[%c0_17, %c0_18] : memref<256x128xbf16, #tpu.memory_space<vmem>>, vector<256x128xbf16>
    %cst_19 = arith.constant dense<0.000000e+00> : vector<2x128xf32>
    %25 = tpu.matmul %23, %24, %cst_19 {dimension_numbers = #tpu.dot_dimension_numbers<[1], [0], [0], [1], [0, 0, 1, 1], [], []>} : vector<2x256xbf16>, vector<256x128xbf16>, vector<2x128xf32> -> vector<2x128xf32>
    %c0_20 = arith.constant 0 : index
    %c0_21 = arith.constant 0 : index
    %26 = vector.load %arg9[%c0_20, %c0_21] : memref<1x128xf32, #tpu.memory_space<vmem>>, vector<1x128xf32>
    %27 = vector.broadcast %26 : vector<1x128xf32> to vector<2x128xf32>
    %28 = arith.addf %25, %27 : vector<2x128xf32>
    %c0_22 = arith.constant 0 : index
    %29 = memref.load %arg10[%c0_22] : memref<1xf32, #tpu.memory_space<smem>>
    %cst_23 = arith.constant 0.000000e+00 : f32
    %30 = vector.broadcast %cst_23 : f32 to vector<2x128xf32>
    %31 = arith.cmpf ogt, %28, %30 : vector<2x128xf32>
    %32 = vector.broadcast %29 : f32 to vector<2x128xf32>
    %33 = arith.mulf %32, %28 : vector<2x128xf32>
    %34 = arith.select %31, %28, %33 : vector<2x128xi1>, vector<2x128xf32>
    %c0_24 = arith.constant 0 : index
    %c0_25 = arith.constant 0 : index
    %35 = vector.load %arg11[%c0_24, %c0_25] : memref<1x128xf32, #tpu.memory_space<vmem>>, vector<1x128xf32>
    %36 = vector.broadcast %35 : vector<1x128xf32> to vector<2x128xf32>
    %37 = arith.mulf %34, %36 : vector<2x128xf32>
    %cst_26 = arith.constant dense<0.000000e+00> : vector<2xf32>
    %38 = vector.multi_reduction <add>, %37, %cst_26 [1] : vector<2x128xf32> to vector<2xf32>
    %39 = vector.shape_cast %38 : vector<2xf32> to vector<2x1xf32>
    %c0_27 = arith.constant 0 : index
    %40 = memref.load %arg12[%c0_27] : memref<1xf32, #tpu.memory_space<smem>>
    %41 = vector.broadcast %40 : f32 to vector<2x1xf32>
    %42 = arith.addf %39, %41 : vector<2x1xf32>
    %c0_28 = arith.constant 0 : index
    %c0_29 = arith.constant 0 : index
    %43 = vector.load %arg13[%c0_28, %c0_29] : memref<2x1xf32, #tpu.memory_space<vmem>>, vector<2x1xf32>
    tpu.vector_store %arg13[%c0_28, %c0_29], %42 {strides = array<i32>} : memref<2x1xf32, #tpu.memory_space<vmem>>, vector<2x1xf32>,
    return
  }
}

module attributes {stable_mosaic.version = 11 : i64} {
  func.func @_dilated_branch_kernel(%arg0: i32, %arg1: memref<1x64x40xf32, #tpu.memory_space<vmem>>, %arg2: memref<40x128xbf16, #tpu.memory_space<vmem>>, %arg3: memref<1x128xf32, #tpu.memory_space<vmem>>, %arg4: memref<128x6xbf16, #tpu.memory_space<vmem>>, %arg5: memref<1x6xf32, #tpu.memory_space<vmem>>, %arg6: memref<1xf32, #tpu.memory_space<smem>>, %arg7: memref<11x6x32xbf16, #tpu.memory_space<vmem>>, %arg8: memref<1x32xf32, #tpu.memory_space<vmem>>, %arg9: memref<1x32xf32, #tpu.memory_space<vmem>>, %arg10: memref<1xf32, #tpu.memory_space<smem>>, %arg11: memref<32x12xbf16, #tpu.memory_space<vmem>>, %arg12: memref<1x12xf32, #tpu.memory_space<vmem>>, %arg13: memref<1xf32, #tpu.memory_space<smem>>, %arg14: memref<11x12x64xbf16, #tpu.memory_space<vmem>>, %arg15: memref<1x64xf32, #tpu.memory_space<vmem>>, %arg16: memref<1x64xf32, #tpu.memory_space<vmem>>, %arg17: memref<1xf32, #tpu.memory_space<smem>>, %arg18: memref<64x12xbf16, #tpu.memory_space<vmem>>, %arg19: memref<1x12xf32, #tpu.memory_space<vmem>>, %arg20: memref<1xf32, #tpu.memory_space<smem>>, %arg21: memref<11x12x64xbf16, #tpu.memory_space<vmem>>, %arg22: memref<1x64xf32, #tpu.memory_space<vmem>>, %arg23: memref<1x64xf32, #tpu.memory_space<vmem>>, %arg24: memref<1xf32, #tpu.memory_space<smem>>, %arg25: memref<64x25xbf16, #tpu.memory_space<vmem>>, %arg26: memref<1x25xf32, #tpu.memory_space<vmem>>, %arg27: memref<1xf32, #tpu.memory_space<smem>>, %arg28: memref<11x25x128xbf16, #tpu.memory_space<vmem>>, %arg29: memref<1x128xf32, #tpu.memory_space<vmem>>, %arg30: memref<1x128xf32, #tpu.memory_space<vmem>>, %arg31: memref<1xf32, #tpu.memory_space<smem>>, %arg32: memref<1x1x128xf32, #tpu.memory_space<vmem>>, %arg33: memref<96x128xf32, #tpu.memory_space<vmem>>) attributes {dimension_semantics = [#tpu.dimension_semantics<parallel>], iteration_bounds = array<i64: 2>, scalar_prefetch = 0 : i64, scratch_operands = 1 : i64, tpu.core_type = #tpu.core_type<tc>, window_params = [{transform_indices = @transform_0, window_bounds = array<i64: 1, 64, 40>}, {pipeline_mode = #tpu.pipeline_mode<synchronous>, transform_indices = @transform_1, window_bounds = array<i64: 40, 128>}, {pipeline_mode = #tpu.pipeline_mode<synchronous>, transform_indices = @transform_2, window_bounds = array<i64: 1, 128>}, {pipeline_mode = #tpu.pipeline_mode<synchronous>, transform_indices = @transform_3, window_bounds = array<i64: 128, 6>}, {pipeline_mode = #tpu.pipeline_mode<synchronous>, transform_indices = @transform_4, window_bounds = array<i64: 1, 6>}, {transform_indices = @transform_5, window_bounds = array<i64: 1>}, {pipeline_mode = #tpu.pipeline_mode<synchronous>, transform_indices = @transform_6, window_bounds = array<i64: 11, 6, 32>}, {pipeline_mode = #tpu.pipeline_mode<synchronous>, transform_indices = @transform_7, window_bounds = array<i64: 1, 32>}, {pipeline_mode = #tpu.pipeline_mode<synchronous>, transform_indices = @transform_8, window_bounds = array<i64: 1, 32>}, {transform_indices = @transform_9, window_bounds = array<i64: 1>}, {pipeline_mode = #tpu.pipeline_mode<synchronous>, transform_indices = @transform_10, window_bounds = array<i64: 32, 12>}, {pipeline_mode = #tpu.pipeline_mode<synchronous>, transform_indices = @transform_11, window_bounds = array<i64: 1, 12>}, {transform_indices = @transform_12, window_bounds = array<i64: 1>}, {pipeline_mode = #tpu.pipeline_mode<synchronous>, transform_indices = @transform_13, window_bounds = array<i64: 11, 12, 64>}, {pipeline_mode = #tpu.pipeline_mode<synchronous>, transform_indices = @transform_14, window_bounds = array<i64: 1, 64>}, {pipeline_mode = #tpu.pipeline_mode<synchronous>, transform_indices = @transform_15, window_bounds = array<i64: 1, 64>}, {transform_indices = @transform_16, window_bounds = array<i64: 1>}, {pipeline_mode = #tpu.pipeline_mode<synchronous>, transform_indices = @transform_17, window_bounds = array<i64: 64, 12>}, {pipeline_mode = #tpu.pipeline_mode<synchronous>, transform_indices = @transform_18, window_bounds = array<i64: 1, 12>}, {transform_indices = @transform_19, window_bounds = array<i64: 1>}, {pipeline_mode = #tpu.pipeline_mode<synchronous>, transform_indices = @transform_20, window_bounds = array<i64: 11, 12, 64>}, {pipeline_mode = #tpu.pipeline_mode<synchronous>, transform_indices = @transform_21, window_bounds = array<i64: 1, 64>}, {pipeline_mode = #tpu.pipeline_mode<synchronous>, transform_indices = @transform_22, window_bounds = array<i64: 1, 64>}, {transform_indices = @transform_23, window_bounds = array<i64: 1>}, {pipeline_mode = #tpu.pipeline_mode<synchronous>, transform_indices = @transform_24, window_bounds = array<i64: 64, 25>}, {pipeline_mode = #tpu.pipeline_mode<synchronous>, transform_indices = @transform_25, window_bounds = array<i64: 1, 25>}, {transform_indices = @transform_26, window_bounds = array<i64: 1>}, {pipeline_mode = #tpu.pipeline_mode<synchronous>, transform_indices = @transform_27, window_bounds = array<i64: 11, 25, 128>}, {pipeline_mode = #tpu.pipeline_mode<synchronous>, transform_indices = @transform_28, window_bounds = array<i64: 1, 128>}, {pipeline_mode = #tpu.pipeline_mode<synchronous>, transform_indices = @transform_29, window_bounds = array<i64: 1, 128>}, {transform_indices = @transform_30, window_bounds = array<i64: 1>}, {transform_indices = @transform_31, window_bounds = array<i64: 1, 1, 128>}]} {
    %cst = arith.constant 0.000000e+00 : f32
    %0 = vector.broadcast %cst : f32 to vector<96x128xf32>
    %c0 = arith.constant 0 : index
    %c0_0 = arith.constant 0 : index
    %1 = vector.load %arg33[%c0, %c0_0] : memref<96x128xf32, #tpu.memory_space<vmem>>, vector<96x128xf32>
    tpu.vector_store %arg33[%c0, %c0_0], %0 {strides = array<i32>} : memref<96x128xf32, #tpu.memory_space<vmem>>, vector<96x128xf32>,
    %c0_1 = arith.constant 0 : index
    %c0_2 = arith.constant 0 : index
    %c0_3 = arith.constant 0 : index
    %2 = vector.load %arg1[%c0_1, %c0_2, %c0_3] : memref<1x64x40xf32, #tpu.memory_space<vmem>>, vector<1x64x40xf32>
    %3 = vector.shape_cast %2 : vector<1x64x40xf32> to vector<64x40xf32>
    %4 = arith.truncf %3 : vector<64x40xf32> to vector<64x40xbf16>
    %c0_4 = arith.constant 0 : index
    %c0_5 = arith.constant 0 : index
    %5 = vector.load %arg2[%c0_4, %c0_5] : memref<40x128xbf16, #tpu.memory_space<vmem>>, vector<40x128xbf16>
    %cst_6 = arith.constant dense<0.000000e+00> : vector<64x128xf32>
    %6 = tpu.matmul %4, %5, %cst_6 {dimension_numbers = #tpu.dot_dimension_numbers<[1], [0], [0], [1], [0, 0, 1, 1], [], []>} : vector<64x40xbf16>, vector<40x128xbf16>, vector<64x128xf32> -> vector<64x128xf32>
    %c0_7 = arith.constant 0 : index
    %c0_8 = arith.constant 0 : index
    %7 = vector.load %arg3[%c0_7, %c0_8] : memref<1x128xf32, #tpu.memory_space<vmem>>, vector<1x128xf32>
    %8 = vector.broadcast %7 : vector<1x128xf32> to vector<64x128xf32>
    %9 = arith.addf %6, %8 : vector<64x128xf32>
    %c0_9 = arith.constant 0 : index
    %c0_10 = arith.constant 0 : index
    %10 = vector.load %arg4[%c0_9, %c0_10] : memref<128x6xbf16, #tpu.memory_space<vmem>>, vector<128x6xbf16>
    %c0_11 = arith.constant 0 : index
    %c0_12 = arith.constant 0 : index
    %11 = vector.load %arg5[%c0_11, %c0_12] : memref<1x6xf32, #tpu.memory_space<vmem>>, vector<1x6xf32>
    %c0_13 = arith.constant 0 : index
    %12 = memref.load %arg6[%c0_13] : memref<1xf32, #tpu.memory_space<smem>>
    %c0_14 = arith.constant 0 : index
    %c0_15 = arith.constant 0 : index
    %13 = vector.load %arg8[%c0_14, %c0_15] : memref<1x32xf32, #tpu.memory_space<vmem>>, vector<1x32xf32>
    %c0_16 = arith.constant 0 : index
    %c0_17 = arith.constant 0 : index
    %14 = vector.load %arg9[%c0_16, %c0_17] : memref<1x32xf32, #tpu.memory_space<vmem>>, vector<1x32xf32>
    %c0_18 = arith.constant 0 : index
    %15 = memref.load %arg10[%c0_18] : memref<1xf32, #tpu.memory_space<smem>>
    %16 = arith.truncf %9 : vector<64x128xf32> to vector<64x128xbf16>
    %cst_19 = arith.constant dense<0.000000e+00> : vector<64x6xf32>
    %17 = tpu.matmul %16, %10, %cst_19 {dimension_numbers = #tpu.dot_dimension_numbers<[1], [0], [0], [1], [0, 0, 1, 1], [], []>} : vector<64x128xbf16>, vector<128x6xbf16>, vector<64x6xf32> -> vector<64x6xf32>
    %18 = vector.broadcast %11 : vector<1x6xf32> to vector<64x6xf32>
    %19 = arith.addf %17, %18 : vector<64x6xf32>
    %cst_20 = arith.constant 0.000000e+00 : f32
    %20 = vector.broadcast %cst_20 : f32 to vector<64x6xf32>
    %21 = arith.cmpf ogt, %19, %20 : vector<64x6xf32>
    %22 = vector.broadcast %12 : f32 to vector<64x6xf32>
    %23 = arith.mulf %22, %19 : vector<64x6xf32>
    %24 = arith.select %21, %19, %23 : vector<64x6xi1>, vector<64x6xf32>
    %c16 = arith.constant 16 : index
    %c0_21 = arith.constant 0 : index
    %25 = vector.load %arg33[%c16, %c0_21] : memref<96x128xf32, #tpu.memory_space<vmem>>, vector<64x6xf32>
    tpu.vector_store %arg33[%c16, %c0_21], %24 {strides = array<i32>} : memref<96x128xf32, #tpu.memory_space<vmem>>, vector<64x6xf32>,
    %c0_22 = arith.constant 0 : index
    %c0_23 = arith.constant 0 : index
    %26 = vector.load %arg33[%c0_22, %c0_23] : memref<96x128xf32, #tpu.memory_space<vmem>>, vector<64x6xf32>
    %27 = arith.truncf %26 : vector<64x6xf32> to vector<64x6xbf16>
    %c0_24 = arith.constant 0 : index
    %c0_25 = arith.constant 0 : index
    %c0_26 = arith.constant 0 : index
    %28 = vector.load %arg7[%c0_24, %c0_25, %c0_26] : memref<11x6x32xbf16, #tpu.memory_space<vmem>>, vector<1x6x32xbf16>
    %29 = vector.shape_cast %28 : vector<1x6x32xbf16> to vector<6x32xbf16>
    %cst_27 = arith.constant dense<0.000000e+00> : vector<64x32xf32>
    %30 = tpu.matmul %27, %29, %cst_27 {dimension_numbers = #tpu.dot_dimension_numbers<[1], [0], [0], [1], [0, 0, 1, 1], [], []>} : vector<64x6xbf16>, vector<6x32xbf16>, vector<64x32xf32> -> vector<64x32xf32>
    %cst_28 = arith.constant 0.000000e+00 : f32
    %31 = vector.broadcast %cst_28 : f32 to vector<64x32xf32>
    %32 = arith.addf %31, %30 : vector<64x32xf32>
    %c8 = arith.constant 8 : index
    %c0_29 = arith.constant 0 : index
    %33 = vector.load %arg33[%c8, %c0_29] : memref<96x128xf32, #tpu.memory_space<vmem>>, vector<64x6xf32>
    %34 = arith.truncf %33 : vector<64x6xf32> to vector<64x6xbf16>
    %c1 = arith.constant 1 : index
    %c0_30 = arith.constant 0 : index
    %c0_31 = arith.constant 0 : index
    %35 = vector.load %arg7[%c1, %c0_30, %c0_31] : memref<11x6x32xbf16, #tpu.memory_space<vmem>>, vector<1x6x32xbf16>
    %36 = vector.shape_cast %35 : vector<1x6x32xbf16> to vector<6x32xbf16>
    %cst_32 = arith.constant dense<0.000000e+00> : vector<64x32xf32>
    %37 = tpu.matmul %34, %36, %cst_32 {dimension_numbers = #tpu.dot_dimension_numbers<[1], [0], [0], [1], [0, 0, 1, 1], [], []>} : vector<64x6xbf16>, vector<6x32xbf16>, vector<64x32xf32> -> vector<64x32xf32>
    %38 = arith.addf %32, %37 : vector<64x32xf32>
    %c12 = arith.constant 12 : index
    %c0_33 = arith.constant 0 : index
    %39 = vector.load %arg33[%c12, %c0_33] : memref<96x128xf32, #tpu.memory_space<vmem>>, vector<64x6xf32>
    %40 = arith.truncf %39 : vector<64x6xf32> to vector<64x6xbf16>
    %c2 = arith.constant 2 : index
    %c0_34 = arith.constant 0 : index
    %c0_35 = arith.constant 0 : index
    %41 = vector.load %arg7[%c2, %c0_34, %c0_35] : memref<11x6x32xbf16, #tpu.memory_space<vmem>>, vector<1x6x32xbf16>
    %42 = vector.shape_cast %41 : vector<1x6x32xbf16> to vector<6x32xbf16>
    %cst_36 = arith.constant dense<0.000000e+00> : vector<64x32xf32>
    %43 = tpu.matmul %40, %42, %cst_36 {dimension_numbers = #tpu.dot_dimension_numbers<[1], [0], [0], [1], [0, 0, 1, 1], [], []>} : vector<64x6xbf16>, vector<6x32xbf16>, vector<64x32xf32> -> vector<64x32xf32>
    %44 = arith.addf %38, %43 : vector<64x32xf32>
    %c14 = arith.constant 14 : index
    %c0_37 = arith.constant 0 : index
    %45 = vector.load %arg33[%c14, %c0_37] : memref<96x128xf32, #tpu.memory_space<vmem>>, vector<64x6xf32>
    %46 = arith.truncf %45 : vector<64x6xf32> to vector<64x6xbf16>
    %c3 = arith.constant 3 : index
    %c0_38 = arith.constant 0 : index
    %c0_39 = arith.constant 0 : index
    %47 = vector.load %arg7[%c3, %c0_38, %c0_39] : memref<11x6x32xbf16, #tpu.memory_space<vmem>>, vector<1x6x32xbf16>
    %48 = vector.shape_cast %47 : vector<1x6x32xbf16> to vector<6x32xbf16>
    %cst_40 = arith.constant dense<0.000000e+00> : vector<64x32xf32>
    %49 = tpu.matmul %46, %48, %cst_40 {dimension_numbers = #tpu.dot_dimension_numbers<[1], [0], [0], [1], [0, 0, 1, 1], [], []>} : vector<64x6xbf16>, vector<6x32xbf16>, vector<64x32xf32> -> vector<64x32xf32>
    %50 = arith.addf %44, %49 : vector<64x32xf32>
    %c15 = arith.constant 15 : index
    %c0_41 = arith.constant 0 : index
    %51 = vector.load %arg33[%c15, %c0_41] : memref<96x128xf32, #tpu.memory_space<vmem>>, vector<64x6xf32>
    %52 = arith.truncf %51 : vector<64x6xf32> to vector<64x6xbf16>
    %c4 = arith.constant 4 : index
    %c0_42 = arith.constant 0 : index
    %c0_43 = arith.constant 0 : index
    %53 = vector.load %arg7[%c4, %c0_42, %c0_43] : memref<11x6x32xbf16, #tpu.memory_space<vmem>>, vector<1x6x32xbf16>
    %54 = vector.shape_cast %53 : vector<1x6x32xbf16> to vector<6x32xbf16>
    %cst_44 = arith.constant dense<0.000000e+00> : vector<64x32xf32>
    %55 = tpu.matmul %52, %54, %cst_44 {dimension_numbers = #tpu.dot_dimension_numbers<[1], [0], [0], [1], [0, 0, 1, 1], [], []>} : vector<64x6xbf16>, vector<6x32xbf16>, vector<64x32xf32> -> vector<64x32xf32>
    %56 = arith.addf %50, %55 : vector<64x32xf32>
    %c16_45 = arith.constant 16 : index
    %c0_46 = arith.constant 0 : index
    %57 = vector.load %arg33[%c16_45, %c0_46] : memref<96x128xf32, #tpu.memory_space<vmem>>, vector<64x6xf32>
    %58 = arith.truncf %57 : vector<64x6xf32> to vector<64x6xbf16>
    %c5 = arith.constant 5 : index
    %c0_47 = arith.constant 0 : index
    %c0_48 = arith.constant 0 : index
    %59 = vector.load %arg7[%c5, %c0_47, %c0_48] : memref<11x6x32xbf16, #tpu.memory_space<vmem>>, vector<1x6x32xbf16>
    %60 = vector.shape_cast %59 : vector<1x6x32xbf16> to vector<6x32xbf16>
    %cst_49 = arith.constant dense<0.000000e+00> : vector<64x32xf32>
    %61 = tpu.matmul %58, %60, %cst_49 {dimension_numbers = #tpu.dot_dimension_numbers<[1], [0], [0], [1], [0, 0, 1, 1], [], []>} : vector<64x6xbf16>, vector<6x32xbf16>, vector<64x32xf32> -> vector<64x32xf32>
    %62 = arith.addf %56, %61 : vector<64x32xf32>
    %c17 = arith.constant 17 : index
    %c0_50 = arith.constant 0 : index
    %63 = vector.load %arg33[%c17, %c0_50] : memref<96x128xf32, #tpu.memory_space<vmem>>, vector<64x6xf32>
    %64 = arith.truncf %63 : vector<64x6xf32> to vector<64x6xbf16>
    %c6 = arith.constant 6 : index
    %c0_51 = arith.constant 0 : index
    %c0_52 = arith.constant 0 : index
    %65 = vector.load %arg7[%c6, %c0_51, %c0_52] : memref<11x6x32xbf16, #tpu.memory_space<vmem>>, vector<1x6x32xbf16>
    %66 = vector.shape_cast %65 : vector<1x6x32xbf16> to vector<6x32xbf16>
    %cst_53 = arith.constant dense<0.000000e+00> : vector<64x32xf32>
    %67 = tpu.matmul %64, %66, %cst_53 {dimension_numbers = #tpu.dot_dimension_numbers<[1], [0], [0], [1], [0, 0, 1, 1], [], []>} : vector<64x6xbf16>, vector<6x32xbf16>, vector<64x32xf32> -> vector<64x32xf32>
    %68 = arith.addf %62, %67 : vector<64x32xf32>
    %c18 = arith.constant 18 : index
    %c0_54 = arith.constant 0 : index
    %69 = vector.load %arg33[%c18, %c0_54] : memref<96x128xf32, #tpu.memory_space<vmem>>, vector<64x6xf32>
    %70 = arith.truncf %69 : vector<64x6xf32> to vector<64x6xbf16>
    %c7 = arith.constant 7 : index
    %c0_55 = arith.constant 0 : index
    %c0_56 = arith.constant 0 : index
    %71 = vector.load %arg7[%c7, %c0_55, %c0_56] : memref<11x6x32xbf16, #tpu.memory_space<vmem>>, vector<1x6x32xbf16>
    %72 = vector.shape_cast %71 : vector<1x6x32xbf16> to vector<6x32xbf16>
    %cst_57 = arith.constant dense<0.000000e+00> : vector<64x32xf32>
    %73 = tpu.matmul %70, %72, %cst_57 {dimension_numbers = #tpu.dot_dimension_numbers<[1], [0], [0], [1], [0, 0, 1, 1], [], []>} : vector<64x6xbf16>, vector<6x32xbf16>, vector<64x32xf32> -> vector<64x32xf32>
    %74 = arith.addf %68, %73 : vector<64x32xf32>
    %c20 = arith.constant 20 : index
    %c0_58 = arith.constant 0 : index
    %75 = vector.load %arg33[%c20, %c0_58] : memref<96x128xf32, #tpu.memory_space<vmem>>, vector<64x6xf32>
    %76 = arith.truncf %75 : vector<64x6xf32> to vector<64x6xbf16>
    %c8_59 = arith.constant 8 : index
    %c0_60 = arith.constant 0 : index
    %c0_61 = arith.constant 0 : index
    %77 = vector.load %arg7[%c8_59, %c0_60, %c0_61] : memref<11x6x32xbf16, #tpu.memory_space<vmem>>, vector<1x6x32xbf16>
    %78 = vector.shape_cast %77 : vector<1x6x32xbf16> to vector<6x32xbf16>
    %cst_62 = arith.constant dense<0.000000e+00> : vector<64x32xf32>
    %79 = tpu.matmul %76, %78, %cst_62 {dimension_numbers = #tpu.dot_dimension_numbers<[1], [0], [0], [1], [0, 0, 1, 1], [], []>} : vector<64x6xbf16>, vector<6x32xbf16>, vector<64x32xf32> -> vector<64x32xf32>
    %80 = arith.addf %74, %79 : vector<64x32xf32>
    %c24 = arith.constant 24 : index
    %c0_63 = arith.constant 0 : index
    %81 = vector.load %arg33[%c24, %c0_63] : memref<96x128xf32, #tpu.memory_space<vmem>>, vector<64x6xf32>
    %82 = arith.truncf %81 : vector<64x6xf32> to vector<64x6xbf16>
    %c9 = arith.constant 9 : index
    %c0_64 = arith.constant 0 : index
    %c0_65 = arith.constant 0 : index
    %83 = vector.load %arg7[%c9, %c0_64, %c0_65] : memref<11x6x32xbf16, #tpu.memory_space<vmem>>, vector<1x6x32xbf16>
    %84 = vector.shape_cast %83 : vector<1x6x32xbf16> to vector<6x32xbf16>
    %cst_66 = arith.constant dense<0.000000e+00> : vector<64x32xf32>
    %85 = tpu.matmul %82, %84, %cst_66 {dimension_numbers = #tpu.dot_dimension_numbers<[1], [0], [0], [1], [0, 0, 1, 1], [], []>} : vector<64x6xbf16>, vector<6x32xbf16>, vector<64x32xf32> -> vector<64x32xf32>
    %86 = arith.addf %80, %85 : vector<64x32xf32>
    %c32 = arith.constant 32 : index
    %c0_67 = arith.constant 0 : index
    %87 = vector.load %arg33[%c32, %c0_67] : memref<96x128xf32, #tpu.memory_space<vmem>>, vector<64x6xf32>
    %88 = arith.truncf %87 : vector<64x6xf32> to vector<64x6xbf16>
    %c10 = arith.constant 10 : index
    %c0_68 = arith.constant 0 : index
    %c0_69 = arith.constant 0 : index
    %89 = vector.load %arg7[%c10, %c0_68, %c0_69] : memref<11x6x32xbf16, #tpu.memory_space<vmem>>, vector<1x6x32xbf16>
    %90 = vector.shape_cast %89 : vector<1x6x32xbf16> to vector<6x32xbf16>
    %cst_70 = arith.constant dense<0.000000e+00> : vector<64x32xf32>
    %91 = tpu.matmul %88, %90, %cst_70 {dimension_numbers = #tpu.dot_dimension_numbers<[1], [0], [0], [1], [0, 0, 1, 1], [], []>} : vector<64x6xbf16>, vector<6x32xbf16>, vector<64x32xf32> -> vector<64x32xf32>
    %92 = arith.addf %86, %91 : vector<64x32xf32>
    %93 = vector.broadcast %13 : vector<1x32xf32> to vector<64x32xf32>
    %94 = arith.mulf %92, %93 : vector<64x32xf32>
    %95 = vector.broadcast %14 : vector<1x32xf32> to vector<64x32xf32>
    %96 = arith.addf %94, %95 : vector<64x32xf32>
    %cst_71 = arith.constant 0.000000e+00 : f32
    %97 = vector.broadcast %cst_71 : f32 to vector<64x32xf32>
    %98 = arith.cmpf ogt, %96, %97 : vector<64x32xf32>
    %99 = vector.broadcast %15 : f32 to vector<64x32xf32>
    %100 = arith.mulf %99, %96 : vector<64x32xf32>
    %101 = arith.select %98, %96, %100 : vector<64x32xi1>, vector<64x32xf32>
    %c0_72 = arith.constant 0 : index
    %c0_73 = arith.constant 0 : index
    %102 = vector.load %arg11[%c0_72, %c0_73] : memref<32x12xbf16, #tpu.memory_space<vmem>>, vector<32x12xbf16>
    %c0_74 = arith.constant 0 : index
    %c0_75 = arith.constant 0 : index
    %103 = vector.load %arg12[%c0_74, %c0_75] : memref<1x12xf32, #tpu.memory_space<vmem>>, vector<1x12xf32>
    %c0_76 = arith.constant 0 : index
    %104 = memref.load %arg13[%c0_76] : memref<1xf32, #tpu.memory_space<smem>>
    %c0_77 = arith.constant 0 : index
    %c0_78 = arith.constant 0 : index
    %105 = vector.load %arg15[%c0_77, %c0_78] : memref<1x64xf32, #tpu.memory_space<vmem>>, vector<1x64xf32>
    %c0_79 = arith.constant 0 : index
    %c0_80 = arith.constant 0 : index
    %106 = vector.load %arg16[%c0_79, %c0_80] : memref<1x64xf32, #tpu.memory_space<vmem>>, vector<1x64xf32>
    %c0_81 = arith.constant 0 : index
    %107 = memref.load %arg17[%c0_81] : memref<1xf32, #tpu.memory_space<smem>>
    %108 = arith.truncf %101 : vector<64x32xf32> to vector<64x32xbf16>
    %cst_82 = arith.constant dense<0.000000e+00> : vector<64x12xf32>
    %109 = tpu.matmul %108, %102, %cst_82 {dimension_numbers = #tpu.dot_dimension_numbers<[1], [0], [0], [1], [0, 0, 1, 1], [], []>} : vector<64x32xbf16>, vector<32x12xbf16>, vector<64x12xf32> -> vector<64x12xf32>
    %110 = vector.broadcast %103 : vector<1x12xf32> to vector<64x12xf32>
    %111 = arith.addf %109, %110 : vector<64x12xf32>
    %cst_83 = arith.constant 0.000000e+00 : f32
    %112 = vector.broadcast %cst_83 : f32 to vector<64x12xf32>
    %113 = arith.cmpf ogt, %111, %112 : vector<64x12xf32>
    %114 = vector.broadcast %104 : f32 to vector<64x12xf32>
    %115 = arith.mulf %114, %111 : vector<64x12xf32>
    %116 = arith.select %113, %111, %115 : vector<64x12xi1>, vector<64x12xf32>
    %c16_84 = arith.constant 16 : index
    %c0_85 = arith.constant 0 : index
    %117 = vector.load %arg33[%c16_84, %c0_85] : memref<96x128xf32, #tpu.memory_space<vmem>>, vector<64x12xf32>
    tpu.vector_store %arg33[%c16_84, %c0_85], %116 {strides = array<i32>} : memref<96x128xf32, #tpu.memory_space<vmem>>, vector<64x12xf32>,
    %c0_86 = arith.constant 0 : index
    %c0_87 = arith.constant 0 : index
    %118 = vector.load %arg33[%c0_86, %c0_87] : memref<96x128xf32, #tpu.memory_space<vmem>>, vector<64x12xf32>
    %119 = arith.truncf %118 : vector<64x12xf32> to vector<64x12xbf16>
    %c0_88 = arith.constant 0 : index
    %c0_89 = arith.constant 0 : index
    %c0_90 = arith.constant 0 : index
    %120 = vector.load %arg14[%c0_88, %c0_89, %c0_90] : memref<11x12x64xbf16, #tpu.memory_space<vmem>>, vector<1x12x64xbf16>
    %121 = vector.shape_cast %120 : vector<1x12x64xbf16> to vector<12x64xbf16>
    %cst_91 = arith.constant dense<0.000000e+00> : vector<64x64xf32>
    %122 = tpu.matmul %119, %121, %cst_91 {dimension_numbers = #tpu.dot_dimension_numbers<[1], [0], [0], [1], [0, 0, 1, 1], [], []>} : vector<64x12xbf16>, vector<12x64xbf16>, vector<64x64xf32> -> vector<64x64xf32>
    %cst_92 = arith.constant 0.000000e+00 : f32
    %123 = vector.broadcast %cst_92 : f32 to vector<64x64xf32>
    %124 = arith.addf %123, %122 : vector<64x64xf32>
    %c8_93 = arith.constant 8 : index
    %c0_94 = arith.constant 0 : index
    %125 = vector.load %arg33[%c8_93, %c0_94] : memref<96x128xf32, #tpu.memory_space<vmem>>, vector<64x12xf32>
    %126 = arith.truncf %125 : vector<64x12xf32> to vector<64x12xbf16>
    %c1_95 = arith.constant 1 : index
    %c0_96 = arith.constant 0 : index
    %c0_97 = arith.constant 0 : index
    %127 = vector.load %arg14[%c1_95, %c0_96, %c0_97] : memref<11x12x64xbf16, #tpu.memory_space<vmem>>, vector<1x12x64xbf16>
    %128 = vector.shape_cast %127 : vector<1x12x64xbf16> to vector<12x64xbf16>
    %cst_98 = arith.constant dense<0.000000e+00> : vector<64x64xf32>
    %129 = tpu.matmul %126, %128, %cst_98 {dimension_numbers = #tpu.dot_dimension_numbers<[1], [0], [0], [1], [0, 0, 1, 1], [], []>} : vector<64x12xbf16>, vector<12x64xbf16>, vector<64x64xf32> -> vector<64x64xf32>
    %130 = arith.addf %124, %129 : vector<64x64xf32>
    %c12_99 = arith.constant 12 : index
    %c0_100 = arith.constant 0 : index
    %131 = vector.load %arg33[%c12_99, %c0_100] : memref<96x128xf32, #tpu.memory_space<vmem>>, vector<64x12xf32>
    %132 = arith.truncf %131 : vector<64x12xf32> to vector<64x12xbf16>
    %c2_101 = arith.constant 2 : index
    %c0_102 = arith.constant 0 : index
    %c0_103 = arith.constant 0 : index
    %133 = vector.load %arg14[%c2_101, %c0_102, %c0_103] : memref<11x12x64xbf16, #tpu.memory_space<vmem>>, vector<1x12x64xbf16>
    %134 = vector.shape_cast %133 : vector<1x12x64xbf16> to vector<12x64xbf16>
    %cst_104 = arith.constant dense<0.000000e+00> : vector<64x64xf32>
    %135 = tpu.matmul %132, %134, %cst_104 {dimension_numbers = #tpu.dot_dimension_numbers<[1], [0], [0], [1], [0, 0, 1, 1], [], []>} : vector<64x12xbf16>, vector<12x64xbf16>, vector<64x64xf32> -> vector<64x64xf32>
    %136 = arith.addf %130, %135 : vector<64x64xf32>
    %c14_105 = arith.constant 14 : index
    %c0_106 = arith.constant 0 : index
    %137 = vector.load %arg33[%c14_105, %c0_106] : memref<96x128xf32, #tpu.memory_space<vmem>>, vector<64x12xf32>
    %138 = arith.truncf %137 : vector<64x12xf32> to vector<64x12xbf16>
    %c3_107 = arith.constant 3 : index
    %c0_108 = arith.constant 0 : index
    %c0_109 = arith.constant 0 : index
    %139 = vector.load %arg14[%c3_107, %c0_108, %c0_109] : memref<11x12x64xbf16, #tpu.memory_space<vmem>>, vector<1x12x64xbf16>
    %140 = vector.shape_cast %139 : vector<1x12x64xbf16> to vector<12x64xbf16>
    %cst_110 = arith.constant dense<0.000000e+00> : vector<64x64xf32>
    %141 = tpu.matmul %138, %140, %cst_110 {dimension_numbers = #tpu.dot_dimension_numbers<[1], [0], [0], [1], [0, 0, 1, 1], [], []>} : vector<64x12xbf16>, vector<12x64xbf16>, vector<64x64xf32> -> vector<64x64xf32>
    %142 = arith.addf %136, %141 : vector<64x64xf32>
    %c15_111 = arith.constant 15 : index
    %c0_112 = arith.constant 0 : index
    %143 = vector.load %arg33[%c15_111, %c0_112] : memref<96x128xf32, #tpu.memory_space<vmem>>, vector<64x12xf32>
    %144 = arith.truncf %143 : vector<64x12xf32> to vector<64x12xbf16>
    %c4_113 = arith.constant 4 : index
    %c0_114 = arith.constant 0 : index
    %c0_115 = arith.constant 0 : index
    %145 = vector.load %arg14[%c4_113, %c0_114, %c0_115] : memref<11x12x64xbf16, #tpu.memory_space<vmem>>, vector<1x12x64xbf16>
    %146 = vector.shape_cast %145 : vector<1x12x64xbf16> to vector<12x64xbf16>
    %cst_116 = arith.constant dense<0.000000e+00> : vector<64x64xf32>
    %147 = tpu.matmul %144, %146, %cst_116 {dimension_numbers = #tpu.dot_dimension_numbers<[1], [0], [0], [1], [0, 0, 1, 1], [], []>} : vector<64x12xbf16>, vector<12x64xbf16>, vector<64x64xf32> -> vector<64x64xf32>
    %148 = arith.addf %142, %147 : vector<64x64xf32>
    %c16_117 = arith.constant 16 : index
    %c0_118 = arith.constant 0 : index
    %149 = vector.load %arg33[%c16_117, %c0_118] : memref<96x128xf32, #tpu.memory_space<vmem>>, vector<64x12xf32>
    %150 = arith.truncf %149 : vector<64x12xf32> to vector<64x12xbf16>
    %c5_119 = arith.constant 5 : index
    %c0_120 = arith.constant 0 : index
    %c0_121 = arith.constant 0 : index
    %151 = vector.load %arg14[%c5_119, %c0_120, %c0_121] : memref<11x12x64xbf16, #tpu.memory_space<vmem>>, vector<1x12x64xbf16>
    %152 = vector.shape_cast %151 : vector<1x12x64xbf16> to vector<12x64xbf16>
    %cst_122 = arith.constant dense<0.000000e+00> : vector<64x64xf32>
    %153 = tpu.matmul %150, %152, %cst_122 {dimension_numbers = #tpu.dot_dimension_numbers<[1], [0], [0], [1], [0, 0, 1, 1], [], []>} : vector<64x12xbf16>, vector<12x64xbf16>, vector<64x64xf32> -> vector<64x64xf32>
    %154 = arith.addf %148, %153 : vector<64x64xf32>
    %c17_123 = arith.constant 17 : index
    %c0_124 = arith.constant 0 : index
    %155 = vector.load %arg33[%c17_123, %c0_124] : memref<96x128xf32, #tpu.memory_space<vmem>>, vector<64x12xf32>
    %156 = arith.truncf %155 : vector<64x12xf32> to vector<64x12xbf16>
    %c6_125 = arith.constant 6 : index
    %c0_126 = arith.constant 0 : index
    %c0_127 = arith.constant 0 : index
    %157 = vector.load %arg14[%c6_125, %c0_126, %c0_127] : memref<11x12x64xbf16, #tpu.memory_space<vmem>>, vector<1x12x64xbf16>
    %158 = vector.shape_cast %157 : vector<1x12x64xbf16> to vector<12x64xbf16>
    %cst_128 = arith.constant dense<0.000000e+00> : vector<64x64xf32>
    %159 = tpu.matmul %156, %158, %cst_128 {dimension_numbers = #tpu.dot_dimension_numbers<[1], [0], [0], [1], [0, 0, 1, 1], [], []>} : vector<64x12xbf16>, vector<12x64xbf16>, vector<64x64xf32> -> vector<64x64xf32>
    %160 = arith.addf %154, %159 : vector<64x64xf32>
    %c18_129 = arith.constant 18 : index
    %c0_130 = arith.constant 0 : index
    %161 = vector.load %arg33[%c18_129, %c0_130] : memref<96x128xf32, #tpu.memory_space<vmem>>, vector<64x12xf32>
    %162 = arith.truncf %161 : vector<64x12xf32> to vector<64x12xbf16>
    %c7_131 = arith.constant 7 : index
    %c0_132 = arith.constant 0 : index
    %c0_133 = arith.constant 0 : index
    %163 = vector.load %arg14[%c7_131, %c0_132, %c0_133] : memref<11x12x64xbf16, #tpu.memory_space<vmem>>, vector<1x12x64xbf16>
    %164 = vector.shape_cast %163 : vector<1x12x64xbf16> to vector<12x64xbf16>
    %cst_134 = arith.constant dense<0.000000e+00> : vector<64x64xf32>
    %165 = tpu.matmul %162, %164, %cst_134 {dimension_numbers = #tpu.dot_dimension_numbers<[1], [0], [0], [1], [0, 0, 1, 1], [], []>} : vector<64x12xbf16>, vector<12x64xbf16>, vector<64x64xf32> -> vector<64x64xf32>
    %166 = arith.addf %160, %165 : vector<64x64xf32>
    %c20_135 = arith.constant 20 : index
    %c0_136 = arith.constant 0 : index
    %167 = vector.load %arg33[%c20_135, %c0_136] : memref<96x128xf32, #tpu.memory_space<vmem>>, vector<64x12xf32>
    %168 = arith.truncf %167 : vector<64x12xf32> to vector<64x12xbf16>
    %c8_137 = arith.constant 8 : index
    %c0_138 = arith.constant 0 : index
    %c0_139 = arith.constant 0 : index
    %169 = vector.load %arg14[%c8_137, %c0_138, %c0_139] : memref<11x12x64xbf16, #tpu.memory_space<vmem>>, vector<1x12x64xbf16>
    %170 = vector.shape_cast %169 : vector<1x12x64xbf16> to vector<12x64xbf16>
    %cst_140 = arith.constant dense<0.000000e+00> : vector<64x64xf32>
    %171 = tpu.matmul %168, %170, %cst_140 {dimension_numbers = #tpu.dot_dimension_numbers<[1], [0], [0], [1], [0, 0, 1, 1], [], []>} : vector<64x12xbf16>, vector<12x64xbf16>, vector<64x64xf32> -> vector<64x64xf32>
    %172 = arith.addf %166, %171 : vector<64x64xf32>
    %c24_141 = arith.constant 24 : index
    %c0_142 = arith.constant 0 : index
    %173 = vector.load %arg33[%c24_141, %c0_142] : memref<96x128xf32, #tpu.memory_space<vmem>>, vector<64x12xf32>
    %174 = arith.truncf %173 : vector<64x12xf32> to vector<64x12xbf16>
    %c9_143 = arith.constant 9 : index
    %c0_144 = arith.constant 0 : index
    %c0_145 = arith.constant 0 : index
    %175 = vector.load %arg14[%c9_143, %c0_144, %c0_145] : memref<11x12x64xbf16, #tpu.memory_space<vmem>>, vector<1x12x64xbf16>
    %176 = vector.shape_cast %175 : vector<1x12x64xbf16> to vector<12x64xbf16>
    %cst_146 = arith.constant dense<0.000000e+00> : vector<64x64xf32>
    %177 = tpu.matmul %174, %176, %cst_146 {dimension_numbers = #tpu.dot_dimension_numbers<[1], [0], [0], [1], [0, 0, 1, 1], [], []>} : vector<64x12xbf16>, vector<12x64xbf16>, vector<64x64xf32> -> vector<64x64xf32>
    %178 = arith.addf %172, %177 : vector<64x64xf32>
    %c32_147 = arith.constant 32 : index
    %c0_148 = arith.constant 0 : index
    %179 = vector.load %arg33[%c32_147, %c0_148] : memref<96x128xf32, #tpu.memory_space<vmem>>, vector<64x12xf32>
    %180 = arith.truncf %179 : vector<64x12xf32> to vector<64x12xbf16>
    %c10_149 = arith.constant 10 : index
    %c0_150 = arith.constant 0 : index
    %c0_151 = arith.constant 0 : index
    %181 = vector.load %arg14[%c10_149, %c0_150, %c0_151] : memref<11x12x64xbf16, #tpu.memory_space<vmem>>, vector<1x12x64xbf16>
    %182 = vector.shape_cast %181 : vector<1x12x64xbf16> to vector<12x64xbf16>
    %cst_152 = arith.constant dense<0.000000e+00> : vector<64x64xf32>
    %183 = tpu.matmul %180, %182, %cst_152 {dimension_numbers = #tpu.dot_dimension_numbers<[1], [0], [0], [1], [0, 0, 1, 1], [], []>} : vector<64x12xbf16>, vector<12x64xbf16>, vector<64x64xf32> -> vector<64x64xf32>
    %184 = arith.addf %178, %183 : vector<64x64xf32>
    %185 = vector.broadcast %105 : vector<1x64xf32> to vector<64x64xf32>
    %186 = arith.mulf %184, %185 : vector<64x64xf32>
    %187 = vector.broadcast %106 : vector<1x64xf32> to vector<64x64xf32>
    %188 = arith.addf %186, %187 : vector<64x64xf32>
    %cst_153 = arith.constant 0.000000e+00 : f32
    %189 = vector.broadcast %cst_153 : f32 to vector<64x64xf32>
    %190 = arith.cmpf ogt, %188, %189 : vector<64x64xf32>
    %191 = vector.broadcast %107 : f32 to vector<64x64xf32>
    %192 = arith.mulf %191, %188 : vector<64x64xf32>
    %193 = arith.select %190, %188, %192 : vector<64x64xi1>, vector<64x64xf32>
    %c0_154 = arith.constant 0 : index
    %c0_155 = arith.constant 0 : index
    %194 = vector.load %arg18[%c0_154, %c0_155] : memref<64x12xbf16, #tpu.memory_space<vmem>>, vector<64x12xbf16>
    %c0_156 = arith.constant 0 : index
    %c0_157 = arith.constant 0 : index
    %195 = vector.load %arg19[%c0_156, %c0_157] : memref<1x12xf32, #tpu.memory_space<vmem>>, vector<1x12xf32>
    %c0_158 = arith.constant 0 : index
    %196 = memref.load %arg20[%c0_158] : memref<1xf32, #tpu.memory_space<smem>>
    %c0_159 = arith.constant 0 : index
    %c0_160 = arith.constant 0 : index
    %197 = vector.load %arg22[%c0_159, %c0_160] : memref<1x64xf32, #tpu.memory_space<vmem>>, vector<1x64xf32>
    %c0_161 = arith.constant 0 : index
    %c0_162 = arith.constant 0 : index
    %198 = vector.load %arg23[%c0_161, %c0_162] : memref<1x64xf32, #tpu.memory_space<vmem>>, vector<1x64xf32>
    %c0_163 = arith.constant 0 : index
    %199 = memref.load %arg24[%c0_163] : memref<1xf32, #tpu.memory_space<smem>>
    %200 = arith.truncf %193 : vector<64x64xf32> to vector<64x64xbf16>
    %cst_164 = arith.constant dense<0.000000e+00> : vector<64x12xf32>
    %201 = tpu.matmul %200, %194, %cst_164 {dimension_numbers = #tpu.dot_dimension_numbers<[1], [0], [0], [1], [0, 0, 1, 1], [], []>} : vector<64x64xbf16>, vector<64x12xbf16>, vector<64x12xf32> -> vector<64x12xf32>
    %202 = vector.broadcast %195 : vector<1x12xf32> to vector<64x12xf32>
    %203 = arith.addf %201, %202 : vector<64x12xf32>
    %cst_165 = arith.constant 0.000000e+00 : f32
    %204 = vector.broadcast %cst_165 : f32 to vector<64x12xf32>
    %205 = arith.cmpf ogt, %203, %204 : vector<64x12xf32>
    %206 = vector.broadcast %196 : f32 to vector<64x12xf32>
    %207 = arith.mulf %206, %203 : vector<64x12xf32>
    %208 = arith.select %205, %203, %207 : vector<64x12xi1>, vector<64x12xf32>
    %c16_166 = arith.constant 16 : index
    %c0_167 = arith.constant 0 : index
    %209 = vector.load %arg33[%c16_166, %c0_167] : memref<96x128xf32, #tpu.memory_space<vmem>>, vector<64x12xf32>
    tpu.vector_store %arg33[%c16_166, %c0_167], %208 {strides = array<i32>} : memref<96x128xf32, #tpu.memory_space<vmem>>, vector<64x12xf32>,
    %c0_168 = arith.constant 0 : index
    %c0_169 = arith.constant 0 : index
    %210 = vector.load %arg33[%c0_168, %c0_169] : memref<96x128xf32, #tpu.memory_space<vmem>>, vector<64x12xf32>
    %211 = arith.truncf %210 : vector<64x12xf32> to vector<64x12xbf16>
    %c0_170 = arith.constant 0 : index
    %c0_171 = arith.constant 0 : index
    %c0_172 = arith.constant 0 : index
    %212 = vector.load %arg21[%c0_170, %c0_171, %c0_172] : memref<11x12x64xbf16, #tpu.memory_space<vmem>>, vector<1x12x64xbf16>
    %213 = vector.shape_cast %212 : vector<1x12x64xbf16> to vector<12x64xbf16>
    %cst_173 = arith.constant dense<0.000000e+00> : vector<64x64xf32>
    %214 = tpu.matmul %211, %213, %cst_173 {dimension_numbers = #tpu.dot_dimension_numbers<[1], [0], [0], [1], [0, 0, 1, 1], [], []>} : vector<64x12xbf16>, vector<12x64xbf16>, vector<64x64xf32> -> vector<64x64xf32>
    %215 = arith.addf %193, %214 : vector<64x64xf32>
    %c8_174 = arith.constant 8 : index
    %c0_175 = arith.constant 0 : index
    %216 = vector.load %arg33[%c8_174, %c0_175] : memref<96x128xf32, #tpu.memory_space<vmem>>, vector<64x12xf32>
    %217 = arith.truncf %216 : vector<64x12xf32> to vector<64x12xbf16>
    %c1_176 = arith.constant 1 : index
    %c0_177 = arith.constant 0 : index
    %c0_178 = arith.constant 0 : index
    %218 = vector.load %arg21[%c1_176, %c0_177, %c0_178] : memref<11x12x64xbf16, #tpu.memory_space<vmem>>, vector<1x12x64xbf16>
    %219 = vector.shape_cast %218 : vector<1x12x64xbf16> to vector<12x64xbf16>
    %cst_179 = arith.constant dense<0.000000e+00> : vector<64x64xf32>
    %220 = tpu.matmul %217, %219, %cst_179 {dimension_numbers = #tpu.dot_dimension_numbers<[1], [0], [0], [1], [0, 0, 1, 1], [], []>} : vector<64x12xbf16>, vector<12x64xbf16>, vector<64x64xf32> -> vector<64x64xf32>
    %221 = arith.addf %215, %220 : vector<64x64xf32>
    %c12_180 = arith.constant 12 : index
    %c0_181 = arith.constant 0 : index
    %222 = vector.load %arg33[%c12_180, %c0_181] : memref<96x128xf32, #tpu.memory_space<vmem>>, vector<64x12xf32>
    %223 = arith.truncf %222 : vector<64x12xf32> to vector<64x12xbf16>
    %c2_182 = arith.constant 2 : index
    %c0_183 = arith.constant 0 : index
    %c0_184 = arith.constant 0 : index
    %224 = vector.load %arg21[%c2_182, %c0_183, %c0_184] : memref<11x12x64xbf16, #tpu.memory_space<vmem>>, vector<1x12x64xbf16>
    %225 = vector.shape_cast %224 : vector<1x12x64xbf16> to vector<12x64xbf16>
    %cst_185 = arith.constant dense<0.000000e+00> : vector<64x64xf32>
    %226 = tpu.matmul %223, %225, %cst_185 {dimension_numbers = #tpu.dot_dimension_numbers<[1], [0], [0], [1], [0, 0, 1, 1], [], []>} : vector<64x12xbf16>, vector<12x64xbf16>, vector<64x64xf32> -> vector<64x64xf32>
    %227 = arith.addf %221, %226 : vector<64x64xf32>
    %c14_186 = arith.constant 14 : index
    %c0_187 = arith.constant 0 : index
    %228 = vector.load %arg33[%c14_186, %c0_187] : memref<96x128xf32, #tpu.memory_space<vmem>>, vector<64x12xf32>
    %229 = arith.truncf %228 : vector<64x12xf32> to vector<64x12xbf16>
    %c3_188 = arith.constant 3 : index
    %c0_189 = arith.constant 0 : index
    %c0_190 = arith.constant 0 : index
    %230 = vector.load %arg21[%c3_188, %c0_189, %c0_190] : memref<11x12x64xbf16, #tpu.memory_space<vmem>>, vector<1x12x64xbf16>
    %231 = vector.shape_cast %230 : vector<1x12x64xbf16> to vector<12x64xbf16>
    %cst_191 = arith.constant dense<0.000000e+00> : vector<64x64xf32>
    %232 = tpu.matmul %229, %231, %cst_191 {dimension_numbers = #tpu.dot_dimension_numbers<[1], [0], [0], [1], [0, 0, 1, 1], [], []>} : vector<64x12xbf16>, vector<12x64xbf16>, vector<64x64xf32> -> vector<64x64xf32>
    %233 = arith.addf %227, %232 : vector<64x64xf32>
    %c15_192 = arith.constant 15 : index
    %c0_193 = arith.constant 0 : index
    %234 = vector.load %arg33[%c15_192, %c0_193] : memref<96x128xf32, #tpu.memory_space<vmem>>, vector<64x12xf32>
    %235 = arith.truncf %234 : vector<64x12xf32> to vector<64x12xbf16>
    %c4_194 = arith.constant 4 : index
    %c0_195 = arith.constant 0 : index
    %c0_196 = arith.constant 0 : index
    %236 = vector.load %arg21[%c4_194, %c0_195, %c0_196] : memref<11x12x64xbf16, #tpu.memory_space<vmem>>, vector<1x12x64xbf16>
    %237 = vector.shape_cast %236 : vector<1x12x64xbf16> to vector<12x64xbf16>
    %cst_197 = arith.constant dense<0.000000e+00> : vector<64x64xf32>
    %238 = tpu.matmul %235, %237, %cst_197 {dimension_numbers = #tpu.dot_dimension_numbers<[1], [0], [0], [1], [0, 0, 1, 1], [], []>} : vector<64x12xbf16>, vector<12x64xbf16>, vector<64x64xf32> -> vector<64x64xf32>
    %239 = arith.addf %233, %238 : vector<64x64xf32>
    %c16_198 = arith.constant 16 : index
    %c0_199 = arith.constant 0 : index
    %240 = vector.load %arg33[%c16_198, %c0_199] : memref<96x128xf32, #tpu.memory_space<vmem>>, vector<64x12xf32>
    %241 = arith.truncf %240 : vector<64x12xf32> to vector<64x12xbf16>
    %c5_200 = arith.constant 5 : index
    %c0_201 = arith.constant 0 : index
    %c0_202 = arith.constant 0 : index
    %242 = vector.load %arg21[%c5_200, %c0_201, %c0_202] : memref<11x12x64xbf16, #tpu.memory_space<vmem>>, vector<1x12x64xbf16>
    %243 = vector.shape_cast %242 : vector<1x12x64xbf16> to vector<12x64xbf16>
    %cst_203 = arith.constant dense<0.000000e+00> : vector<64x64xf32>
    %244 = tpu.matmul %241, %243, %cst_203 {dimension_numbers = #tpu.dot_dimension_numbers<[1], [0], [0], [1], [0, 0, 1, 1], [], []>} : vector<64x12xbf16>, vector<12x64xbf16>, vector<64x64xf32> -> vector<64x64xf32>
    %245 = arith.addf %239, %244 : vector<64x64xf32>
    %c17_204 = arith.constant 17 : index
    %c0_205 = arith.constant 0 : index
    %246 = vector.load %arg33[%c17_204, %c0_205] : memref<96x128xf32, #tpu.memory_space<vmem>>, vector<64x12xf32>
    %247 = arith.truncf %246 : vector<64x12xf32> to vector<64x12xbf16>
    %c6_206 = arith.constant 6 : index
    %c0_207 = arith.constant 0 : index
    %c0_208 = arith.constant 0 : index
    %248 = vector.load %arg21[%c6_206, %c0_207, %c0_208] : memref<11x12x64xbf16, #tpu.memory_space<vmem>>, vector<1x12x64xbf16>
    %249 = vector.shape_cast %248 : vector<1x12x64xbf16> to vector<12x64xbf16>
    %cst_209 = arith.constant dense<0.000000e+00> : vector<64x64xf32>
    %250 = tpu.matmul %247, %249, %cst_209 {dimension_numbers = #tpu.dot_dimension_numbers<[1], [0], [0], [1], [0, 0, 1, 1], [], []>} : vector<64x12xbf16>, vector<12x64xbf16>, vector<64x64xf32> -> vector<64x64xf32>
    %251 = arith.addf %245, %250 : vector<64x64xf32>
    %c18_210 = arith.constant 18 : index
    %c0_211 = arith.constant 0 : index
    %252 = vector.load %arg33[%c18_210, %c0_211] : memref<96x128xf32, #tpu.memory_space<vmem>>, vector<64x12xf32>
    %253 = arith.truncf %252 : vector<64x12xf32> to vector<64x12xbf16>
    %c7_212 = arith.constant 7 : index
    %c0_213 = arith.constant 0 : index
    %c0_214 = arith.constant 0 : index
    %254 = vector.load %arg21[%c7_212, %c0_213, %c0_214] : memref<11x12x64xbf16, #tpu.memory_space<vmem>>, vector<1x12x64xbf16>
    %255 = vector.shape_cast %254 : vector<1x12x64xbf16> to vector<12x64xbf16>
    %cst_215 = arith.constant dense<0.000000e+00> : vector<64x64xf32>
    %256 = tpu.matmul %253, %255, %cst_215 {dimension_numbers = #tpu.dot_dimension_numbers<[1], [0], [0], [1], [0, 0, 1, 1], [], []>} : vector<64x12xbf16>, vector<12x64xbf16>, vector<64x64xf32> -> vector<64x64xf32>
    %257 = arith.addf %251, %256 : vector<64x64xf32>
    %c20_216 = arith.constant 20 : index
    %c0_217 = arith.constant 0 : index
    %258 = vector.load %arg33[%c20_216, %c0_217] : memref<96x128xf32, #tpu.memory_space<vmem>>, vector<64x12xf32>
    %259 = arith.truncf %258 : vector<64x12xf32> to vector<64x12xbf16>
    %c8_218 = arith.constant 8 : index
    %c0_219 = arith.constant 0 : index
    %c0_220 = arith.constant 0 : index
    %260 = vector.load %arg21[%c8_218, %c0_219, %c0_220] : memref<11x12x64xbf16, #tpu.memory_space<vmem>>, vector<1x12x64xbf16>
    %261 = vector.shape_cast %260 : vector<1x12x64xbf16> to vector<12x64xbf16>
    %cst_221 = arith.constant dense<0.000000e+00> : vector<64x64xf32>
    %262 = tpu.matmul %259, %261, %cst_221 {dimension_numbers = #tpu.dot_dimension_numbers<[1], [0], [0], [1], [0, 0, 1, 1], [], []>} : vector<64x12xbf16>, vector<12x64xbf16>, vector<64x64xf32> -> vector<64x64xf32>
    %263 = arith.addf %257, %262 : vector<64x64xf32>
    %c24_222 = arith.constant 24 : index
    %c0_223 = arith.constant 0 : index
    %264 = vector.load %arg33[%c24_222, %c0_223] : memref<96x128xf32, #tpu.memory_space<vmem>>, vector<64x12xf32>
    %265 = arith.truncf %264 : vector<64x12xf32> to vector<64x12xbf16>
    %c9_224 = arith.constant 9 : index
    %c0_225 = arith.constant 0 : index
    %c0_226 = arith.constant 0 : index
    %266 = vector.load %arg21[%c9_224, %c0_225, %c0_226] : memref<11x12x64xbf16, #tpu.memory_space<vmem>>, vector<1x12x64xbf16>
    %267 = vector.shape_cast %266 : vector<1x12x64xbf16> to vector<12x64xbf16>
    %cst_227 = arith.constant dense<0.000000e+00> : vector<64x64xf32>
    %268 = tpu.matmul %265, %267, %cst_227 {dimension_numbers = #tpu.dot_dimension_numbers<[1], [0], [0], [1], [0, 0, 1, 1], [], []>} : vector<64x12xbf16>, vector<12x64xbf16>, vector<64x64xf32> -> vector<64x64xf32>
    %269 = arith.addf %263, %268 : vector<64x64xf32>
    %c32_228 = arith.constant 32 : index
    %c0_229 = arith.constant 0 : index
    %270 = vector.load %arg33[%c32_228, %c0_229] : memref<96x128xf32, #tpu.memory_space<vmem>>, vector<64x12xf32>
    %271 = arith.truncf %270 : vector<64x12xf32> to vector<64x12xbf16>
    %c10_230 = arith.constant 10 : index
    %c0_231 = arith.constant 0 : index
    %c0_232 = arith.constant 0 : index
    %272 = vector.load %arg21[%c10_230, %c0_231, %c0_232] : memref<11x12x64xbf16, #tpu.memory_space<vmem>>, vector<1x12x64xbf16>
    %273 = vector.shape_cast %272 : vector<1x12x64xbf16> to vector<12x64xbf16>
    %cst_233 = arith.constant dense<0.000000e+00> : vector<64x64xf32>
    %274 = tpu.matmul %271, %273, %cst_233 {dimension_numbers = #tpu.dot_dimension_numbers<[1], [0], [0], [1], [0, 0, 1, 1], [], []>} : vector<64x12xbf16>, vector<12x64xbf16>, vector<64x64xf32> -> vector<64x64xf32>
    %275 = arith.addf %269, %274 : vector<64x64xf32>
    %276 = vector.broadcast %197 : vector<1x64xf32> to vector<64x64xf32>
    %277 = arith.mulf %275, %276 : vector<64x64xf32>
    %278 = vector.broadcast %198 : vector<1x64xf32> to vector<64x64xf32>
    %279 = arith.addf %277, %278 : vector<64x64xf32>
    %cst_234 = arith.constant 0.000000e+00 : f32
    %280 = vector.broadcast %cst_234 : f32 to vector<64x64xf32>
    %281 = arith.cmpf ogt, %279, %280 : vector<64x64xf32>
    %282 = vector.broadcast %199 : f32 to vector<64x64xf32>
    %283 = arith.mulf %282, %279 : vector<64x64xf32>
    %284 = arith.select %281, %279, %283 : vector<64x64xi1>, vector<64x64xf32>
    %c0_235 = arith.constant 0 : index
    %c0_236 = arith.constant 0 : index
    %285 = vector.load %arg25[%c0_235, %c0_236] : memref<64x25xbf16, #tpu.memory_space<vmem>>, vector<64x25xbf16>
    %c0_237 = arith.constant 0 : index
    %c0_238 = arith.constant 0 : index
    %286 = vector.load %arg26[%c0_237, %c0_238] : memref<1x25xf32, #tpu.memory_space<vmem>>, vector<1x25xf32>
    %c0_239 = arith.constant 0 : index
    %287 = memref.load %arg27[%c0_239] : memref<1xf32, #tpu.memory_space<smem>>
    %c0_240 = arith.constant 0 : index
    %c0_241 = arith.constant 0 : index
    %288 = vector.load %arg29[%c0_240, %c0_241] : memref<1x128xf32, #tpu.memory_space<vmem>>, vector<1x128xf32>
    %c0_242 = arith.constant 0 : index
    %c0_243 = arith.constant 0 : index
    %289 = vector.load %arg30[%c0_242, %c0_243] : memref<1x128xf32, #tpu.memory_space<vmem>>, vector<1x128xf32>
    %c0_244 = arith.constant 0 : index
    %290 = memref.load %arg31[%c0_244] : memref<1xf32, #tpu.memory_space<smem>>
    %291 = arith.truncf %284 : vector<64x64xf32> to vector<64x64xbf16>
    %cst_245 = arith.constant dense<0.000000e+00> : vector<64x25xf32>
    %292 = tpu.matmul %291, %285, %cst_245 {dimension_numbers = #tpu.dot_dimension_numbers<[1], [0], [0], [1], [0, 0, 1, 1], [], []>} : vector<64x64xbf16>, vector<64x25xbf16>, vector<64x25xf32> -> vector<64x25xf32>
    %293 = vector.broadcast %286 : vector<1x25xf32> to vector<64x25xf32>
    %294 = arith.addf %292, %293 : vector<64x25xf32>
    %cst_246 = arith.constant 0.000000e+00 : f32
    %295 = vector.broadcast %cst_246 : f32 to vector<64x25xf32>
    %296 = arith.cmpf ogt, %294, %295 : vector<64x25xf32>
    %297 = vector.broadcast %287 : f32 to vector<64x25xf32>
    %298 = arith.mulf %297, %294 : vector<64x25xf32>
    %299 = arith.select %296, %294, %298 : vector<64x25xi1>, vector<64x25xf32>
    %c16_247 = arith.constant 16 : index
    %c0_248 = arith.constant 0 : index
    %300 = vector.load %arg33[%c16_247, %c0_248] : memref<96x128xf32, #tpu.memory_space<vmem>>, vector<64x25xf32>
    tpu.vector_store %arg33[%c16_247, %c0_248], %299 {strides = array<i32>} : memref<96x128xf32, #tpu.memory_space<vmem>>, vector<64x25xf32>,
    %c0_249 = arith.constant 0 : index
    %c0_250 = arith.constant 0 : index
    %301 = vector.load %arg33[%c0_249, %c0_250] : memref<96x128xf32, #tpu.memory_space<vmem>>, vector<64x25xf32>
    %302 = arith.truncf %301 : vector<64x25xf32> to vector<64x25xbf16>
    %c0_251 = arith.constant 0 : index
    %c0_252 = arith.constant 0 : index
    %c0_253 = arith.constant 0 : index
    %303 = vector.load %arg28[%c0_251, %c0_252, %c0_253] : memref<11x25x128xbf16, #tpu.memory_space<vmem>>, vector<1x25x128xbf16>
    %304 = vector.shape_cast %303 : vector<1x25x128xbf16> to vector<25x128xbf16>
    %cst_254 = arith.constant dense<0.000000e+00> : vector<64x128xf32>
    %305 = tpu.matmul %302, %304, %cst_254 {dimension_numbers = #tpu.dot_dimension_numbers<[1], [0], [0], [1], [0, 0, 1, 1], [], []>} : vector<64x25xbf16>, vector<25x128xbf16>, vector<64x128xf32> -> vector<64x128xf32>
    %cst_255 = arith.constant 0.000000e+00 : f32
    %306 = vector.broadcast %cst_255 : f32 to vector<64x128xf32>
    %307 = arith.addf %306, %305 : vector<64x128xf32>
    %c8_256 = arith.constant 8 : index
    %c0_257 = arith.constant 0 : index
    %308 = vector.load %arg33[%c8_256, %c0_257] : memref<96x128xf32, #tpu.memory_space<vmem>>, vector<64x25xf32>
    %309 = arith.truncf %308 : vector<64x25xf32> to vector<64x25xbf16>
    %c1_258 = arith.constant 1 : index
    %c0_259 = arith.constant 0 : index
    %c0_260 = arith.constant 0 : index
    %310 = vector.load %arg28[%c1_258, %c0_259, %c0_260] : memref<11x25x128xbf16, #tpu.memory_space<vmem>>, vector<1x25x128xbf16>
    %311 = vector.shape_cast %310 : vector<1x25x128xbf16> to vector<25x128xbf16>
    %cst_261 = arith.constant dense<0.000000e+00> : vector<64x128xf32>
    %312 = tpu.matmul %309, %311, %cst_261 {dimension_numbers = #tpu.dot_dimension_numbers<[1], [0], [0], [1], [0, 0, 1, 1], [], []>} : vector<64x25xbf16>, vector<25x128xbf16>, vector<64x128xf32> -> vector<64x128xf32>
    %313 = arith.addf %307, %312 : vector<64x128xf32>
    %c12_262 = arith.constant 12 : index
    %c0_263 = arith.constant 0 : index
    %314 = vector.load %arg33[%c12_262, %c0_263] : memref<96x128xf32, #tpu.memory_space<vmem>>, vector<64x25xf32>
    %315 = arith.truncf %314 : vector<64x25xf32> to vector<64x25xbf16>
    %c2_264 = arith.constant 2 : index
    %c0_265 = arith.constant 0 : index
    %c0_266 = arith.constant 0 : index
    %316 = vector.load %arg28[%c2_264, %c0_265, %c0_266] : memref<11x25x128xbf16, #tpu.memory_space<vmem>>, vector<1x25x128xbf16>
    %317 = vector.shape_cast %316 : vector<1x25x128xbf16> to vector<25x128xbf16>
    %cst_267 = arith.constant dense<0.000000e+00> : vector<64x128xf32>
    %318 = tpu.matmul %315, %317, %cst_267 {dimension_numbers = #tpu.dot_dimension_numbers<[1], [0], [0], [1], [0, 0, 1, 1], [], []>} : vector<64x25xbf16>, vector<25x128xbf16>, vector<64x128xf32> -> vector<64x128xf32>
    %319 = arith.addf %313, %318 : vector<64x128xf32>
    %c14_268 = arith.constant 14 : index
    %c0_269 = arith.constant 0 : index
    %320 = vector.load %arg33[%c14_268, %c0_269] : memref<96x128xf32, #tpu.memory_space<vmem>>, vector<64x25xf32>
    %321 = arith.truncf %320 : vector<64x25xf32> to vector<64x25xbf16>
    %c3_270 = arith.constant 3 : index
    %c0_271 = arith.constant 0 : index
    %c0_272 = arith.constant 0 : index
    %322 = vector.load %arg28[%c3_270, %c0_271, %c0_272] : memref<11x25x128xbf16, #tpu.memory_space<vmem>>, vector<1x25x128xbf16>
    %323 = vector.shape_cast %322 : vector<1x25x128xbf16> to vector<25x128xbf16>
    %cst_273 = arith.constant dense<0.000000e+00> : vector<64x128xf32>
    %324 = tpu.matmul %321, %323, %cst_273 {dimension_numbers = #tpu.dot_dimension_numbers<[1], [0], [0], [1], [0, 0, 1, 1], [], []>} : vector<64x25xbf16>, vector<25x128xbf16>, vector<64x128xf32> -> vector<64x128xf32>
    %325 = arith.addf %319, %324 : vector<64x128xf32>
    %c15_274 = arith.constant 15 : index
    %c0_275 = arith.constant 0 : index
    %326 = vector.load %arg33[%c15_274, %c0_275] : memref<96x128xf32, #tpu.memory_space<vmem>>, vector<64x25xf32>
    %327 = arith.truncf %326 : vector<64x25xf32> to vector<64x25xbf16>
    %c4_276 = arith.constant 4 : index
    %c0_277 = arith.constant 0 : index
    %c0_278 = arith.constant 0 : index
    %328 = vector.load %arg28[%c4_276, %c0_277, %c0_278] : memref<11x25x128xbf16, #tpu.memory_space<vmem>>, vector<1x25x128xbf16>
    %329 = vector.shape_cast %328 : vector<1x25x128xbf16> to vector<25x128xbf16>
    %cst_279 = arith.constant dense<0.000000e+00> : vector<64x128xf32>
    %330 = tpu.matmul %327, %329, %cst_279 {dimension_numbers = #tpu.dot_dimension_numbers<[1], [0], [0], [1], [0, 0, 1, 1], [], []>} : vector<64x25xbf16>, vector<25x128xbf16>, vector<64x128xf32> -> vector<64x128xf32>
    %331 = arith.addf %325, %330 : vector<64x128xf32>
    %c16_280 = arith.constant 16 : index
    %c0_281 = arith.constant 0 : index
    %332 = vector.load %arg33[%c16_280, %c0_281] : memref<96x128xf32, #tpu.memory_space<vmem>>, vector<64x25xf32>
    %333 = arith.truncf %332 : vector<64x25xf32> to vector<64x25xbf16>
    %c5_282 = arith.constant 5 : index
    %c0_283 = arith.constant 0 : index
    %c0_284 = arith.constant 0 : index
    %334 = vector.load %arg28[%c5_282, %c0_283, %c0_284] : memref<11x25x128xbf16, #tpu.memory_space<vmem>>, vector<1x25x128xbf16>
    %335 = vector.shape_cast %334 : vector<1x25x128xbf16> to vector<25x128xbf16>
    %cst_285 = arith.constant dense<0.000000e+00> : vector<64x128xf32>
    %336 = tpu.matmul %333, %335, %cst_285 {dimension_numbers = #tpu.dot_dimension_numbers<[1], [0], [0], [1], [0, 0, 1, 1], [], []>} : vector<64x25xbf16>, vector<25x128xbf16>, vector<64x128xf32> -> vector<64x128xf32>
    %337 = arith.addf %331, %336 : vector<64x128xf32>
    %c17_286 = arith.constant 17 : index
    %c0_287 = arith.constant 0 : index
    %338 = vector.load %arg33[%c17_286, %c0_287] : memref<96x128xf32, #tpu.memory_space<vmem>>, vector<64x25xf32>
    %339 = arith.truncf %338 : vector<64x25xf32> to vector<64x25xbf16>
    %c6_288 = arith.constant 6 : index
    %c0_289 = arith.constant 0 : index
    %c0_290 = arith.constant 0 : index
    %340 = vector.load %arg28[%c6_288, %c0_289, %c0_290] : memref<11x25x128xbf16, #tpu.memory_space<vmem>>, vector<1x25x128xbf16>
    %341 = vector.shape_cast %340 : vector<1x25x128xbf16> to vector<25x128xbf16>
    %cst_291 = arith.constant dense<0.000000e+00> : vector<64x128xf32>
    %342 = tpu.matmul %339, %341, %cst_291 {dimension_numbers = #tpu.dot_dimension_numbers<[1], [0], [0], [1], [0, 0, 1, 1], [], []>} : vector<64x25xbf16>, vector<25x128xbf16>, vector<64x128xf32> -> vector<64x128xf32>
    %343 = arith.addf %337, %342 : vector<64x128xf32>
    %c18_292 = arith.constant 18 : index
    %c0_293 = arith.constant 0 : index
    %344 = vector.load %arg33[%c18_292, %c0_293] : memref<96x128xf32, #tpu.memory_space<vmem>>, vector<64x25xf32>
    %345 = arith.truncf %344 : vector<64x25xf32> to vector<64x25xbf16>
    %c7_294 = arith.constant 7 : index
    %c0_295 = arith.constant 0 : index
    %c0_296 = arith.constant 0 : index
    %346 = vector.load %arg28[%c7_294, %c0_295, %c0_296] : memref<11x25x128xbf16, #tpu.memory_space<vmem>>, vector<1x25x128xbf16>
    %347 = vector.shape_cast %346 : vector<1x25x128xbf16> to vector<25x128xbf16>
    %cst_297 = arith.constant dense<0.000000e+00> : vector<64x128xf32>
    %348 = tpu.matmul %345, %347, %cst_297 {dimension_numbers = #tpu.dot_dimension_numbers<[1], [0], [0], [1], [0, 0, 1, 1], [], []>} : vector<64x25xbf16>, vector<25x128xbf16>, vector<64x128xf32> -> vector<64x128xf32>
    %349 = arith.addf %343, %348 : vector<64x128xf32>
    %c20_298 = arith.constant 20 : index
    %c0_299 = arith.constant 0 : index
    %350 = vector.load %arg33[%c20_298, %c0_299] : memref<96x128xf32, #tpu.memory_space<vmem>>, vector<64x25xf32>
    %351 = arith.truncf %350 : vector<64x25xf32> to vector<64x25xbf16>
    %c8_300 = arith.constant 8 : index
    %c0_301 = arith.constant 0 : index
    %c0_302 = arith.constant 0 : index
    %352 = vector.load %arg28[%c8_300, %c0_301, %c0_302] : memref<11x25x128xbf16, #tpu.memory_space<vmem>>, vector<1x25x128xbf16>
    %353 = vector.shape_cast %352 : vector<1x25x128xbf16> to vector<25x128xbf16>
    %cst_303 = arith.constant dense<0.000000e+00> : vector<64x128xf32>
    %354 = tpu.matmul %351, %353, %cst_303 {dimension_numbers = #tpu.dot_dimension_numbers<[1], [0], [0], [1], [0, 0, 1, 1], [], []>} : vector<64x25xbf16>, vector<25x128xbf16>, vector<64x128xf32> -> vector<64x128xf32>
    %355 = arith.addf %349, %354 : vector<64x128xf32>
    %c24_304 = arith.constant 24 : index
    %c0_305 = arith.constant 0 : index
    %356 = vector.load %arg33[%c24_304, %c0_305] : memref<96x128xf32, #tpu.memory_space<vmem>>, vector<64x25xf32>
    %357 = arith.truncf %356 : vector<64x25xf32> to vector<64x25xbf16>
    %c9_306 = arith.constant 9 : index
    %c0_307 = arith.constant 0 : index
    %c0_308 = arith.constant 0 : index
    %358 = vector.load %arg28[%c9_306, %c0_307, %c0_308] : memref<11x25x128xbf16, #tpu.memory_space<vmem>>, vector<1x25x128xbf16>
    %359 = vector.shape_cast %358 : vector<1x25x128xbf16> to vector<25x128xbf16>
    %cst_309 = arith.constant dense<0.000000e+00> : vector<64x128xf32>
    %360 = tpu.matmul %357, %359, %cst_309 {dimension_numbers = #tpu.dot_dimension_numbers<[1], [0], [0], [1], [0, 0, 1, 1], [], []>} : vector<64x25xbf16>, vector<25x128xbf16>, vector<64x128xf32> -> vector<64x128xf32>
    %361 = arith.addf %355, %360 : vector<64x128xf32>
    %c32_310 = arith.constant 32 : index
    %c0_311 = arith.constant 0 : index
    %362 = vector.load %arg33[%c32_310, %c0_311] : memref<96x128xf32, #tpu.memory_space<vmem>>, vector<64x25xf32>
    %363 = arith.truncf %362 : vector<64x25xf32> to vector<64x25xbf16>
    %c10_312 = arith.constant 10 : index
    %c0_313 = arith.constant 0 : index
    %c0_314 = arith.constant 0 : index
    %364 = vector.load %arg28[%c10_312, %c0_313, %c0_314] : memref<11x25x128xbf16, #tpu.memory_space<vmem>>, vector<1x25x128xbf16>
    %365 = vector.shape_cast %364 : vector<1x25x128xbf16> to vector<25x128xbf16>
    %cst_315 = arith.constant dense<0.000000e+00> : vector<64x128xf32>
    %366 = tpu.matmul %363, %365, %cst_315 {dimension_numbers = #tpu.dot_dimension_numbers<[1], [0], [0], [1], [0, 0, 1, 1], [], []>} : vector<64x25xbf16>, vector<25x128xbf16>, vector<64x128xf32> -> vector<64x128xf32>
    %367 = arith.addf %361, %366 : vector<64x128xf32>
    %368 = vector.broadcast %288 : vector<1x128xf32> to vector<64x128xf32>
    %369 = arith.mulf %367, %368 : vector<64x128xf32>
    %370 = vector.broadcast %289 : vector<1x128xf32> to vector<64x128xf32>
    %371 = arith.addf %369, %370 : vector<64x128xf32>
    %cst_316 = arith.constant 0.000000e+00 : f32
    %372 = vector.broadcast %cst_316 : f32 to vector<64x128xf32>
    %373 = arith.cmpf ogt, %371, %372 : vector<64x128xf32>
    %374 = vector.broadcast %290 : f32 to vector<64x128xf32>
    %375 = arith.mulf %374, %371 : vector<64x128xf32>
    %376 = arith.select %373, %371, %375 : vector<64x128xi1>, vector<64x128xf32>
    %cst_317 = arith.constant dense<0xFF800000> : vector<128xf32>
    %377 = vector.multi_reduction <maximumf>, %376, %cst_317 [0] : vector<64x128xf32> to vector<128xf32>
    %378 = vector.shape_cast %377 : vector<128xf32> to vector<1x128xf32>
    %c0_318 = arith.constant 0 : index
    %c0_319 = arith.constant 0 : index
    %c0_320 = arith.constant 0 : index
    %379 = vector.load %arg32[%c0_318, %c0_319, %c0_320] : memref<1x1x128xf32, #tpu.memory_space<vmem>>, vector<1x1x128xf32>
    %380 = vector.shape_cast %379 : vector<1x1x128xf32> to vector<1x128xf32>
    %381 = vector.shape_cast %378 : vector<1x128xf32> to vector<1x1x128xf32>
    tpu.vector_store %arg32[%c0_318, %c0_319, %c0_320], %381 {strides = array<i32>} : memref<1x1x128xf32, #tpu.memory_space<vmem>>, vector<1x1x128xf32>,
    return
  }
  func.func @transform_0(%arg0: i32) -> (i32, i32, i32) {
    %c0_i32 = arith.constant 0 : i32
    %c0_i32_0 = arith.constant 0 : i32
    %c0_i32_1 = arith.constant 0 : i32
    return %arg0, %c0_i32, %c0_i32_0 : i32, i32, i32
  }
  func.func @transform_1(%arg0: i32) -> (i32, i32) {
    %c0_i32 = arith.constant 0 : i32
    %c0_i32_0 = arith.constant 0 : i32
    %c0_i32_1 = arith.constant 0 : i32
    return %c0_i32, %c0_i32_0 : i32, i32
  }
  func.func @transform_2(%arg0: i32) -> (i32, i32) {
    %c0_i32 = arith.constant 0 : i32
    %c0_i32_0 = arith.constant 0 : i32
    %c0_i32_1 = arith.constant 0 : i32
    return %c0_i32, %c0_i32_0 : i32, i32
  }
  func.func @transform_3(%arg0: i32) -> (i32, i32) {
    %c0_i32 = arith.constant 0 : i32
    %c0_i32_0 = arith.constant 0 : i32
    %c0_i32_1 = arith.constant 0 : i32
    return %c0_i32, %c0_i32_0 : i32, i32
  }
  func.func @transform_4(%arg0: i32) -> (i32, i32) {
    %c0_i32 = arith.constant 0 : i32
    %c0_i32_0 = arith.constant 0 : i32
    %c0_i32_1 = arith.constant 0 : i32
    return %c0_i32, %c0_i32_0 : i32, i32
  }
  func.func @transform_5(%arg0: i32) -> i32 {
    %c0_i32 = arith.constant 0 : i32
    %c0_i32_0 = arith.constant 0 : i32
    return %c0_i32 : i32
  }
  func.func @transform_6(%arg0: i32) -> (i32, i32, i32) {
    %c0_i32 = arith.constant 0 : i32
    %c0_i32_0 = arith.constant 0 : i32
    %c0_i32_1 = arith.constant 0 : i32
    %c0_i32_2 = arith.constant 0 : i32
    return %c0_i32, %c0_i32_0, %c0_i32_1 : i32, i32, i32
  }
  func.func @transform_7(%arg0: i32) -> (i32, i32) {
    %c0_i32 = arith.constant 0 : i32
    %c0_i32_0 = arith.constant 0 : i32
    %c0_i32_1 = arith.constant 0 : i32
    return %c0_i32, %c0_i32_0 : i32, i32
  }
  func.func @transform_8(%arg0: i32) -> (i32, i32) {
    %c0_i32 = arith.constant 0 : i32
    %c0_i32_0 = arith.constant 0 : i32
    %c0_i32_1 = arith.constant 0 : i32
    return %c0_i32, %c0_i32_0 : i32, i32
  }
  func.func @transform_9(%arg0: i32) -> i32 {
    %c0_i32 = arith.constant 0 : i32
    %c0_i32_0 = arith.constant 0 : i32
    return %c0_i32 : i32
  }
  func.func @transform_10(%arg0: i32) -> (i32, i32) {
    %c0_i32 = arith.constant 0 : i32
    %c0_i32_0 = arith.constant 0 : i32
    %c0_i32_1 = arith.constant 0 : i32
    return %c0_i32, %c0_i32_0 : i32, i32
  }
  func.func @transform_11(%arg0: i32) -> (i32, i32) {
    %c0_i32 = arith.constant 0 : i32
    %c0_i32_0 = arith.constant 0 : i32
    %c0_i32_1 = arith.constant 0 : i32
    return %c0_i32, %c0_i32_0 : i32, i32
  }
  func.func @transform_12(%arg0: i32) -> i32 {
    %c0_i32 = arith.constant 0 : i32
    %c0_i32_0 = arith.constant 0 : i32
    return %c0_i32 : i32
  }
  func.func @transform_13(%arg0: i32) -> (i32, i32, i32) {
    %c0_i32 = arith.constant 0 : i32
    %c0_i32_0 = arith.constant 0 : i32
    %c0_i32_1 = arith.constant 0 : i32
    %c0_i32_2 = arith.constant 0 : i32
    return %c0_i32, %c0_i32_0, %c0_i32_1 : i32, i32, i32
  }
  func.func @transform_14(%arg0: i32) -> (i32, i32) {
    %c0_i32 = arith.constant 0 : i32
    %c0_i32_0 = arith.constant 0 : i32
    %c0_i32_1 = arith.constant 0 : i32
    return %c0_i32, %c0_i32_0 : i32, i32
  }
  func.func @transform_15(%arg0: i32) -> (i32, i32) {
    %c0_i32 = arith.constant 0 : i32
    %c0_i32_0 = arith.constant 0 : i32
    %c0_i32_1 = arith.constant 0 : i32
    return %c0_i32, %c0_i32_0 : i32, i32
  }
  func.func @transform_16(%arg0: i32) -> i32 {
    %c0_i32 = arith.constant 0 : i32
    %c0_i32_0 = arith.constant 0 : i32
    return %c0_i32 : i32
  }
  func.func @transform_17(%arg0: i32) -> (i32, i32) {
    %c0_i32 = arith.constant 0 : i32
    %c0_i32_0 = arith.constant 0 : i32
    %c0_i32_1 = arith.constant 0 : i32
    return %c0_i32, %c0_i32_0 : i32, i32
  }
  func.func @transform_18(%arg0: i32) -> (i32, i32) {
    %c0_i32 = arith.constant 0 : i32
    %c0_i32_0 = arith.constant 0 : i32
    %c0_i32_1 = arith.constant 0 : i32
    return %c0_i32, %c0_i32_0 : i32, i32
  }
  func.func @transform_19(%arg0: i32) -> i32 {
    %c0_i32 = arith.constant 0 : i32
    %c0_i32_0 = arith.constant 0 : i32
    return %c0_i32 : i32
  }
  func.func @transform_20(%arg0: i32) -> (i32, i32, i32) {
    %c0_i32 = arith.constant 0 : i32
    %c0_i32_0 = arith.constant 0 : i32
    %c0_i32_1 = arith.constant 0 : i32
    %c0_i32_2 = arith.constant 0 : i32
    return %c0_i32, %c0_i32_0, %c0_i32_1 : i32, i32, i32
  }
  func.func @transform_21(%arg0: i32) -> (i32, i32) {
    %c0_i32 = arith.constant 0 : i32
    %c0_i32_0 = arith.constant 0 : i32
    %c0_i32_1 = arith.constant 0 : i32
    return %c0_i32, %c0_i32_0 : i32, i32
  }
  func.func @transform_22(%arg0: i32) -> (i32, i32) {
    %c0_i32 = arith.constant 0 : i32
    %c0_i32_0 = arith.constant 0 : i32
    %c0_i32_1 = arith.constant 0 : i32
    return %c0_i32, %c0_i32_0 : i32, i32
  }
  func.func @transform_23(%arg0: i32) -> i32 {
    %c0_i32 = arith.constant 0 : i32
    %c0_i32_0 = arith.constant 0 : i32
    return %c0_i32 : i32
  }
  func.func @transform_24(%arg0: i32) -> (i32, i32) {
    %c0_i32 = arith.constant 0 : i32
    %c0_i32_0 = arith.constant 0 : i32
    %c0_i32_1 = arith.constant 0 : i32
    return %c0_i32, %c0_i32_0 : i32, i32
  }
  func.func @transform_25(%arg0: i32) -> (i32, i32) {
    %c0_i32 = arith.constant 0 : i32
    %c0_i32_0 = arith.constant 0 : i32
    %c0_i32_1 = arith.constant 0 : i32
    return %c0_i32, %c0_i32_0 : i32, i32
  }
  func.func @transform_26(%arg0: i32) -> i32 {
    %c0_i32 = arith.constant 0 : i32
    %c0_i32_0 = arith.constant 0 : i32
    return %c0_i32 : i32
  }
  func.func @transform_27(%arg0: i32) -> (i32, i32, i32) {
    %c0_i32 = arith.constant 0 : i32
    %c0_i32_0 = arith.constant 0 : i32
    %c0_i32_1 = arith.constant 0 : i32
    %c0_i32_2 = arith.constant 0 : i32
    return %c0_i32, %c0_i32_0, %c0_i32_1 : i32, i32, i32
  }
  func.func @transform_28(%arg0: i32) -> (i32, i32) {
    %c0_i32 = arith.constant 0 : i32
    %c0_i32_0 = arith.constant 0 : i32
    %c0_i32_1 = arith.constant 0 : i32
    return %c0_i32, %c0_i32_0 : i32, i32
  }
  func.func @transform_29(%arg0: i32) -> (i32, i32) {
    %c0_i32 = arith.constant 0 : i32
    %c0_i32_0 = arith.constant 0 : i32
    %c0_i32_1 = arith.constant 0 : i32
    return %c0_i32, %c0_i32_0 : i32, i32
  }
  func.func @transform_30(%arg0: i32) -> i32 {
    %c0_i32 = arith.constant 0 : i32
    %c0_i32_0 = arith.constant 0 : i32
    return %c0_i32 : i32
  }
  func.func @transform_31(%arg0: i32) -> (i32, i32, i32) {
    %c0_i32 = arith.constant 0 : i32
    %c0_i32_0 = arith.constant 0 : i32
    %c0_i32_1 = arith.constant 0 : i32
    return %arg0, %c0_i32, %c0_i32_0 : i32, i32, i32
  }
}

</mosaic_0001>

<bundles_post_ra>
// kernel: capla_forward.8
= control target key start
LH: loop header
LB: loop body
LE: loop exit
PB: predicated region body
PF: predicated region fallthrough
CT: control target
= control target key end

     0   :  { %vm67_vm0 = vcmask 1043456   ;;  %vm54_vm1 = vcmask 326656   ;;  %s272_s1 = inlined_call_operand.vmem [shape: bf16[40,128], index: 1, kind: input, shape index: {}]   ;;  %s273_s0 = inlined_call_operand.vmem [shape: f32[64,40], index: 0, kind: input, shape index: {}]   ;;  %s274_s2 = inlined_call_operand.vmem [shape: f32[1,128], index: 2, kind: input, shape index: {}]   ;;  %s275_s3 = inlined_call_operand.vmem [shape: f32[64,128], index: 3, kind: output, shape index: {}]  }
   0x1   :  { %v185_v0 = vld [vmem:[%s272_s1 + $0x10] ss:$0 sps:$4 sm:$0xff]   ;;  %v186_v1 = vld [vmem:[%s272_s1 + $0x8] sm:$0xff]   ;;  %v15_v3 = vld [vmem:[%s273_s0] sm:$0xff] }
   0x2   :  { %183 = vmatprep.subr.msk.bf16.mxu0 %vm67_vm0, %v185_v0  ;;  %184 = vmatprep.subr.msk.bf16.mxu1 %vm67_vm0, %v185_v0  ;;  %v69_v2 = vsel %vm67_vm0, %v185_v0, 0  ;;  %v16_v4 = vld [vmem:[%s273_s0 + $0x8] sm:$0xff]  ;;  %v19_v5 = vld [vmem:[%s273_s0 + $0x20] sm:$0xff]  ;;  %v17_v10 = vld [vmem:[%s273_s0 + $0x10] sm:$0xff] }
   0x3   :  { %164 = vmatpush3.bf16.msra.mxu0 %v69_v2  ;;  %180 = vmatpush3.bf16.msra.mxu1 %v69_v2  ;;  %v20_v6 = vld [vmem:[%s273_s0 + $0x28] sm:$0xff]  ;;  %v187_v7 = vld [vmem:[%s272_s1] sm:$0xff]   ;;  %v23_v8 = vpack.c.bf16 %v16_v4, %v15_v3  ;;  %v18_v11 = vld [vmem:[%s273_s0 + $0x18] sm:$0xff] }
   0x4   :  { %165 = vmatprep.subr.bf16.mxu0 %v186_v1  ;;  %178 = vmatprep.subr.bf16.mxu1 %v186_v1  ;;  %v25_v9 = vpack.c.bf16 %v20_v6, %v19_v5  ;;  %v21_v12 = vld [vmem:[%s273_s0 + $0x30] sm:$0xff]  ;;  %v22_v13 = vld [vmem:[%s273_s0 + $0x38] sm:$0xff]  ;;  %v24_v14 = vpack.c.bf16 %v18_v11, %v17_v10  ;;  %v148_v16 = vld [vmem:[%s274_s2] ss:$0 sm:$0xff] }
   0x5   :  { %169 = vmatprep.mubr.msk.bf16.mxu0 %vm54_vm1, %v23_v8  ;;  %v26_v15 = vpack.c.bf16 %v22_v13, %v21_v12 }
   0x6   :  { %173 = vmatprep.mubr.msk.bf16.mxu1 %vm54_vm1, %v25_v9 }
   0x7   :  { %166 = vmatpush3.bf16.msra.mxu0 %v186_v1  ;;  %181 = vmatpush3.bf16.msra.mxu1 %v186_v1 }
   0x8   :  { %167 = vmatprep.subr.bf16.mxu0 %v187_v7  ;;  %179 = vmatprep.subr.bf16.mxu1 %v187_v7 }
   0xb   :  { %168 = vmatpush3.bf16.msra.mxu0 %v187_v7  ;;  %182 = vmatpush3.bf16.msra.mxu1 %v187_v7 }
   0xe   :  { %170 = vmatmul.mubr.msk.bf16.vlgmr.msra.gmra.mxu0 %vm54_vm1, %v24_v14  ;;  %174 = vmatmul.mubr.msk.bf16.vlgmr.msra.gmra.mxu1 %vm54_vm1, %v26_v15 }
  0xce   :  { %v171_v17 = vpop.f32.mrf.mxu0  ;;  %v175_v18 = vpop.f32.mrf.mxu1 }
  0xcf   :  { %v114_v19 = vadd.f32 %v171_v17, %v148_v16  ;;  %v130_v20 = vadd.f32 %v175_v18, %v148_v16 }
  0xd0   :  { %v105_v21 = vpop.f32.mrf.mxu0  ;;  %v121_v22 = vpop.f32.mrf.mxu1 }
  0xd1   :  { %138 = vst [vmem:[%s275_s3 + $0x10] sm:$0xff] %v114_v19  ;;  %142 = vst [vmem:[%s275_s3 + $0x30] sm:$0xff] %v130_v20  ;;  %v106_v23 = vadd.f32 %v148_v16, %v105_v21  ;;  %v122_v24 = vadd.f32 %v148_v16, %v121_v22 }
  0xd2   :  { %v172_v25 = vpop.f32.mrf.mxu0  ;;  %v176_v26 = vpop.f32.mrf.mxu1 }
  0xd3   :  { %136 = vst [vmem:[%s275_s3] sm:$0xff] %v106_v23  ;;  %140 = vst [vmem:[%s275_s3 + $0x20] sm:$0xff] %v122_v24  ;;  %v117_v27 = vadd.f32 %v172_v25, %v148_v16  ;;  %v133_v28 = vadd.f32 %v176_v26, %v148_v16 }
  0xd4   :  { %v108_v29 = vpop.f32.mrf.mxu0  ;;  %v124_v30 = vpop.f32.mrf.mxu1 }
  0xd5   :  { %139 = vst [vmem:[%s275_s3 + $0x18] sm:$0xff] %v117_v27  ;;  %143 = vst [vmem:[%s275_s3 + $0x38] sm:$0xff] %v133_v28  ;;  %v109_v31 = vadd.f32 %v148_v16, %v108_v29  ;;  %v125_v32 = vadd.f32 %v148_v16, %v124_v30 }
  0xd7   :  { %137 = vst [vmem:[%s275_s3 + $0x8] sm:$0xff] %v109_v31  ;;  %141 = vst [vmem:[%s275_s3 + $0x28] sm:$0xff] %v125_v32 }

// kernel: capla_forward.10
= control target key start
LH: loop header
LB: loop body
LE: loop exit
PB: predicated region body
PF: predicated region fallthrough
CT: control target
= control target key end

     0   :  { %s2392_s21 = smov 0   ;;  %s2737_s0 = inlined_call_operand.vmem [shape: f32[2,32,128], index: 0, kind: input, shape index: {}]   ;;  %s2738_s1 = inlined_call_operand.vmem [shape: f32[2,32,128], index: 1, kind: input, shape index: {}]   ;;  %s2739_s2 = inlined_call_operand.vmem [shape: bf16[128,128], index: 2, kind: input, shape index: {}]   ;;  %s2740_s3 = inlined_call_operand.vmem [shape: f32[1,128], index: 3, kind: input, shape index: {}]   ;;  %s2741_s4 = inlined_call_operand.vmem [shape: bf16[128,128], index: 4, kind: input, shape index: {}]   ;;  %s2742_s5 = inlined_call_operand.vmem [shape: f32[1,128], index: 5, kind: input, shape index: {}]   ;;  %s2743_s6 = inlined_call_operand.vmem [shape: bf16[128,128], index: 6, kind: input, shape index: {}]   ;;  %s2744_s7 = inlined_call_operand.vmem [shape: f32[1,128], index: 7, kind: input, shape index: {}]   ;;  %s2745_s8 = inlined_call_operand.vmem [shape: bf16[128,128], index: 8, kind: input, shape index: {}]   ;;  %s2746_s9 = inlined_call_operand.vmem [shape: f32[1,128], index: 9, kind: input, shape index: {}]   ;;  %s2747_s10 = inlined_call_operand.vmem [shape: f32[1,128], index: 10, kind: input, shape index: {}]   ;;  %s2748_s11 = inlined_call_operand.vmem [shape: f32[1,128], index: 11, kind: input, shape index: {}]   ;;  %s2749_s12 = inlined_call_operand.vmem [shape: bf16[128,128], index: 12, kind: input, shape index: {}]   ;;  %s2750_s13 = inlined_call_operand.vmem [shape: f32[1,128], index: 13, kind: input, shape index: {}]   ;;  %s2751_s14 = inlined_call_operand.vmem [shape: bf16[128,128], index: 14, kind: input, shape index: {}]   ;;  %s2752_s15 = inlined_call_operand.vmem [shape: f32[1,128], index: 15, kind: input, shape index: {}]   ;;  %s2753_s16 = inlined_call_operand.vmem [shape: f32[2,32,128], index: 16, kind: output, shape index: {}]  }
   0x1   :  { %2754 = sst [smem:[#allocation2_spill]] %s2737_s0 }
   0x2 LB: > { %s1871_s22 = sadd.s32 4294967295, %s2304_s21   ;;  %p1875_p0 = scmp.ge.s32.totalorder %s2304_s21, 1  ;;  %s2304_s21 = sphi %s2392_s21, %s26_s21  }
   0x3   : > { %p472_p1 = scmp.lt.s32.totalorder %s2304_s21, 3 }
   0x5   : > { %p473_p2 = pnand %p1875_p0, %p472_p1 }
   0x6   : > { %p527_p3 = scmp.lt.s32.totalorder (!%p473_p2), %s1871_s22, 1  ;;  %s2755_s20 = sld [smem:[#allocation2_spill]] (!%p473_p2) }
   0x7   : > { %476 = sbr.rel (%p473_p2) target bundleno = 2881 (0xb41), region = 84  ;;  %s2306_s18 = smov (!%p473_p2), 64  }
   0xc   : > { %v2202_v0 = vld [vmem:[%s2741_s4 + $0x38] sm:$0xff]   ;;  %v2203_v1 = vld [vmem:[%s2741_s4 + $0x30] sm:$0xff]   ;;  %v2205_v3 = vld [vmem:[%s2741_s4 + $0x28] sm:$0xff]   ;;  %s2757_s22 = smov (!%p527_p3, %s1871_s22), 1  ;;  %vm923_vm0 = vcmask 523264   ;;  %vm989_vm1 = vcmask 261120  }
   0xd   : > { %2047 = vmatprep.subr.bf16.mxu1 %v2202_v0  ;;  %v2204_v2 = vld [vmem:[%s2739_s2 + $0x38] sm:$0xff]   ;;  %v2206_v4 = vld [vmem:[%s2739_s2 + $0x30] sm:$0xff]   ;;  %v2208_v5 = vld [vmem:[%s2739_s2 + $0x28] sm:$0xff]   ;;  %s2421_s24 = sshll.u32 %s2757_s22, 5 }
   0xe   : > { %2048 = vmatpush3.bf16.msra.mxu1 %v2202_v0  ;;  %2027 = vmatprep.subr.bf16.mxu0 %v2204_v2  ;;  %v2207_v6 = vld [vmem:[%s2741_s4 + $0x20] sm:$0xff]   ;;  %v2209_v8 = vld [vmem:[%s2741_s4 + $0x18] sm:$0xff]   ;;  %s2433_s0 = scalar_lea.vmem %s2738_s1, %s2421_s24  ;;  %s2442_s23 = scalar_lea.vmem %s2755_s20, %s2421_s24  ;;  %v2211_v12 = vld [vmem:[%s2741_s4 + $0x10] sm:$0xff]  }
   0xf   : > { %2049 = vmatprep.subr.bf16.mxu1 %v2203_v1  ;;  %2028 = vmatpush3.bf16.msra.mxu0 %v2204_v2  ;;  %v2210_v7 = vld [vmem:[%s2739_s2 + $0x20] sm:$0xff]   ;;  %v2212_v9 = vld [vmem:[%s2739_s2 + $0x18] sm:$0xff]   ;;  %v548_v11 = vld [vmem:[%s2433_s0 + $0x8] sm:$0xff]  ;;  %s541_s29 = scalar_lea.vmem %s2753_s16, %s2421_s24 }
  0x10   : > { %2029 = vmatprep.subr.bf16.mxu0 %v2206_v4  ;;  %v547_v10 = vld [vmem:[%s2433_s0] sm:$0xff]  ;;  %v2453_v15 = vld [vmem:[%s2442_s23 + $0x8] sm:$0xff]  ;;  %v2214_v17 = vld [vmem:[%s2739_s2 + $0x10] sm:$0xff]  }
  0x11   : > { %v675_v13 = vpack.c.bf16 %v548_v11, %v547_v10  ;;  %v2450_v14 = vld [vmem:[%s2442_s23] sm:$0xff]  ;;  %v2213_v16 = vld [vmem:[%s2741_s4 + $0x8] sm:$0xff]   ;;  %v549_v22 = vld [vmem:[%s2433_s0 + $0x10] sm:$0xff] }
  0x12   : > { %2050 = vmatpush3.bf16.msra.mxu1 %v2203_v1  ;;  %v553_v18 = vpack.c.bf16 %v2453_v15, %v2450_v14  ;;  %v2216_v19 = vld [vmem:[%s2739_s2 + $0x8] sm:$0xff]   ;;  %v2215_v20 = vld [vmem:[%s2741_s4] sm:$0xff]   ;;  %v550_v23 = vld [vmem:[%s2433_s0 + $0x18] sm:$0xff] }
  0x13   : > { %2051 = vmatprep.subr.bf16.mxu1 %v2205_v3  ;;  %2030 = vmatpush3.bf16.msra.mxu0 %v2206_v4  ;;  %v2217_v21 = vld [vmem:[%s2739_s2] sm:$0xff]   ;;  %v2475_v24 = vld [vmem:[%s2442_s23 + $0x10] sm:$0xff]  ;;  %v2478_v25 = vld [vmem:[%s2442_s23 + $0x18] sm:$0xff]  ;;  %v676_v26 = vpack.c.bf16 %v550_v23, %v549_v22 }
  0x14   : > { %2031 = vmatprep.subr.bf16.mxu0 %v2208_v5  ;;  %2063 = vmatprep.mubr.bf16.mxu1 %v675_v13  ;;  %v554_v27 = vpack.c.bf16 %v2478_v25, %v2475_v24  ;;  %v1891_v29 = vld [vmem:[%s2742_s5] ss:$0 sm:$0xff]  ;;  %v2218_v52 = vld [vmem:[%s2743_s6 + $0x38] sm:$0xff]   ;;  %v2219_v53 = vld [vmem:[%s2743_s6 + $0x30] sm:$0xff]  }
  0x15   : > { %2043 = vmatprep.mubr.bf16.mxu0 %v553_v18  ;;  %v1882_v33 = vld [vmem:[%s2740_s3] ss:$0 sm:$0xff]  ;;  %v2220_v54 = vld [vmem:[%s2743_s6 + $0x28] sm:$0xff]   ;;  %v2222_v56 = vld [vmem:[%s2743_s6 + $0x18] sm:$0xff]  }
  0x16   : > { %2052 = vmatpush3.bf16.msra.mxu1 %v2205_v3  ;;  %v2221_v55 = vld [vmem:[%s2743_s6 + $0x20] sm:$0xff]   ;;  %v2223_v57 = vld [vmem:[%s2743_s6 + $0x10] sm:$0xff]   ;;  %v2224_v58 = vld [vmem:[%s2743_s6 + $0x8] sm:$0xff]  }
  0x17   : > { %2053 = vmatprep.subr.bf16.mxu1 %v2207_v6  ;;  %2032 = vmatpush3.bf16.msra.mxu0 %v2208_v5  ;;  %v2225_v59 = vld [vmem:[%s2743_s6] sm:$0xff]  }
  0x18   : > { %2033 = vmatprep.subr.bf16.mxu0 %v2210_v7 }
  0x1a   : > { %2054 = vmatpush3.bf16.msra.mxu1 %v2207_v6 }
  0x1b   : > { %2055 = vmatprep.subr.bf16.mxu1 %v2209_v8  ;;  %2034 = vmatpush3.bf16.msra.mxu0 %v2210_v7 }
  0x1c   : > { %2035 = vmatprep.subr.bf16.mxu0 %v2212_v9 }
  0x1e   : > { %2056 = vmatpush3.bf16.msra.mxu1 %v2209_v8 }
  0x1f   : > { %2057 = vmatprep.subr.bf16.mxu1 %v2211_v12  ;;  %2036 = vmatpush3.bf16.msra.mxu0 %v2212_v9  ;;  %v1900_v9 = vld [vmem:[%s2744_s7] ss:$0 sm:$0xff] }
  0x20   : > { %2037 = vmatprep.subr.bf16.mxu0 %v2214_v17 }
  0x22   : > { %2058 = vmatpush3.bf16.msra.mxu1 %v2211_v12 }
  0x23   : > { %2059 = vmatprep.subr.bf16.mxu1 %v2213_v16  ;;  %2038 = vmatpush3.bf16.msra.mxu0 %v2214_v17 }
  0x24   : > { %2039 = vmatprep.subr.bf16.mxu0 %v2216_v19 }
  0x26   : > { %2060 = vmatpush3.bf16.msra.mxu1 %v2213_v16 }
  0x27   : > { %2061 = vmatprep.subr.bf16.mxu1 %v2215_v20  ;;  %2040 = vmatpush3.bf16.msra.mxu0 %v2216_v19 }
  0x28   : > { %2041 = vmatprep.subr.bf16.mxu0 %v2217_v21 }
  0x2a   : > { %2062 = vmatpush3.bf16.msra.mxu1 %v2215_v20 }
  0x2b   : > { %2042 = vmatpush3.bf16.msra.mxu0 %v2217_v21 }
  0x2c   : > { %2067 = vmatprep.subr.bf16.mxu0 %v2218_v52 }
  0x2d   : > { %2064 = vmatmul.mubr.bf16.vlgmr.msra.gmra.mxu1 %v676_v26 }
  0x2e   : > { %2044 = vmatmul.mubr.bf16.vlgmr.msra.gmra.mxu0 %v554_v27 }
  0x2f   : > { %2083 = vmatprep.mubr.bf16.mxu0 %v675_v13  ;;  %2068 = vmatpush3.bf16.msra.mxu0 %v2218_v52 }
  0x30   : > { %2069 = vmatprep.subr.bf16.mxu0 %v2219_v53 }
  0x33   : > { %2070 = vmatpush3.bf16.msra.mxu0 %v2219_v53 }
  0x34   : > { %2071 = vmatprep.subr.bf16.mxu0 %v2220_v54 }
  0x37   : > { %2072 = vmatpush3.bf16.msra.mxu0 %v2220_v54 }
  0x38   : > { %2073 = vmatprep.subr.bf16.mxu0 %v2221_v55 }
  0x3b   : > { %2074 = vmatpush3.bf16.msra.mxu0 %v2221_v55 }
  0x3c   : > { %2075 = vmatprep.subr.bf16.mxu0 %v2222_v56 }
  0x3f   : > { %2076 = vmatpush3.bf16.msra.mxu0 %v2222_v56 }
  0x40   : > { %2077 = vmatprep.subr.bf16.mxu0 %v2223_v57 }
  0x43   : > { %2078 = vmatpush3.bf16.msra.mxu0 %v2223_v57 }
  0x44   : > { %2079 = vmatprep.subr.bf16.mxu0 %v2224_v58 }
  0x47   : > { %2080 = vmatpush3.bf16.msra.mxu0 %v2224_v58 }
  0x48   : > { %2081 = vmatprep.subr.bf16.mxu0 %v2225_v59 }
  0x4b   : > { %2082 = vmatpush3.bf16.msra.mxu0 %v2225_v59 }
  0x4e   : > { %2084 = vmatmul.mubr.bf16.vlgmr.msra.gmra.mxu0 %v676_v26 }
  0xed   : > { %v2065_v28 = vpop.f32.mrf.mxu1 }
  0xee   : > { %v2045_v31 = vpop.f32.mrf.mxu0  ;;  %v791_v35 = vadd.f32 %v2065_v28, %v1891_v29 }
  0xef   : > { %v782_v30 = vpop.f32.mrf.mxu1  ;;  %v669_v49 = vadd.f32 %v2045_v31, %v1882_v33 }
  0xf0   : > { %v660_v34 = vpop.f32.mrf.mxu0  ;;  %v783_v39 = vadd.f32 %v1891_v29, %v782_v30 }
  0xf1   : > { %v2066_v32 = vpop.f32.mrf.mxu1  ;;  %v661_v42 = vadd.f32 %v1882_v33, %v660_v34 }
  0xf2   : > { %v794_v36 = vadd.f32 %v2066_v32, %v1891_v29  ;;  %v2046_v38 = vpop.f32.mrf.mxu0 }
  0xf3   : > { %v785_v37 = vpop.f32.mrf.mxu1  ;;  %v672_v50 = vadd.f32 %v2046_v38, %v1882_v33 }
  0xf4   : > { %v2488_v40 = vpack.c.bf16 %v794_v36, %v791_v35  ;;  %v786_v41 = vadd.f32 %v1891_v29, %v785_v37  ;;  %v663_v43 = vpop.f32.mrf.mxu0 }
  0xf5   : > { %v664_v46 = vadd.f32 %v1882_v33, %v663_v43  ;;  %v2504_v51 = vpack.c.bf16 %v672_v50, %v669_v49 }
  0xf6   : > { %v2490_v44 = vpack.c.bf16 %v786_v41, %v783_v39  ;;  %2179 = vmatprep.subr.msk.bf16.mxu1 %vm923_vm0, %v2488_v40  ;;  %v934_v45 = vsel %vm923_vm0, %v2488_v40, 0 }
  0xf7   : > { %2088 = vmatpush3.bf16.xpose.msra.mxu1 %v934_v45  ;;  %v2498_v47 = vpack.c.bf16 %v664_v46, %v661_v42 }
  0xf8   : > { %2180 = vmatprep.subr.msk.bf16.mxu1 %vm923_vm0, %v2490_v44  ;;  %v931_v48 = vsel %vm923_vm0, %v2490_v44, 0 }
  0xf9   : > { %2091 = vmatprep.mubr.msk.bf16.mxu1 %vm923_vm0, %v2498_v47 }
  0xff   : > { %2090 = vmatpush3.bf16.xpose.msra.mxu1 %v931_v48 }
 0x106   : > { %2092 = vmatmul.mubr.msk.bf16.vlgmr.msra.gmra.mxu1 %vm923_vm0, %v2504_v51 }
 0x10e   : > { %v2085_v8 = vpop.f32.mrf.mxu0 }
 0x10f   : > { %v911_v11 = vadd.f32 %v2085_v8, %v1900_v9 }
 0x110   : > { %v902_v10 = vpop.f32.mrf.mxu0 }
 0x111   : > { %v903_v39 = vadd.f32 %v1900_v9, %v902_v10 }
 0x112   : > { %v2086_v12 = vpop.f32.mrf.mxu0 }
 0x113   : > { %v914_v13 = vadd.f32 %v2086_v12, %v1900_v9 }
 0x114   : > { %v905_v41 = vpop.f32.mrf.mxu0 }
 0x115   : > { %v2539_v16 = vpack.c.bf16 %v914_v13, %v911_v11  ;;  %v906_v42 = vadd.f32 %v1900_v9, %v905_v41 }
 0x117   : > { %2095 = vmatprep.subr.bf16.mxu1 %v2539_v16  ;;  %v2547_v43 = vpack.c.bf16 %v906_v42, %v903_v39 }
 0x118   : > { %2096 = vmatpush3.bf16.msra.mxu1 %v2539_v16 }
 0x119   : > { %2097 = vmatprep.subr.bf16.mxu1 %v2547_v43 }
 0x11c   : > { %2098 = vmatpush3.bf16.msra.mxu1 %v2547_v43 }
 0x1c6   : > { %v2093_v60 = vpop.f32.mrf.mxu1 }
 0x1c7   : > { %v987_v61 = vmul.f32 0.125, %v2093_v60 }
 0x1c8   : > { %v970_v62 = vpop.f32.mrf.mxu1 }
 0x1c9   : > { %v985_v63 = vmul.f32 0.125, %v970_v62  ;;  %v996_v0 = vsel %vm989_vm1, %v987_v61, -inf }
 0x1ca   : > { %997 = vmax.xlane.f32.xlu1 %v996_v0  ;;  %v2094_v1 = vpop.f32.mrf.mxu1 }
 0x1cb   : > { %v988_v2 = vmul.f32 0.125, %v2094_v1  ;;  %v990_v3 = vsel %vm989_vm1, %v985_v63, -inf }
 0x1cc   : > { %991 = vmax.xlane.f32.xlu0 %v990_v3  ;;  %v973_v4 = vpop.f32.mrf.mxu1 }
 0x1cd   : > { %v986_v5 = vmul.f32 0.125, %v973_v4  ;;  %v999_v6 = vsel %vm989_vm1, %v988_v2, -inf }
 0x1ce   : > { %1000 = vmax.xlane.f32.xlu1 %v999_v6 }
 0x1cf   : > { %v993_v7 = vsel %vm989_vm1, %v986_v5, -inf }
 0x1d0   : > { %994 = vmax.xlane.f32.xlu0 %v993_v7 }
 0x253   : > { %v998_v17 = vpop.xlane.xlu1 %997 }
 0x254   : > { %v1004_v18 = vsub.f32 %v987_v61, %v998_v17 }
 0x255   : > { %v992_v19 = vpop.xlane.xlu0 %991 }
 0x256   : > { %v1010_v20 = vmul.f32 1.442695, %v1004_v18  ;;  %v1002_v21 = vsub.f32 %v985_v63, %v992_v19 }
 0x257   : > { %v1001_v22 = vpop.xlane.xlu1 %1000 }
 0x258   : > { %2250 = vpow2.f32 %v1010_v20  ;;  %v1006_v23 = vmul.f32 1.442695, %v1002_v21  ;;  %v1005_v26 = vsub.f32 %v988_v2, %v1001_v22 }
 0x259   : > { %v995_v27 = vpop.xlane.xlu0 %994 }
 0x25a   : > { %2252 = vpow2.f32 %v1006_v23  ;;  %v1003_v28 = vsub.f32 %v986_v5, %v995_v27  ;;  %v1012_v29 = vmul.f32 1.442695, %v1005_v26 }
 0x25c   : > { %v1008_v30 = vmul.f32 1.442695, %v1003_v28 }
 0x25e   : > { %2254 = vpow2.f32 %v1008_v30 }
 0x25f   : > { %2256 = vpow2.f32 %v1012_v29 }
 0x265   : > { %v2251_v31 = vpop.eup %2250 }
 0x266   : > { %v1020_v32 = vsel %vm989_vm1, %v2251_v31, 0.0 }
 0x267   : > { %v2253_v33 = vpop.eup %2252  ;;  %1021 = vadd.xlane.f32.xlu0 %v1020_v32 }
 0x268   : > { %v1014_v34 = vsel %vm989_vm1, %v2253_v33, 0.0 }
 0x26b   : > { %v2255_v35 = vpop.eup %2254  ;;  %1015 = vadd.xlane.f32.xlu0 %v1014_v34 }
 0x26c   : > { %v1017_v36 = vsel %vm989_vm1, %v2255_v35, 0.0  ;;  %v2257_v37 = vpop.eup %2256 }
 0x26d   : > { %1018 = vadd.xlane.f32.xlu1 %v1017_v36  ;;  %v1023_v38 = vsel %vm989_vm1, %v2257_v37, 0.0 }
 0x271   : > { %1024 = vadd.xlane.f32.xlu1 %v1023_v38 }
 0x281   : > { %1101 = vrot.lane.b32.xlu0 %v2488_v40, %s2306_s18 }
 0x282   : > { %1099 = vrot.lane.b32.xlu1 %v2490_v44, %s2306_s18 }
 0x286   : > { %1093 = vrot.lane.b32.xlu1 %v2498_v47, %s2306_s18 }
 0x28a   : > { %1095 = vrot.lane.b32.xlu1 %v2504_v51, %s2306_s18 }
 0x2f0   : > { %v1022_v45 = vpop.xlane.xlu0 %1021 }
 0x2f4   : > { %v1016_v46 = vpop.xlane.xlu0 %1015 }
 0x2f5   : > { %2258 = vrcp.f32 %v1016_v46 }
 0x2f6   : > { %v1019_v48 = vpop.xlane.xlu1 %1018 }
 0x2f7   : > { %2260 = vrcp.f32 %v1019_v48 }
 0x2f8   : > { %v1102_v49 = vpop.permute.xlu0 %1101  ;;  %2262 = vrcp.f32 %v1022_v45 }
 0x2f9   : > { %2181 = vmatprep.subr.msk.bf16.mxu1 %vm923_vm0, %v1102_v49  ;;  %v1113_v59 = vsel %vm923_vm0, %v1102_v49, 0 }
 0x2fa   : > { %v1025_v50 = vpop.xlane.xlu1 %1024 }
 0x2fb   : > { %2264 = vrcp.f32 %v1025_v50 }
 0x2fe   : > { %v1100_v47 = vpop.permute.xlu1 %1099 }
 0x2ff   : > { %v1110_v61 = vsel %vm923_vm0, %v1100_v47, 0 }
 0x302   : > { %v2259_v40 = vpop.eup %2258  ;;  %v1094_v60 = vpop.permute.xlu1 %1093 }
 0x303   : > { %v1030_v44 = vmul.f32 %v2259_v40, %v2253_v33 }
 0x304   : > { %v2261_v52 = vpop.eup %2260 }
 0x305   : > { %v1031_v53 = vmul.f32 %v2261_v52, %v2255_v35  ;;  %v2263_v54 = vpop.eup %2262 }
 0x306   : > { %v1032_v51 = vmul.f32 %v2263_v54, %v2251_v31  ;;  %v1096_v62 = vpop.permute.xlu1 %1095 }
 0x307   : > { %v1034_v55 = vpack.c.bf16 %v1031_v53, %v1030_v44 }
 0x308   : > { %v2265_v56 = vpop.eup %2264 }
 0x309   : > { %2099 = vmatprep.mubr.msk.bf16.mxu1 %vm989_vm1, %v1034_v55  ;;  %v1033_v57 = vmul.f32 %v2265_v56, %v2257_v37  ;;  %v2226_v56 = vld [vmem:[%s2745_s8 + $0x38] sm:$0xff]  }
 0x30a   : > { %2119 = vmatprep.subr.bf16.mxu0 %v2226_v56 }
 0x30b   : > { %v1035_v58 = vpack.c.bf16 %v1033_v57, %v1032_v51  ;;  %v2227_v51 = vld [vmem:[%s2745_s8 + $0x30] sm:$0xff]   ;;  %2120 = vmatpush3.bf16.msra.mxu0 %v2226_v56  ;;  %v2228_v57 = vld [vmem:[%s2745_s8 + $0x28] sm:$0xff]  }
 0x30c   : > { %2121 = vmatprep.subr.bf16.mxu0 %v2227_v51  ;;  %v2243_v56 = vld [vmem:[%s2751_s14 + $0x30] sm:$0xff]  }
 0x30d   : > { %2100 = vmatmul.mubr.msk.bf16.vlgmr.msra.gmra.mxu1 %vm989_vm1, %v1035_v58  ;;  %v2229_v58 = vld [vmem:[%s2745_s8 + $0x20] sm:$0xff]  }
 0x30e   : > { %2104 = vmatpush3.bf16.xpose.msra.mxu1 %v1113_v59  ;;  %2107 = vmatprep.mubr.msk.bf16.mxu1 %vm923_vm0, %v1094_v60  ;;  %v2230_v59 = vld [vmem:[%s2745_s8 + $0x18] sm:$0xff]   ;;  %v2231_v60 = vld [vmem:[%s2745_s8 + $0x10] sm:$0xff]  }
 0x30f   : > { %2182 = vmatprep.subr.msk.bf16.mxu1 %vm923_vm0, %v1100_v47  ;;  %2122 = vmatpush3.bf16.msra.mxu0 %v2227_v51  ;;  %v2244_v51 = vld [vmem:[%s2751_s14 + $0x28] sm:$0xff]  }
 0x310   : > { %2123 = vmatprep.subr.bf16.mxu0 %v2228_v57 }
 0x313   : > { %2124 = vmatpush3.bf16.msra.mxu0 %v2228_v57  ;;  %v2245_v57 = vld [vmem:[%s2751_s14 + $0x20] sm:$0xff]  }
 0x314   : > { %2125 = vmatprep.subr.bf16.mxu0 %v2229_v58 }
 0x316   : > { %2106 = vmatpush3.bf16.xpose.msra.mxu1 %v1110_v61  ;;  %v2232_v61 = vld [vmem:[%s2745_s8 + $0x8] sm:$0xff]  }
 0x317   : > { %2126 = vmatpush3.bf16.msra.mxu0 %v2229_v58  ;;  %v2246_v58 = vld [vmem:[%s2751_s14 + $0x18] sm:$0xff]  }
 0x318   : > { %2127 = vmatprep.subr.bf16.mxu0 %v2230_v59 }
 0x31b   : > { %2128 = vmatpush3.bf16.msra.mxu0 %v2230_v59 }
 0x31c   : > { %2129 = vmatprep.subr.bf16.mxu0 %v2231_v60 }
 0x31d   : > { %2108 = vmatmul.mubr.msk.bf16.vlgmr.msra.gmra.mxu1 %vm923_vm0, %v1096_v62 }
 0x31f   : > { %2130 = vmatpush3.bf16.msra.mxu0 %v2231_v60 }
 0x320   : > { %2131 = vmatprep.subr.bf16.mxu0 %v2232_v61 }
 0x323   : > { %2132 = vmatpush3.bf16.msra.mxu0 %v2232_v61 }
 0x3cd   : > { %v2567_v63 = vpop.f32.mrf.mxu1 }
 0x3cf   : > { %v2569_v0 = vpop.f32.mrf.mxu1 }
 0x3d1   : > { %v2571_v1 = vpop.f32.mrf.mxu1 }
 0x3d3   : > { %v2573_v2 = vpop.f32.mrf.mxu1 }
 0x3dd   : > { %v2109_v3 = vpop.f32.mrf.mxu1 }
 0x3de   : > { %v1166_v7 = vmul.f32 0.125, %v2109_v3  ;;  %v2233_v3 = vld [vmem:[%s2745_s8] sm:$0xff]  }
 0x3df   : > { %v1149_v4 = vpop.f32.mrf.mxu1  ;;  %2133 = vmatprep.subr.bf16.mxu0 %v2233_v3 }
 0x3e0   : > { %v1164_v5 = vmul.f32 0.125, %v1149_v4  ;;  %v1174_v12 = vsel %vm989_vm1, %v1166_v7, -inf  ;;  %2134 = vmatpush3.bf16.msra.mxu0 %v2233_v3 }
 0x3e1   : > { %v2110_v6 = vpop.f32.mrf.mxu1 }
 0x3e2   : > { %v1168_v8 = vsel %vm989_vm1, %v1164_v5, -inf  ;;  %v1167_v11 = vmul.f32 0.125, %v2110_v6 }
 0x3e3   : > { %1169 = vmax.xlane.f32.xlu0 %v1168_v8  ;;  %v1152_v9 = vpop.f32.mrf.mxu1 }
 0x3e4   : > { %v1165_v10 = vmul.f32 0.125, %v1152_v9  ;;  %v1177_v17 = vsel %vm989_vm1, %v1167_v11, -inf }
 0x3e6   : > { %v1171_v13 = vsel %vm989_vm1, %v1165_v10, -inf }
 0x3e7   : > { %1175 = vmax.xlane.f32.xlu0 %v1174_v12  ;;  %1172 = vmax.xlane.f32.xlu1 %v1171_v13 }
 0x3eb   : > { %1178 = vmax.xlane.f32.xlu0 %v1177_v17 }
 0x46c   : > { %v1170_v18 = vpop.xlane.xlu0 %1169 }
 0x46d   : > { %v1180_v19 = vsub.f32 %v1164_v5, %v1170_v18 }
 0x46f   : > { %v1184_v23 = vmul.f32 1.442695, %v1180_v19 }
 0x470   : > { %v1176_v20 = vpop.xlane.xlu0 %1175  ;;  %v1173_v21 = vpop.xlane.xlu1 %1172 }
 0x471   : > { %v1182_v22 = vsub.f32 %v1166_v7, %v1176_v20  ;;  %v1181_v27 = vsub.f32 %v1165_v10, %v1173_v21 }
 0x473   : > { %v1188_v26 = vmul.f32 1.442695, %v1182_v22  ;;  %v1186_v30 = vmul.f32 1.442695, %v1181_v27 }
 0x474   : > { %v1179_v28 = vpop.xlane.xlu0 %1178 }
 0x475   : > { %2266 = vpow2.f32 %v1188_v26  ;;  %v1183_v29 = vsub.f32 %v1167_v11, %v1179_v28 }
 0x476   : > { %2268 = vpow2.f32 %v1184_v23 }
 0x477   : > { %v1190_v31 = vmul.f32 1.442695, %v1183_v29 }
 0x479   : > { %2270 = vpow2.f32 %v1190_v31 }
 0x47a   : > { %2272 = vpow2.f32 %v1186_v30 }
 0x482   : > { %v2267_v32 = vpop.eup %2266 }
 0x483   : > { %v1198_v33 = vsel %vm989_vm1, %v2267_v32, 0.0  ;;  %v2269_v34 = vpop.eup %2268 }
 0x484   : > { %1199 = vadd.xlane.f32.xlu0 %v1198_v33  ;;  %v1192_v36 = vsel %vm989_vm1, %v2269_v34, 0.0 }
 0x486   : > { %v2271_v35 = vpop.eup %2270 }
 0x487   : > { %v1201_v37 = vsel %vm989_vm1, %v2271_v35, 0.0  ;;  %v2273_v38 = vpop.eup %2272 }
 0x488   : > { %1193 = vadd.xlane.f32.xlu0 %v1192_v36  ;;  %1202 = vadd.xlane.f32.xlu1 %v1201_v37  ;;  %v1195_v39 = vsel %vm989_vm1, %v2273_v38, 0.0 }
 0x48c   : > { %1196 = vadd.xlane.f32.xlu1 %v1195_v39 }
 0x49d   : > { %1216 = vrot.lane.b32.xlu1 %v2547_v43, %s2306_s18 }
 0x49e   : > { %1218 = vrot.lane.b32.xlu0 %v2539_v16, %s2306_s18 }
 0x50d   : > { %v1200_v41 = vpop.xlane.xlu0 %1199 }
 0x511   : > { %v1194_v42 = vpop.xlane.xlu0 %1193  ;;  %v1203_v45 = vpop.xlane.xlu1 %1202 }
 0x512   : > { %2274 = vrcp.f32 %v1203_v45 }
 0x513   : > { %2276 = vrcp.f32 %v1194_v42 }
 0x514   : > { %2278 = vrcp.f32 %v1200_v41 }
 0x515   : > { %v1219_v46 = vpop.permute.xlu0 %1218  ;;  %v1197_v48 = vpop.xlane.xlu1 %1196 }
 0x516   : > { %2280 = vrcp.f32 %v1197_v48  ;;  %2111 = vmatprep.subr.bf16.mxu1 %v1219_v46 }
 0x517   : > { %2112 = vmatpush3.bf16.msra.mxu1 %v1219_v46 }
 0x519   : > { %v1217_v49 = vpop.permute.xlu1 %1216 }
 0x51a   : > { %2113 = vmatprep.subr.bf16.mxu1 %v1217_v49 }
 0x51b   : > { %2114 = vmatpush3.bf16.msra.mxu1 %v1217_v49 }
 0x51f   : > { %v2275_v50 = vpop.eup %2274 }
 0x520   : > { %v2277_v40 = vpop.eup %2276  ;;  %v1211_v44 = vmul.f32 %v2275_v50, %v2271_v35 }
 0x521   : > { %v2279_v43 = vpop.eup %2278  ;;  %v1208_v16 = vmul.f32 %v2277_v40, %v2269_v34  ;;  %v2234_v40 = vld [vmem:[%s2749_s12 + $0x38] sm:$0xff]  }
 0x522   : > { %v1210_v54 = vmul.f32 %v2279_v43, %v2267_v32  ;;  %2139 = vmatprep.subr.bf16.mxu1 %v2234_v40  ;;  %v2235_v43 = vld [vmem:[%s2749_s12 + $0x30] sm:$0xff]  }
 0x523   : > { %v2281_v52 = vpop.eup %2280 }
 0x524   : > { %v1209_v53 = vmul.f32 %v2281_v52, %v2273_v38  ;;  %v1213_v55 = vpack.c.bf16 %v1211_v44, %v1210_v54  ;;  %v2236_v52 = vld [vmem:[%s2749_s12 + $0x28] sm:$0xff]   ;;  %v2237_v44 = vld [vmem:[%s2749_s12 + $0x20] sm:$0xff]  }
 0x525   : > { %v2240_v54 = vld [vmem:[%s2749_s12 + $0x8] sm:$0xff]  }
 0x526   : > { %v1212_v47 = vpack.c.bf16 %v1209_v53, %v1208_v16  ;;  %v2238_v16 = vld [vmem:[%s2749_s12 + $0x18] sm:$0xff]   ;;  %v2239_v53 = vld [vmem:[%s2749_s12 + $0x10] sm:$0xff]  }
 0x528   : > { %2115 = vmatprep.mubr.msk.bf16.mxu1 %vm989_vm1, %v1212_v47  ;;  %v2241_v47 = vld [vmem:[%s2749_s12] sm:$0xff]  }
 0x529   : > { %2116 = vmatmul.mubr.msk.bf16.vlgmr.msra.gmra.mxu1 %vm989_vm1, %v1213_v55  ;;  %v2242_v55 = vld [vmem:[%s2751_s14 + $0x38] sm:$0xff]  }
 0x52a   : > { %2140 = vmatpush3.bf16.msra.mxu1 %v2234_v40  ;;  %2159 = vmatprep.subr.bf16.mxu0 %v2242_v55 }
 0x52b   : > { %2141 = vmatprep.subr.bf16.mxu1 %v2235_v43 }
 0x52e   : > { %2142 = vmatpush3.bf16.msra.mxu1 %v2235_v43 }
 0x52f   : > { %2143 = vmatprep.subr.bf16.mxu1 %v2236_v52 }
 0x532   : > { %2144 = vmatpush3.bf16.msra.mxu1 %v2236_v52 }
 0x533   : > { %2145 = vmatprep.subr.bf16.mxu1 %v2237_v44 }
 0x536   : > { %2146 = vmatpush3.bf16.msra.mxu1 %v2237_v44  ;;  %v1945_v44 = vld [vmem:[%s2752_s15] ss:$0 sm:$0xff] }
 0x537   : > { %2147 = vmatprep.subr.bf16.mxu1 %v2238_v16 }
 0x53a   : > { %2148 = vmatpush3.bf16.msra.mxu1 %v2238_v16 }
 0x53b   : > { %2149 = vmatprep.subr.bf16.mxu1 %v2239_v53 }
 0x53e   : > { %2150 = vmatpush3.bf16.msra.mxu1 %v2239_v53 }
 0x53f   : > { %2151 = vmatprep.subr.bf16.mxu1 %v2240_v54 }
 0x542   : > { %2152 = vmatpush3.bf16.msra.mxu1 %v2240_v54 }
 0x543   : > { %2153 = vmatprep.subr.bf16.mxu1 %v2241_v47 }
 0x546   : > { %2154 = vmatpush3.bf16.msra.mxu1 %v2241_v47 }
 0x5e9   : > { %v2117_v62 = vpop.f32.mrf.mxu1 }
 0x5eb   : > { %v1262_v4 = vpop.f32.mrf.mxu1 }
 0x5ed   : > { %v2118_v5 = vpop.f32.mrf.mxu1 }
 0x5ee   : > { %v2197_v8 = vpack.i.bf16 %v2118_v5, %v2117_v62 }
 0x5ef   : > { %v1265_v6 = vpop.f32.mrf.mxu1 }
 0x5f0   : > { %v2192_v7 = vpack.i.bf16 %v1265_v6, %v1262_v4 }
 0x5f2   : > { %2193 = vrot.lane.b32.xlu1 %v2192_v7, %s2306_s18 }
 0x5f6   : > { %2198 = vrot.lane.b32.xlu1 %v2197_v8, %s2306_s18 }
 0x664   : > { %v2194_v9 = vpop.permute.xlu1 %2193 }
 0x665   : > { %v2196_v10 = vunpack.i.h.bf16 %v2194_v9  ;;  %v2195_v11 = vunpack.i.l.bf16 %v2194_v9 }
 0x667   : > { %v1293_v12 = vsel %vm923_vm0, %v2569_v0, %v2195_v11  ;;  %v1294_v13 = vsel %vm923_vm0, %v2573_v2, %v2196_v10  ;;  %v1925_v2 = vld [vmem:[%s2746_s9] ss:$0 sm:$0xff] }
 0x668   : > { %v2199_v17 = vpop.permute.xlu1 %2198  ;;  %v1297_v18 = vpack.c.bf16 %v1294_v13, %v1293_v12  ;;  %v2689_v13 = vld [vmem:[%s2747_s10] ss:$0 sm:$0xff] }
 0x669   : > { %v2201_v19 = vunpack.i.h.bf16 %v2199_v17  ;;  %v2200_v20 = vunpack.i.l.bf16 %v2199_v17 }
 0x66a   : > { %2135 = vmatprep.mubr.bf16.mxu0 %v1297_v18 }
 0x66b   : > { %v1296_v21 = vsel %vm923_vm0, %v2571_v1, %v2201_v19  ;;  %v1295_v22 = vsel %vm923_vm0, %v2567_v63, %v2200_v20 }
 0x66c   : > { %v1298_v23 = vpack.c.bf16 %v1296_v21, %v1295_v22  ;;  %v2697_v22 = vld [vmem:[%s2748_s11] ss:$0 sm:$0xff] }
 0x66e   : > { %2136 = vmatmul.mubr.bf16.vlgmr.msra.gmra.mxu0 %v1298_v23 }
 0x66f   : > { %2160 = vmatpush3.bf16.msra.mxu0 %v2242_v55 }
 0x670   : > { %2161 = vmatprep.subr.bf16.mxu0 %v2243_v56 }
 0x673   : > { %2162 = vmatpush3.bf16.msra.mxu0 %v2243_v56 }
 0x674   : > { %2163 = vmatprep.subr.bf16.mxu0 %v2244_v51 }
 0x677   : > { %2164 = vmatpush3.bf16.msra.mxu0 %v2244_v51 }
 0x678   : > { %2165 = vmatprep.subr.bf16.mxu0 %v2245_v57 }
 0x67b   : > { %2166 = vmatpush3.bf16.msra.mxu0 %v2245_v57 }
 0x67c   : > { %2167 = vmatprep.subr.bf16.mxu0 %v2246_v58 }
 0x67f   : > { %2168 = vmatpush3.bf16.msra.mxu0 %v2246_v58 }
 0x72e   : > { %v2137_v26 = vpop.f32.mrf.mxu0 }
 0x72f   : > { %v1414_v29 = vadd.f32 %v2137_v26, %v2475_v24 }
 0x730   : > { %v1397_v27 = vpop.f32.mrf.mxu0 }
 0x731   : > { %v1412_v0 = vadd.f32 %v1397_v27, %v2450_v14  ;;  %v1425_v32 = vadd.f32 %v1925_v2, %v1414_v29 }
 0x732   : > { %v2138_v28 = vpop.f32.mrf.mxu0 }
 0x733   : > { %v1423_v30 = vadd.f32 %v1925_v2, %v1412_v0  ;;  %v1415_v63 = vadd.f32 %v2138_v28, %v2478_v25 }
 0x734   : > { %v1400_v31 = vpop.f32.mrf.mxu0 }
 0x735   : > { %v1413_v1 = vadd.f32 %v1400_v31, %v2453_v15  ;;  %1427 = vadd.xlane.f32.xlu0 %v1423_v30  ;;  %v1426_v34 = vadd.f32 %v1925_v2, %v1415_v63 }
 0x737   : > { %v1424_v33 = vadd.f32 %v1925_v2, %v1413_v1 }
 0x739   : > { %1431 = vadd.xlane.f32.xlu0 %v1425_v32  ;;  %1429 = vadd.xlane.f32.xlu1 %v1424_v33 }
 0x73d   : > { %1433 = vadd.xlane.f32.xlu0 %v1426_v34 }
 0x7be   : > { %v1428_v14 = vpop.xlane.xlu0 %1427 }
 0x7bf   : > { %v1436_v35 = vmul.f32 0.0078125, %v1428_v14 }
 0x7c1   : > { %v2630_v36 = vsub.f32 %v1423_v30, %v1436_v35 }
 0x7c2   : > { %v1432_v37 = vpop.xlane.xlu0 %1431  ;;  %v1430_v38 = vpop.xlane.xlu1 %1429 }
 0x7c3   : > { %v1438_v24 = vmul.f32 0.0078125, %v1432_v37  ;;  %v1437_v39 = vmul.f32 0.0078125, %v1430_v38  ;;  %v1444_v15 = vmul.f32 %v2630_v36, %v2630_v36 }
 0x7c5   : > { %v2634_v41 = vsub.f32 %v1425_v32, %v1438_v24  ;;  %v2636_v25 = vsub.f32 %v1424_v33, %v1437_v39  ;;  %1448 = vadd.xlane.f32.xlu0 %v1444_v15  ;;  %v2247_v32 = vld [vmem:[%s2751_s14 + $0x10] sm:$0xff]   ;;  %v2248_v33 = vld [vmem:[%s2751_s14 + $0x8] sm:$0xff]  }
 0x7c6   : > { %v1434_v42 = vpop.xlane.xlu0 %1433  ;;  %2169 = vmatprep.subr.bf16.mxu0 %v2247_v32 }
 0x7c7   : > { %v1439_v45 = vmul.f32 0.0078125, %v1434_v42  ;;  %v1446_v46 = vmul.f32 %v2634_v41, %v2634_v41  ;;  %v1445_v48 = vmul.f32 %v2636_v25, %v2636_v25  ;;  %2170 = vmatpush3.bf16.msra.mxu0 %v2247_v32 }
 0x7c8   : > { %2171 = vmatprep.subr.bf16.mxu0 %v2248_v33 }
 0x7c9   : > { %v2642_v49 = vsub.f32 %v1426_v34, %v1439_v45  ;;  %1452 = vadd.xlane.f32.xlu0 %v1446_v46  ;;  %1450 = vadd.xlane.f32.xlu1 %v1445_v48  ;;  %v2249_v34 = vld [vmem:[%s2751_s14] sm:$0xff]  }
 0x7cb   : > { %v1447_v50 = vmul.f32 %v2642_v49, %v2642_v49  ;;  %2172 = vmatpush3.bf16.msra.mxu0 %v2248_v33 }
 0x7cc   : > { %2173 = vmatprep.subr.bf16.mxu0 %v2249_v34 }
 0x7cd   : > { %1454 = vadd.xlane.f32.xlu1 %v1447_v50 }
 0x7cf   : > { %2174 = vmatpush3.bf16.msra.mxu0 %v2249_v34 }
 0x84e   : > { %v1449_v59 = vpop.xlane.xlu0 %1448 }
 0x84f   : > { %v1456_v60 = vmul.f32 0.0078125, %v1449_v59 }
 0x851   : > { %v1460_v61 = vadd.f32 1e-05, %v1456_v60 }
 0x852   : > { %v1453_v62 = vpop.xlane.xlu0 %1452  ;;  %v1451_v3 = vpop.xlane.xlu1 %1450 }
 0x853   : > { %2282 = vrsqrt.f32 %v1460_v61  ;;  %v1458_v4 = vmul.f32 0.0078125, %v1453_v62  ;;  %v1457_v5 = vmul.f32 0.0078125, %v1451_v3 }
 0x855   : > { %v1462_v6 = vadd.f32 1e-05, %v1458_v4  ;;  %v1461_v7 = vadd.f32 1e-05, %v1457_v5 }
 0x856   : > { %v1455_v8 = vpop.xlane.xlu1 %1454 }
 0x857   : > { %2284 = vrsqrt.f32 %v1462_v6  ;;  %v1459_v9 = vmul.f32 0.0078125, %v1455_v8 }
 0x858   : > { %2286 = vrsqrt.f32 %v1461_v7 }
 0x859   : > { %v1463_v10 = vadd.f32 1e-05, %v1459_v9 }
 0x85b   : > { %2288 = vrsqrt.f32 %v1463_v10 }
 0x860   : > { %v2283_v11 = vpop.eup %2282 }
 0x861   : > { %v1468_v12 = vmul.f32 %v2283_v11, %v2630_v36  ;;  %v1928_v36 = vld [vmem:[%s2750_s13] ss:$0 sm:$0xff] }
 0x863   : > { %v1478_v21 = vmul.f32 %v2689_v13, %v1468_v12 }
 0x864   : > { %v2285_v17 = vpop.eup %2284 }
 0x865   : > { %v2287_v18 = vpop.eup %2286  ;;  %v1470_v19 = vmul.f32 %v2285_v17, %v2634_v41  ;;  %v1488_v28 = vadd.f32 %v2697_v22, %v1478_v21 }
 0x866   : > { %v1469_v20 = vmul.f32 %v2287_v18, %v2636_v25 }
 0x867   : > { %v1480_v0 = vmul.f32 %v2689_v13, %v1470_v19 }
 0x868   : > { %v2289_v23 = vpop.eup %2288  ;;  %v1479_v26 = vmul.f32 %v2689_v13, %v1469_v20 }
 0x869   : > { %v1471_v27 = vmul.f32 %v2289_v23, %v2642_v49  ;;  %v1490_v31 = vadd.f32 %v2697_v22, %v1480_v0 }
 0x86a   : > { %v1489_v2 = vadd.f32 %v2697_v22, %v1479_v26 }
 0x86b   : > { %v1481_v29 = vmul.f32 %v2689_v13, %v1471_v27 }
 0x86c   : > { %v1492_v30 = vpack.c.bf16 %v1489_v2, %v1488_v28 }
 0x86d   : > { %v1491_v1 = vadd.f32 %v2697_v22, %v1481_v29 }
 0x86e   : > { %2155 = vmatprep.mubr.bf16.mxu1 %v1492_v30 }
 0x86f   : > { %v1493_v63 = vpack.c.bf16 %v1491_v1, %v1490_v31 }
 0x871   : > { %2156 = vmatmul.mubr.bf16.vlgmr.msra.gmra.mxu1 %v1493_v63 }
 0x931   : > { %v2157_v14 = vpop.f32.mrf.mxu1 }
 0x932   : > { %v1608_v39 = vadd.f32 %v2157_v14, %v1928_v36 }
 0x933   : > { %v1599_v35 = vpop.f32.mrf.mxu1 }
 0x934   : > { %v1600_v38 = vadd.f32 %v1928_v36, %v1599_v35  ;;  %v1616_v46 = vmax.f32 %v1608_v39, 0.0 }
 0x935   : > { %v2158_v37 = vpop.f32.mrf.mxu1 }
 0x936   : > { %v1611_v24 = vadd.f32 %v2158_v37, %v1928_v36  ;;  %v1614_v42 = vmax.f32 %v1600_v38, 0.0 }
 0x937   : > { %v1602_v15 = vpop.f32.mrf.mxu1 }
 0x938   : > { %v1603_v41 = vadd.f32 %v1928_v36, %v1602_v15  ;;  %v1617_v25 = vmax.f32 %v1611_v24, 0.0 }
 0x93a   : > { %v1615_v45 = vmax.f32 %v1603_v41, 0.0  ;;  %v1619_v49 = vpack.c.bf16 %v1617_v25, %v1616_v46 }
 0x93c   : > { %v1618_v48 = vpack.c.bf16 %v1615_v45, %v1614_v42 }
 0x93e   : > { %2175 = vmatprep.mubr.bf16.mxu0 %v1618_v48 }
 0x93f   : > { %2176 = vmatmul.mubr.bf16.vlgmr.msra.gmra.mxu0 %v1619_v49 }
 0x9ff   : > { %v2177_v50 = vpop.f32.mrf.mxu0 }
 0xa00   : > { %v1735_v16 = vadd.f32 %v2177_v50, %v1490_v31 }
 0xa01   : > { %v1718_v40 = vpop.f32.mrf.mxu0 }
 0xa02   : > { %v1733_v43 = vadd.f32 %v1718_v40, %v1488_v28  ;;  %v1746_v56 = vadd.f32 %v1945_v44, %v1735_v16 }
 0xa03   : > { %v2178_v52 = vpop.f32.mrf.mxu0 }
 0xa04   : > { %v1744_v53 = vadd.f32 %v1945_v44, %v1733_v43  ;;  %v1736_v55 = vadd.f32 %v2178_v52, %v1491_v1 }
 0xa05   : > { %v1721_v54 = vpop.f32.mrf.mxu0 }
 0xa06   : > { %v1734_v47 = vadd.f32 %v1721_v54, %v1489_v2  ;;  %1748 = vadd.xlane.f32.xlu0 %v1744_v53  ;;  %v1747_v57 = vadd.f32 %v1945_v44, %v1736_v55 }
 0xa08   : > { %v1745_v51 = vadd.f32 %v1945_v44, %v1734_v47 }
 0xa0a   : > { %1752 = vadd.xlane.f32.xlu0 %v1746_v56  ;;  %1750 = vadd.xlane.f32.xlu1 %v1745_v51 }
 0xa0e   : > { %1754 = vadd.xlane.f32.xlu1 %v1747_v57 }
 0xa8f   : > { %v1749_v58 = vpop.xlane.xlu0 %1748 }
 0xa90   : > { %v1756_v59 = vmul.f32 0.0078125, %v1749_v58 }
 0xa92   : > { %v1760_v60 = vsub.f32 %v1744_v53, %v1756_v59 }
 0xa93   : > { %v1753_v61 = vpop.xlane.xlu0 %1752  ;;  %v1751_v62 = vpop.xlane.xlu1 %1750 }
 0xa94   : > { %v1758_v3 = vmul.f32 0.0078125, %v1753_v61  ;;  %v1757_v4 = vmul.f32 0.0078125, %v1751_v62  ;;  %v1764_v5 = vmul.f32 %v1760_v60, %v1760_v60 }
 0xa96   : > { %v1762_v6 = vsub.f32 %v1746_v56, %v1758_v3  ;;  %v1761_v7 = vsub.f32 %v1745_v51, %v1757_v4  ;;  %1768 = vadd.xlane.f32.xlu0 %v1764_v5 }
 0xa97   : > { %v1755_v8 = vpop.xlane.xlu1 %1754 }
 0xa98   : > { %v1759_v9 = vmul.f32 0.0078125, %v1755_v8  ;;  %v1766_v10 = vmul.f32 %v1762_v6, %v1762_v6  ;;  %v1765_v11 = vmul.f32 %v1761_v7, %v1761_v7 }
 0xa9a   : > { %v1763_v12 = vsub.f32 %v1747_v57, %v1759_v9  ;;  %1772 = vadd.xlane.f32.xlu0 %v1766_v10  ;;  %1770 = vadd.xlane.f32.xlu1 %v1765_v11 }
 0xa9c   : > { %v1767_v17 = vmul.f32 %v1763_v12, %v1763_v12 }
 0xa9e   : > { %1774 = vadd.xlane.f32.xlu1 %v1767_v17 }
 0xb1f   : > { %v1769_v18 = vpop.xlane.xlu0 %1768 }
 0xb20   : > { %v1776_v19 = vmul.f32 0.0078125, %v1769_v18 }
 0xb22   : > { %v1780_v20 = vadd.f32 1e-05, %v1776_v19 }
 0xb23   : > { %v1773_v21 = vpop.xlane.xlu0 %1772  ;;  %v1771_v23 = vpop.xlane.xlu1 %1770 }
 0xb24   : > { %2290 = vrsqrt.f32 %v1780_v20  ;;  %v1778_v26 = vmul.f32 0.0078125, %v1773_v21  ;;  %v1777_v27 = vmul.f32 0.0078125, %v1771_v23 }
 0xb26   : > { %v1782_v0 = vadd.f32 1e-05, %v1778_v26  ;;  %v1781_v28 = vadd.f32 1e-05, %v1777_v27 }
 0xb27   : > { %v1775_v2 = vpop.xlane.xlu1 %1774 }
 0xb28   : > { %2292 = vrsqrt.f32 %v1782_v0  ;;  %v1779_v29 = vmul.f32 0.0078125, %v1775_v2 }
 0xb29   : > { %2294 = vrsqrt.f32 %v1781_v28 }
 0xb2a   : > { %v1783_v30 = vadd.f32 1e-05, %v1779_v29 }
 0xb2c   : > { %2296 = vrsqrt.f32 %v1783_v30 }
 0xb31   : > { %v2291_v31 = vpop.eup %2290 }
 0xb32   : > { %v1788_v1 = vmul.f32 %v2291_v31, %v1760_v60 }
 0xb34   : > { %v1792_v63 = vmul.f32 %v2689_v13, %v1788_v1 }
 0xb35   : > { %v2293_v32 = vpop.eup %2292 }
 0xb36   : > { %v2295_v33 = vpop.eup %2294  ;;  %v1796_v34 = vadd.f32 %v2697_v22, %v1792_v63  ;;  %v1790_v14 = vmul.f32 %v2293_v32, %v1762_v6 }
 0xb37   : > { %v1789_v35 = vmul.f32 %v2295_v33, %v1761_v7 }
 0xb38   : > { %1800 = vst [vmem:[%s541_s29] sm:$0xff] %v1796_v34  ;;  %v1794_v36 = vmul.f32 %v2689_v13, %v1790_v14 }
 0xb39   : > { %v2297_v37 = vpop.eup %2296  ;;  %v1793_v38 = vmul.f32 %v2689_v13, %v1789_v35 }
 0xb3a   : > { %v1798_v24 = vadd.f32 %v2697_v22, %v1794_v36  ;;  %v1791_v39 = vmul.f32 %v2297_v37, %v1763_v12 }
 0xb3b   : > { %v1797_v15 = vadd.f32 %v2697_v22, %v1793_v38 }
 0xb3c   : > { %1802 = vst [vmem:[%s541_s29 + $0x10] sm:$0xff] %v1798_v24  ;;  %v1795_v41 = vmul.f32 %v2689_v13, %v1791_v39 }
 0xb3d   : > { %1801 = vst [vmem:[%s541_s29 + $0x8] sm:$0xff] %v1797_v15 }
 0xb3e   : > { %v1799_v25 = vadd.f32 %v2697_v22, %v1795_v41 }
 0xb40   : > { %1803 = vst [vmem:[%s541_s29 + $0x18] sm:$0xff] %v1799_v25 }
 0xb41 PF: > { %s26_s21 = sadd.s32 1, %s2304_s21  }
 0xb42   : > { %p23_p4 = scmp.ge.s32.totalorder %s26_s21, 4  }
 0xb44   :  { %25 = sbr.rel (!%p23_p4) target bundleno = 2 (0x2), region = 117 }

// kernel: capla_forward.11
= control target key start
LH: loop header
LB: loop body
LE: loop exit
PB: predicated region body
PF: predicated region fallthrough
CT: control target
= control target key end

     0   :  { %s1840_s19 = smov 0   ;;  %s2021_s0 = inlined_call_operand.vmem [shape: f32[2,32,128], index: 0, kind: input, shape index: {}]   ;;  %s2022_s1 = inlined_call_operand.vmem [shape: bf16[3,128,32], index: 1, kind: input, shape index: {}]   ;;  %s2023_s2 = inlined_call_operand.vmem [shape: f32[1,32], index: 2, kind: input, shape index: {}]   ;;  %s2024_s3 = inlined_call_operand.<no memory space> [shape: f32[1], index: 3, kind: input, shape index: {}]   ;;  %s2025_s4 = inlined_call_operand.vmem [shape: bf16[3,32,64], index: 4, kind: input, shape index: {}]   ;;  %s2026_s5 = inlined_call_operand.vmem [shape: f32[1,64], index: 5, kind: input, shape index: {}]   ;;  %s2027_s6 = inlined_call_operand.<no memory space> [shape: f32[1], index: 6, kind: input, shape index: {}]   ;;  %s2028_s7 = inlined_call_operand.vmem [shape: bf16[3,64,64], index: 7, kind: input, shape index: {}]   ;;  %s2029_s8 = inlined_call_operand.vmem [shape: f32[1,64], index: 8, kind: input, shape index: {}]   ;;  %s2030_s9 = inlined_call_operand.<no memory space> [shape: f32[1], index: 9, kind: input, shape index: {}]   ;;  %s2031_s10 = inlined_call_operand.vmem [shape: f32[2,1,64], index: 10, kind: output, shape index: {}]  }
   0x1   :  { %15 = sst [smem:[#allocation3]] %s2024_s3 }
   0x2   :  { %16 = sst [smem:[#allocation4]] %s2027_s6 }
   0x3   :  { %17 = sst [smem:[#allocation5]] %s2030_s9 }
   0x4 LB: > { %s1415_s20 = sadd.s32 4294967295, %s1774_s19   ;;  %p1419_p0 = scmp.ge.s32.totalorder %s1774_s19, 1  ;;  %s1774_s19 = sphi %s1840_s19, %s23_s19  }
   0x5   : > { %p315_p1 = scmp.lt.s32.totalorder %s1774_s19, 3 }
   0x7   : > { %p316_p2 = pnand %p1419_p0, %p315_p1 }
   0x8   : > { %p351_p3 = scmp.lt.s32.totalorder (!%p316_p2), %s1415_s20, 1  ;;  %s365_s16 = sld [smem:[#allocation3]] (!%p316_p2) }
   0x9   : > { %319 = sbr.rel (%p316_p2) target bundleno = 763 (0x2fb), region = 60  ;;  %s761_s6 = sld [smem:[#allocation4]] (!%p316_p2) }
   0xa   : > { %s1033_s30 = sld [smem:[#allocation5]] (!%p316_p2) }
   0xe   : > { %v1726_v0 = vld [vmem:[%s2022_s1 + $0x38] sm:$0xff]   ;;  %v1728_v2 = vld [vmem:[%s2022_s1 + $0x30] sm:$0xff]   ;;  %v1730_v4 = vld [vmem:[%s2022_s1 + $0x28] sm:$0xff]   ;;  %s2033_s20 = smov (!%p351_p3, %s1415_s20), 1  ;;  %v751_v60 = vstv %s365_s16  ;;  %vm762_vm0 = vcmask 261120   ;;  %vm766_vm3 = vcmask 259072  }
   0xf   : > { %v1727_v1 = vld [vmem:[%s2022_s1 + $0x78] sm:$0xff]   ;;  %1598 = vmatprep.subr.bf16.mxu0 %v1726_v0  ;;  %v1729_v3 = vld [vmem:[%s2022_s1 + $0x70] sm:$0xff]   ;;  %v1731_v5 = vld [vmem:[%s2022_s1 + $0x68] sm:$0xff]   ;;  %s1537_s14 = sshll.u32 %s2033_s20, 5  ;;  %vm1034_vm6 = vcmask 523264   ;;  %vm1038_vm9 = vcmask 519168   ;;  %s358_s13 = scalar_lea.vmem %s2031_s10, %s2033_s20 }
  0x10   : > { %1599 = vmatpush3.bf16.msra.mxu0 %v1726_v0  ;;  %1618 = vmatprep.subr.bf16.mxu1 %v1727_v1  ;;  %v1732_v6 = vld [vmem:[%s2022_s1 + $0x20] sm:$0xff]   ;;  %v1734_v8 = vld [vmem:[%s2022_s1 + $0x18] sm:$0xff]   ;;  %s355_s9 = scalar_lea.vmem %s2021_s0, %s1537_s14  ;;  %v1736_v10 = vld [vmem:[%s2022_s1 + $0x10] sm:$0xff]   ;;  %vm1355_vm15 = vcmask 517120  }
  0x11   : > { %1619 = vmatpush3.bf16.msra.mxu1 %v1727_v1  ;;  %1600 = vmatprep.subr.bf16.mxu0 %v1728_v2  ;;  %v1733_v7 = vld [vmem:[%s2022_s1 + $0x60] sm:$0xff]   ;;  %v1735_v9 = vld [vmem:[%s2022_s1 + $0x58] sm:$0xff]   ;;  %v1737_v11 = vld [vmem:[%s2022_s1 + $0x50] sm:$0xff]  }
  0x12   : > { %1620 = vmatprep.subr.bf16.mxu1 %v1729_v3  ;;  %v360_v12 = vld [vmem:[%s355_s9] sm:$0xff]  ;;  %v361_v13 = vld [vmem:[%s355_s9 + $0x8] sm:$0xff]  ;;  %v362_v14 = vld [vmem:[%s355_s9 + $0x10] sm:$0xff] }
  0x13   : > { %366 = vst [vmem:[#allocation2] sm:$0xff] %v360_v12  ;;  %367 = vst [vmem:[#allocation2 + $0x8] sm:$0xff] %v361_v13  ;;  %v374_v15 = vpack.c.bf16 %v361_v13, %v360_v12  ;;  %v363_v16 = vld [vmem:[%s355_s9 + $0x18] sm:$0xff]  ;;  %v1738_v17 = vld [vmem:[%s2022_s1 + $0x8] sm:$0xff]  }
  0x14   : > { %1601 = vmatpush3.bf16.msra.mxu0 %v1728_v2  ;;  %368 = vst [vmem:[#allocation2 + $0x10] sm:$0xff] %v362_v14  ;;  %369 = vst [vmem:[#allocation2 + $0x18] sm:$0xff] %v363_v16  ;;  %v1739_v18 = vld [vmem:[%s2022_s1 + $0x48] sm:$0xff]   ;;  %v1740_v19 = vld [vmem:[%s2022_s1] sm:$0xff]  }
  0x15   : > { %1621 = vmatpush3.bf16.msra.mxu1 %v1729_v3  ;;  %1602 = vmatprep.subr.bf16.mxu0 %v1730_v4  ;;  %v1741_v22 = vld [vmem:[%s2022_s1 + $0x40] sm:$0xff]   ;;  %v1742_v24 = vld [vmem:[%s2022_s1 + $0xb8] sm:$0xff]   ;;  %v1743_v31 = vld [vmem:[%s2022_s1 + $0xb0] sm:$0xff]  }
  0x16   : > { %1622 = vmatprep.subr.bf16.mxu1 %v1731_v5  ;;  %1614 = vmatprep.mubr.bf16.mxu0 %v374_v15  ;;  %v1744_v34 = vld [vmem:[%s2022_s1 + $0xa8] sm:$0xff]   ;;  %v1745_v35 = vld [vmem:[%s2022_s1 + $0xa0] sm:$0xff]   ;;  %v1746_v36 = vld [vmem:[%s2022_s1 + $0x98] sm:$0xff]  }
  0x17   : > { %v1747_v37 = vld [vmem:[%s2022_s1 + $0x90] sm:$0xff]   ;;  %v1748_v38 = vld [vmem:[%s2022_s1 + $0x88] sm:$0xff]   ;;  %v1749_v39 = vld [vmem:[%s2022_s1 + $0x80] sm:$0xff]  }
  0x18   : > { %1603 = vmatpush3.bf16.msra.mxu0 %v1730_v4  ;;  %v1750_v43 = vld [vmem:[%s2025_s4 + $0x8] sm:$0xff]   ;;  %v1751_v44 = vld [vmem:[%s2025_s4] sm:$0xff]   ;;  %v1752_v45 = vld [vmem:[%s2025_s4 + $0x18] sm:$0xff]  }
  0x19   : > { %1623 = vmatpush3.bf16.msra.mxu1 %v1731_v5  ;;  %1604 = vmatprep.subr.bf16.mxu0 %v1732_v6  ;;  %v1430_v49 = vld [vmem:[%s2023_s2] ss:$0 sm:$0xff] }
  0x1a   : > { %1624 = vmatprep.subr.bf16.mxu1 %v1733_v7  ;;  %v499_v20 = vld [vmem:[#allocation2 + $0x1] sm:$0xff] }
  0x1b   : > { %v500_v21 = vld [vmem:[#allocation2 + $0x9] sm:$0xff]  ;;  %v373_v25 = vld [vmem:[#allocation2 + $0x18] sm:$0x3f] }
  0x1c   : > { %1605 = vmatpush3.bf16.msra.mxu0 %v1732_v6  ;;  %v503_v23 = vpack.c.bf16 %v500_v21, %v499_v20  ;;  %v501_v26 = vld [vmem:[#allocation2 + $0x11] sm:$0xff]  ;;  %v502_v27 = vld [vmem:[#allocation2 + $0x19] sm:$0x3f]  ;;  %v623_v28 = vld [vmem:[#allocation2 + $0x2] sm:$0xff]  ;;  %v375_v30 = vpack.c.bf16 %v373_v25, %v362_v14 }
  0x1d   : > { %1625 = vmatpush3.bf16.msra.mxu1 %v1733_v7  ;;  %1606 = vmatprep.subr.bf16.mxu0 %v1734_v8  ;;  %v624_v29 = vld [vmem:[#allocation2 + $0xa] sm:$0xff]  ;;  %v504_v32 = vpack.c.bf16 %v502_v27, %v501_v26  ;;  %v625_v40 = vld [vmem:[#allocation2 + $0x12] sm:$0xff]  ;;  %v626_v41 = vld [vmem:[#allocation2 + $0x1a] sm:$0x3f] }
  0x1e   : > { %1626 = vmatprep.subr.bf16.mxu1 %v1735_v9  ;;  %1634 = vmatprep.mubr.bf16.mxu1 %v503_v23  ;;  %v627_v33 = vpack.c.bf16 %v624_v29, %v623_v28  ;;  %v628_v42 = vpack.c.bf16 %v626_v41, %v625_v40  ;;  %v1754_v26 = vld [vmem:[%s2025_s4 + $0x28] sm:$0xff]   ;;  %v1759_v40 = vld [vmem:[%s2028_s7 + $0x30] sm:$0xff]  }
  0x1f   : > { %v1760_v41 = vld [vmem:[%s2028_s7 + $0x8] sm:$0xff]  }
  0x20   : > { %1607 = vmatpush3.bf16.msra.mxu0 %v1734_v8 }
  0x21   : > { %1627 = vmatpush3.bf16.msra.mxu1 %v1735_v9  ;;  %1608 = vmatprep.subr.bf16.mxu0 %v1736_v10 }
  0x22   : > { %1628 = vmatprep.subr.bf16.mxu1 %v1737_v11 }
  0x24   : > { %1609 = vmatpush3.bf16.msra.mxu0 %v1736_v10 }
  0x25   : > { %1629 = vmatpush3.bf16.msra.mxu1 %v1737_v11  ;;  %1610 = vmatprep.subr.bf16.mxu0 %v1738_v17 }
  0x26   : > { %1630 = vmatprep.subr.bf16.mxu1 %v1739_v18 }
  0x28   : > { %1611 = vmatpush3.bf16.msra.mxu0 %v1738_v17 }
  0x29   : > { %1631 = vmatpush3.bf16.msra.mxu1 %v1739_v18  ;;  %1612 = vmatprep.subr.bf16.mxu0 %v1740_v19 }
  0x2a   : > { %1632 = vmatprep.subr.bf16.mxu1 %v1741_v22 }
  0x2c   : > { %1613 = vmatpush3.bf16.msra.mxu0 %v1740_v19 }
  0x2d   : > { %1633 = vmatpush3.bf16.msra.mxu1 %v1741_v22  ;;  %1638 = vmatprep.subr.bf16.mxu0 %v1742_v24 }
  0x2e   : > { %1658 = vmatprep.subr.bf16.mxu1 %v1750_v43 }
  0x2f   : > { %1615 = vmatmul.mubr.bf16.vlgmr.msra.gmra.mxu0 %v375_v30 }
  0x30   : > { %1639 = vmatpush3.bf16.msra.mxu0 %v1742_v24  ;;  %1635 = vmatmul.mubr.bf16.vlgmr.msra.gmra.mxu1 %v504_v32  ;;  %v1753_v24 = vld [vmem:[%s2025_s4 + $0x10] sm:$0xff]   ;;  %v1755_v32 = vld [vmem:[%s2025_s4 + $0x20] sm:$0xff]  }
  0x31   : > { %1640 = vmatprep.subr.bf16.mxu0 %v1743_v31  ;;  %1654 = vmatprep.mubr.bf16.mxu0 %v627_v33 }
  0x32   : > { %1659 = vmatpush3.bf16.msra.mxu1 %v1750_v43  ;;  %v1762_v43 = vld [vmem:[%s2028_s7] sm:$0xff]  }
  0x33   : > { %1660 = vmatprep.subr.bf16.mxu1 %v1751_v44 }
  0x34   : > { %1641 = vmatpush3.bf16.msra.mxu0 %v1743_v31 }
  0x35   : > { %1642 = vmatprep.subr.bf16.mxu0 %v1744_v34 }
  0x36   : > { %1661 = vmatpush3.bf16.msra.mxu1 %v1751_v44  ;;  %v1763_v44 = vld [vmem:[%s2028_s7 + $0x20] sm:$0xff]  }
  0x37   : > { %1666 = vmatprep.subr.bf16.mxu1 %v1752_v45 }
  0x38   : > { %1643 = vmatpush3.bf16.msra.mxu0 %v1744_v34 }
  0x39   : > { %1644 = vmatprep.subr.bf16.mxu0 %v1745_v35 }
  0x3c   : > { %1645 = vmatpush3.bf16.msra.mxu0 %v1745_v35 }
  0x3d   : > { %1646 = vmatprep.subr.bf16.mxu0 %v1746_v36 }
  0x40   : > { %1647 = vmatpush3.bf16.msra.mxu0 %v1746_v36 }
  0x41   : > { %1648 = vmatprep.subr.bf16.mxu0 %v1747_v37 }
  0x44   : > { %1649 = vmatpush3.bf16.msra.mxu0 %v1747_v37  ;;  %v1756_v37 = vld [vmem:[%s2028_s7 + $0x18] sm:$0xff]  }
  0x45   : > { %1650 = vmatprep.subr.bf16.mxu0 %v1748_v38 }
  0x48   : > { %1651 = vmatpush3.bf16.msra.mxu0 %v1748_v38  ;;  %v1757_v38 = vld [vmem:[%s2028_s7 + $0x38] sm:$0xff]  }
  0x49   : > { %1652 = vmatprep.subr.bf16.mxu0 %v1749_v39 }
  0x4c   : > { %1653 = vmatpush3.bf16.msra.mxu0 %v1749_v39  ;;  %v1758_v39 = vld [vmem:[%s2028_s7 + $0x10] sm:$0xff]  }
  0x4d   : > { %1694 = vmatprep.subr.bf16.mxu0 %v1757_v38 }
  0x4f   : > { %1655 = vmatmul.mubr.bf16.vlgmr.msra.gmra.mxu0 %v628_v42  ;;  %v1761_v42 = vld [vmem:[%s2028_s7 + $0x28] sm:$0xff]  }
  0x50   : > { %1695 = vmatpush3.bf16.msra.mxu0 %v1757_v38 }
  0x51   : > { %1696 = vmatprep.subr.bf16.mxu0 %v1759_v40 }
  0x54   : > { %1697 = vmatpush3.bf16.msra.mxu0 %v1759_v40 }
  0x55   : > { %1698 = vmatprep.subr.bf16.mxu0 %v1761_v42 }
  0x58   : > { %1699 = vmatpush3.bf16.msra.mxu0 %v1761_v42 }
  0x59   : > { %1700 = vmatprep.subr.bf16.mxu0 %v1763_v44 }
  0x5c   : > { %1701 = vmatpush3.bf16.msra.mxu0 %v1763_v44 }
  0xef   : > { %v1616_v46 = vpop.f32.mrf.mxu0 }
  0xf0   : > { %v1636_v48 = vpop.f32.mrf.mxu1  ;;  %v497_v52 = vadd.f32 %v1616_v46, %v1430_v49 }
  0xf1   : > { %v474_v47 = vpop.f32.mrf.mxu0 }
  0xf2   : > { %v604_v51 = vpop.f32.mrf.mxu1  ;;  %v495_v53 = vadd.f32 %v1430_v49, %v474_v47  ;;  %v621_v56 = vadd.f32 %v1636_v48, %v497_v52 }
  0xf3   : > { %v1617_v50 = vpop.f32.mrf.mxu0 }
  0xf4   : > { %v1637_v55 = vpop.f32.mrf.mxu1  ;;  %v498_v57 = vadd.f32 %v1617_v50, %v1430_v49  ;;  %v619_v61 = vadd.f32 %v604_v51, %v495_v53  ;;  %v1483_v51 = vld [vmem:[%s2026_s5] ss:$0 sm:$0xff] }
  0xf5   : > { %v477_v54 = vpop.f32.mrf.mxu0 }
  0xf6   : > { %v496_v58 = vadd.f32 %v1430_v49, %v477_v54  ;;  %v607_v62 = vpop.f32.mrf.mxu1  ;;  %v622_v1 = vadd.f32 %v1637_v55, %v498_v57 }
  0xf8   : > { %v620_v4 = vadd.f32 %v607_v62, %v496_v58 }
 0x10f   : > { %v1656_v59 = vpop.f32.mrf.mxu0 }
 0x110   : > { %v745_v63 = vadd.f32 %v1656_v59, %v621_v56  ;;  %v1023_v59 = vstv %s761_s6 }
 0x111   : > { %v728_v0 = vpop.f32.mrf.mxu0 }
 0x112   : > { %vm749_vm1 = vcmp.gt.f32.partialorder %v745_v63, 0.0  ;;  %v754_v2 = vmul.f32 %v751_v60, %v745_v63  ;;  %v743_v3 = vadd.f32 %v728_v0, %v619_v61 }
 0x113   : > { %v1657_v5 = vpop.f32.mrf.mxu0 }
 0x114   : > { %v758_v6 = vsel %vm749_vm1, %v745_v63, %v754_v2  ;;  %vm747_vm2 = vcmp.gt.f32.partialorder %v743_v3, 0.0  ;;  %v752_v7 = vmul.f32 %v751_v60, %v743_v3  ;;  %v746_v8 = vadd.f32 %v1657_v5, %v622_v1 }
 0x115   : > { %765 = vst.msk [vmem:[#allocation2 + $0x10] sm:$0xff] %vm762_vm0, %v758_v6  ;;  %v731_v9 = vpop.f32.mrf.mxu0  ;;  %vm1366_vm1 = vcmask 516096  }
 0x116   : > { %v756_v10 = vsel %vm747_vm2, %v743_v3, %v752_v7  ;;  %vm750_vm4 = vcmp.gt.f32.partialorder %v746_v8, 0.0  ;;  %v755_v11 = vmul.f32 %v751_v60, %v746_v8  ;;  %v744_v12 = vadd.f32 %v731_v9, %v620_v4 }
 0x117   : > { %763 = vst.msk [vmem:[#allocation2] sm:$0xff] %vm762_vm0, %v756_v10 }
 0x118   : > { %v759_v13 = vsel %vm750_vm4, %v746_v8, %v755_v11  ;;  %vm748_vm5 = vcmp.gt.f32.partialorder %v744_v12, 0.0  ;;  %v753_v14 = vmul.f32 %v751_v60, %v744_v12 }
 0x119   : > { %767 = vst.msk [vmem:[#allocation2 + $0x18] sm:$0x3f] %vm766_vm3, %v759_v13 }
 0x11a   : > { %v757_v15 = vsel %vm748_vm5, %v744_v12, %v753_v14 }
 0x11b   : > { %764 = vst.msk [vmem:[#allocation2 + $0x8] sm:$0xff] %vm762_vm0, %v757_v15 }
 0x11c   : > { %v770_v22 = vld [vmem:[#allocation2 + $0x10] sm:$0xff] }
 0x11e   : > { %v768_v16 = vld [vmem:[#allocation2] sm:$0xff] }
 0x120   : > { %v771_v17 = vld [vmem:[#allocation2 + $0x18] sm:$0xf] }
 0x121   : > { %v773_v23 = vpack.c.bf16 %v771_v17, %v770_v22  ;;  %v857_v27 = vld [vmem:[#allocation2 + $0x11] sm:$0xff]  ;;  %v858_v28 = vld [vmem:[#allocation2 + $0x19] sm:$0xf] }
 0x122   : > { %v769_v18 = vld [vmem:[#allocation2 + $0x8] sm:$0xff]  ;;  %v860_v31 = vpack.c.bf16 %v858_v28, %v857_v27  ;;  %v939_v34 = vld [vmem:[#allocation2 + $0x12] sm:$0xff]  ;;  %v940_v35 = vld [vmem:[#allocation2 + $0x1a] sm:$0xf] }
 0x123   : > { %v855_v19 = vld [vmem:[#allocation2 + $0x1] sm:$0xff]  ;;  %v856_v20 = vld [vmem:[#allocation2 + $0x9] sm:$0xff]  ;;  %v772_v21 = vpack.c.bf16 %v769_v18, %v768_v16  ;;  %v942_v36 = vpack.c.bf16 %v940_v35, %v939_v34 }
 0x124   : > { %v859_v25 = vpack.c.bf16 %v856_v20, %v855_v19  ;;  %v937_v29 = vld [vmem:[#allocation2 + $0x2] sm:$0xff]  ;;  %v938_v30 = vld [vmem:[#allocation2 + $0xa] sm:$0xff] }
 0x125   : > { %1662 = vmatprep.mubr.msk.bf16.mxu1 %vm762_vm0, %v772_v21  ;;  %v941_v33 = vpack.c.bf16 %v938_v30, %v937_v29  ;;  %v1765_v30 = vld [vmem:[%s2028_s7 + $0x50] sm:$0xff]  }
 0x126   : > { %1663 = vmatmul.mubr.msk.bf16.vlgmr.msra.gmra.mxu1 %vm762_vm0, %v773_v23 }
 0x127   : > { %1667 = vmatpush3.bf16.msra.mxu1 %v1752_v45  ;;  %1670 = vmatprep.mubr.msk.bf16.mxu1 %vm762_vm0, %v859_v25  ;;  %v1983_v45 = vld [vmem:[%s2028_s7 + $0x58] sm:$0xff]  }
 0x128   : > { %1668 = vmatprep.subr.bf16.mxu1 %v1753_v24 }
 0x12b   : > { %1669 = vmatpush3.bf16.msra.mxu1 %v1753_v24 }
 0x12c   : > { %1674 = vmatprep.subr.bf16.mxu1 %v1754_v26 }
 0x12e   : > { %1671 = vmatmul.mubr.msk.bf16.vlgmr.msra.gmra.mxu1 %vm762_vm0, %v860_v31 }
 0x12f   : > { %1675 = vmatpush3.bf16.msra.mxu1 %v1754_v26  ;;  %1678 = vmatprep.mubr.msk.bf16.mxu1 %vm762_vm0, %v941_v33  ;;  %v1767_v33 = vld [vmem:[%s2028_s7 + $0x40] sm:$0xff]  }
 0x130   : > { %1676 = vmatprep.subr.bf16.mxu1 %v1755_v32 }
 0x133   : > { %1677 = vmatpush3.bf16.msra.mxu1 %v1755_v32  ;;  %v1766_v32 = vld [vmem:[%s2028_s7 + $0x48] sm:$0xff]  }
 0x134   : > { %1682 = vmatprep.subr.bf16.mxu1 %v1756_v37 }
 0x136   : > { %1679 = vmatmul.mubr.msk.bf16.vlgmr.msra.gmra.mxu1 %vm762_vm0, %v942_v36 }
 0x137   : > { %1683 = vmatpush3.bf16.msra.mxu1 %v1756_v37 }
 0x138   : > { %1684 = vmatprep.subr.bf16.mxu1 %v1758_v39 }
 0x13b   : > { %1685 = vmatpush3.bf16.msra.mxu1 %v1758_v39  ;;  %v1506_v39 = vld [vmem:[%s2029_s8] ss:$0 sm:$0xff] }
 0x13c   : > { %1686 = vmatprep.subr.bf16.mxu1 %v1760_v41 }
 0x13f   : > { %1687 = vmatpush3.bf16.msra.mxu1 %v1760_v41 }
 0x140   : > { %1688 = vmatprep.subr.bf16.mxu1 %v1762_v43 }
 0x143   : > { %1689 = vmatpush3.bf16.msra.mxu1 %v1762_v43 }
 0x144   : > { %1706 = vmatprep.subr.bf16.mxu1 %v1983_v45 }
 0x1e6   : > { %v1664_v46 = vpop.f32.mrf.mxu1 }
 0x1e7   : > { %v853_v54 = vadd.f32 %v1664_v46, %v1483_v51 }
 0x1e8   : > { %v830_v47 = vpop.f32.mrf.mxu1 }
 0x1e9   : > { %v851_v56 = vadd.f32 %v1483_v51, %v830_v47 }
 0x1ea   : > { %v1665_v48 = vpop.f32.mrf.mxu1 }
 0x1eb   : > { %v854_v60 = vadd.f32 %v1665_v48, %v1483_v51 }
 0x1ec   : > { %v833_v49 = vpop.f32.mrf.mxu1 }
 0x1ed   : > { %v852_v63 = vadd.f32 %v1483_v51, %v833_v49 }
 0x1ee   : > { %v1672_v50 = vpop.f32.mrf.mxu1 }
 0x1ef   : > { %v935_v57 = vadd.f32 %v1672_v50, %v853_v54 }
 0x1f0   : > { %v918_v52 = vpop.f32.mrf.mxu1 }
 0x1f1   : > { %v933_v61 = vadd.f32 %v918_v52, %v851_v56 }
 0x1f2   : > { %v1673_v53 = vpop.f32.mrf.mxu1 }
 0x1f3   : > { %v936_v1 = vadd.f32 %v1673_v53, %v854_v60  ;;  %v1343_v53 = vstv %s1033_s30 }
 0x1f4   : > { %v921_v55 = vpop.f32.mrf.mxu1 }
 0x1f5   : > { %v934_v4 = vadd.f32 %v921_v55, %v852_v63 }
 0x1f6   : > { %v1680_v58 = vpop.f32.mrf.mxu1 }
 0x1f7   : > { %v1017_v62 = vadd.f32 %v1680_v58, %v935_v57 }
 0x1f8   : > { %v1000_v0 = vpop.f32.mrf.mxu1 }
 0x1f9   : > { %vm1021_vm7 = vcmp.gt.f32.partialorder %v1017_v62, 0.0  ;;  %v1026_v2 = vmul.f32 %v1023_v59, %v1017_v62  ;;  %v1015_v3 = vadd.f32 %v1000_v0, %v933_v61 }
 0x1fa   : > { %v1681_v5 = vpop.f32.mrf.mxu1 }
 0x1fb   : > { %v1030_v6 = vsel %vm1021_vm7, %v1017_v62, %v1026_v2  ;;  %vm1019_vm8 = vcmp.gt.f32.partialorder %v1015_v3, 0.0  ;;  %v1024_v7 = vmul.f32 %v1023_v59, %v1015_v3  ;;  %v1018_v8 = vadd.f32 %v1681_v5, %v936_v1 }
 0x1fc   : > { %1037 = vst.msk [vmem:[#allocation2 + $0x10] sm:$0xff] %vm1034_vm6, %v1030_v6  ;;  %v1003_v9 = vpop.f32.mrf.mxu1 }
 0x1fd   : > { %v1028_v10 = vsel %vm1019_vm8, %v1015_v3, %v1024_v7  ;;  %vm1022_vm10 = vcmp.gt.f32.partialorder %v1018_v8, 0.0  ;;  %v1027_v11 = vmul.f32 %v1023_v59, %v1018_v8  ;;  %v1016_v12 = vadd.f32 %v1003_v9, %v934_v4 }
 0x1fe   : > { %1035 = vst.msk [vmem:[#allocation2] sm:$0xff] %vm1034_vm6, %v1028_v10 }
 0x1ff   : > { %v1031_v13 = vsel %vm1022_vm10, %v1018_v8, %v1027_v11  ;;  %vm1020_vm11 = vcmp.gt.f32.partialorder %v1016_v12, 0.0  ;;  %v1025_v14 = vmul.f32 %v1023_v59, %v1016_v12 }
 0x200   : > { %1039 = vst.msk [vmem:[#allocation2 + $0x18] sm:$0xf] %vm1038_vm9, %v1031_v13 }
 0x201   : > { %v1029_v15 = vsel %vm1020_vm11, %v1016_v12, %v1025_v14 }
 0x202   : > { %1036 = vst.msk [vmem:[#allocation2 + $0x8] sm:$0xff] %vm1034_vm6, %v1029_v15 }
 0x203   : > { %v1042_v25 = vld [vmem:[#allocation2 + $0x10] sm:$0xff] }
 0x205   : > { %v1040_v16 = vld [vmem:[#allocation2] sm:$0xff] }
 0x207   : > { %v1043_v17 = vld [vmem:[#allocation2 + $0x18] sm:$0x3]  ;;  %v1244_v35 = vld [vmem:[#allocation2 + $0x1a] sm:$0x3] }
 0x208   : > { %v1145_v18 = vld [vmem:[#allocation2 + $0x11] sm:$0xff]  ;;  %v1146_v19 = vld [vmem:[#allocation2 + $0x19] sm:$0x3]  ;;  %v1045_v28 = vpack.c.bf16 %v1043_v17, %v1042_v25 }
 0x209   : > { %v1041_v20 = vld [vmem:[#allocation2 + $0x8] sm:$0xff]  ;;  %v1148_v29 = vpack.c.bf16 %v1146_v19, %v1145_v18  ;;  %v1243_v34 = vld [vmem:[#allocation2 + $0x12] sm:$0xff] }
 0x20a   : > { %v1143_v21 = vld [vmem:[#allocation2 + $0x1] sm:$0xff]  ;;  %v1144_v22 = vld [vmem:[#allocation2 + $0x9] sm:$0xff]  ;;  %v1044_v23 = vpack.c.bf16 %v1041_v20, %v1040_v16  ;;  %v1246_v36 = vpack.c.bf16 %v1244_v35, %v1243_v34 }
 0x20b   : > { %v1147_v24 = vpack.c.bf16 %v1144_v22, %v1143_v21  ;;  %v1241_v26 = vld [vmem:[#allocation2 + $0x2] sm:$0xff]  ;;  %v1242_v27 = vld [vmem:[#allocation2 + $0xa] sm:$0xff] }
 0x20c   : > { %1690 = vmatprep.mubr.msk.bf16.mxu1 %vm1034_vm6, %v1044_v23  ;;  %v1245_v31 = vpack.c.bf16 %v1242_v27, %v1241_v26 }
 0x20d   : > { %1702 = vmatprep.mubr.msk.bf16.mxu0 %vm1034_vm6, %v1147_v24  ;;  %1691 = vmatmul.mubr.msk.bf16.vlgmr.msra.gmra.mxu1 %vm1034_vm6, %v1045_v28 }
 0x20e   : > { %1703 = vmatmul.mubr.msk.bf16.vlgmr.msra.gmra.mxu0 %vm1034_vm6, %v1148_v29  ;;  %1707 = vmatpush3.bf16.msra.mxu1 %v1983_v45 }
 0x20f   : > { %1714 = vmatprep.mubr.msk.bf16.mxu1 %vm1034_vm6, %v1245_v31  ;;  %1708 = vmatprep.subr.bf16.mxu1 %v1765_v30 }
 0x212   : > { %1709 = vmatpush3.bf16.msra.mxu1 %v1765_v30 }
 0x213   : > { %1710 = vmatprep.subr.bf16.mxu1 %v1766_v32 }
 0x216   : > { %1711 = vmatpush3.bf16.msra.mxu1 %v1766_v32 }
 0x217   : > { %1712 = vmatprep.subr.bf16.mxu1 %v1767_v33 }
 0x21a   : > { %1713 = vmatpush3.bf16.msra.mxu1 %v1767_v33 }
 0x21d   : > { %1715 = vmatmul.mubr.msk.bf16.vlgmr.msra.gmra.mxu1 %vm1034_vm6, %v1246_v36 }
 0x2cd   : > { %v1692_v37 = vpop.f32.mrf.mxu1 }
 0x2ce   : > { %v1704_v40 = vpop.f32.mrf.mxu0  ;;  %v1141_v42 = vadd.f32 %v1692_v37, %v1506_v39 }
 0x2cf   : > { %v1118_v38 = vpop.f32.mrf.mxu1 }
 0x2d0   : > { %v1222_v43 = vpop.f32.mrf.mxu0  ;;  %v1139_v44 = vadd.f32 %v1506_v39, %v1118_v38  ;;  %v1239_v46 = vadd.f32 %v1704_v40, %v1141_v42 }
 0x2d1   : > { %v1693_v41 = vpop.f32.mrf.mxu1 }
 0x2d2   : > { %v1142_v47 = vadd.f32 %v1693_v41, %v1506_v39  ;;  %v1705_v48 = vpop.f32.mrf.mxu0  ;;  %v1237_v50 = vadd.f32 %v1222_v43, %v1139_v44 }
 0x2d3   : > { %v1121_v45 = vpop.f32.mrf.mxu1 }
 0x2d4   : > { %v1140_v51 = vadd.f32 %v1506_v39, %v1121_v45  ;;  %v1240_v55 = vadd.f32 %v1705_v48, %v1142_v47  ;;  %v1225_v57 = vpop.f32.mrf.mxu0 }
 0x2d6   : > { %v1238_v60 = vadd.f32 %v1225_v57, %v1140_v51 }
 0x2dd   : > { %v1716_v49 = vpop.f32.mrf.mxu1 }
 0x2de   : > { %v1337_v52 = vadd.f32 %v1716_v49, %v1239_v46 }
 0x2df   : > { %v1320_v54 = vpop.f32.mrf.mxu1 }
 0x2e0   : > { %v1335_v56 = vadd.f32 %v1320_v54, %v1237_v50  ;;  %v1346_v58 = vmul.f32 %v1343_v53, %v1337_v52  ;;  %vm1341_vm12 = vcmp.gt.f32.partialorder %v1337_v52, 0.0 }
 0x2e1   : > { %v1717_v59 = vpop.f32.mrf.mxu1 }
 0x2e2   : > { %v1344_v61 = vmul.f32 %v1343_v53, %v1335_v56  ;;  %v1338_v62 = vadd.f32 %v1717_v59, %v1240_v55  ;;  %vm1339_vm13 = vcmp.gt.f32.partialorder %v1335_v56, 0.0  ;;  %v1350_v2 = vsel %vm1341_vm12, %v1337_v52, %v1346_v58 }
 0x2e3   : > { %v1323_v63 = vpop.f32.mrf.mxu1  ;;  %v1354_v8 = vsel %vm1034_vm6, %v1350_v2, -inf }
 0x2e4   : > { %vm1342_vm14 = vcmp.gt.f32.partialorder %v1338_v62, 0.0  ;;  %v1347_v0 = vmul.f32 %v1343_v53, %v1338_v62  ;;  %v1336_v1 = vadd.f32 %v1323_v63, %v1238_v60  ;;  %v1348_v3 = vsel %vm1339_vm13, %v1335_v56, %v1344_v61 }
 0x2e5   : > { %v1352_v9 = vsel %vm1034_vm6, %v1348_v3, -inf }
 0x2e6   : > { %v1351_v4 = vsel %vm1342_vm14, %v1338_v62, %v1347_v0  ;;  %vm1340_vm0 = vcmp.gt.f32.partialorder %v1336_v1, 0.0  ;;  %v1345_v5 = vmul.f32 %v1343_v53, %v1336_v1 }
 0x2e7   : > { %v1356_v6 = vsel %vm1355_vm15, %v1351_v4, -inf }
 0x2e8   : > { %v1349_v7 = vsel %vm1340_vm0, %v1336_v1, %v1345_v5  ;;  %v1358_v11 = vmax.f32 %v1354_v8, %v1356_v6 }
 0x2e9   : > { %v1353_v10 = vsel %vm1034_vm6, %v1349_v7, -inf }
 0x2ea   : > { %v1357_v12 = vmax.f32 %v1352_v9, %v1353_v10 }
 0x2ec   : > { %v1359_v13 = vmax.f32 %v1357_v12, %v1358_v11 }
 0x2ee   : > { %v1360_v14 = vrot.slane %v1359_v13, 4 }
 0x2f0   : > { %v1361_v15 = vmax.f32 %v1359_v13, %v1360_v14 }
 0x2f2   : > { %v1362_v16 = vrot.slane %v1361_v15, 2 }
 0x2f4   : > { %v1363_v17 = vmax.f32 %v1361_v15, %v1362_v16 }
 0x2f6   : > { %v1364_v18 = vrot.slane %v1363_v17, 1 }
 0x2f8   : > { %v1365_v19 = vmax.f32 %v1363_v17, %v1364_v18 }
 0x2fa   : > { %1367 = vst.msk [vmem:[%s358_s13] sm:$0x1] %vm1366_vm1, %v1365_v19 }
 0x2fb PF: > { %s23_s19 = sadd.s32 1, %s1774_s19  }
 0x2fc   : > { %p20_p4 = scmp.ge.s32.totalorder %s23_s19, 4  }
 0x2fe   :  { %22 = sbr.rel (!%p20_p4) target bundleno = 4 (0x4), region = 96 }

// kernel: capla_forward.13
= control target key start
LH: loop header
LB: loop body
LE: loop exit
PB: predicated region body
PF: predicated region fallthrough
CT: control target
= control target key end

     0   :  { %v806_v1 = vmov 0   ;;  %vm116_vm0 = vcmask 523264   ;;  %vm635_vm4 = vcmask 1041408   ;;  %vm642_vm5 = vcmask 1024   ;;  %s1075_s4 = inlined_call_operand.vmem [shape: bf16[64,256], index: 4, kind: input, shape index: {}]   ;;  %s1076_s3 = inlined_call_operand.vmem [shape: bf16[128,256], index: 3, kind: input, shape index: {}]   ;;  %s1077_s1 = inlined_call_operand.vmem [shape: f32[2,64], index: 1, kind: input, shape index: {}]   ;;  %s1078_s5 = inlined_call_operand.vmem [shape: bf16[128,256], index: 5, kind: input, shape index: {}]   ;;  %s1079_s0 = inlined_call_operand.vmem [shape: f32[2,128], index: 0, kind: input, shape index: {}]   ;;  %s1080_s2 = inlined_call_operand.vmem [shape: f32[2,128], index: 2, kind: input, shape index: {}]   ;;  %s1081_s8 = inlined_call_operand.vmem [shape: bf16[256,128], index: 8, kind: input, shape index: {}]   ;;  %s1082_s6 = inlined_call_operand.vmem [shape: f32[1,256], index: 6, kind: input, shape index: {}]   ;;  %s1083_s7 = inlined_call_operand.<no memory space> [shape: f32[1], index: 7, kind: input, shape index: {}]   ;;  %s1084_s9 = inlined_call_operand.vmem [shape: f32[1,128], index: 9, kind: input, shape index: {}]   ;;  %s1085_s10 = inlined_call_operand.<no memory space> [shape: f32[1], index: 10, kind: input, shape index: {}]   ;;  %s1086_s11 = inlined_call_operand.vmem [shape: f32[1,128], index: 11, kind: input, shape index: {}]   ;;  %s1087_s12 = inlined_call_operand.<no memory space> [shape: f32[1], index: 12, kind: input, shape index: {}]   ;;  %s1088_s13 = inlined_call_operand.vmem [shape: f32[2,1], index: 13, kind: output, shape index: {}]  }
   0x1   :  { %v730_v0 = vld [vmem:[%s1075_s4 + $0x34] ss:$8 sps:$4 sm:$0xff]   ;;  %152 = vmatprep.mubr.bf16.mxu0 %v806_v1  ;;  %273 = vmatprep.mubr.bf16.mxu1 %v806_v1  ;;  %v734_v3 = vld [vmem:[%s1075_s4 + $0x30] ss:$8 sps:$4 sm:$0xff]   ;;  %v736_v5 = vld [vmem:[%s1075_s4 + $0x24] ss:$8 sps:$4 sm:$0xff]  }
   0x2   :  { %v732_v2 = vld [vmem:[%s1076_s3 + $0x74] ss:$8 sps:$4 sm:$0xff]   ;;  %128 = vmatprep.subr.bf16.mxu0 %v730_v0  ;;  %v735_v4 = vld [vmem:[%s1076_s3 + $0x70] ss:$8 sps:$4 sm:$0xff]   ;;  %v738_v6 = vld [vmem:[%s1076_s3 + $0x64] ss:$8 sps:$4 sm:$0xff]  }
   0x3   :  { %241 = vmatprep.subr.bf16.mxu1 %v732_v2  ;;  %129 = vmatpush1.bf16.msra.mxu0 %v734_v3  ;;  %v740_v7 = vld [vmem:[%s1075_s4 + $0x20] ss:$8 sps:$4 sm:$0xff]   ;;  %v742_v9 = vld [vmem:[%s1075_s4 + $0x14] ss:$8 sps:$4 sm:$0xff]   ;;  %v746_v11 = vld [vmem:[%s1075_s4 + $0x10] ss:$8 sps:$4 sm:$0xff]  }
   0x4   :  { %242 = vmatpush1.bf16.msra.mxu1 %v735_v4  ;;  %130 = vmatprep.subr.bf16.mxu0 %v736_v5  ;;  %v741_v8 = vld [vmem:[%s1076_s3 + $0x60] ss:$8 sps:$4 sm:$0xff]   ;;  %v744_v10 = vld [vmem:[%s1076_s3 + $0x54] ss:$8 sps:$4 sm:$0xff]   ;;  %v747_v12 = vld [vmem:[%s1076_s3 + $0x50] ss:$8 sps:$4 sm:$0xff]   ;;  %v425_v5 = vlaneseq }
   0x5   :  { %243 = vmatprep.subr.bf16.mxu1 %v738_v6  ;;  %v748_v13 = vld [vmem:[%s1075_s4 + $0x4] ss:$8 sps:$4 sm:$0xff]   ;;  %v752_v15 = vld [vmem:[%s1075_s4] ss:$8 sps:$4 sm:$0xff]   ;;  %v754_v18 = vld [vmem:[%s1076_s3 + $0x34] ss:$8 sps:$4 sm:$0xff]  }
   0x6   :  { %v750_v14 = vld [vmem:[%s1076_s3 + $0x44] ss:$8 sps:$4 sm:$0xff]   ;;  %v753_v16 = vld [vmem:[%s1076_s3 + $0x40] ss:$8 sps:$4 sm:$0xff]   ;;  %v758_v19 = vld [vmem:[%s1078_s5 + $0x74] ss:$8 sps:$4 sm:$0xff]  }
   0x7   :  { %131 = vmatpush1.bf16.msra.mxu0 %v740_v7  ;;  %v66_v17 = vld [vmem:[%s1077_s1] sm:$0x3]  ;;  %v756_v21 = vld [vmem:[%s1078_s5 + $0x70] ss:$8 sps:$4 sm:$0xff]   ;;  %v760_v23 = vld [vmem:[%s1076_s3 + $0x24] ss:$8 sps:$4 sm:$0xff]  }
   0x8   :  { %244 = vmatpush1.bf16.msra.mxu1 %v741_v8  ;;  %132 = vmatprep.subr.bf16.mxu0 %v742_v9  ;;  %v67_v20 = vpack.c.bf16 %v66_v17, %v66_v17  ;;  %v759_v22 = vld [vmem:[%s1076_s3 + $0x30] ss:$8 sps:$4 sm:$0xff]   ;;  %v764_v24 = vld [vmem:[%s1078_s5 + $0x64] ss:$8 sps:$4 sm:$0xff]   ;;  %v762_v25 = vld [vmem:[%s1078_s5 + $0x60] ss:$8 sps:$4 sm:$0xff]  }
   0x9   :  { %245 = vmatprep.subr.bf16.mxu1 %v744_v10  ;;  %v765_v26 = vld [vmem:[%s1076_s3 + $0x20] ss:$8 sps:$4 sm:$0xff]   ;;  %v766_v27 = vld [vmem:[%s1076_s3 + $0x14] ss:$8 sps:$4 sm:$0xff]   ;;  %v768_v29 = vld [vmem:[%s1078_s5 + $0x50] ss:$8 sps:$4 sm:$0xff]  }
   0xa   :  { %v770_v28 = vld [vmem:[%s1078_s5 + $0x54] ss:$8 sps:$4 sm:$0xff]   ;;  %v771_v30 = vld [vmem:[%s1076_s3 + $0x10] ss:$8 sps:$4 sm:$0xff]   ;;  %v772_v31 = vld [vmem:[%s1076_s3 + $0x4] ss:$8 sps:$4 sm:$0xff]  }
   0xb   :  { %133 = vmatpush1.bf16.msra.mxu0 %v746_v11  ;;  %v776_v32 = vld [vmem:[%s1078_s5 + $0x44] ss:$8 sps:$4 sm:$0xff]   ;;  %v774_v33 = vld [vmem:[%s1078_s5 + $0x40] ss:$8 sps:$4 sm:$0xff]   ;;  %v780_v36 = vld [vmem:[%s1078_s5 + $0x34] ss:$8 sps:$4 sm:$0xff]  }
   0xc   :  { %246 = vmatpush1.bf16.msra.mxu1 %v747_v12  ;;  %134 = vmatprep.subr.bf16.mxu0 %v748_v13  ;;  %v777_v34 = vld [vmem:[%s1076_s3] ss:$8 sps:$4 sm:$0xff]   ;;  %v778_v38 = vld [vmem:[%s1078_s5 + $0x30] ss:$8 sps:$4 sm:$0xff]   ;;  %v783_v39 = vld [vmem:[%s1078_s5 + $0x24] ss:$8 sps:$4 sm:$0xff]  }
   0xd   :  { %247 = vmatprep.subr.bf16.mxu1 %v750_v14  ;;  %v48_v35 = vld [vmem:[%s1079_s0] sm:$0x3]  ;;  %v786_v41 = vld [vmem:[%s1078_s5 + $0x14] ss:$8 sps:$4 sm:$0xff]   ;;  %v784_v42 = vld [vmem:[%s1078_s5 + $0x10] ss:$8 sps:$4 sm:$0xff]  }
   0xe   :  { %v49_v37 = vpack.c.bf16 %v48_v35, %v48_v35  ;;  %v781_v40 = vld [vmem:[%s1078_s5 + $0x20] ss:$8 sps:$4 sm:$0xff]   ;;  %v789_v43 = vld [vmem:[%s1078_s5 + $0x4] ss:$8 sps:$4 sm:$0xff]   ;;  %v790_v47 = vld [vmem:[%s1081_s8 + $0x78] sm:$0xff]   ;;  %v426_v8 = vshrl.u32 %v425_v5, 7  ;;  %v624_v35 = vstv %s1085_s10 }
   0xf   :  { %135 = vmatpush1.bf16.msra.mxu0 %v752_v15  ;;  %v787_v44 = vld [vmem:[%s1078_s5] ss:$8 sps:$4 sm:$0xff]   ;;  %v791_v48 = vld [vmem:[%s1081_s8 + $0x38] sm:$0xff]   ;;  %v792_v49 = vld [vmem:[%s1081_s8 + $0x70] sm:$0xff]  }
  0x10   :  { %248 = vmatpush1.bf16.msra.mxu1 %v753_v16  ;;  %380 = vmatprep.subr.bf16.mxu0 %v758_v19  ;;  %v282_v45 = vld [vmem:[%s1080_s2] sm:$0x3]  ;;  %v793_v50 = vld [vmem:[%s1081_s8 + $0x30] sm:$0xff]   ;;  %v794_v51 = vld [vmem:[%s1081_s8 + $0x68] sm:$0xff]   ;;  %v427_v9 = vsub.s32 0, %v426_v8  ;;  %v431_v11 = vsub.s32 1, %v426_v8 }
  0x11   :  { %249 = vmatprep.subr.bf16.mxu1 %v754_v18  ;;  %v283_v46 = vpack.c.bf16 %v282_v45, %v282_v45  ;;  %v795_v52 = vld [vmem:[%s1081_s8 + $0x28] sm:$0xff]   ;;  %v796_v53 = vld [vmem:[%s1081_s8 + $0x60] sm:$0xff]   ;;  %v798_v55 = vld [vmem:[%s1081_s8 + $0x58] sm:$0xff]   ;;  %v440_v18 = vstv %s1083_s7 }
  0x12   :  { %656 = vmatmul.mubr.msk.bf16.vlgmr.msra.gmra.mxu0 %vm116_vm0, %v67_v20  ;;  %v797_v54 = vld [vmem:[%s1081_s8 + $0x20] sm:$0xff]   ;;  %v799_v56 = vld [vmem:[%s1081_s8 + $0x18] sm:$0xff]   ;;  %v800_v57 = vld [vmem:[%s1081_s8 + $0x50] sm:$0xff]  }
  0x13   :  { %381 = vmatpush1.bf16.msra.mxu0 %v756_v21  ;;  %412 = vmatprep.mubr.bf16.mxu0 %v806_v1  ;;  %v801_v58 = vld [vmem:[%s1081_s8 + $0x10] sm:$0xff]   ;;  %v802_v59 = vld [vmem:[%s1081_s8 + $0x48] sm:$0xff]   ;;  %v804_v61 = vld [vmem:[%s1081_s8 + $0x40] sm:$0xff]  }
  0x14   :  { %250 = vmatpush1.bf16.msra.mxu1 %v759_v22  ;;  %382 = vmatprep.subr.bf16.mxu0 %v764_v24  ;;  %v803_v60 = vld [vmem:[%s1081_s8 + $0x8] sm:$0xff]   ;;  %v805_v62 = vld [vmem:[%s1081_s8] sm:$0xff]  }
  0x15   :  { %251 = vmatprep.subr.bf16.mxu1 %v760_v23  ;;  %v423_v10 = vld [vmem:[%s1082_s6] sm:$0x3] }
  0x16   :  { %v428_v13 = vrot.slane %v423_v10, %v427_v9  ;;  %v432_v17 = vrot.slane %v423_v10, %v431_v11 }
  0x17   :  { %383 = vmatpush1.bf16.msra.mxu0 %v762_v25 }
  0x18   :  { %252 = vmatpush1.bf16.msra.mxu1 %v765_v26  ;;  %384 = vmatprep.subr.bf16.mxu0 %v770_v28 }
  0x19   :  { %253 = vmatprep.subr.bf16.mxu1 %v766_v27 }
  0x1b   :  { %385 = vmatpush1.bf16.msra.mxu0 %v768_v29 }
  0x1c   :  { %254 = vmatpush1.bf16.msra.mxu1 %v771_v30  ;;  %386 = vmatprep.subr.bf16.mxu0 %v776_v32  ;;  %v689_v32 = vld [vmem:[%s1084_s9] ss:$0 sm:$0xff] }
  0x1d   :  { %255 = vmatprep.subr.bf16.mxu1 %v772_v31 }
  0x1f   :  { %387 = vmatpush1.bf16.msra.mxu0 %v774_v33 }
  0x20   :  { %256 = vmatpush1.bf16.msra.mxu1 %v777_v34  ;;  %388 = vmatprep.subr.bf16.mxu0 %v780_v36 }
  0x21   :  { %707 = vmatprep.subr.bf16.mxu1 %v790_v47 }
  0x23   :  { %274 = vmatmul.mubr.bf16.vlgmr.msra.gmra.mxu1 %v49_v37  ;;  %389 = vmatpush1.bf16.msra.mxu0 %v778_v38 }
  0x24   :  { %390 = vmatprep.subr.bf16.mxu0 %v783_v39  ;;  %708 = vmatpush3.bf16.msra.mxu1 %v791_v48 }
  0x25   :  { %709 = vmatprep.subr.bf16.mxu1 %v792_v49 }
  0x27   :  { %391 = vmatpush1.bf16.msra.mxu0 %v781_v40  ;;  %v706_v40 = vld [vmem:[%s1086_s11] ss:$0 sm:$0xff] }
  0x28   :  { %392 = vmatprep.subr.bf16.mxu0 %v786_v41  ;;  %710 = vmatpush3.bf16.msra.mxu1 %v793_v50 }
  0x29   :  { %711 = vmatprep.subr.bf16.mxu1 %v794_v51 }
  0x2b   :  { %393 = vmatpush1.bf16.msra.mxu0 %v784_v42 }
  0x2c   :  { %394 = vmatprep.subr.bf16.mxu0 %v789_v43  ;;  %712 = vmatpush3.bf16.msra.mxu1 %v795_v52 }
  0x2d   :  { %713 = vmatprep.subr.bf16.mxu1 %v796_v53 }
  0x2f   :  { %395 = vmatpush1.bf16.msra.mxu0 %v787_v44  ;;  %v640_v44 = vstv %s1087_s12 }
  0x30   :  { %714 = vmatpush3.bf16.msra.mxu1 %v797_v54 }
  0x31   :  { %715 = vmatprep.subr.bf16.mxu1 %v798_v55 }
  0x32   :  { %413 = vmatmul.mubr.bf16.vlgmr.msra.gmra.mxu0 %v283_v46 }
  0x34   :  { %716 = vmatpush3.bf16.msra.mxu1 %v799_v56 }
  0x35   :  { %717 = vmatprep.subr.bf16.mxu1 %v800_v57 }
  0x38   :  { %718 = vmatpush3.bf16.msra.mxu1 %v801_v58 }
  0x39   :  { %719 = vmatprep.subr.bf16.mxu1 %v802_v59 }
  0x3c   :  { %720 = vmatpush3.bf16.msra.mxu1 %v803_v60 }
  0x3d   :  { %721 = vmatprep.subr.bf16.mxu1 %v804_v61 }
  0x40   :  { %722 = vmatpush3.bf16.msra.mxu1 %v805_v62 }
  0xd2   :  { %v154_v63 = vpop.f32.mrf.mxu0 }
  0xd4   :  { %v156_v0 = vpop.f32.mrf.mxu0 }
  0xd6   :  { %v158_v1 = vpop.f32.mrf.mxu0 }
  0xd8   :  { %v159_v2 = vpop.f32.mrf.mxu0 }
  0xe3   :  { %v275_v3 = vpop.f32.mrf.mxu1 }
  0xe4   :  { %v276_v12 = vadd.f32 %v275_v3, %v154_v63 }
  0xe5   :  { %v277_v4 = vpop.f32.mrf.mxu1 }
  0xe6   :  { %v278_v15 = vadd.f32 %v277_v4, %v156_v0 }
  0xe7   :  { %v279_v6 = vpop.f32.mrf.mxu1 }
  0xe9   :  { %v280_v7 = vpop.f32.mrf.mxu1 }
  0xf2   :  { %v414_v14 = vpop.f32.mrf.mxu0 }
  0xf3   :  { %v421_v16 = vadd.f32 %v414_v14, %v276_v12 }
  0xf4   :  { %v416_v19 = vpop.f32.mrf.mxu0 }
  0xf5   :  { %v435_v20 = vadd.f32 %v428_v13, %v421_v16  ;;  %v422_v21 = vadd.f32 %v416_v19, %v278_v15 }
  0xf6   :  { %v418_v22 = vpop.f32.mrf.mxu0 }
  0xf7   :  { %vm438_vm1 = vcmp.gt.f32.partialorder %v435_v20, 0.0  ;;  %v441_v23 = vmul.f32 %v440_v18, %v435_v20  ;;  %v436_v24 = vadd.f32 %v432_v17, %v422_v21 }
  0xf8   :  { %v419_v25 = vpop.f32.mrf.mxu0 }
  0xf9   :  { %v442_v26 = vmul.f32 %v440_v18, %v436_v24  ;;  %vm439_vm2 = vcmp.gt.f32.partialorder %v436_v24, 0.0  ;;  %v443_v27 = vsel %vm438_vm1, %v435_v20, %v441_v23 }
  0xfa   :  { %v445_v30 = vpack.c.bf16 %v443_v27, %v443_v27 }
  0xfb   :  { %v444_v28 = vsel %vm439_vm2, %v436_v24, %v442_v26 }
  0xfc   :  { %v446_v29 = vpack.c.bf16 %v444_v28, %v444_v28 }
  0xfe   :  { %614 = vmatprep.mubr.bf16.mxu1 %v446_v29 }
  0xff   :  { %615 = vmatmul.mubr.bf16.vlgmr.msra.gmra.mxu1 %v445_v30 }
 0x1bf   :  { %v723_v31 = vpop.f32.mrf.mxu1 }
 0x1c1   :  { %v724_v33 = vpop.f32.mrf.mxu1 }
 0x1c2   :  { %v725_v34 = vadd.f32 %v724_v33, %v723_v31 }
 0x1c3   :  { %v726_v36 = vpop.f32.mrf.mxu1 }
 0x1c4   :  { %v617_v37 = vadd.f32 %v725_v34, %v689_v32 }
 0x1c5   :  { %v727_v38 = vpop.f32.mrf.mxu1 }
 0x1c6   :  { %v625_v39 = vmul.f32 %v624_v35, %v617_v37  ;;  %vm623_vm3 = vcmp.gt.f32.partialorder %v617_v37, 0.0 }
 0x1c8   :  { %v626_v41 = vsel %vm623_vm3, %v617_v37, %v625_v39 }
 0x1c9   :  { %v634_v42 = vmul.f32 %v706_v40, %v626_v41 }
 0x1cb   :  { %v636_v43 = vsel %vm635_vm4, %v634_v42, 0.0 }
 0x1cc   :  { %637 = vadd.xlane.f32.xlu0 %v636_v43 }
 0x255   :  { %v638_v45 = vpop.xlane.xlu0 %637 }
 0x256   :  { %v641_v46 = vadd.f32 %v640_v44, %v638_v45 }
 0x258   :  { %643 = vst.msk [vmem:[%s1088_s13] sm:$0x3] %vm642_vm5, %v641_v46 }

// kernel: capla_forward.12
= control target key start
LH: loop header
LB: loop body
LE: loop exit
PB: predicated region body
PF: predicated region fallthrough
CT: control target
= control target key end

     0   :  { %s4250_s0 = inlined_call_operand.vmem [shape: f32[2,32,128], index: 0, kind: input, shape index: {}]   ;;  %s4251_s1 = inlined_call_operand.vmem [shape: bf16[128,8], index: 1, kind: input, shape index: {}]   ;;  %s4252_s2 = inlined_call_operand.vmem [shape: f32[1,8], index: 2, kind: input, shape index: {}]   ;;  %s4253_s3 = inlined_call_operand.<no memory space> [shape: f32[1], index: 3, kind: input, shape index: {}]   ;;  %s4254_s4 = inlined_call_operand.vmem [shape: bf16[9,8,32], index: 4, kind: input, shape index: {}]   ;;  %s4255_s5 = inlined_call_operand.vmem [shape: f32[1,32], index: 5, kind: input, shape index: {}]   ;;  %s4256_s6 = inlined_call_operand.vmem [shape: f32[1,32], index: 6, kind: input, shape index: {}]   ;;  %s4257_s7 = inlined_call_operand.<no memory space> [shape: f32[1], index: 7, kind: input, shape index: {}]   ;;  %s4258_s8 = inlined_call_operand.vmem [shape: bf16[32,16], index: 8, kind: input, shape index: {}]   ;;  %s4259_s9 = inlined_call_operand.vmem [shape: f32[1,16], index: 9, kind: input, shape index: {}]   ;;  %s4260_s10 = inlined_call_operand.<no memory space> [shape: f32[1], index: 10, kind: input, shape index: {}]   ;;  %s4261_s11 = inlined_call_operand.vmem [shape: bf16[9,16,64], index: 11, kind: input, shape index: {}]   ;;  %s4262_s12 = inlined_call_operand.vmem [shape: f32[1,64], index: 12, kind: input, shape index: {}]   ;;  %s4263_s13 = inlined_call_operand.vmem [shape: f32[1,64], index: 13, kind: input, shape index: {}]   ;;  %s4264_s15 = inlined_call_operand.vmem [shape: bf16[64,32], index: 15, kind: input, shape index: {}]   ;;  %s4265_s16 = inlined_call_operand.vmem [shape: f32[1,32], index: 16, kind: input, shape index: {}]   ;;  %s4266_s18 = inlined_call_operand.vmem [shape: bf16[9,32,128], index: 18, kind: input, shape index: {}]   ;;  %s4267_s19 = inlined_call_operand.vmem [shape: f32[1,128], index: 19, kind: input, shape index: {}]   ;;  %s4268_s20 = inlined_call_operand.vmem [shape: f32[1,128], index: 20, kind: input, shape index: {}]   ;;  %s4269_s22 = inlined_call_operand.vmem [shape: f32[2,1,128], index: 22, kind: output, shape index: {}]   ;;  %s4270_s14 = inlined_call_operand.<no memory space> [shape: f32[1], index: 14, kind: input, shape index: {}]   ;;  %s4271_s17 = inlined_call_operand.<no memory space> [shape: f32[1], index: 17, kind: input, shape index: {}]   ;;  %s4272_s21 = inlined_call_operand.<no memory space> [shape: f32[1], index: 21, kind: input, shape index: {}]  }
   0x1   :  { %4275 = sst [smem:[#allocation9_spill]] %s4250_s0 }
   0x2   :  { %4276 = sst [smem:[#allocation10_spill]] %s4251_s1 }
   0x3   :  { %4277 = sst [smem:[#allocation11_spill]] %s4252_s2  ;;  %s3932_s2 = smov 0  }
   0x4   :  { %4278 = sst [smem:[#allocation12_spill]] %s4253_s3 }
   0x5   :  { %4279 = sst [smem:[#allocation13_spill]] %s4254_s4 }
   0x6   :  { %4280 = sst [smem:[#allocation14_spill]] %s4255_s5 }
   0x7   :  { %4281 = sst [smem:[#allocation15_spill]] %s4256_s6 }
   0x8   :  { %s4282_s29 = sld [smem:[#allocation12_spill]] }
   0x9   :  { %28 = sst [smem:[#allocation4]] %s4257_s7 }
   0xa   :  { %29 = sst [smem:[#allocation5]] %s4260_s10 }
   0xb   :  { %30 = sst [smem:[#allocation6]] %s4270_s14 }
   0xc   :  { %31 = sst [smem:[#allocation7]] %s4271_s17 }
   0xd   :  { %32 = sst [smem:[#allocation8]] %s4272_s21 }
   0xe   :  { %27 = sst [smem:[#allocation3]] %s4282_s29 }
   0xf LB: > { %s3226_s7 = sadd.s32 4294967295, %s3796_s2   ;;  %p3230_p0 = scmp.ge.s32.totalorder %s3796_s2, 1  ;;  %s3796_s2 = sphi %s3932_s2, %s38_s2  }
  0x10   : > { %p618_p1 = scmp.lt.s32.totalorder %s3796_s2, 3 }
  0x12   : > { %p619_p2 = pnand %p3230_p0, %p618_p1 }
  0x13   : > { %s4283_s17 = sld [smem:[#allocation10_spill]] (!%p619_p2)  ;;  %p678_p3 = scmp.lt.s32.totalorder (!%p619_p2), %s3226_s7, 1 }
  0x14   : > { %622 = sbr.rel (%p619_p2) target bundleno = 1464 (0x5b8), region = 108  ;;  %s4284_s0 = sld [smem:[#allocation9_spill]] (!%p619_p2) }
  0x15   : > { %s714_s24 = sld [smem:[#allocation3]] (!%p619_p2) }
  0x16   : > { %s4286_s26 = sld [smem:[#allocation11_spill]] (!%p619_p2) }
  0x17   : > { %s4287_s10 = sld [smem:[#allocation14_spill]] (!%p619_p2) }
  0x18   : > { %s717_s14 = sld [smem:[#allocation4]] (!%p619_p2) }
  0x19   : > { %v3748_v0 = vld [vmem:[%s4283_s17 + $0x38] sm:$0xff]   ;;  %v3749_v1 = vld [vmem:[%s4283_s17 + $0x30] sm:$0xff]   ;;  %s4290_s7 = smov (!%p678_p3, %s3226_s7), 1  ;;  %v3798_v2 = vmov 0.0   ;;  %v3750_v3 = vld [vmem:[%s4283_s17 + $0x28] sm:$0xff]   ;;  %vm862_vm0 = vcmask 1043456  }
  0x1a   : > { %3510 = vmatprep.subr.bf16.mxu0 %v3748_v0  ;;  %687 = vst [vmem:[#allocation2] sm:$0xff] %v3798_v2  ;;  %690 = vst [vmem:[#allocation2 + $0x18] sm:$0xff] %v3798_v2  ;;  %s3399_s29 = sshll.u32 %s4290_s7, 5  ;;  %v3751_v4 = vld [vmem:[%s4283_s17 + $0x20] sm:$0xff]   ;;  %v3752_v8 = vld [vmem:[%s4283_s17 + $0x18] sm:$0xff]   ;;  %vm836_vm2 = vcmask 64512   ;;  %s685_s28 = scalar_lea.vmem %s4269_s22, %s4290_s7 }
  0x1b   : > { %692 = vst [vmem:[#allocation2 + $0x28] sm:$0xff] %v3798_v2  ;;  %688 = vst [vmem:[#allocation2 + $0x8] sm:$0xff] %v3798_v2  ;;  %3511 = vmatpush3.bf16.msra.mxu0 %v3748_v0  ;;  %s682_s23 = scalar_lea.vmem %s4284_s0, %s3399_s29  ;;  %v3753_v9 = vld [vmem:[%s4283_s17 + $0x10] sm:$0xff]   ;;  %v3754_v10 = vld [vmem:[%s4283_s17 + $0x8] sm:$0xff]   ;;  %s4285_s29 = sld [smem:[#allocation13_spill]]  ;;  %v827_v23 = vstv %s714_s24  ;;  %vm1525_vm10 = vcmask 261120  }
  0x1c   : > { %689 = vst [vmem:[#allocation2 + $0x10] sm:$0xff] %v3798_v2  ;;  %691 = vst [vmem:[#allocation2 + $0x20] sm:$0xff] %v3798_v2  ;;  %3512 = vmatprep.subr.bf16.mxu0 %v3749_v1  ;;  %v693_v5 = vld [vmem:[%s682_s23] sm:$0xff]  ;;  %v694_v6 = vld [vmem:[%s682_s23 + $0x8] sm:$0xff]  ;;  %s4288_s3 = sld [smem:[#allocation15_spill]]  ;;  %vm1594_vm12 = vcmask 130048  }
  0x1d   : > { %v718_v7 = vpack.c.bf16 %v694_v6, %v693_v5  ;;  %v3755_v11 = vld [vmem:[%s4283_s17] sm:$0xff]   ;;  %v695_v12 = vld [vmem:[%s682_s23 + $0x10] sm:$0xff]  ;;  %v696_v13 = vld [vmem:[%s682_s23 + $0x18] sm:$0xff]  ;;  %s1501_s6 = sld [smem:[#allocation5]] }
  0x1e   : > { %v719_v14 = vpack.c.bf16 %v696_v13, %v695_v12  ;;  %v3233_v21 = vld [vmem:[%s4286_s26] ss:$0 sm:$0xff]  ;;  %s2298_s27 = sld [smem:[#allocation7]] }
  0x1f   : > { %3513 = vmatpush3.bf16.msra.mxu0 %v3749_v1  ;;  %3526 = vmatprep.mubr.bf16.mxu0 %v718_v7 }
  0x20   : > { %3514 = vmatprep.subr.bf16.mxu0 %v3750_v3 }
  0x21   : > { %v3242_v15 = vld [vmem:[%s4285_s29 + $0x4] sm:$0xf]  ;;  %v3256_v16 = vld [vmem:[%s4285_s29 + $0x14] sm:$0xf]  ;;  %v847_v19 = vld [vmem:[%s4285_s29] sm:$0xf] }
  0x22   : > { %3730 = vmatprep.subr.msk.bf16.mxu1 %vm862_vm0, %v3242_v15  ;;  %v864_v17 = vsel %vm862_vm0, %v3242_v15, 0  ;;  %v1198_v18 = vsel %vm862_vm0, %v3256_v16, 0  ;;  %v3262_v20 = vld [vmem:[%s4285_s29 + $0x1c] sm:$0xf]  ;;  %v922_v51 = vsel %vm862_vm0, %v847_v19, 0 }
  0x23   : > { %3515 = vmatpush3.bf16.msra.mxu0 %v3750_v3  ;;  %3531 = vmatpush3.bf16.msra.mxu1 %v864_v17  ;;  %v1338_v54 = vsel %vm862_vm0, %v3262_v20, 0  ;;  %v3247_v56 = vld [vmem:[%s4285_s29 + $0x8] sm:$0xf]  ;;  %v3250_v3 = vld [vmem:[%s4285_s29 + $0xc] sm:$0xf] }
  0x24   : > { %3516 = vmatprep.subr.bf16.mxu0 %v3751_v4  ;;  %3731 = vmatprep.subr.msk.bf16.mxu1 %vm862_vm0, %v847_v19  ;;  %v988_v62 = vsel %vm862_vm0, %v3247_v56, 0  ;;  %v3259_v17 = vld [vmem:[%s4285_s29 + $0x18] sm:$0xf] }
  0x27   : > { %3517 = vmatpush3.bf16.msra.mxu0 %v3751_v4 }
  0x28   : > { %3518 = vmatprep.subr.bf16.mxu0 %v3752_v8 }
  0x2b   : > { %3519 = vmatpush3.bf16.msra.mxu0 %v3752_v8  ;;  %v1058_v8 = vsel %vm862_vm0, %v3250_v3, 0 }
  0x2c   : > { %3520 = vmatprep.subr.bf16.mxu0 %v3753_v9 }
  0x2f   : > { %3521 = vmatpush3.bf16.msra.mxu0 %v3753_v9 }
  0x30   : > { %3522 = vmatprep.subr.bf16.mxu0 %v3754_v10 }
  0x33   : > { %3523 = vmatpush3.bf16.msra.mxu0 %v3754_v10 }
  0x34   : > { %3524 = vmatprep.subr.bf16.mxu0 %v3755_v11 }
  0x37   : > { %3525 = vmatpush3.bf16.msra.mxu0 %v3755_v11  ;;  %v3253_v11 = vld [vmem:[%s4285_s29 + $0x10] sm:$0xf] }
  0x38   : > { %3735 = vmatprep.subr.msk.bf16.mxu0 %vm862_vm0, %v3256_v16  ;;  %v1128_v15 = vsel %vm862_vm0, %v3253_v11, 0 }
  0x3a   : > { %3527 = vmatmul.mubr.bf16.vlgmr.msra.gmra.mxu0 %v719_v14 }
  0x3b   : > { %3561 = vmatpush3.bf16.msra.mxu0 %v1198_v18 }
  0x3c   : > { %3737 = vmatprep.subr.msk.bf16.mxu0 %vm862_vm0, %v3262_v20 }
  0xfa   : > { %v3528_v22 = vpop.f32.mrf.mxu0 }
  0xfb   : > { %v817_v24 = vadd.f32 %v3528_v22, %v3233_v21  ;;  %v1268_v22 = vsel %vm862_vm0, %v3259_v17, 0 }
  0xfc   : > { %v808_v25 = vpop.f32.mrf.mxu0 }
  0xfd   : > { %vm825_vm1 = vcmp.gt.f32.partialorder %v817_v24, 0.0  ;;  %v830_v26 = vmul.f32 %v827_v23, %v817_v24  ;;  %v809_v27 = vadd.f32 %v3233_v21, %v808_v25 }
  0xfe   : > { %v3529_v28 = vpop.f32.mrf.mxu0 }
  0xff   : > { %v834_v29 = vsel %vm825_vm1, %v817_v24, %v830_v26  ;;  %vm823_vm3 = vcmp.gt.f32.partialorder %v809_v27, 0.0  ;;  %v828_v30 = vmul.f32 %v827_v23, %v809_v27  ;;  %v820_v31 = vadd.f32 %v3529_v28, %v3233_v21  ;;  %v3265_v24 = vld [vmem:[%s4285_s29 + $0x20] sm:$0xf] }
 0x100   : > { %839 = vst.msk [vmem:[#allocation2 + $0x18] sm:$0xff] %vm836_vm2, %v834_v29  ;;  %v811_v32 = vpop.f32.mrf.mxu0  ;;  %v1408_v28 = vsel %vm862_vm0, %v3265_v24, 0 }
 0x101   : > { %v832_v33 = vsel %vm823_vm3, %v809_v27, %v828_v30  ;;  %vm826_vm4 = vcmp.gt.f32.partialorder %v820_v31, 0.0  ;;  %v831_v34 = vmul.f32 %v827_v23, %v820_v31  ;;  %v812_v35 = vadd.f32 %v3233_v21, %v811_v32  ;;  %v3756_v30 = vld [vmem:[%s4258_s8 + $0x8] sm:$0xff]  }
 0x102   : > { %837 = vst.msk [vmem:[#allocation2 + $0x8] sm:$0xff] %vm836_vm2, %v832_v33 }
 0x103   : > { %v835_v36 = vsel %vm826_vm4, %v820_v31, %v831_v34  ;;  %vm824_vm5 = vcmp.gt.f32.partialorder %v812_v35, 0.0  ;;  %v829_v37 = vmul.f32 %v827_v23, %v812_v35  ;;  %v3757_v31 = vld [vmem:[%s4258_s8] sm:$0xff]   ;;  %vm2334_vm4 = vcmask 523264  }
 0x104   : > { %840 = vst.msk [vmem:[#allocation2 + $0x20] sm:$0xff] %vm836_vm2, %v835_v36 }
 0x105   : > { %v833_v38 = vsel %vm824_vm5, %v812_v35, %v829_v37 }
 0x106   : > { %838 = vst.msk [vmem:[#allocation2 + $0x10] sm:$0xff] %vm836_vm2, %v833_v38 }
 0x107   : > { %v844_v60 = vld [vmem:[#allocation2 + $0x18] sm:$0xff] }
 0x109   : > { %v848_v39 = vld [vmem:[#allocation2 + $0x4] sm:$0xff] }
 0x10a   : > { %v842_v42 = vld [vmem:[#allocation2 + $0x8] sm:$0xff] }
 0x10b   : > { %v1185_v40 = vld [vmem:[#allocation2 + $0x19] sm:$0xff]  ;;  %v1186_v41 = vld [vmem:[#allocation2 + $0x21] sm:$0xff]  ;;  %v845_v53 = vpack.c.bf16 %v842_v42, %v3798_v2 }
 0x10c   : > { %v851_v49 = vld [vmem:[#allocation2 + $0x1c] sm:$0xff]  ;;  %v1188_v52 = vpack.c.bf16 %v1186_v41, %v1185_v40  ;;  %v1326_v58 = vld [vmem:[#allocation2 + $0x24] sm:$0xff] }
 0x10d   : > { %v849_v43 = vld [vmem:[#allocation2 + $0xc] sm:$0xff]  ;;  %v850_v48 = vld [vmem:[#allocation2 + $0x14] sm:$0xff]  ;;  %v1328_v63 = vpack.c.bf16 %v1326_v58, %v851_v49  ;;  %v976_v6 = vld [vmem:[#allocation2 + $0x1e] sm:$0xff] }
 0x10e   : > { %v1183_v44 = vld [vmem:[#allocation2 + $0x9] sm:$0xff]  ;;  %v1184_v45 = vld [vmem:[#allocation2 + $0x11] sm:$0xff]  ;;  %v852_v46 = vpack.c.bf16 %v849_v43, %v848_v39  ;;  %v853_v50 = vpack.c.bf16 %v851_v49, %v850_v48  ;;  %v1327_v55 = vpack.c.bf16 %v850_v48, %v849_v43  ;;  %v1046_v13 = vld [vmem:[#allocation2 + $0x1f] sm:$0xff] }
 0x10f   : > { %v1187_v47 = vpack.c.bf16 %v1184_v45, %v1183_v44  ;;  %v843_v57 = vld [vmem:[#allocation2 + $0x10] sm:$0xff]  ;;  %v973_v0 = vld [vmem:[#allocation2 + $0x6] sm:$0xff]  ;;  %v1255_v25 = vld [vmem:[#allocation2 + $0x1a] sm:$0xff] }
 0x110   : > { %3532 = vmatprep.mubr.msk.bf16.mxu1 %vm836_vm2, %v852_v46  ;;  %v974_v59 = vld [vmem:[#allocation2 + $0xe] sm:$0xff]  ;;  %v846_v61 = vpack.c.bf16 %v844_v60, %v843_v57  ;;  %v975_v4 = vld [vmem:[#allocation2 + $0x16] sm:$0xff]  ;;  %v1117_v16 = vpack.c.bf16 %v843_v57, %v842_v42  ;;  %v1116_v18 = vld [vmem:[#allocation2 + $0x20] sm:$0xff] }
 0x111   : > { %3562 = vmatprep.mubr.msk.bf16.mxu0 %vm836_vm2, %v1187_v47  ;;  %3533 = vmatmul.mubr.msk.bf16.vlgmr.msra.gmra.mxu1 %vm836_vm2, %v853_v50  ;;  %v977_v1 = vpack.c.bf16 %v974_v59, %v973_v0  ;;  %v1044_v5 = vld [vmem:[#allocation2 + $0xf] sm:$0xff]  ;;  %v978_v7 = vpack.c.bf16 %v976_v6, %v975_v4  ;;  %v1043_v9 = vld [vmem:[#allocation2 + $0x7] sm:$0xff]  ;;  %v1045_v12 = vld [vmem:[#allocation2 + $0x17] sm:$0xff]  ;;  %v1118_v21 = vpack.c.bf16 %v1116_v18, %v844_v60 }
 0x112   : > { %3563 = vmatmul.mubr.msk.bf16.vlgmr.msra.gmra.mxu0 %vm836_vm2, %v1188_v52  ;;  %3537 = vmatpush3.bf16.msra.mxu1 %v922_v51  ;;  %v1047_v10 = vpack.c.bf16 %v1044_v5, %v1043_v9  ;;  %v1048_v14 = vpack.c.bf16 %v1046_v13, %v1045_v12  ;;  %v1253_v19 = vld [vmem:[#allocation2 + $0xa] sm:$0xff]  ;;  %v1254_v20 = vld [vmem:[#allocation2 + $0x12] sm:$0xff]  ;;  %v1256_v26 = vld [vmem:[#allocation2 + $0x22] sm:$0xff]  ;;  %v1398_v29 = vpack.c.bf16 %v3798_v2, %v1116_v18 }
 0x113   : > { %3538 = vmatprep.mubr.msk.bf16.mxu1 %vm836_vm2, %v845_v53  ;;  %3574 = vmatprep.mubr.msk.bf16.mxu0 %vm836_vm2, %v1327_v55  ;;  %v1257_v23 = vpack.c.bf16 %v1254_v20, %v1253_v19  ;;  %v1258_v27 = vpack.c.bf16 %v1256_v26, %v1255_v25 }
 0x114   : > { %3573 = vmatpush3.bf16.msra.mxu0 %v1338_v54  ;;  %3732 = vmatprep.subr.msk.bf16.mxu1 %vm862_vm0, %v3247_v56 }
 0x115   : > { %3584 = vmatprep.subr.bf16.mxu0 %v3756_v30 }
 0x119   : > { %3539 = vmatmul.mubr.msk.bf16.vlgmr.msra.gmra.mxu1 %vm836_vm2, %v846_v61 }
 0x11a   : > { %3575 = vmatmul.mubr.msk.bf16.vlgmr.msra.gmra.mxu0 %vm836_vm2, %v1328_v63  ;;  %3543 = vmatpush3.bf16.msra.mxu1 %v988_v62 }
 0x11b   : > { %3544 = vmatprep.mubr.msk.bf16.mxu1 %vm836_vm2, %v977_v1  ;;  %3733 = vmatprep.subr.msk.bf16.mxu1 %vm862_vm0, %v3250_v3 }
 0x11c   : > { %3585 = vmatpush3.bf16.msra.mxu0 %v3756_v30 }
 0x11d   : > { %3586 = vmatprep.subr.bf16.mxu0 %v3757_v31 }
 0x120   : > { %3587 = vmatpush3.bf16.msra.mxu0 %v3757_v31 }
 0x121   : > { %3545 = vmatmul.mubr.msk.bf16.vlgmr.msra.gmra.mxu1 %vm836_vm2, %v978_v7 }
 0x122   : > { %3549 = vmatpush3.bf16.msra.mxu1 %v1058_v8  ;;  %3550 = vmatprep.mubr.msk.bf16.mxu1 %vm836_vm2, %v1047_v10 }
 0x123   : > { %3734 = vmatprep.subr.msk.bf16.mxu1 %vm862_vm0, %v3253_v11 }
 0x129   : > { %3551 = vmatmul.mubr.msk.bf16.vlgmr.msra.gmra.mxu1 %vm836_vm2, %v1048_v14 }
 0x12a   : > { %3555 = vmatpush3.bf16.msra.mxu1 %v1128_v15  ;;  %3556 = vmatprep.mubr.msk.bf16.mxu1 %vm836_vm2, %v1117_v16 }
 0x12b   : > { %3736 = vmatprep.subr.msk.bf16.mxu1 %vm862_vm0, %v3259_v17 }
 0x131   : > { %3557 = vmatmul.mubr.msk.bf16.vlgmr.msra.gmra.mxu1 %vm836_vm2, %v1118_v21 }
 0x132   : > { %3567 = vmatpush3.bf16.msra.mxu1 %v1268_v22  ;;  %3568 = vmatprep.mubr.msk.bf16.mxu1 %vm836_vm2, %v1257_v23 }
 0x133   : > { %3738 = vmatprep.subr.msk.bf16.mxu1 %vm862_vm0, %v3265_v24 }
 0x139   : > { %3569 = vmatmul.mubr.msk.bf16.vlgmr.msra.gmra.mxu1 %vm836_vm2, %v1258_v27 }
 0x13a   : > { %3579 = vmatpush3.bf16.msra.mxu1 %v1408_v28  ;;  %3580 = vmatprep.mubr.msk.bf16.mxu1 %vm836_vm2, %v846_v61  ;;  %v3268_v28 = vld [vmem:[%s4287_s10] ss:$0 sm:$0xff]  ;;  %s2301_s10 = sld [smem:[#allocation8]] }
 0x141   : > { %3581 = vmatmul.mubr.msk.bf16.vlgmr.msra.gmra.mxu1 %vm836_vm2, %v1398_v29 }
 0x1d1   : > { %v3534_v32 = vpop.f32.mrf.mxu1 }
 0x1d2   : > { %v3564_v45 = vpop.f32.mrf.mxu0 }
 0x1d3   : > { %v900_v33 = vpop.f32.mrf.mxu1 }
 0x1d4   : > { %v1234_v48 = vpop.f32.mrf.mxu0 }
 0x1d5   : > { %v3535_v34 = vpop.f32.mrf.mxu1 }
 0x1d6   : > { %v3565_v52 = vpop.f32.mrf.mxu0 }
 0x1d7   : > { %v903_v35 = vpop.f32.mrf.mxu1 }
 0x1d8   : > { %v1237_v60 = vpop.f32.mrf.mxu0 }
 0x1d9   : > { %v3540_v36 = vpop.f32.mrf.mxu1 }
 0x1da   : > { %v967_v50 = vadd.f32 %v3540_v36, %v3534_v32  ;;  %v3576_v7 = vpop.f32.mrf.mxu0 }
 0x1db   : > { %v958_v37 = vpop.f32.mrf.mxu1 }
 0x1dc   : > { %v959_v53 = vadd.f32 %v958_v37, %v900_v33  ;;  %v1374_v16 = vpop.f32.mrf.mxu0  ;;  %v3269_v37 = vld [vmem:[%s4288_s3] ss:$0 sm:$0xff]  ;;  %s1504_s3 = sld [smem:[#allocation6]] }
 0x1dd   : > { %v3541_v38 = vpop.f32.mrf.mxu1 }
 0x1de   : > { %v970_v56 = vadd.f32 %v3541_v38, %v3535_v34  ;;  %v3577_v24 = vpop.f32.mrf.mxu0 }
 0x1df   : > { %v961_v39 = vpop.f32.mrf.mxu1 }
 0x1e0   : > { %v962_v0 = vadd.f32 %v961_v39, %v903_v35  ;;  %v1377_v33 = vpop.f32.mrf.mxu0 }
 0x1e1   : > { %v3546_v40 = vpop.f32.mrf.mxu1 }
 0x1e2   : > { %v1041_v54 = vadd.f32 %v3546_v40, %v967_v50 }
 0x1e3   : > { %v1024_v41 = vpop.f32.mrf.mxu1 }
 0x1e4   : > { %v1039_v57 = vadd.f32 %v1024_v41, %v959_v53 }
 0x1e5   : > { %v3547_v42 = vpop.f32.mrf.mxu1 }
 0x1e6   : > { %v1042_v61 = vadd.f32 %v3547_v42, %v970_v56 }
 0x1e7   : > { %v1027_v43 = vpop.f32.mrf.mxu1 }
 0x1e8   : > { %v1040_v5 = vadd.f32 %v1027_v43, %v962_v0  ;;  %v1585_v0 = vstv %s1501_s6 }
 0x1e9   : > { %v3552_v44 = vpop.f32.mrf.mxu1 }
 0x1ea   : > { %v1111_v58 = vadd.f32 %v3552_v44, %v1041_v54 }
 0x1eb   : > { %v1094_v46 = vpop.f32.mrf.mxu1 }
 0x1ec   : > { %v1109_v62 = vadd.f32 %v1094_v46, %v1039_v57 }
 0x1ed   : > { %v3553_v47 = vpop.f32.mrf.mxu1 }
 0x1ee   : > { %v1112_v3 = vadd.f32 %v3553_v47, %v1042_v61  ;;  %v3761_v61 = vld [vmem:[%s4261_s11 + $0x18] sm:$0xff]  }
 0x1ef   : > { %v1097_v49 = vpop.f32.mrf.mxu1 }
 0x1f0   : > { %v1110_v10 = vadd.f32 %v1097_v49, %v1040_v5 }
 0x1f1   : > { %v3558_v51 = vpop.f32.mrf.mxu1 }
 0x1f2   : > { %v1181_v63 = vadd.f32 %v3558_v51, %v1111_v58  ;;  %v3758_v58 = vld [vmem:[%s4261_s11 + $0x8] sm:$0xff]  }
 0x1f3   : > { %v1164_v55 = vpop.f32.mrf.mxu1  ;;  %3592 = vmatprep.subr.bf16.mxu1 %v3758_v58 }
 0x1f4   : > { %v1179_v4 = vadd.f32 %v1164_v55, %v1109_v62  ;;  %v1251_v9 = vadd.f32 %v3564_v45, %v1181_v63  ;;  %v1487_v45 = vstv %s717_s14  ;;  %3593 = vmatpush3.bf16.msra.mxu1 %v3758_v58  ;;  %v3270_v62 = vld [vmem:[%s4259_s9] ss:$0 sm:$0xff] }
 0x1f5   : > { %v3559_v59 = vpop.f32.mrf.mxu1 }
 0x1f6   : > { %v1182_v8 = vadd.f32 %v3559_v59, %v1112_v3  ;;  %v1249_v13 = vadd.f32 %v1234_v48, %v1179_v4  ;;  %v3759_v59 = vld [vmem:[%s4261_s11] sm:$0xff]  }
 0x1f7   : > { %v1167_v1 = vpop.f32.mrf.mxu1  ;;  %3598 = vmatprep.subr.bf16.mxu0 %v3759_v59 }
 0x1f8   : > { %v1180_v14 = vadd.f32 %v1167_v1, %v1110_v10  ;;  %v1252_v18 = vadd.f32 %v3565_v52, %v1182_v8 }
 0x1f9   : > { %v3570_v6 = vpop.f32.mrf.mxu1 }
 0x1fa   : > { %v1321_v12 = vadd.f32 %v3570_v6, %v1251_v9  ;;  %v1250_v22 = vadd.f32 %v1237_v60, %v1180_v14  ;;  %v3760_v60 = vld [vmem:[%s4261_s11 + $0x10] sm:$0xff]  }
 0x1fb   : > { %v1304_v11 = vpop.f32.mrf.mxu1  ;;  %3604 = vmatprep.subr.bf16.mxu1 %v3760_v60 }
 0x1fc   : > { %v1319_v17 = vadd.f32 %v1304_v11, %v1249_v13  ;;  %v1391_v21 = vadd.f32 %v3576_v7, %v1321_v12 }
 0x1fd   : > { %v3571_v15 = vpop.f32.mrf.mxu1 }
 0x1fe   : > { %v1322_v20 = vadd.f32 %v3571_v15, %v1252_v18  ;;  %v1389_v26 = vadd.f32 %v1374_v16, %v1319_v17 }
 0x1ff   : > { %v1307_v19 = vpop.f32.mrf.mxu1 }
 0x200   : > { %v1320_v27 = vadd.f32 %v1307_v19, %v1250_v22  ;;  %v1392_v31 = vadd.f32 %v3577_v24, %v1322_v20 }
 0x201   : > { %v3582_v23 = vpop.f32.mrf.mxu1 }
 0x202   : > { %v1461_v25 = vadd.f32 %v3582_v23, %v1391_v21  ;;  %v1390_v38 = vadd.f32 %v1377_v33, %v1320_v27  ;;  %v3762_v33 = vld [vmem:[%s4261_s11 + $0x20] sm:$0xff]  }
 0x203   : > { %v1444_v29 = vpop.f32.mrf.mxu1 }
 0x204   : > { %v1459_v30 = vadd.f32 %v1444_v29, %v1389_v26  ;;  %v1471_v34 = vmul.f32 %v3268_v28, %v1461_v25 }
 0x205   : > { %v3583_v32 = vpop.f32.mrf.mxu1 }
 0x206   : > { %v1469_v35 = vmul.f32 %v3268_v28, %v1459_v30  ;;  %v1462_v36 = vadd.f32 %v3583_v32, %v1392_v31  ;;  %v1481_v43 = vadd.f32 %v3269_v37, %v1471_v34 }
 0x207   : > { %v1447_v39 = vpop.f32.mrf.mxu1 }
 0x208   : > { %v1472_v40 = vmul.f32 %v3268_v28, %v1462_v36  ;;  %v1479_v41 = vadd.f32 %v3269_v37, %v1469_v35  ;;  %v1460_v42 = vadd.f32 %v1447_v39, %v1390_v38  ;;  %v1490_v50 = vmul.f32 %v1487_v45, %v1481_v43  ;;  %v3763_v35 = vld [vmem:[%s4261_s11 + $0x28] sm:$0xff]  }
 0x209   : > { %vm1485_vm8 = vcmp.gt.f32.partialorder %v1481_v43, 0.0 }
 0x20a   : > { %v1482_v44 = vadd.f32 %v3269_v37, %v1472_v40  ;;  %v1470_v46 = vmul.f32 %v3268_v28, %v1460_v42  ;;  %v1488_v48 = vmul.f32 %v1487_v45, %v1479_v41  ;;  %vm1483_vm7 = vcmp.gt.f32.partialorder %v1479_v41, 0.0 }
 0x20b   : > { %v1494_v55 = vsel %vm1485_vm8, %v1481_v43, %v1490_v50 }
 0x20c   : > { %v1491_v47 = vmul.f32 %v1487_v45, %v1482_v44  ;;  %vm1486_vm6 = vcmp.gt.f32.partialorder %v1482_v44, 0.0  ;;  %v1480_v49 = vadd.f32 %v3269_v37, %v1470_v46  ;;  %v1492_v53 = vsel %vm1483_vm7, %v1479_v41, %v1488_v48 }
 0x20e   : > { %vm1484_vm9 = vcmp.gt.f32.partialorder %v1480_v49, 0.0  ;;  %v1489_v51 = vmul.f32 %v1487_v45, %v1480_v49  ;;  %v1495_v52 = vsel %vm1486_vm6, %v1482_v44, %v1491_v47  ;;  %v3764_v45 = vld [vmem:[%s4261_s11 + $0x30] sm:$0xff]   ;;  %v3765_v47 = vld [vmem:[%s4261_s11 + $0x38] sm:$0xff]  }
 0x20f   : > { %v1506_v57 = vpack.c.bf16 %v1495_v52, %v1494_v55 }
 0x210   : > { %v1493_v54 = vsel %vm1484_vm9, %v1480_v49, %v1489_v51 }
 0x211   : > { %v1505_v56 = vpack.c.bf16 %v1493_v54, %v1492_v53 }
 0x213   : > { %3588 = vmatprep.mubr.msk.bf16.mxu0 %vm1525_vm10, %v1505_v56  ;;  %v3766_v56 = vld [vmem:[%s4261_s11 + $0x40] sm:$0xff]  }
 0x214   : > { %3589 = vmatmul.mubr.msk.bf16.vlgmr.msra.gmra.mxu0 %vm1525_vm10, %v1506_v57 }
 0x215   : > { %3599 = vmatpush3.bf16.msra.mxu0 %v3759_v59 }
 0x216   : > { %3610 = vmatprep.subr.bf16.mxu0 %v3761_v61 }
 0x2d4   : > { %v3590_v63 = vpop.f32.mrf.mxu0 }
 0x2d5   : > { %v1575_v1 = vadd.f32 %v3590_v63, %v3270_v62 }
 0x2d6   : > { %v1566_v3 = vpop.f32.mrf.mxu0 }
 0x2d7   : > { %vm1583_vm11 = vcmp.gt.f32.partialorder %v1575_v1, 0.0  ;;  %v1588_v4 = vmul.f32 %v1585_v0, %v1575_v1  ;;  %v1567_v5 = vadd.f32 %v3270_v62, %v1566_v3  ;;  %v3769_v3 = vld [vmem:[%s4264_s15 + $0x8] sm:$0xff]  }
 0x2d8   : > { %v3591_v6 = vpop.f32.mrf.mxu0 }
 0x2d9   : > { %v1592_v7 = vsel %vm1583_vm11, %v1575_v1, %v1588_v4  ;;  %vm1581_vm13 = vcmp.gt.f32.partialorder %v1567_v5, 0.0  ;;  %v1586_v8 = vmul.f32 %v1585_v0, %v1567_v5  ;;  %v1578_v9 = vadd.f32 %v3591_v6, %v3270_v62  ;;  %v3768_v1 = vld [vmem:[%s4264_s15 + $0x10] sm:$0xff]  }
 0x2da   : > { %v1569_v10 = vpop.f32.mrf.mxu0  ;;  %1597 = vst.msk [vmem:[#allocation2 + $0x18] sm:$0xff] %vm1594_vm12, %v1592_v7 }
 0x2db   : > { %v1590_v11 = vsel %vm1581_vm13, %v1567_v5, %v1586_v8  ;;  %vm1584_vm14 = vcmp.gt.f32.partialorder %v1578_v9, 0.0  ;;  %v1589_v12 = vmul.f32 %v1585_v0, %v1578_v9  ;;  %v1570_v13 = vadd.f32 %v3270_v62, %v1569_v10 }
 0x2dc   : > { %1595 = vst.msk [vmem:[#allocation2 + $0x8] sm:$0xff] %vm1594_vm12, %v1590_v11 }
 0x2dd   : > { %v1593_v14 = vsel %vm1584_vm14, %v1578_v9, %v1589_v12  ;;  %vm1582_vm15 = vcmp.gt.f32.partialorder %v1570_v13, 0.0  ;;  %v1587_v15 = vmul.f32 %v1585_v0, %v1570_v13  ;;  %v3767_v0 = vld [vmem:[%s4264_s15 + $0x18] sm:$0xff]  }
 0x2de   : > { %1598 = vst.msk [vmem:[#allocation2 + $0x20] sm:$0xff] %vm1594_vm12, %v1593_v14 }
 0x2df   : > { %v1591_v16 = vsel %vm1582_vm15, %v1570_v13, %v1587_v15 }
 0x2e0   : > { %1596 = vst.msk [vmem:[#allocation2 + $0x10] sm:$0xff] %vm1594_vm12, %v1591_v16 }
 0x2e1   : > { %v1602_v20 = vld [vmem:[#allocation2 + $0x18] sm:$0xff] }
 0x2e3   : > { %v1600_v17 = vld [vmem:[#allocation2 + $0x8] sm:$0xff] }
 0x2e4   : > { %v1603_v18 = vpack.c.bf16 %v1600_v17, %v3798_v2  ;;  %v1607_v19 = vld [vmem:[#allocation2 + $0x4] sm:$0xff] }
 0x2e5   : > { %v4083_v21 = vld [vmem:[#allocation2 + $0x1c] sm:$0xff]  ;;  %v1812_v28 = vld [vmem:[#allocation2 + $0x7] sm:$0xff] }
 0x2e6   : > { %3600 = vmatprep.mubr.msk.bf16.mxu0 %vm1594_vm12, %v1603_v18  ;;  %v1738_v32 = vld [vmem:[#allocation2 + $0x6] sm:$0xff]  ;;  %v1741_v42 = vld [vmem:[#allocation2 + $0x1e] sm:$0xff] }
 0x2e7   : > { %v1608_v22 = vld [vmem:[#allocation2 + $0xc] sm:$0xff]  ;;  %v1609_v24 = vld [vmem:[#allocation2 + $0x14] sm:$0xff]  ;;  %v1815_v40 = vld [vmem:[#allocation2 + $0x1f] sm:$0xff] }
 0x2e8   : > { %v1601_v23 = vld [vmem:[#allocation2 + $0x10] sm:$0xff]  ;;  %v1611_v25 = vpack.c.bf16 %v1608_v22, %v1607_v19  ;;  %v1612_v27 = vpack.c.bf16 %v4083_v21, %v1609_v24  ;;  %v1962_v48 = vld [vmem:[#allocation2 + $0x19] sm:$0xff]  ;;  %v1963_v49 = vld [vmem:[#allocation2 + $0x21] sm:$0xff]  ;;  %v2112_v55 = vpack.c.bf16 %v1609_v24, %v1608_v22 }
 0x2e9   : > { %v4085_v26 = vpack.c.bf16 %v1602_v20, %v1601_v23  ;;  %v1813_v29 = vld [vmem:[#allocation2 + $0xf] sm:$0xff]  ;;  %v1814_v36 = vld [vmem:[#allocation2 + $0x17] sm:$0xff]  ;;  %v1890_v46 = vpack.c.bf16 %v1601_v23, %v1600_v17  ;;  %v1889_v50 = vld [vmem:[#allocation2 + $0x20] sm:$0xff]  ;;  %v1965_v53 = vpack.c.bf16 %v1963_v49, %v1962_v48 }
 0x2ea   : > { %v1739_v30 = vld [vmem:[#allocation2 + $0xe] sm:$0xff]  ;;  %v1816_v31 = vpack.c.bf16 %v1813_v29, %v1812_v28  ;;  %3594 = vmatprep.mubr.msk.bf16.mxu1 %vm1594_vm12, %v1611_v25  ;;  %v1740_v37 = vld [vmem:[#allocation2 + $0x16] sm:$0xff]  ;;  %v1817_v41 = vpack.c.bf16 %v1815_v40, %v1814_v36  ;;  %v1891_v54 = vpack.c.bf16 %v1889_v50, %v1602_v20  ;;  %v2111_v58 = vld [vmem:[#allocation2 + $0x24] sm:$0xff]  ;;  %v2187_v63 = vpack.c.bf16 %v3798_v2, %v1889_v50 }
 0x2eb   : > { %3601 = vmatmul.mubr.msk.bf16.vlgmr.msra.gmra.mxu0 %vm1594_vm12, %v4085_v26  ;;  %v1742_v34 = vpack.c.bf16 %v1739_v30, %v1738_v32  ;;  %3595 = vmatmul.mubr.msk.bf16.vlgmr.msra.gmra.mxu1 %vm1594_vm12, %v1612_v27  ;;  %v1960_v38 = vld [vmem:[#allocation2 + $0x9] sm:$0xff]  ;;  %v1961_v39 = vld [vmem:[#allocation2 + $0x11] sm:$0xff]  ;;  %v1743_v43 = vpack.c.bf16 %v1741_v42, %v1740_v37  ;;  %v2036_v59 = vld [vmem:[#allocation2 + $0x1a] sm:$0xff] }
 0x2ec   : > { %3612 = vmatprep.mubr.msk.bf16.mxu0 %vm1594_vm12, %v1816_v31  ;;  %3605 = vmatpush3.bf16.msra.mxu1 %v3760_v60  ;;  %v1964_v44 = vpack.c.bf16 %v1961_v39, %v1960_v38  ;;  %v2034_v51 = vld [vmem:[#allocation2 + $0xa] sm:$0xff]  ;;  %v2035_v52 = vld [vmem:[#allocation2 + $0x12] sm:$0xff]  ;;  %v2037_v60 = vld [vmem:[#allocation2 + $0x22] sm:$0xff] }
 0x2ed   : > { %3606 = vmatprep.mubr.msk.bf16.mxu1 %vm1594_vm12, %v1742_v34  ;;  %3611 = vmatpush3.bf16.msra.mxu0 %v3761_v61  ;;  %v2038_v57 = vpack.c.bf16 %v2035_v52, %v2034_v51  ;;  %v2113_v61 = vpack.c.bf16 %v2111_v58, %v4083_v21  ;;  %v2039_v62 = vpack.c.bf16 %v2037_v60, %v2036_v59  ;;  %v3770_v2 = vld [vmem:[%s4264_s15] sm:$0xff]  }
 0x2ee   : > { %3616 = vmatprep.subr.bf16.mxu1 %v3762_v33  ;;  %3622 = vmatprep.subr.bf16.mxu0 %v3763_v35 }
 0x2f3   : > { %3613 = vmatmul.mubr.msk.bf16.vlgmr.msra.gmra.mxu0 %vm1594_vm12, %v1817_v41  ;;  %3607 = vmatmul.mubr.msk.bf16.vlgmr.msra.gmra.mxu1 %vm1594_vm12, %v1743_v43 }
 0x2f4   : > { %3624 = vmatprep.mubr.msk.bf16.mxu0 %vm1594_vm12, %v1964_v44  ;;  %3617 = vmatpush3.bf16.msra.mxu1 %v3762_v33 }
 0x2f5   : > { %3618 = vmatprep.mubr.msk.bf16.mxu1 %vm1594_vm12, %v1890_v46  ;;  %3623 = vmatpush3.bf16.msra.mxu0 %v3763_v35 }
 0x2f6   : > { %3628 = vmatprep.subr.bf16.mxu1 %v3764_v45  ;;  %3634 = vmatprep.subr.bf16.mxu0 %v3765_v47 }
 0x2fb   : > { %3625 = vmatmul.mubr.msk.bf16.vlgmr.msra.gmra.mxu0 %vm1594_vm12, %v1965_v53  ;;  %3619 = vmatmul.mubr.msk.bf16.vlgmr.msra.gmra.mxu1 %vm1594_vm12, %v1891_v54 }
 0x2fc   : > { %3636 = vmatprep.mubr.msk.bf16.mxu0 %vm1594_vm12, %v2112_v55  ;;  %3629 = vmatpush3.bf16.msra.mxu1 %v3764_v45 }
 0x2fd   : > { %3630 = vmatprep.mubr.msk.bf16.mxu1 %vm1594_vm12, %v2038_v57  ;;  %3635 = vmatpush3.bf16.msra.mxu0 %v3765_v47 }
 0x2fe   : > { %3640 = vmatprep.subr.bf16.mxu1 %v3766_v56  ;;  %3646 = vmatprep.subr.bf16.mxu0 %v3767_v0 }
 0x303   : > { %3637 = vmatmul.mubr.msk.bf16.vlgmr.msra.gmra.mxu0 %vm1594_vm12, %v2113_v61  ;;  %3631 = vmatmul.mubr.msk.bf16.vlgmr.msra.gmra.mxu1 %vm1594_vm12, %v2039_v62 }
 0x304   : > { %3641 = vmatpush3.bf16.msra.mxu1 %v3766_v56  ;;  %3642 = vmatprep.mubr.msk.bf16.mxu1 %vm1594_vm12, %v4085_v26 }
 0x305   : > { %3647 = vmatpush3.bf16.msra.mxu0 %v3767_v0 }
 0x306   : > { %3648 = vmatprep.subr.bf16.mxu0 %v3768_v1 }
 0x309   : > { %3649 = vmatpush3.bf16.msra.mxu0 %v3768_v1 }
 0x30a   : > { %3650 = vmatprep.subr.bf16.mxu0 %v3769_v3 }
 0x30b   : > { %3643 = vmatmul.mubr.msk.bf16.vlgmr.msra.gmra.mxu1 %vm1594_vm12, %v2187_v63  ;;  %v3318_v63 = vld [vmem:[%s4262_s12] ss:$0 sm:$0xff] }
 0x30d   : > { %3651 = vmatpush3.bf16.msra.mxu0 %v3769_v3 }
 0x30e   : > { %3652 = vmatprep.subr.bf16.mxu0 %v3770_v2 }
 0x311   : > { %3653 = vmatpush3.bf16.msra.mxu0 %v3770_v2 }
 0x3ab   : > { %v3602_v4 = vpop.f32.mrf.mxu0  ;;  %v3596_v5 = vpop.f32.mrf.mxu1 }
 0x3ac   : > { %v1732_v18 = vadd.f32 %v3602_v4, %v3596_v5 }
 0x3ad   : > { %v1723_v6 = vpop.f32.mrf.mxu0  ;;  %v1662_v7 = vpop.f32.mrf.mxu1 }
 0x3ae   : > { %v1724_v21 = vadd.f32 %v1723_v6, %v1662_v7 }
 0x3af   : > { %v3603_v8 = vpop.f32.mrf.mxu0  ;;  %v3597_v9 = vpop.f32.mrf.mxu1 }
 0x3b0   : > { %v1735_v25 = vadd.f32 %v3603_v8, %v3597_v9  ;;  %v3319_v8 = vld [vmem:[%s4263_s13] ss:$0 sm:$0xff] }
 0x3b1   : > { %v1726_v10 = vpop.f32.mrf.mxu0  ;;  %v1665_v11 = vpop.f32.mrf.mxu1 }
 0x3b2   : > { %v1727_v32 = vadd.f32 %v1726_v10, %v1665_v11 }
 0x3b3   : > { %v3614_v12 = vpop.f32.mrf.mxu0  ;;  %v3608_v13 = vpop.f32.mrf.mxu1 }
 0x3b4   : > { %v1810_v22 = vadd.f32 %v3608_v13, %v1732_v18 }
 0x3b5   : > { %v1867_v14 = vpop.f32.mrf.mxu0  ;;  %v1793_v15 = vpop.f32.mrf.mxu1 }
 0x3b6   : > { %v1808_v26 = vadd.f32 %v1793_v15, %v1724_v21  ;;  %v1884_v30 = vadd.f32 %v3614_v12, %v1810_v22 }
 0x3b7   : > { %v3615_v16 = vpop.f32.mrf.mxu0  ;;  %v3609_v17 = vpop.f32.mrf.mxu1 }
 0x3b8   : > { %v1811_v29 = vadd.f32 %v3609_v17, %v1735_v25  ;;  %v1882_v35 = vadd.f32 %v1867_v14, %v1808_v26 }
 0x3b9   : > { %v1870_v19 = vpop.f32.mrf.mxu0  ;;  %v1796_v20 = vpop.f32.mrf.mxu1 }
 0x3ba   : > { %v1809_v37 = vadd.f32 %v1796_v20, %v1727_v32  ;;  %v1885_v40 = vadd.f32 %v3615_v16, %v1811_v29  ;;  %v2280_v16 = vstv %s1504_s3  ;;  %v3771_v29 = vld [vmem:[%s4266_s18 + $0x18] sm:$0xff]   ;;  %v3774_v32 = vld [vmem:[%s4266_s18 + $0x20] sm:$0xff]  }
 0x3bb   : > { %v3626_v23 = vpop.f32.mrf.mxu0  ;;  %v3620_v24 = vpop.f32.mrf.mxu1  ;;  %3658 = vmatprep.subr.bf16.mxu1 %v3771_v29 }
 0x3bc   : > { %v1958_v34 = vadd.f32 %v3620_v24, %v1884_v30  ;;  %v1883_v45 = vadd.f32 %v1870_v19, %v1809_v37  ;;  %v3772_v30 = vld [vmem:[%s4266_s18 + $0x28] sm:$0xff]   ;;  %3659 = vmatpush3.bf16.msra.mxu1 %v3771_v29  ;;  %v2394_v37 = vstv %s2298_s27 }
 0x3bd   : > { %v2015_v27 = vpop.f32.mrf.mxu0  ;;  %v1941_v28 = vpop.f32.mrf.mxu1  ;;  %3674 = vmatprep.subr.bf16.mxu0 %v3772_v30 }
 0x3be   : > { %v1956_v39 = vadd.f32 %v1941_v28, %v1882_v35  ;;  %v2032_v44 = vadd.f32 %v3626_v23, %v1958_v34  ;;  %v3776_v34 = vld [vmem:[%s4266_s18 + $0x48] sm:$0xff]   ;;  %v3320_v35 = vld [vmem:[%s4265_s16] ss:$0 sm:$0xff] }
 0x3bf   : > { %v3627_v31 = vpop.f32.mrf.mxu0  ;;  %v3621_v33 = vpop.f32.mrf.mxu1 }
 0x3c0   : > { %v1959_v42 = vadd.f32 %v3621_v33, %v1885_v40  ;;  %v2030_v48 = vadd.f32 %v2015_v27, %v1956_v39  ;;  %v3775_v33 = vld [vmem:[%s4266_s18 + $0x8] sm:$0xff]  }
 0x3c1   : > { %v2018_v36 = vpop.f32.mrf.mxu0  ;;  %v1944_v38 = vpop.f32.mrf.mxu1 }
 0x3c2   : > { %v1957_v49 = vadd.f32 %v1944_v38, %v1883_v45  ;;  %v2033_v53 = vadd.f32 %v3627_v31, %v1959_v42  ;;  %v3773_v31 = vld [vmem:[%s4266_s18 + $0x10] sm:$0xff]  }
 0x3c3   : > { %v3632_v41 = vpop.f32.mrf.mxu1  ;;  %v3638_v43 = vpop.f32.mrf.mxu0  ;;  %3660 = vmatprep.subr.bf16.mxu1 %v3773_v31 }
 0x3c4   : > { %v2106_v47 = vadd.f32 %v3632_v41, %v2032_v44  ;;  %v2031_v57 = vadd.f32 %v2018_v36, %v1957_v49  ;;  %3661 = vmatpush3.bf16.msra.mxu1 %v3773_v31 }
 0x3c5   : > { %v2089_v46 = vpop.f32.mrf.mxu1  ;;  %v2163_v51 = vpop.f32.mrf.mxu0  ;;  %3666 = vmatprep.subr.bf16.mxu1 %v3775_v33 }
 0x3c6   : > { %v2104_v52 = vadd.f32 %v2089_v46, %v2030_v48  ;;  %v2180_v56 = vadd.f32 %v3638_v43, %v2106_v47 }
 0x3c7   : > { %v3633_v50 = vpop.f32.mrf.mxu1  ;;  %v3639_v59 = vpop.f32.mrf.mxu0 }
 0x3c8   : > { %v2107_v55 = vadd.f32 %v3633_v50, %v2033_v53  ;;  %v2178_v61 = vadd.f32 %v2163_v51, %v2104_v52 }
 0x3c9   : > { %v2092_v54 = vpop.f32.mrf.mxu1  ;;  %v2166_v4 = vpop.f32.mrf.mxu0 }
 0x3ca   : > { %v2105_v62 = vadd.f32 %v2092_v54, %v2031_v57  ;;  %v2181_v3 = vadd.f32 %v3639_v59, %v2107_v55 }
 0x3cb   : > { %v3644_v58 = vpop.f32.mrf.mxu1 }
 0x3cc   : > { %v2254_v60 = vadd.f32 %v3644_v58, %v2180_v56  ;;  %v2179_v9 = vadd.f32 %v2166_v4, %v2105_v62 }
 0x3cd   : > { %v2237_v0 = vpop.f32.mrf.mxu1 }
 0x3ce   : > { %v2252_v1 = vadd.f32 %v2237_v0, %v2178_v61  ;;  %v2264_v5 = vmul.f32 %v3318_v63, %v2254_v60 }
 0x3cf   : > { %v3645_v2 = vpop.f32.mrf.mxu1 }
 0x3d0   : > { %v2262_v6 = vmul.f32 %v3318_v63, %v2252_v1  ;;  %v2255_v7 = vadd.f32 %v3645_v2, %v2181_v3  ;;  %v2274_v14 = vadd.f32 %v3319_v8, %v2264_v5  ;;  %v4178_v2 = vld [vmem:[#allocation2] sm:$0xff] }
 0x3d1   : > { %v2240_v10 = vpop.f32.mrf.mxu1  ;;  %v3777_v5 = vld [vmem:[%s4266_s18] sm:$0xff]  }
 0x3d2   : > { %v2265_v11 = vmul.f32 %v3318_v63, %v2255_v7  ;;  %v2272_v12 = vadd.f32 %v3319_v8, %v2262_v6  ;;  %v2253_v13 = vadd.f32 %v2240_v10, %v2179_v9  ;;  %v2283_v21 = vmul.f32 %v2280_v16, %v2274_v14  ;;  %v3778_v6 = vld [vmem:[%s4266_s18 + $0x40] sm:$0xff]   ;;  %v3780_v9 = vld [vmem:[%s4266_s18 + $0x68] sm:$0xff]  }
 0x3d3   : > { %vm2278_vm2 = vcmp.gt.f32.partialorder %v2274_v14, 0.0 }
 0x3d4   : > { %v2275_v15 = vadd.f32 %v3319_v8, %v2265_v11  ;;  %v2263_v17 = vmul.f32 %v3318_v63, %v2253_v13  ;;  %v2281_v19 = vmul.f32 %v2280_v16, %v2272_v12  ;;  %vm2276_vm1 = vcmp.gt.f32.partialorder %v2272_v12, 0.0 }
 0x3d5   : > { %v2287_v26 = vsel %vm2278_vm2, %v2274_v14, %v2283_v21 }
 0x3d6   : > { %v2284_v18 = vmul.f32 %v2280_v16, %v2275_v15  ;;  %vm2279_vm0 = vcmp.gt.f32.partialorder %v2275_v15, 0.0  ;;  %v2273_v20 = vadd.f32 %v3319_v8, %v2263_v17  ;;  %v2285_v24 = vsel %vm2276_vm1, %v2272_v12, %v2281_v19  ;;  %v3779_v8 = vld [vmem:[%s4266_s18 + $0x38] sm:$0xff]  }
 0x3d8   : > { %vm2277_vm3 = vcmp.gt.f32.partialorder %v2273_v20, 0.0  ;;  %v2282_v22 = vmul.f32 %v2280_v16, %v2273_v20  ;;  %v2288_v23 = vsel %vm2279_vm0, %v2275_v15, %v2284_v18  ;;  %v3781_v18 = vld [vmem:[%s4266_s18 + $0x30] sm:$0xff]  }
 0x3d9   : > { %v2303_v28 = vpack.c.bf16 %v2288_v23, %v2287_v26 }
 0x3da   : > { %v2286_v25 = vsel %vm2277_vm3, %v2273_v20, %v2282_v22  ;;  %v3782_v20 = vld [vmem:[%s4266_s18 + $0x60] sm:$0xff]   ;;  %v3783_v22 = vld [vmem:[%s4266_s18 + $0x58] sm:$0xff]  }
 0x3db   : > { %v2302_v27 = vpack.c.bf16 %v2286_v25, %v2285_v24  ;;  %v3784_v24 = vld [vmem:[%s4266_s18 + $0x88] sm:$0xff]  }
 0x3dd   : > { %3654 = vmatprep.mubr.msk.bf16.mxu0 %vm2334_vm4, %v2302_v27 }
 0x3de   : > { %3655 = vmatmul.mubr.msk.bf16.vlgmr.msra.gmra.mxu0 %vm2334_vm4, %v2303_v28 }
 0x3df   : > { %3675 = vmatpush3.bf16.msra.mxu0 %v3772_v30 }
 0x3e0   : > { %3676 = vmatprep.subr.bf16.mxu0 %v3774_v32 }
 0x3e3   : > { %3677 = vmatpush3.bf16.msra.mxu0 %v3774_v32  ;;  %v3785_v32 = vld [vmem:[%s4266_s18 + $0x50] sm:$0xff]  }
 0x3e4   : > { %3690 = vmatprep.subr.bf16.mxu0 %v3776_v34 }
 0x49e   : > { %v3656_v36 = vpop.f32.mrf.mxu0 }
 0x49f   : > { %v2384_v38 = vadd.f32 %v3656_v36, %v3320_v35 }
 0x4a0   : > { %v2375_v39 = vpop.f32.mrf.mxu0 }
 0x4a1   : > { %vm2392_vm5 = vcmp.gt.f32.partialorder %v2384_v38, 0.0  ;;  %v2397_v40 = vmul.f32 %v2394_v37, %v2384_v38  ;;  %v2376_v41 = vadd.f32 %v3320_v35, %v2375_v39  ;;  %v3788_v39 = vld [vmem:[%s4266_s18 + $0x70] sm:$0xff]  }
 0x4a2   : > { %v3657_v42 = vpop.f32.mrf.mxu0 }
 0x4a3   : > { %v2401_v43 = vsel %vm2392_vm5, %v2384_v38, %v2397_v40  ;;  %vm2390_vm6 = vcmp.gt.f32.partialorder %v2376_v41, 0.0  ;;  %v2395_v44 = vmul.f32 %v2394_v37, %v2376_v41  ;;  %v2387_v45 = vadd.f32 %v3657_v42, %v3320_v35 }
 0x4a4   : > { %2405 = vst.msk [vmem:[#allocation2 + $0x18] sm:$0xff] %vm1525_vm10, %v2401_v43  ;;  %v2378_v46 = vpop.f32.mrf.mxu0 }
 0x4a5   : > { %v2399_v47 = vsel %vm2390_vm6, %v2376_v41, %v2395_v44  ;;  %vm2393_vm7 = vcmp.gt.f32.partialorder %v2387_v45, 0.0  ;;  %v2398_v48 = vmul.f32 %v2394_v37, %v2387_v45  ;;  %v2379_v49 = vadd.f32 %v3320_v35, %v2378_v46  ;;  %v3787_v35 = vld [vmem:[%s4266_s18 + $0x78] sm:$0xff]  }
 0x4a6   : > { %2403 = vst.msk [vmem:[#allocation2 + $0x8] sm:$0xff] %vm1525_vm10, %v2399_v47 }
 0x4a7   : > { %v2402_v50 = vsel %vm2393_vm7, %v2387_v45, %v2398_v48  ;;  %vm2391_vm8 = vcmp.gt.f32.partialorder %v2379_v49, 0.0  ;;  %v2396_v51 = vmul.f32 %v2394_v37, %v2379_v49 }
 0x4a8   : > { %2406 = vst.msk [vmem:[#allocation2 + $0x20] sm:$0xff] %vm1525_vm10, %v2402_v50 }
 0x4a9   : > { %v2400_v52 = vsel %vm2391_vm8, %v2379_v49, %v2396_v51 }
 0x4aa   : > { %2404 = vst.msk [vmem:[#allocation2 + $0x10] sm:$0xff] %vm1525_vm10, %v2400_v52 }
 0x4ab   : > { %v2410_v11 = vld [vmem:[#allocation2 + $0x18] sm:$0xff] }
 0x4ad   : > { %v2417_v53 = vld [vmem:[#allocation2 + $0x4] sm:$0xff] }
 0x4ae   : > { %v2562_v54 = vld [vmem:[#allocation2 + $0x6] sm:$0xff] }
 0x4af   : > { %v4167_v55 = vld [vmem:[#allocation2 + $0x1c] sm:$0xff]  ;;  %v2408_v56 = vld [vmem:[#allocation2 + $0x8] sm:$0xff] }
 0x4b0   : > { %v2565_v0 = vld [vmem:[#allocation2 + $0x1e] sm:$0xff]  ;;  %v2411_v4 = vpack.c.bf16 %v2408_v56, %v4178_v2  ;;  %v2644_v17 = vld [vmem:[#allocation2 + $0x7] sm:$0xff] }
 0x4b1   : > { %v4169_v57 = vld [vmem:[#allocation2 + $0xc] sm:$0xff]  ;;  %v4171_v59 = vld [vmem:[#allocation2 + $0x14] sm:$0xff]  ;;  %v2729_v10 = vld [vmem:[#allocation2 + $0x20] sm:$0xff] }
 0x4b2   : > { %v2563_v58 = vld [vmem:[#allocation2 + $0xe] sm:$0xff]  ;;  %v2421_v60 = vpack.c.bf16 %v4169_v57, %v2417_v53  ;;  %v2422_v62 = vpack.c.bf16 %v4167_v55, %v4171_v59  ;;  %v2564_v63 = vld [vmem:[#allocation2 + $0x16] sm:$0xff]  ;;  %v2731_v16 = vpack.c.bf16 %v2729_v10, %v2410_v11  ;;  %v2893_v26 = vld [vmem:[#allocation2 + $0x22] sm:$0xff]  ;;  %v3059_v40 = vpack.c.bf16 %v4178_v2, %v2729_v10 }
 0x4b3   : > { %v2566_v61 = vpack.c.bf16 %v2563_v58, %v2562_v54  ;;  %v2727_v1 = vld [vmem:[#allocation2 + $0x10] sm:$0xff]  ;;  %v2567_v3 = vpack.c.bf16 %v2565_v0, %v2564_v63  ;;  %v2892_v25 = vld [vmem:[#allocation2 + $0x1a] sm:$0xff]  ;;  %v2976_v41 = vpack.c.bf16 %v4171_v59, %v4169_v57  ;;  %v2975_v42 = vld [vmem:[#allocation2 + $0x24] sm:$0xff] }
 0x4b4   : > { %3662 = vmatprep.mubr.msk.bf16.mxu1 %vm1525_vm10, %v2421_v60  ;;  %v2730_v7 = vpack.c.bf16 %v2727_v1, %v2408_v56  ;;  %v2645_v12 = vld [vmem:[#allocation2 + $0xf] sm:$0xff]  ;;  %v2412_v13 = vpack.c.bf16 %v2410_v11, %v2727_v1  ;;  %v2646_v23 = vld [vmem:[#allocation2 + $0x17] sm:$0xff]  ;;  %v2647_v27 = vld [vmem:[#allocation2 + $0x1f] sm:$0xff]  ;;  %v2895_v31 = vpack.c.bf16 %v2893_v26, %v2892_v25  ;;  %v2977_v43 = vpack.c.bf16 %v2975_v42, %v4167_v55 }
 0x4b5   : > { %3678 = vmatprep.mubr.msk.bf16.mxu0 %vm1525_vm10, %v2566_v61  ;;  %3663 = vmatmul.mubr.msk.bf16.vlgmr.msra.gmra.mxu1 %vm1525_vm10, %v2422_v62  ;;  %v2890_v14 = vld [vmem:[#allocation2 + $0xa] sm:$0xff]  ;;  %v2891_v15 = vld [vmem:[#allocation2 + $0x12] sm:$0xff]  ;;  %v2648_v19 = vpack.c.bf16 %v2645_v12, %v2644_v17  ;;  %v2649_v30 = vpack.c.bf16 %v2647_v27, %v2646_v23  ;;  %v2811_v37 = vld [vmem:[#allocation2 + $0x21] sm:$0xff] }
 0x4b6   : > { %3679 = vmatmul.mubr.msk.bf16.vlgmr.msra.gmra.mxu0 %vm1525_vm10, %v2567_v3  ;;  %3667 = vmatpush3.bf16.msra.mxu1 %v3775_v33  ;;  %v2894_v21 = vpack.c.bf16 %v2891_v15, %v2890_v14  ;;  %v2808_v28 = vld [vmem:[#allocation2 + $0x9] sm:$0xff]  ;;  %v2809_v29 = vld [vmem:[#allocation2 + $0x11] sm:$0xff]  ;;  %v2810_v36 = vld [vmem:[#allocation2 + $0x19] sm:$0xff] }
 0x4b7   : > { %3670 = vmatprep.mubr.msk.bf16.mxu1 %vm1525_vm10, %v2411_v4  ;;  %3691 = vmatpush3.bf16.msra.mxu0 %v3776_v34  ;;  %v2812_v33 = vpack.c.bf16 %v2809_v29, %v2808_v28  ;;  %v3786_v34 = vld [vmem:[%s4266_s18 + $0x80] sm:$0xff]   ;;  %v2813_v38 = vpack.c.bf16 %v2811_v37, %v2810_v36 }
 0x4b8   : > { %3694 = vmatprep.mubr.msk.bf16.mxu0 %vm1525_vm10, %v2730_v7  ;;  %3668 = vmatprep.subr.bf16.mxu1 %v3777_v5 }
 0x4b9   : > { %3692 = vmatprep.subr.bf16.mxu0 %v3778_v6 }
 0x4ba   : > { %3669 = vmatpush3.bf16.msra.mxu1 %v3777_v5 }
 0x4bb   : > { %3693 = vmatpush3.bf16.msra.mxu0 %v3778_v6  ;;  %3682 = vmatprep.subr.bf16.mxu1 %v3779_v8 }
 0x4bc   : > { %3706 = vmatprep.subr.bf16.mxu0 %v3780_v9 }
 0x4bd   : > { %3671 = vmatmul.mubr.msk.bf16.vlgmr.msra.gmra.mxu1 %vm1525_vm10, %v2412_v13 }
 0x4be   : > { %3683 = vmatpush3.bf16.msra.mxu1 %v3779_v8  ;;  %3695 = vmatmul.mubr.msk.bf16.vlgmr.msra.gmra.mxu0 %vm1525_vm10, %v2731_v16 }
 0x4bf   : > { %3686 = vmatprep.mubr.msk.bf16.mxu1 %vm1525_vm10, %v2648_v19  ;;  %3707 = vmatpush3.bf16.msra.mxu0 %v3780_v9 }
 0x4c0   : > { %3710 = vmatprep.mubr.msk.bf16.mxu0 %vm1525_vm10, %v2894_v21  ;;  %3684 = vmatprep.subr.bf16.mxu1 %v3781_v18 }
 0x4c1   : > { %3708 = vmatprep.subr.bf16.mxu0 %v3782_v20 }
 0x4c2   : > { %3685 = vmatpush3.bf16.msra.mxu1 %v3781_v18 }
 0x4c3   : > { %3709 = vmatpush3.bf16.msra.mxu0 %v3782_v20  ;;  %3698 = vmatprep.subr.bf16.mxu1 %v3783_v22 }
 0x4c4   : > { %3722 = vmatprep.subr.bf16.mxu0 %v3784_v24 }
 0x4c5   : > { %3687 = vmatmul.mubr.msk.bf16.vlgmr.msra.gmra.mxu1 %vm1525_vm10, %v2649_v30 }
 0x4c6   : > { %3699 = vmatpush3.bf16.msra.mxu1 %v3783_v22  ;;  %3711 = vmatmul.mubr.msk.bf16.vlgmr.msra.gmra.mxu0 %vm1525_vm10, %v2895_v31 }
 0x4c7   : > { %3702 = vmatprep.mubr.msk.bf16.mxu1 %vm1525_vm10, %v2812_v33  ;;  %3723 = vmatpush3.bf16.msra.mxu0 %v3784_v24 }
 0x4c8   : > { %3726 = vmatprep.mubr.msk.bf16.mxu0 %vm1525_vm10, %v2412_v13  ;;  %3700 = vmatprep.subr.bf16.mxu1 %v3785_v32 }
 0x4c9   : > { %3724 = vmatprep.subr.bf16.mxu0 %v3786_v34 }
 0x4ca   : > { %3701 = vmatpush3.bf16.msra.mxu1 %v3785_v32 }
 0x4cb   : > { %3725 = vmatpush3.bf16.msra.mxu0 %v3786_v34  ;;  %3714 = vmatprep.subr.bf16.mxu1 %v3787_v35 }
 0x4cd   : > { %3703 = vmatmul.mubr.msk.bf16.vlgmr.msra.gmra.mxu1 %vm1525_vm10, %v2813_v38 }
 0x4ce   : > { %3715 = vmatpush3.bf16.msra.mxu1 %v3787_v35  ;;  %3727 = vmatmul.mubr.msk.bf16.vlgmr.msra.gmra.mxu0 %vm1525_vm10, %v3059_v40  ;;  %v3395_v35 = vld [vmem:[%s4267_s19] ss:$0 sm:$0xff] }
 0x4cf   : > { %3718 = vmatprep.mubr.msk.bf16.mxu1 %vm1525_vm10, %v2976_v41  ;;  %3716 = vmatprep.subr.bf16.mxu1 %v3788_v39 }
 0x4d2   : > { %3717 = vmatpush3.bf16.msra.mxu1 %v3788_v39 }
 0x4d5   : > { %3719 = vmatmul.mubr.msk.bf16.vlgmr.msra.gmra.mxu1 %vm1525_vm10, %v2977_v43 }
 0x575   : > { %v3664_v44 = vpop.f32.mrf.mxu1 }
 0x576   : > { %v3680_v45 = vpop.f32.mrf.mxu0 }
 0x577   : > { %v2480_v46 = vpop.f32.mrf.mxu1 }
 0x578   : > { %v2625_v47 = vpop.f32.mrf.mxu0 }
 0x579   : > { %v3665_v48 = vpop.f32.mrf.mxu1 }
 0x57a   : > { %v3681_v49 = vpop.f32.mrf.mxu0 }
 0x57b   : > { %v2483_v50 = vpop.f32.mrf.mxu1 }
 0x57c   : > { %v2628_v51 = vpop.f32.mrf.mxu0 }
 0x57d   : > { %v3672_v52 = vpop.f32.mrf.mxu1 }
 0x57e   : > { %v3696_v53 = vpop.f32.mrf.mxu0  ;;  %v2556_v60 = vadd.f32 %v3672_v52, %v3664_v44 }
 0x57f   : > { %v2547_v54 = vpop.f32.mrf.mxu1 }
 0x580   : > { %v2789_v56 = vpop.f32.mrf.mxu0  ;;  %v2548_v62 = vadd.f32 %v2547_v54, %v2480_v46  ;;  %v2642_v3 = vadd.f32 %v3680_v45, %v2556_v60  ;;  %v3396_v46 = vld [vmem:[%s4268_s20] ss:$0 sm:$0xff] }
 0x581   : > { %v3673_v57 = vpop.f32.mrf.mxu1 }
 0x582   : > { %v3697_v58 = vpop.f32.mrf.mxu0  ;;  %v2559_v1 = vadd.f32 %v3673_v57, %v3665_v48  ;;  %v2640_v7 = vadd.f32 %v2625_v47, %v2548_v62 }
 0x583   : > { %v2550_v59 = vpop.f32.mrf.mxu1 }
 0x584   : > { %v2792_v61 = vpop.f32.mrf.mxu0  ;;  %v2551_v5 = vadd.f32 %v2550_v59, %v2483_v50  ;;  %v2643_v11 = vadd.f32 %v3681_v49, %v2559_v1 }
 0x585   : > { %v3688_v55 = vpop.f32.mrf.mxu1 }
 0x586   : > { %v3712_v63 = vpop.f32.mrf.mxu0  ;;  %v2724_v6 = vadd.f32 %v3688_v55, %v2642_v3  ;;  %v2641_v14 = vadd.f32 %v2628_v51, %v2551_v5 }
 0x587   : > { %v2707_v0 = vpop.f32.mrf.mxu1 }
 0x588   : > { %v2953_v2 = vpop.f32.mrf.mxu0  ;;  %v2722_v10 = vadd.f32 %v2707_v0, %v2640_v7  ;;  %v2806_v16 = vadd.f32 %v3696_v53, %v2724_v6 }
 0x589   : > { %v3689_v4 = vpop.f32.mrf.mxu1 }
 0x58a   : > { %v3713_v8 = vpop.f32.mrf.mxu0  ;;  %v2725_v13 = vadd.f32 %v3689_v4, %v2643_v11  ;;  %v2804_v20 = vadd.f32 %v2789_v56, %v2722_v10  ;;  %v3160_v56 = vstv %s2301_s10 }
 0x58b   : > { %v2710_v9 = vpop.f32.mrf.mxu1 }
 0x58c   : > { %v2956_v15 = vpop.f32.mrf.mxu0  ;;  %v2723_v18 = vadd.f32 %v2710_v9, %v2641_v14  ;;  %v2807_v24 = vadd.f32 %v3697_v58, %v2725_v13 }
 0x58d   : > { %v3704_v12 = vpop.f32.mrf.mxu1 }
 0x58e   : > { %v2888_v19 = vadd.f32 %v3704_v12, %v2806_v16  ;;  %v3728_v22 = vpop.f32.mrf.mxu0  ;;  %v2805_v27 = vadd.f32 %v2792_v61, %v2723_v18 }
 0x58f   : > { %v2871_v17 = vpop.f32.mrf.mxu1 }
 0x590   : > { %v2886_v23 = vadd.f32 %v2871_v17, %v2804_v20  ;;  %v2970_v28 = vadd.f32 %v3712_v63, %v2888_v19  ;;  %v3117_v30 = vpop.f32.mrf.mxu0 }
 0x591   : > { %v3705_v21 = vpop.f32.mrf.mxu1 }
 0x592   : > { %v2889_v26 = vadd.f32 %v3705_v21, %v2807_v24  ;;  %v2968_v33 = vadd.f32 %v2953_v2, %v2886_v23  ;;  %v3729_v40 = vpop.f32.mrf.mxu0 }
 0x593   : > { %v2874_v25 = vpop.f32.mrf.mxu1 }
 0x594   : > { %v2887_v31 = vadd.f32 %v2874_v25, %v2805_v27  ;;  %v2971_v38 = vadd.f32 %v3713_v8, %v2889_v26  ;;  %v3120_v50 = vpop.f32.mrf.mxu0 }
 0x595   : > { %v3720_v29 = vpop.f32.mrf.mxu1 }
 0x596   : > { %v3052_v32 = vadd.f32 %v3720_v29, %v2970_v28  ;;  %v2969_v43 = vadd.f32 %v2956_v15, %v2887_v31 }
 0x597   : > { %v3035_v34 = vpop.f32.mrf.mxu1 }
 0x598   : > { %v3134_v36 = vadd.f32 %v3728_v22, %v3052_v32  ;;  %v3050_v37 = vadd.f32 %v3035_v34, %v2968_v33 }
 0x599   : > { %v3721_v39 = vpop.f32.mrf.mxu1 }
 0x59a   : > { %v3132_v41 = vadd.f32 %v3117_v30, %v3050_v37  ;;  %v3053_v42 = vadd.f32 %v3721_v39, %v2971_v38  ;;  %v3144_v44 = vmul.f32 %v3395_v35, %v3134_v36 }
 0x59b   : > { %v3038_v45 = vpop.f32.mrf.mxu1 }
 0x59c   : > { %v3142_v47 = vmul.f32 %v3395_v35, %v3132_v41  ;;  %v3135_v48 = vadd.f32 %v3729_v40, %v3053_v42  ;;  %v3051_v49 = vadd.f32 %v3038_v45, %v2969_v43  ;;  %v3154_v52 = vadd.f32 %v3396_v46, %v3144_v44 }
 0x59e   : > { %v3145_v51 = vmul.f32 %v3395_v35, %v3135_v48  ;;  %v3152_v53 = vadd.f32 %v3396_v46, %v3142_v47  ;;  %v3133_v54 = vadd.f32 %v3120_v50, %v3051_v49  ;;  %v3163_v60 = vmul.f32 %v3160_v56, %v3154_v52 }
 0x59f   : > { %vm3158_vm10 = vcmp.gt.f32.partialorder %v3154_v52, 0.0 }
 0x5a0   : > { %v3155_v57 = vadd.f32 %v3396_v46, %v3145_v51  ;;  %v3143_v58 = vmul.f32 %v3395_v35, %v3133_v54  ;;  %v3161_v61 = vmul.f32 %v3160_v56, %v3152_v53  ;;  %vm3156_vm11 = vcmp.gt.f32.partialorder %v3152_v53, 0.0 }
 0x5a1   : > { %v3167_v0 = vsel %vm3158_vm10, %v3154_v52, %v3163_v60 }
 0x5a2   : > { %vm3159_vm9 = vcmp.gt.f32.partialorder %v3155_v57, 0.0  ;;  %v3164_v59 = vmul.f32 %v3160_v56, %v3155_v57  ;;  %v3153_v55 = vadd.f32 %v3396_v46, %v3143_v58  ;;  %v3165_v1 = vsel %vm3156_vm11, %v3152_v53, %v3161_v61 }
 0x5a4   : > { %v3168_v62 = vsel %vm3159_vm9, %v3155_v57, %v3164_v59  ;;  %vm3157_vm12 = vcmp.gt.f32.partialorder %v3153_v55, 0.0  ;;  %v3162_v63 = vmul.f32 %v3160_v56, %v3153_v55 }
 0x5a5   : > { %v3170_v2 = vmax.f32 %v3167_v0, %v3168_v62 }
 0x5a6   : > { %v3166_v3 = vsel %vm3157_vm12, %v3153_v55, %v3162_v63 }
 0x5a7   : > { %v3169_v4 = vmax.f32 %v3165_v1, %v3166_v3 }
 0x5a9   : > { %v3171_v5 = vmax.f32 %v3169_v4, %v3170_v2 }
 0x5ab   : > { %v3172_v6 = vrot.slane %v3171_v5, 4 }
 0x5ad   : > { %v3173_v7 = vmax.f32 %v3171_v5, %v3172_v6 }
 0x5af   : > { %v3174_v8 = vrot.slane %v3173_v7, 2 }
 0x5b1   : > { %v3175_v9 = vmax.f32 %v3173_v7, %v3174_v8 }
 0x5b3   : > { %v3176_v10 = vrot.slane %v3175_v9, 1 }
 0x5b5   : > { %v3177_v11 = vmax.f32 %v3175_v9, %v3176_v10 }
 0x5b7   : > { %3178 = vst [vmem:[%s685_s28] sm:$0x1] %v3177_v11 }
 0x5b8 PF: > { %s38_s2 = sadd.s32 1, %s3796_s2  }
 0x5b9   : > { %p35_p4 = scmp.ge.s32.totalorder %s38_s2, 4  }
 0x5bb   :  { %37 = sbr.rel (!%p35_p4) target bundleno = 15 (0xf), region = 162 }

// kernel: capla_forward.7
= control target key start
LH: loop header
LB: loop body
LE: loop exit
PB: predicated region body
PF: predicated region fallthrough
CT: control target
= control target key end

     0   :  { %s8080_s6 = smov 1   ;;  %s8081_s10 = smov 2   ;;  %s9526_s0 = inlined_call_operand.smem [shape: u32[32], index: -1, kind: input, shape index: {}] }
   0x1   :  { %s8122_s5 = sld [smem:[%s9526_s0]]   ;;  %s8082_s14 = smov 3  }
   0x2   :  { %s8127_s9 = sld [smem:[%s9526_s0 + %s8080_s6]]   ;;  %s8083_s18 = smov 4  }
   0x3   :  { %s8132_s13 = sld [smem:[%s9526_s0 + %s8081_s10]]   ;;  %s8084_s22 = smov 5  }
   0x4   :  { %s8137_s17 = sld [smem:[%s9526_s0 + %s8082_s14]]   ;;  %s8085_s26 = smov 6  }
   0x5   :  { %s8142_s21 = sld [smem:[%s9526_s0 + %s8083_s18]]   ;;  %s8086_s30 = smov 7  }
   0x6   :  { %s8147_s25 = sld [smem:[%s9526_s0 + %s8084_s22]]   ;;  %s8087_s4 = smov 8  }
   0x7   :  { %s8152_s29 = sld [smem:[%s9526_s0 + %s8085_s26]]   ;;  %s8088_s10 = smov 9  }
   0x8   :  { %s8157_s3 = sld [smem:[%s9526_s0 + %s8086_s30]]   ;;  %s8089_s15 = smov 10  }
   0x9   :  { %s8162_s8 = sld [smem:[%s9526_s0 + %s8087_s4]]   ;;  %s8090_s20 = smov 11  }
   0xa   :  { %s8167_s14 = sld [smem:[%s9526_s0 + %s8088_s10]]   ;;  %s8091_s26 = smov 12  }
   0xb   :  { %s8172_s19 = sld [smem:[%s9526_s0 + %s8089_s15]]   ;;  %s8092_s1 = smov 13  }
   0xc   :  { %s8177_s24 = sld [smem:[%s9526_s0 + %s8090_s20]]   ;;  %s8093_s7 = smov 14  }
   0xd   :  { %s8182_s30 = sld [smem:[%s9526_s0 + %s8091_s26]]   ;;  %s8094_s15 = smov 15  }
   0xe   :  { %9538 = sst [smem:[#allocation11_spill]] %s8157_s3  ;;  %s8095_s22 = smov 16  }
   0xf   :  { %9539 = sst [smem:[#allocation12_spill]] %s8162_s8  ;;  %s8096_s28 = smov 17  }
  0x10   :  { %s8187_s6 = sld [smem:[%s9526_s0 + %s8092_s1]]   ;;  %s8099_s23 = smov 20  }
  0x11   :  { %s8192_s12 = sld [smem:[%s9526_s0 + %s8093_s7]]   ;;  %s8097_s7 = smov 18  }
  0x12   :  { %9540 = sst [smem:[#allocation13_spill]] %s8177_s24  ;;  %s8100_s1 = smov 21  }
  0x13   :  { %s8197_s20 = sld [smem:[%s9526_s0 + %s8094_s15]]   ;;  %s8098_s15 = smov 19  }
  0x14   :  { %s8202_s27 = sld [smem:[%s9526_s0 + %s8095_s22]]   ;;  %s8101_s10 = smov 22  }
  0x15   :  { %s8207_s4 = sld [smem:[%s9526_s0 + %s8096_s28]]   ;;  %s8102_s16 = smov 23  }
  0x16   :  { %9541 = sst [smem:[#allocation14_spill]] %s8187_s6  ;;  %s8103_s22 = smov 24  }
  0x17   :  { %9542 = sst [smem:[#allocation15_spill]] %s8192_s12  ;;  %s8106_s18 = smov 27  }
  0x18   :  { %s8212_s12 = sld [smem:[%s9526_s0 + %s8097_s7]]   ;;  %s8105_s7 = smov 26  }
  0x19   :  { %9543 = sst [smem:[#allocation16_spill]] %s8197_s20  ;;  %s8107_s26 = smov 28  }
  0x1a   :  { %s6731_s20 = sld [smem:[%s9526_s0 + %s8098_s15]]   ;;  %s8109_s11 = smov 30  }
  0x1b   :  { %9544 = sst [smem:[#allocation17_spill]] %s8207_s4 }
  0x1c   :  { %s8220_s24 = sld [smem:[%s9526_s0 + %s8099_s23]]  }
  0x1d   :  { %s8225_s4 = sld [smem:[%s9526_s0 + %s8100_s1]]   ;;  %s8104_s1 = smov 25  }
  0x1e   :  { %9545 = sst [smem:[#allocation18_spill]] %s8212_s12 }
  0x1f   :  { %s8230_s12 = sld [smem:[%s9526_s0 + %s8101_s10]]  }
  0x20   :  { %s6735_s6 = sld [smem:[%s9526_s0 + %s8102_s16]]  }
  0x21   :  { %s8243_s10 = sld [smem:[%s9526_s0 + %s8104_s1]]   ;;  %s8108_s1 = smov 29  }
  0x22   :  { %9546 = sst [smem:[#allocation19_spill]] %s8220_s24 }
  0x23   :  { %9547 = sst [smem:[#allocation20_spill]] %s8225_s4 }
  0x24   :  { %s8238_s24 = sld [smem:[%s9526_s0 + %s8103_s22]]  }
  0x25   :  { %9548 = sst [smem:[#allocation21_spill]] %s8230_s12  ;;  %s8110_s12 = smov 31  }
  0x26   :  { %s6738_s16 = sld [smem:[%s9526_s0 + %s8105_s7]]  }
  0x27   :  { %9550 = sst [smem:[#allocation23_spill]] %s8243_s10 }
  0x28   :  { %s8251_s22 = sld [smem:[%s9526_s0 + %s8106_s18]]  }
  0x29   :  { %s8256_s28 = sld [smem:[%s9526_s0 + %s8107_s26]]  }
  0x2a   :  { %9549 = sst [smem:[#allocation22_spill]] %s8238_s24  ;;  %s8275_s24 = smov 0  }
  0x2b   :  { %s8261_s8 = sld [smem:[%s9526_s0 + %s8108_s1]]  }
  0x2c   :  { %s6742_s3 = sld [smem:[%s9526_s0 + %s8109_s11]]  }
  0x2d   :  { %68 = sst [smem:[#allocation3]] %s8147_s25 }
  0x2e   :  { %9551 = sst [smem:[#allocation24_spill]] %s8251_s22 }
  0x2f   :  { %s8269_s22 = sld [smem:[%s9526_s0 + %s8110_s12]]  }
  0x30   :  { %69 = sst [smem:[#allocation4]] %s8167_s14 }
  0x31   :  { %70 = sst [smem:[#allocation5]] %s8182_s30 }
  0x32   :  { %71 = sst [smem:[#allocation6]] %s8202_s27 }
  0x33   :  { %72 = sst [smem:[#allocation7]] %s6731_s20 }
  0x34   :  { %73 = sst [smem:[#allocation8]] %s6735_s6 }
  0x35   :  { %74 = sst [smem:[#allocation9]] %s6738_s16 }
  0x36   :  { %75 = sst [smem:[#allocation10]] %s6742_s3 }
  0x37 LB: > { %s6744_s0 = sadd.s32 4294967295, %s8078_s24   ;;  %p6748_p0 = scmp.ge.s32.totalorder %s8078_s24, 1  ;;  %s8078_s24 = sphi %s8275_s24, %s81_s24  }
  0x38   : > { %p877_p1 = scmp.lt.s32.totalorder %s8078_s24, 3 }
  0x3a   : > { %p878_p2 = pnand %p6748_p0, %p877_p1 }
  0x3c   : > { %881 = sbr.rel (%p878_p2) target bundleno = 2331 (0x91b), region = 144 }
  0x41   : > { %v8005_v0 = vld [vmem:[%s8127_s9 + $0x10] ss:$0 sps:$4 sm:$0xff]   ;;  %vm1028_vm0 = vcmask 1043456   ;;  %v8006_v1 = vld [vmem:[%s8127_s9 + $0x8] sm:$0xff]   ;;  %v8007_v3 = vld [vmem:[%s8127_s9] sm:$0xff]   ;;  %p955_p3 = scmp.lt.s32.totalorder %s6744_s0, 1 }
  0x42   : > { %7930 = vmatprep.subr.msk.bf16.mxu0 %vm1028_vm0, %v8005_v0  ;;  %v1030_v2 = vsel %vm1028_vm0, %v8005_v0, 0  ;;  %v8008_v4 = vld [vmem:[%s8137_s17 + $0x38] sm:$0xff]   ;;  %v8009_v5 = vld [vmem:[%s8137_s17 + $0x30] sm:$0xff]   ;;  %v8010_v6 = vld [vmem:[%s8137_s17 + $0x28] sm:$0xff]   ;;  %vm1015_vm1 = vcmask 326656   ;;  %v8111_v24 = vmov 0.0  }
  0x43   : > { %7387 = vmatpush3.bf16.msra.mxu0 %v1030_v2  ;;  %s9638_s0 = smov (!%p955_p3, %s6744_s0), 1  ;;  %7400 = vmatprep.subr.bf16.mxu1 %v8008_v4  ;;  %v8011_v16 = vld [vmem:[%s8137_s17 + $0x20] sm:$0xff]   ;;  %v8012_v19 = vld [vmem:[%s8137_s17 + $0x18] sm:$0xff]   ;;  %v8013_v21 = vld [vmem:[%s8137_s17 + $0x10] sm:$0xff]   ;;  %968 = vst [vmem:[#allocation2 + $0x20] sm:$0xff] %v8111_v24  ;;  %vm1307_vm2 = vcmask 1042432  }
  0x44   : > { %7388 = vmatprep.subr.bf16.mxu0 %v8006_v1  ;;  %s7113_s25 = sshll.u32 %s9638_s0, 6  ;;  %7401 = vmatpush3.bf16.msra.mxu1 %v8008_v4  ;;  %v8014_v22 = vld [vmem:[%s8137_s17 + $0x8] sm:$0xff]   ;;  %v8015_v23 = vld [vmem:[%s8137_s17] sm:$0xff]   ;;  %964 = vst [vmem:[#allocation2] sm:$0xff] %v8111_v24  ;;  %965 = vst [vmem:[#allocation2 + $0x8] sm:$0xff] %v8111_v24  ;;  %s1114_s14 = sld [smem:[#allocation3]] }
  0x45   : > { %s959_s3 = scalar_lea.vmem %s8122_s5, %s7113_s25  ;;  %7402 = vmatprep.subr.bf16.mxu1 %v8009_v5  ;;  %966 = vst [vmem:[#allocation2 + $0x10] sm:$0xff] %v8111_v24  ;;  %967 = vst [vmem:[#allocation2 + $0x18] sm:$0xff] %v8111_v24  ;;  %v6751_v28 = vld [vmem:[%s8132_s13] ss:$0 sm:$0xff]  ;;  %v6768_v46 = vld [vmem:[%s8152_s29 + $0x4] sm:$0x7] }
  0x46   : > { %v976_v7 = vld [vmem:[%s959_s3] sm:$0xff]  ;;  %v977_v8 = vld [vmem:[%s959_s3 + $0x8] sm:$0xff]  ;;  %v978_v9 = vld [vmem:[%s959_s3 + $0x10] sm:$0xff]  ;;  %969 = vst [vmem:[#allocation2 + $0x28] sm:$0xff] %v8111_v24  ;;  %v1309_v47 = vsel %vm1307_vm2, %v6768_v46, 0  ;;  %vm1266_vm4 = vcmask 48128  }
  0x47   : > { %7389 = vmatpush3.bf16.msra.mxu0 %v8006_v1  ;;  %v984_v10 = vpack.c.bf16 %v977_v8, %v976_v7  ;;  %v979_v11 = vld [vmem:[%s959_s3 + $0x18] sm:$0xff]  ;;  %v980_v12 = vld [vmem:[%s959_s3 + $0x20] sm:$0xff]  ;;  %v981_v13 = vld [vmem:[%s959_s3 + $0x28] sm:$0xff]  ;;  %970 = vst [vmem:[#allocation2 + $0x30] sm:$0xff] %v8111_v24  ;;  %s9560_s30 = sld [smem:[#allocation11_spill]] }
  0x48   : > { %7390 = vmatprep.subr.bf16.mxu0 %v8007_v3  ;;  %v985_v14 = vpack.c.bf16 %v979_v11, %v978_v9  ;;  %v986_v15 = vpack.c.bf16 %v981_v13, %v980_v12  ;;  %7403 = vmatpush3.bf16.msra.mxu1 %v8009_v5  ;;  %v982_v17 = vld [vmem:[%s959_s3 + $0x30] sm:$0xff]  ;;  %v983_v18 = vld [vmem:[%s959_s3 + $0x38] sm:$0xff]  ;;  %971 = vst [vmem:[#allocation2 + $0x38] sm:$0xff] %v8111_v24  ;;  %972 = vst [vmem:[#allocation2 + $0x40] sm:$0xff] %v8111_v24  ;;  %s8566_s6 = sld [smem:[#allocation4]] }
  0x49   : > { %7392 = vmatprep.mubr.msk.bf16.mxu0 %vm1015_vm1, %v984_v10  ;;  %7404 = vmatprep.subr.bf16.mxu1 %v8010_v6  ;;  %v987_v20 = vpack.c.bf16 %v983_v18, %v982_v17  ;;  %973 = vst [vmem:[#allocation2 + $0x48] sm:$0xff] %v8111_v24  ;;  %974 = vst [vmem:[#allocation2 + $0x50] sm:$0xff] %v8111_v24  ;;  %v6777_v48 = vld [vmem:[%s8152_s29 + $0x8] sm:$0x7]  ;;  %v8323_v50 = vld [vmem:[%s8152_s29] sm:$0x7] }
  0x4a   : > { %v1483_v49 = vsel %vm1307_vm2, %v6777_v48, 0  ;;  %v8328_v51 = vld [vmem:[%s8152_s29 + $0x10] sm:$0x7]  ;;  %v6759_v52 = vld [vmem:[%s8142_s21] ss:$0 sm:$0xff]  ;;  %v1249_v54 = vstv %s1114_s14  ;;  %s9562_s20 = sld [smem:[#allocation12_spill]] }
  0x4b   : > { %7391 = vmatpush3.bf16.msra.mxu0 %v8007_v3  ;;  %s9570_s27 = sld [smem:[#allocation14_spill]] }
  0x4c   : > { %7405 = vmatpush3.bf16.msra.mxu1 %v8010_v6  ;;  %7931 = vmatprep.subr.msk.bf16.mxu0 %vm1307_vm2, %v6768_v46  ;;  %s9571_s4 = sld [smem:[#allocation13_spill]] }
  0x4d   : > { %7406 = vmatprep.subr.bf16.mxu1 %v8011_v16  ;;  %s2432_s10 = sld [smem:[#allocation5]] }
  0x4e   : > { %7393 = vmatmul.mubr.msk.bf16.vlgmr.msra.gmra.mxu0 %vm1015_vm1, %v985_v14  ;;  %s9574_s16 = sld [smem:[#allocation17_spill]] }
  0x4f   : > { %7396 = vmatprep.mubr.msk.bf16.mxu0 %vm1015_vm1, %v986_v15  ;;  %7425 = vmatpush3.bf16.msra.mxu0 %v1309_v47  ;;  %s9583_s26 = sld [smem:[#allocation15_spill]] }
  0x50   : > { %7407 = vmatpush3.bf16.msra.mxu1 %v8011_v16  ;;  %7932 = vmatprep.subr.msk.bf16.mxu0 %vm1307_vm2, %v8323_v50  ;;  %s9588_s1 = sld [smem:[#allocation16_spill]] }
  0x51   : > { %7408 = vmatprep.subr.bf16.mxu1 %v8012_v19  ;;  %s2435_s2 = sld [smem:[#allocation6]] }
  0x52   : > { %s9589_s11 = sld [smem:[#allocation19_spill]] }
  0x53   : > { %s9590_s7 = sld [smem:[#allocation18_spill]] }
  0x54   : > { %7409 = vmatpush3.bf16.msra.mxu1 %v8012_v19  ;;  %s3797_s15 = sld [smem:[#allocation7]] }
  0x55   : > { %7410 = vmatprep.subr.bf16.mxu1 %v8013_v21  ;;  %s9592_s12 = sld [smem:[#allocation22_spill]] }
  0x56   : > { %7397 = vmatmul.mubr.msk.bf16.gmra.mxu0 %vm1015_vm1, %v987_v20  ;;  %vm2458_vm1 = vcmask 261120   ;;  %s9612_s18 = sld [smem:[#allocation20_spill]] }
  0x57   : > { %s9209_s23 = sld [smem:[#allocation8]] }
  0x58   : > { %7411 = vmatpush3.bf16.msra.mxu1 %v8013_v21  ;;  %s9617_s25 = sld [smem:[#allocation21_spill]] }
  0x59   : > { %7412 = vmatprep.subr.bf16.mxu1 %v8014_v22  ;;  %s9619_s3 = sld [smem:[#allocation24_spill]] }
  0x5a   : > { %s9621_s14 = sld [smem:[#allocation23_spill]] }
  0x5c   : > { %7413 = vmatpush3.bf16.msra.mxu1 %v8014_v22 }
  0x5d   : > { %7414 = vmatprep.subr.bf16.mxu1 %v8015_v23 }
  0x60   : > { %7415 = vmatpush3.bf16.msra.mxu1 %v8015_v23 }
  0x61   : > { %7933 = vmatprep.subr.msk.bf16.mxu1 %vm1307_vm2, %v6777_v48 }
 0x10e   : > { %v7394_v25 = vpop.f32.mrf.mxu0 }
 0x10f   : > { %v1075_v33 = vadd.f32 %v7394_v25, %v6751_v28 }
 0x110   : > { %v1066_v26 = vpop.f32.mrf.mxu0 }
 0x111   : > { %v1067_v31 = vadd.f32 %v6751_v28, %v1066_v26 }
 0x112   : > { %v7395_v27 = vpop.f32.mrf.mxu0 }
 0x113   : > { %v1078_v29 = vadd.f32 %v7395_v27, %v6751_v28 }
 0x114   : > { %v1069_v30 = vpop.f32.mrf.mxu0 }
 0x115   : > { %v1070_v32 = vadd.f32 %v6751_v28, %v1069_v30  ;;  %v1119_v36 = vpack.c.bf16 %v1078_v29, %v1075_v33 }
 0x116   : > { %v7398_v34 = vpop.f32.mrf.mxu0 }
 0x117   : > { %v1118_v35 = vpack.c.bf16 %v1070_v32, %v1067_v31  ;;  %v1091_v43 = vadd.f32 %v7398_v34, %v6751_v28  ;;  %v1389_v32 = vsel %vm1307_vm2, %v8323_v50, 0 }
 0x118   : > { %v1082_v37 = vpop.f32.mrf.mxu0 }
 0x119   : > { %7416 = vmatprep.mubr.bf16.mxu1 %v1118_v35  ;;  %v1083_v41 = vadd.f32 %v6751_v28, %v1082_v37  ;;  %v1687_v35 = vsel %vm1307_vm2, %v8328_v51, 0  ;;  %v6797_v37 = vld [vmem:[%s8152_s29 + $0x18] sm:$0x7] }
 0x11a   : > { %v7399_v38 = vpop.f32.mrf.mxu0  ;;  %7417 = vmatmul.mubr.bf16.vlgmr.msra.gmra.mxu1 %v1119_v36  ;;  %v6782_v36 = vld [vmem:[%s8152_s29 + $0xc] sm:$0x7] }
 0x11b   : > { %v1094_v39 = vadd.f32 %v7399_v38, %v6751_v28  ;;  %7445 = vmatpush3.bf16.msra.mxu1 %v1483_v49 }
 0x11c   : > { %v1085_v40 = vpop.f32.mrf.mxu0  ;;  %7935 = vmatprep.subr.msk.bf16.mxu1 %vm1307_vm2, %v8328_v51 }
 0x11d   : > { %v1086_v42 = vadd.f32 %v6751_v28, %v1085_v40  ;;  %v1121_v45 = vpack.c.bf16 %v1094_v39, %v1091_v43 }
 0x11f   : > { %v1120_v44 = vpack.c.bf16 %v1086_v42, %v1083_v41 }
 0x121   : > { %7420 = vmatprep.mubr.bf16.mxu1 %v1120_v44 }
 0x122   : > { %7421 = vmatmul.mubr.bf16.gmra.mxu1 %v1121_v45 }
 0x1da   : > { %v7418_v53 = vpop.f32.mrf.mxu1 }
 0x1db   : > { %v1219_v55 = vadd.f32 %v7418_v53, %v6759_v52  ;;  %v9532_v53 = vmov 0.0|0.0  }
 0x1dc   : > { %v1210_v56 = vpop.f32.mrf.mxu1 }
 0x1dd   : > { %vm1243_vm3 = vcmp.gt.f32.partialorder %v1219_v55, 0.0  ;;  %v1252_v57 = vmul.f32 %v1249_v54, %v1219_v55  ;;  %v1211_v58 = vadd.f32 %v6759_v52, %v1210_v56  ;;  %v1585_v56 = vsel %vm1307_vm2, %v6782_v36, 0 }
 0x1de   : > { %v7419_v59 = vpop.f32.mrf.mxu1 }
 0x1df   : > { %v1260_v60 = vsel %vm1243_vm3, %v1219_v55, %v1252_v57  ;;  %vm1241_vm5 = vcmp.gt.f32.partialorder %v1211_v58, 0.0  ;;  %v1250_v61 = vmul.f32 %v1249_v54, %v1211_v58  ;;  %v1222_v62 = vadd.f32 %v7419_v59, %v6759_v52 }
 0x1e0   : > { %1269 = vst.msk [vmem:[#allocation2 + $0x20] sm:$0xff] %vm1266_vm4, %v1260_v60  ;;  %v1213_v63 = vpop.f32.mrf.mxu1  ;;  %v6792_v60 = vld [vmem:[%s8152_s29 + $0x14] sm:$0x7] }
 0x1e1   : > { %v1258_v0 = vsel %vm1241_vm5, %v1211_v58, %v1250_v61  ;;  %vm1244_vm6 = vcmp.gt.f32.partialorder %v1222_v62, 0.0  ;;  %v1253_v1 = vmul.f32 %v1249_v54, %v1222_v62  ;;  %v1214_v2 = vadd.f32 %v6759_v52, %v1213_v63 }
 0x1e2   : > { %1267 = vst.msk [vmem:[#allocation2 + $0x10] sm:$0xff] %vm1266_vm4, %v1258_v0  ;;  %v7422_v3 = vpop.f32.mrf.mxu1  ;;  %v1891_v63 = vsel %vm1307_vm2, %v6797_v37, 0 }
 0x1e3   : > { %v1261_v4 = vsel %vm1244_vm6, %v1222_v62, %v1253_v1  ;;  %vm1242_vm7 = vcmp.gt.f32.partialorder %v1214_v2, 0.0  ;;  %v1251_v5 = vmul.f32 %v1249_v54, %v1214_v2  ;;  %v1235_v6 = vadd.f32 %v7422_v3, %v6759_v52  ;;  %v6807_v1 = vld [vmem:[%s8152_s29 + $0x20] sm:$0x7] }
 0x1e4   : > { %1270 = vst.msk [vmem:[#allocation2 + $0x28] sm:$0xff] %vm1266_vm4, %v1261_v4  ;;  %v1226_v7 = vpop.f32.mrf.mxu1  ;;  %vm2609_vm6 = vcmask 1045504  }
 0x1e5   : > { %v1259_v8 = vsel %vm1242_vm7, %v1214_v2, %v1251_v5  ;;  %vm1247_vm8 = vcmp.gt.f32.partialorder %v1235_v6, 0.0  ;;  %v1256_v9 = vmul.f32 %v1249_v54, %v1235_v6  ;;  %v1227_v10 = vadd.f32 %v6759_v52, %v1226_v7 }
 0x1e6   : > { %1268 = vst.msk [vmem:[#allocation2 + $0x18] sm:$0xff] %vm1266_vm4, %v1259_v8  ;;  %v7423_v11 = vpop.f32.mrf.mxu1  ;;  %vm2561_vm7 = vcmask 97280  }
 0x1e7   : > { %v1264_v12 = vsel %vm1247_vm8, %v1235_v6, %v1256_v9  ;;  %vm1245_vm9 = vcmp.gt.f32.partialorder %v1227_v10, 0.0  ;;  %v1254_v13 = vmul.f32 %v1249_v54, %v1227_v10  ;;  %v1238_v14 = vadd.f32 %v7423_v11, %v6759_v52  ;;  %v1279_v23 = vld [vmem:[#allocation2 + $0x20] sm:$0xff] }
 0x1e8   : > { %1273 = vst.msk [vmem:[#allocation2 + $0x40] sm:$0xff] %vm1266_vm4, %v1264_v12  ;;  %v1229_v15 = vpop.f32.mrf.mxu1 }
 0x1e9   : > { %v1262_v16 = vsel %vm1245_vm9, %v1227_v10, %v1254_v13  ;;  %vm1248_vm10 = vcmp.gt.f32.partialorder %v1238_v14, 0.0  ;;  %v1257_v17 = vmul.f32 %v1249_v54, %v1238_v14  ;;  %v1230_v18 = vadd.f32 %v6759_v52, %v1229_v15  ;;  %v1277_v19 = vld [vmem:[#allocation2 + $0x10] sm:$0xff] }
 0x1ea   : > { %1271 = vst.msk [vmem:[#allocation2 + $0x30] sm:$0xff] %vm1266_vm4, %v1262_v16  ;;  %v1289_v20 = vpack.c.bf16 %v1277_v19, %v8111_v24  ;;  %v1456_v25 = vld [vmem:[#allocation2 + $0xc] sm:$0xff] }
 0x1eb   : > { %v1265_v21 = vsel %vm1248_vm10, %v1238_v14, %v1257_v17  ;;  %vm1246_vm11 = vcmp.gt.f32.partialorder %v1230_v18, 0.0  ;;  %v1255_v22 = vmul.f32 %v1249_v54, %v1230_v18  ;;  %v8342_v26 = vld [vmem:[#allocation2 + $0x24] sm:$0xff]  ;;  %v1660_v51 = vld [vmem:[#allocation2 + $0xf] sm:$0xff]  ;;  %v1789_v17 = vsel %vm1307_vm2, %v6792_v60, 0 }
 0x1ec   : > { %1274 = vst.msk [vmem:[#allocation2 + $0x48] sm:$0xff] %vm1266_vm4, %v1265_v21  ;;  %7426 = vmatprep.mubr.msk.bf16.mxu0 %vm1266_vm4, %v1289_v20  ;;  %v1280_v38 = vld [vmem:[#allocation2 + $0x28] sm:$0xff] }
 0x1ed   : > { %v1263_v27 = vsel %vm1246_vm11, %v1230_v18, %v1255_v22  ;;  %v1278_v28 = vld [vmem:[#allocation2 + $0x18] sm:$0xff]  ;;  %v8397_v58 = vpack.c.bf16 %v1280_v38, %v1279_v23  ;;  %v1663_v59 = vld [vmem:[#allocation2 + $0x27] sm:$0xff] }
 0x1ee   : > { %v8344_v29 = vld [vmem:[#allocation2 + $0x14] sm:$0xff]  ;;  %v8346_v30 = vld [vmem:[#allocation2 + $0x1c] sm:$0xff]  ;;  %1272 = vst.msk [vmem:[#allocation2 + $0x38] sm:$0xff] %vm1266_vm4, %v1263_v27  ;;  %v8349_v31 = vpack.c.bf16 %v1279_v23, %v1278_v28  ;;  %v8394_v55 = vpack.c.bf16 %v1278_v28, %v1277_v19  ;;  %v1561_v14 = vld [vmem:[#allocation2 + $0x26] sm:$0xff]  ;;  %v2095_v27 = vsel %vm1307_vm2, %v6807_v1, 0 }
 0x1ef   : > { %v1464_v33 = vpack.c.bf16 %v8344_v29, %v1456_v25  ;;  %v1465_v34 = vpack.c.bf16 %v8342_v26, %v8346_v30  ;;  %v1661_v41 = vld [vmem:[#allocation2 + $0x17] sm:$0xff]  ;;  %v8370_v42 = vld [vmem:[#allocation2 + $0x40] sm:$0xff]  ;;  %v1558_v5 = vld [vmem:[#allocation2 + $0xe] sm:$0xff] }
 0x1f0   : > { %7427 = vmatmul.mubr.msk.bf16.vlgmr.msra.gmra.mxu0 %vm1266_vm4, %v8349_v31  ;;  %v1668_v52 = vpack.c.bf16 %v1661_v41, %v1660_v51  ;;  %v1662_v54 = vld [vmem:[#allocation2 + $0x1f] sm:$0xff]  ;;  %v1559_v2 = vld [vmem:[#allocation2 + $0x16] sm:$0xff] }
 0x1f1   : > { %7446 = vmatprep.mubr.msk.bf16.mxu1 %vm1266_vm4, %v1464_v33  ;;  %7435 = vmatpush3.bf16.msra.mxu0 %v1389_v32  ;;  %v1281_v39 = vld [vmem:[#allocation2 + $0x30] sm:$0xff]  ;;  %v1669_v61 = vpack.c.bf16 %v1663_v59, %v1662_v54  ;;  %v1865_v7 = vld [vmem:[#allocation2 + $0x19] sm:$0xff]  ;;  %v1566_v8 = vpack.c.bf16 %v1559_v2, %v1558_v5  ;;  %v1866_v22 = vld [vmem:[#allocation2 + $0x21] sm:$0xff] }
 0x1f2   : > { %7447 = vmatmul.mubr.msk.bf16.vlgmr.msra.gmra.mxu1 %vm1266_vm4, %v1465_v34  ;;  %v8364_v40 = vpack.c.bf16 %v1281_v39, %v1280_v38  ;;  %7934 = vmatprep.subr.msk.bf16.mxu0 %vm1307_vm2, %v6782_v36  ;;  %v8372_v43 = vld [vmem:[#allocation2 + $0x2c] sm:$0xff]  ;;  %v1560_v12 = vld [vmem:[#allocation2 + $0x1e] sm:$0xff]  ;;  %v6817_v32 = vld [vmem:[%s8152_s29 + $0x28] sm:$0x7] }
 0x1f3   : > { %7465 = vmatpush3.bf16.msra.mxu1 %v1687_v35  ;;  %v8374_v44 = vld [vmem:[#allocation2 + $0x44] sm:$0xff]  ;;  %v1664_v62 = vld [vmem:[#allocation2 + $0x2f] sm:$0xff]  ;;  %v1567_v16 = vpack.c.bf16 %v1561_v14, %v1560_v12  ;;  %v6802_v23 = vld [vmem:[%s8152_s29 + $0x1c] sm:$0x7] }
 0x1f4   : > { %7937 = vmatprep.subr.msk.bf16.mxu1 %vm1307_vm2, %v6797_v37  ;;  %7430 = vmatprep.mubr.msk.bf16.mxu0 %vm1266_vm4, %v8364_v40  ;;  %v1864_v6 = vld [vmem:[#allocation2 + $0x11] sm:$0xff]  ;;  %v1667_v9 = vld [vmem:[#allocation2 + $0x47] sm:$0xff]  ;;  %v1993_v41 = vsel %vm1307_vm2, %v6802_v23, 0 }
 0x1f5   : > { %v1282_v45 = vld [vmem:[#allocation2 + $0x38] sm:$0xff]  ;;  %v1872_v11 = vpack.c.bf16 %v1865_v7, %v1864_v6  ;;  %v1867_v15 = vld [vmem:[#allocation2 + $0x29] sm:$0xff]  ;;  %v1870_v35 = vld [vmem:[#allocation2 + $0x41] sm:$0xff] }
 0x1f6   : > { %v8376_v46 = vld [vmem:[#allocation2 + $0x34] sm:$0xff]  ;;  %v8378_v47 = vld [vmem:[#allocation2 + $0x3c] sm:$0xff]  ;;  %v8381_v48 = vpack.c.bf16 %v8370_v42, %v1282_v45  ;;  %v8410_v4 = vpack.c.bf16 %v1282_v45, %v1281_v39  ;;  %v1873_v25 = vpack.c.bf16 %v1867_v15, %v1866_v22  ;;  %v1565_v34 = vld [vmem:[#allocation2 + $0x46] sm:$0xff]  ;;  %v2076_v39 = vpack.c.bf16 %v8346_v30, %v8344_v29 }
 0x1f7   : > { %v1466_v49 = vpack.c.bf16 %v8376_v46, %v8372_v43  ;;  %v1467_v50 = vpack.c.bf16 %v8374_v44, %v8378_v47  ;;  %v1665_v57 = vld [vmem:[#allocation2 + $0x37] sm:$0xff]  ;;  %v1666_v3 = vld [vmem:[#allocation2 + $0x3f] sm:$0xff]  ;;  %v1562_v18 = vld [vmem:[#allocation2 + $0x2e] sm:$0xff]  ;;  %v2078_v29 = vpack.c.bf16 %v8378_v47, %v8376_v46 }
 0x1f8   : > { %7431 = vmatmul.mubr.msk.bf16.gmra.mxu0 %vm1266_vm4, %v8381_v48  ;;  %v1670_v0 = vpack.c.bf16 %v1665_v57, %v1664_v62  ;;  %v1671_v10 = vpack.c.bf16 %v1667_v9, %v1666_v3  ;;  %v1563_v13 = vld [vmem:[#allocation2 + $0x36] sm:$0xff]  ;;  %v1564_v33 = vld [vmem:[#allocation2 + $0x3e] sm:$0xff]  ;;  %v1871_v36 = vld [vmem:[#allocation2 + $0x49] sm:$0xff] }
 0x1f9   : > { %7450 = vmatprep.mubr.msk.bf16.mxu1 %vm1266_vm4, %v1466_v49  ;;  %7436 = vmatprep.mubr.msk.bf16.mxu0 %vm1266_vm4, %v9532_v53  ;;  %v1868_v19 = vld [vmem:[#allocation2 + $0x31] sm:$0xff]  ;;  %v1869_v20 = vld [vmem:[#allocation2 + $0x39] sm:$0xff]  ;;  %v1568_v21 = vpack.c.bf16 %v1563_v13, %v1562_v18  ;;  %v1569_v37 = vpack.c.bf16 %v1565_v34, %v1564_v33  ;;  %v1875_v38 = vpack.c.bf16 %v1871_v36, %v1870_v35  ;;  %v6812_v45 = vld [vmem:[%s8152_s29 + $0x24] sm:$0x7] }
 0x1fa   : > { %7451 = vmatmul.mubr.msk.bf16.gmra.mxu1 %vm1266_vm4, %v1467_v50  ;;  %v1874_v28 = vpack.c.bf16 %v1869_v20, %v1868_v19  ;;  %v2077_v49 = vpack.c.bf16 %v8372_v43, %v8342_v26  ;;  %v2299_v50 = vsel %vm1307_vm2, %v6817_v32, 0  ;;  %v1769_v30 = vld [vmem:[#allocation2 + $0x48] sm:$0xff]  ;;  %v1966_v51 = vld [vmem:[#allocation2 + $0x12] sm:$0xff] }
 0x1fb   : > { %7466 = vmatprep.mubr.msk.bf16.mxu1 %vm1266_vm4, %v1668_v52  ;;  %v1967_v52 = vld [vmem:[#allocation2 + $0x1a] sm:$0xff]  ;;  %v2075_v26 = vld [vmem:[#allocation2 + $0x4c] sm:$0xff]  ;;  %v1773_v43 = vpack.c.bf16 %v1769_v30, %v8370_v42  ;;  %v1968_v57 = vld [vmem:[#allocation2 + $0x22] sm:$0xff]  ;;  %v2181_v62 = vpack.c.bf16 %v8111_v24, %v1769_v30 }
 0x1fc   : > { %v1974_v54 = vpack.c.bf16 %v1967_v52, %v1966_v51  ;;  %v1969_v46 = vld [vmem:[#allocation2 + $0x2a] sm:$0xff]  ;;  %v1970_v47 = vld [vmem:[#allocation2 + $0x32] sm:$0xff] }
 0x1fd   : > { %v1975_v59 = vpack.c.bf16 %v1969_v46, %v1968_v57 }
 0x200   : > { %7437 = vmatmul.mubr.msk.bf16.vlgmr.msra.gmra.mxu0 %vm1266_vm4, %v8394_v55 }
 0x201   : > { %7455 = vmatpush3.bf16.msra.mxu0 %v1585_v56  ;;  %7440 = vmatprep.mubr.msk.bf16.mxu0 %vm1266_vm4, %v8397_v58  ;;  %v1971_v56 = vld [vmem:[#allocation2 + $0x3a] sm:$0xff] }
 0x202   : > { %7467 = vmatmul.mubr.msk.bf16.vlgmr.msra.gmra.mxu1 %vm1266_vm4, %v1669_v61  ;;  %7936 = vmatprep.subr.msk.bf16.mxu0 %vm1307_vm2, %v6792_v60  ;;  %v2197_v60 = vsel %vm1307_vm2, %v6812_v45, 0  ;;  %v1976_v42 = vpack.c.bf16 %v1971_v56, %v1970_v47 }
 0x203   : > { %7470 = vmatprep.mubr.msk.bf16.mxu1 %vm1266_vm4, %v1670_v0  ;;  %7485 = vmatpush3.bf16.msra.mxu1 %v1891_v63  ;;  %v8016_v63 = vld [vmem:[%s8172_s19 + $0x8] sm:$0xff]   ;;  %v8017_v0 = vld [vmem:[%s8172_s19] sm:$0xff]  }
 0x204   : > { %7939 = vmatprep.subr.msk.bf16.mxu1 %vm1307_vm2, %v6807_v1 }
 0x208   : > { %7441 = vmatmul.mubr.msk.bf16.gmra.mxu0 %vm1266_vm4, %v8410_v4 }
 0x209   : > { %7456 = vmatprep.mubr.msk.bf16.mxu0 %vm1266_vm4, %v1566_v8 }
 0x20a   : > { %7471 = vmatmul.mubr.msk.bf16.gmra.mxu1 %vm1266_vm4, %v1671_v10 }
 0x20b   : > { %7486 = vmatprep.mubr.msk.bf16.mxu1 %vm1266_vm4, %v1872_v11 }
 0x210   : > { %7457 = vmatmul.mubr.msk.bf16.vlgmr.msra.gmra.mxu0 %vm1266_vm4, %v1567_v16 }
 0x211   : > { %7475 = vmatpush3.bf16.msra.mxu0 %v1789_v17  ;;  %7460 = vmatprep.mubr.msk.bf16.mxu0 %vm1266_vm4, %v1568_v21 }
 0x212   : > { %7487 = vmatmul.mubr.msk.bf16.vlgmr.msra.gmra.mxu1 %vm1266_vm4, %v1873_v25  ;;  %7938 = vmatprep.subr.msk.bf16.mxu0 %vm1307_vm2, %v6802_v23 }
 0x213   : > { %7490 = vmatprep.mubr.msk.bf16.mxu1 %vm1266_vm4, %v1874_v28  ;;  %7505 = vmatpush3.bf16.msra.mxu1 %v2095_v27 }
 0x214   : > { %7941 = vmatprep.subr.msk.bf16.mxu1 %vm1307_vm2, %v6817_v32 }
 0x218   : > { %7461 = vmatmul.mubr.msk.bf16.gmra.mxu0 %vm1266_vm4, %v1569_v37 }
 0x219   : > { %7476 = vmatprep.mubr.msk.bf16.mxu0 %vm1266_vm4, %v8394_v55  ;;  %v2079_v55 = vpack.c.bf16 %v2075_v26, %v8374_v44  ;;  %v1972_v44 = vld [vmem:[#allocation2 + $0x42] sm:$0xff] }
 0x21a   : > { %7491 = vmatmul.mubr.msk.bf16.gmra.mxu1 %vm1266_vm4, %v1875_v38 }
 0x21b   : > { %7506 = vmatprep.mubr.msk.bf16.mxu1 %vm1266_vm4, %v2076_v39 }
 0x220   : > { %7477 = vmatmul.mubr.msk.bf16.vlgmr.msra.gmra.mxu0 %vm1266_vm4, %v8397_v58 }
 0x221   : > { %7495 = vmatpush3.bf16.msra.mxu0 %v1993_v41  ;;  %7480 = vmatprep.mubr.msk.bf16.mxu0 %vm1266_vm4, %v8410_v4 }
 0x222   : > { %7507 = vmatmul.mubr.msk.bf16.vlgmr.msra.gmra.mxu1 %vm1266_vm4, %v2077_v49  ;;  %7940 = vmatprep.subr.msk.bf16.mxu0 %vm1307_vm2, %v6812_v45 }
 0x223   : > { %7510 = vmatprep.mubr.msk.bf16.mxu1 %vm1266_vm4, %v2078_v29  ;;  %7525 = vmatpush3.bf16.msra.mxu1 %v2299_v50 }
 0x228   : > { %7481 = vmatmul.mubr.msk.bf16.gmra.mxu0 %vm1266_vm4, %v1773_v43 }
 0x229   : > { %7496 = vmatprep.mubr.msk.bf16.mxu0 %vm1266_vm4, %v1974_v54 }
 0x22a   : > { %7511 = vmatmul.mubr.msk.bf16.gmra.mxu1 %vm1266_vm4, %v2079_v55 }
 0x22b   : > { %7526 = vmatprep.mubr.msk.bf16.mxu1 %vm1266_vm4, %v8397_v58  ;;  %v1973_v58 = vld [vmem:[#allocation2 + $0x4a] sm:$0xff] }
 0x22c   : > { %v1977_v61 = vpack.c.bf16 %v1973_v58, %v1972_v44 }
 0x230   : > { %7497 = vmatmul.mubr.msk.bf16.vlgmr.msra.gmra.mxu0 %vm1266_vm4, %v1975_v59 }
 0x231   : > { %7515 = vmatpush3.bf16.msra.mxu0 %v2197_v60  ;;  %7500 = vmatprep.mubr.msk.bf16.mxu0 %vm1266_vm4, %v1976_v42 }
 0x232   : > { %7527 = vmatmul.mubr.msk.bf16.vlgmr.msra.gmra.mxu1 %vm1266_vm4, %v8410_v4  ;;  %7534 = vmatprep.subr.bf16.mxu0 %v8016_v63 }
 0x233   : > { %7530 = vmatprep.mubr.msk.bf16.mxu1 %vm1266_vm4, %v1773_v43 }
 0x238   : > { %7501 = vmatmul.mubr.msk.bf16.gmra.mxu0 %vm1266_vm4, %v1977_v61 }
 0x239   : > { %7516 = vmatprep.mubr.msk.bf16.mxu0 %vm1266_vm4, %v8349_v31 }
 0x23a   : > { %7531 = vmatmul.mubr.msk.bf16.gmra.mxu1 %vm1266_vm4, %v9532_v53 }
 0x240   : > { %7517 = vmatmul.mubr.msk.bf16.vlgmr.msra.gmra.mxu0 %vm1266_vm4, %v8364_v40 }
 0x241   : > { %7520 = vmatprep.mubr.msk.bf16.mxu0 %vm1266_vm4, %v8381_v48  ;;  %7535 = vmatpush3.bf16.msra.mxu0 %v8016_v63 }
 0x242   : > { %7536 = vmatprep.subr.bf16.mxu0 %v8017_v0 }
 0x245   : > { %7537 = vmatpush3.bf16.msra.mxu0 %v8017_v0 }
 0x248   : > { %7521 = vmatmul.mubr.msk.bf16.gmra.mxu0 %vm1266_vm4, %v2181_v62 }
 0x2b0   : > { %v7428_v31 = vpop.f32.mrf.mxu0 }
 0x2b2   : > { %v8474_v1 = vpop.f32.mrf.mxu1  ;;  %v1345_v2 = vpop.f32.mrf.mxu0 }
 0x2b4   : > { %v8476_v3 = vpop.f32.mrf.mxu1  ;;  %v7429_v40 = vpop.f32.mrf.mxu0 }
 0x2b6   : > { %v8478_v4 = vpop.f32.mrf.mxu1  ;;  %v1348_v48 = vpop.f32.mrf.mxu0 }
 0x2b8   : > { %v8480_v5 = vpop.f32.mrf.mxu1  ;;  %v8482_v24 = vpop.f32.mrf.mxu0 }
 0x2ba   : > { %v8484_v6 = vpop.f32.mrf.mxu1  ;;  %v8486_v7 = vpop.f32.mrf.mxu0 }
 0x2bc   : > { %v8488_v8 = vpop.f32.mrf.mxu1  ;;  %v8490_v9 = vpop.f32.mrf.mxu0 }
 0x2be   : > { %v8492_v10 = vpop.f32.mrf.mxu1  ;;  %v8494_v11 = vpop.f32.mrf.mxu0 }
 0x2c0   : > { %v8496_v12 = vpop.f32.mrf.mxu1  ;;  %v7438_v13 = vpop.f32.mrf.mxu0 }
 0x2c1   : > { %v1434_v44 = vadd.f32 %v7438_v13, %v7428_v31 }
 0x2c2   : > { %v7468_v14 = vpop.f32.mrf.mxu1  ;;  %v1425_v15 = vpop.f32.mrf.mxu0 }
 0x2c3   : > { %v1426_v62 = vadd.f32 %v1425_v15, %v1345_v2 }
 0x2c4   : > { %v8498_v16 = vpop.f32.mrf.mxu1  ;;  %v7439_v17 = vpop.f32.mrf.mxu0 }
 0x2c5   : > { %v1437_v53 = vadd.f32 %v7439_v17, %v7429_v40 }
 0x2c6   : > { %v8500_v18 = vpop.f32.mrf.mxu1  ;;  %v1428_v19 = vpop.f32.mrf.mxu0 }
 0x2c7   : > { %v1553_v31 = vadd.f32 %v8478_v4, %v1437_v53 }
 0x2c8   : > { %v8502_v20 = vpop.f32.mrf.mxu1  ;;  %v7442_v21 = vpop.f32.mrf.mxu0 }
 0x2c9   : > { %v1450_v13 = vadd.f32 %v7442_v21, %v8482_v24 }
 0x2ca   : > { %v8504_v22 = vpop.f32.mrf.mxu1  ;;  %v1441_v23 = vpop.f32.mrf.mxu0 }
 0x2cb   : > { %v1556_v4 = vadd.f32 %v8484_v6, %v1450_v13 }
 0x2cc   : > { %v8506_v25 = vpop.f32.mrf.mxu1  ;;  %v7443_v27 = vpop.f32.mrf.mxu0 }
 0x2ce   : > { %v8508_v28 = vpop.f32.mrf.mxu1  ;;  %v1444_v32 = vpop.f32.mrf.mxu0 }
 0x2cf   : > { %v1445_v53 = vadd.f32 %v1444_v32, %v8494_v11 }
 0x2d0   : > { %v8510_v33 = vpop.f32.mrf.mxu1  ;;  %v7458_v34 = vpop.f32.mrf.mxu0 }
 0x2d1   : > { %9552 = vst [vmem:[#allocation25_spill] sm:$0xff] %v8510_v33  ;;  %v1555_v6 = vadd.f32 %v8496_v12, %v1445_v53 }
 0x2d2   : > { %v8512_v35 = vpop.f32.mrf.mxu1  ;;  %v1621_v36 = vpop.f32.mrf.mxu0 }
 0x2d4   : > { %v8514_v37 = vpop.f32.mrf.mxu1  ;;  %v7459_v38 = vpop.f32.mrf.mxu0 }
 0x2d6   : > { %v8516_v39 = vpop.f32.mrf.mxu1  ;;  %v1624_v41 = vpop.f32.mrf.mxu0 }
 0x2d8   : > { %v8518_v45 = vpop.f32.mrf.mxu1  ;;  %v7462_v49 = vpop.f32.mrf.mxu0 }
 0x2da   : > { %v8520_v50 = vpop.f32.mrf.mxu1  ;;  %v1637_v29 = vpop.f32.mrf.mxu0 }
 0x2db   : > { %9553 = vst [vmem:[#allocation26_spill] sm:$0xff] %v8520_v50 }
 0x2dc   : > { %v8522_v30 = vpop.f32.mrf.mxu1  ;;  %v7463_v51 = vpop.f32.mrf.mxu0 }
 0x2dd   : > { %9554 = vst [vmem:[#allocation27_spill] sm:$0xff] %v8522_v30 }
 0x2de   : > { %v8524_v52 = vpop.f32.mrf.mxu1  ;;  %v1640_v26 = vpop.f32.mrf.mxu0 }
 0x2df   : > { %9555 = vst [vmem:[#allocation28_spill] sm:$0xff] %v8524_v52  ;;  %v1429_v52 = vadd.f32 %v1428_v19, %v1348_v48  ;;  %v1655_v48 = vadd.f32 %v7459_v38, %v1553_v31  ;;  %v1453_v19 = vadd.f32 %v7443_v27, %v8490_v9 }
 0x2e0   : > { %v8526_v43 = vpop.f32.mrf.mxu1  ;;  %v7478_v54 = vpop.f32.mrf.mxu0 }
 0x2e1   : > { %9556 = vst [vmem:[#allocation29_spill] sm:$0xff] %v8526_v43  ;;  %v1552_v43 = vadd.f32 %v8474_v1, %v1434_v44  ;;  %v1551_v2 = vadd.f32 %v8480_v5, %v1429_v52  ;;  %v1442_v1 = vadd.f32 %v1441_v23, %v8486_v7  ;;  %v1757_v7 = vadd.f32 %v8500_v18, %v1655_v48 }
 0x2e2   : > { %v8528_v55 = vpop.f32.mrf.mxu1  ;;  %v1825_v46 = vpop.f32.mrf.mxu0  ;;  %v1658_v23 = vadd.f32 %v7462_v49, %v1556_v4  ;;  %v1657_v18 = vadd.f32 %v1640_v26, %v1555_v6 }
 0x2e3   : > { %v1554_v21 = vadd.f32 %v8488_v8, %v1442_v1 }
 0x2e4   : > { %v8530_v47 = vpop.f32.mrf.mxu1  ;;  %v7479_v56 = vpop.f32.mrf.mxu0  ;;  %v1760_v49 = vadd.f32 %v8504_v22, %v1658_v23 }
 0x2e5   : > { %9557 = vst [vmem:[#allocation30_spill] sm:$0xff] %v8530_v47  ;;  %v1550_v47 = vadd.f32 %v8476_v3, %v1426_v62  ;;  %v1656_v38 = vadd.f32 %v1637_v29, %v1554_v21 }
 0x2e6   : > { %v8532_v57 = vpop.f32.mrf.mxu1  ;;  %v1828_v59 = vpop.f32.mrf.mxu0 }
 0x2e7   : > { %9558 = vst [vmem:[#allocation31_spill] sm:$0xff] %v8532_v57  ;;  %v1654_v57 = vadd.f32 %v7458_v34, %v1552_v43  ;;  %v1652_v33 = vadd.f32 %v1621_v36, %v1550_v47  ;;  %v1653_v34 = vadd.f32 %v1624_v41, %v1551_v2  ;;  %v1859_v41 = vadd.f32 %v7479_v56, %v1757_v7  ;;  %v9564_v2 = vld [vmem:[#allocation26_spill] sm:$0xff] }
 0x2e8   : > { %v8534_v60 = vpop.f32.mrf.mxu1  ;;  %v7482_v42 = vpop.f32.mrf.mxu0 }
 0x2e9   : > { %9559 = vst [vmem:[#allocation32_spill] sm:$0xff] %v8534_v60  ;;  %v1756_v17 = vadd.f32 %v7468_v14, %v1654_v57  ;;  %v1754_v36 = vadd.f32 %v8498_v16, %v1652_v33  ;;  %v1557_v14 = vadd.f32 %v8492_v10, %v1453_v19  ;;  %v1755_v9 = vadd.f32 %v8502_v20, %v1653_v34 }
 0x2ea   : > { %v8536_v58 = vpop.f32.mrf.mxu1  ;;  %v1841_v61 = vpop.f32.mrf.mxu0  ;;  %v1758_v20 = vadd.f32 %v8506_v25, %v1656_v38  ;;  %v1961_v29 = vadd.f32 %v8516_v39, %v1859_v41  ;;  %v1862_v56 = vadd.f32 %v7482_v42, %v1760_v49  ;;  %v8585_v38 = vstv %s8566_s6  ;;  %s5198_s6 = sld [smem:[#allocation10]] }
 0x2eb   : > { %v1858_v3 = vadd.f32 %v7478_v54, %v1756_v17  ;;  %v1856_v52 = vadd.f32 %v1825_v46, %v1754_v36  ;;  %v1659_v11 = vadd.f32 %v7463_v51, %v1557_v14  ;;  %v1857_v32 = vadd.f32 %v1828_v59, %v1755_v9  ;;  %v8579_v36 = vld [vmem:[%s9562_s20] ss:$0 sm:$0xff]  ;;  %s962_s20 = scalar_lea.vmem %s8269_s22, %s9638_s0 }
 0x2ec   : > { %v8538_v63 = vpop.f32.mrf.mxu1  ;;  %v7483_v0 = vpop.f32.mrf.mxu0  ;;  %v9563_v62 = vld [vmem:[#allocation30_spill] sm:$0xff]  ;;  %v9569_v9 = vld [vmem:[#allocation29_spill] sm:$0xff] }
 0x2ed   : > { %v1960_v16 = vadd.f32 %v8512_v35, %v1858_v3  ;;  %v1958_v46 = vadd.f32 %v8514_v37, %v1856_v52  ;;  %v1761_v35 = vadd.f32 %v8508_v28, %v1659_v11  ;;  %v1959_v12 = vadd.f32 %v8518_v45, %v1857_v32 }
 0x2ee   : > { %v8541_v30 = vpop.f32.mrf.mxu1  ;;  %v1844_v50 = vpop.f32.mrf.mxu0  ;;  %v1860_v37 = vadd.f32 %v1841_v61, %v1758_v20  ;;  %v1964_v45 = vadd.f32 %v9564_v2, %v1862_v56  ;;  %v9565_v61 = vld [vmem:[#allocation27_spill] sm:$0xff] }
 0x2ef   : > { %v1863_v59 = vadd.f32 %v7483_v0, %v1761_v35  ;;  %v9566_v17 = vld [vmem:[#allocation31_spill] sm:$0xff] }
 0x2f0   : > { %v7498_v60 = vpop.f32.mrf.mxu0  ;;  %v8547_v15 = vpop.f32.mrf.mxu1  ;;  %v1962_v48 = vadd.f32 %v9565_v61, %v1860_v37  ;;  %v9568_v4 = vld [vmem:[#allocation32_spill] sm:$0xff] }
 0x2f1   : > { %v2062_v8 = vadd.f32 %v7498_v60, %v1960_v16  ;;  %v9561_v60 = vld [vmem:[#allocation25_spill] sm:$0xff] }
 0x2f2   : > { %v2029_v40 = vpop.f32.mrf.mxu0  ;;  %v7528_v24 = vpop.f32.mrf.mxu1  ;;  %v1759_v25 = vadd.f32 %v9561_v60, %v1657_v18 }
 0x2f3   : > { %v2060_v47 = vadd.f32 %v2029_v40, %v1958_v46  ;;  %v2164_v22 = vadd.f32 %v8528_v55, %v2062_v8  ;;  %v8573_v40 = vld [vmem:[%s9560_s30] ss:$0 sm:$0xff]  ;;  %s5195_s30 = sld [smem:[#allocation9]] }
 0x2f4   : > { %v7499_v43 = vpop.f32.mrf.mxu0  ;;  %v2335_v33 = vpop.f32.mrf.mxu1  ;;  %v1861_v31 = vadd.f32 %v1844_v50, %v1759_v25 }
 0x2f5   : > { %v2063_v26 = vadd.f32 %v7499_v43, %v1961_v29  ;;  %v2162_v28 = vadd.f32 %v9563_v62, %v2060_v47  ;;  %v9567_v43 = vld [vmem:[#allocation28_spill] sm:$0xff] }
 0x2f6   : > { %v2032_v5 = vpop.f32.mrf.mxu0  ;;  %v7529_v51 = vpop.f32.mrf.mxu1  ;;  %v1965_v3 = vadd.f32 %v9567_v43, %v1863_v59 }
 0x2f7   : > { %v2061_v44 = vadd.f32 %v2032_v5, %v1959_v12  ;;  %v2165_v19 = vadd.f32 %v9566_v17, %v2063_v26 }
 0x2f8   : > { %v7502_v27 = vpop.f32.mrf.mxu0  ;;  %v2338_v13 = vpop.f32.mrf.mxu1 }
 0x2f9   : > { %v2066_v34 = vadd.f32 %v7502_v27, %v1964_v45  ;;  %v2163_v5 = vadd.f32 %v9568_v4, %v2061_v44 }
 0x2fa   : > { %v2045_v54 = vpop.f32.mrf.mxu0  ;;  %v7532_v50 = vpop.f32.mrf.mxu1 }
 0x2fb   : > { %v2064_v21 = vadd.f32 %v2045_v54, %v1962_v48  ;;  %v2168_v54 = vadd.f32 %v8536_v58, %v2066_v34 }
 0x2fc   : > { %v7503_v10 = vpop.f32.mrf.mxu0  ;;  %v2351_v8 = vpop.f32.mrf.mxu1 }
 0x2fd   : > { %v2067_v14 = vadd.f32 %v7503_v10, %v1965_v3  ;;  %v2166_v49 = vadd.f32 %v8538_v63, %v2064_v21 }
 0x2fe   : > { %v2048_v57 = vpop.f32.mrf.mxu0  ;;  %v7533_v37 = vpop.f32.mrf.mxu1 }
 0x300   : > { %v7518_v39 = vpop.f32.mrf.mxu0  ;;  %v2354_v45 = vpop.f32.mrf.mxu1 }
 0x301   : > { %v2266_v42 = vadd.f32 %v7518_v39, %v2164_v22 }
 0x302   : > { %v2233_v1 = vpop.f32.mrf.mxu0 }
 0x303   : > { %v2368_v55 = vadd.f32 %v7528_v24, %v2266_v42  ;;  %v2264_v0 = vadd.f32 %v2233_v1, %v2162_v28  ;;  %v1963_v24 = vadd.f32 %v9569_v9, %v1861_v31  ;;  %v9572_v9 = vmov 0.0|0.0  }
 0x304   : > { %v7519_v53 = vpop.f32.mrf.mxu0 }
 0x305   : > { %v2382_v52 = vmul.f32 %v8573_v40, %v2368_v55  ;;  %v2366_v7 = vadd.f32 %v2335_v33, %v2264_v0  ;;  %v2267_v23 = vadd.f32 %v7519_v53, %v2165_v19  ;;  %v2065_v32 = vadd.f32 %v2048_v57, %v1963_v24  ;;  %v8019_v24 = vld [vmem:[%s9570_s27] sm:$0x3f]  }
 0x306   : > { %v2236_v41 = vpop.f32.mrf.mxu0  ;;  %7943 = vmatprep.subr.msk.bf16.mxu0 %vm2609_vm6, %v8019_v24 }
 0x307   : > { %v2396_v27 = vadd.f32 %v8579_v36, %v2382_v52  ;;  %v2380_v16 = vmul.f32 %v8573_v40, %v2366_v7  ;;  %v2369_v11 = vadd.f32 %v7529_v51, %v2267_v23  ;;  %v2265_v6 = vadd.f32 %v2236_v41, %v2163_v5 }
 0x308   : > { %v7522_v46 = vpop.f32.mrf.mxu0  ;;  %v2169_v51 = vadd.f32 %v8541_v30, %v2067_v14  ;;  %v2167_v22 = vadd.f32 %v8547_v15, %v2065_v32  ;;  %v2696_v41 = vsel %vm2609_vm6, %v8019_v24, 0 }
 0x309   : > { %vm2404_vm12 = vcmp.gt.f32.partialorder %v2396_v27, 0.0  ;;  %v2413_v33 = vmul.f32 %v8585_v38, %v2396_v27  ;;  %v2383_v18 = vmul.f32 %v8573_v40, %v2369_v11  ;;  %v2394_v10 = vadd.f32 %v8579_v36, %v2380_v16  ;;  %v6824_v16 = vld [vmem:[%s9571_s4] ss:$0 sm:$0xff] }
 0x30a   : > { %v2367_v20 = vadd.f32 %v2338_v13, %v2265_v6  ;;  %v2270_v47 = vadd.f32 %v7522_v46, %v2168_v54  ;;  %v2249_v29 = vpop.f32.mrf.mxu0  ;;  %v2544_v6 = vstv %s2432_s10 }
 0x30b   : > { %v2397_v56 = vadd.f32 %v8579_v36, %v2383_v18  ;;  %v2268_v35 = vadd.f32 %v2249_v29, %v2166_v49  ;;  %v2421_v12 = vsel %vm2404_vm12, %v2396_v27, %v2413_v33  ;;  %v2411_v25 = vmul.f32 %v8585_v38, %v2394_v10  ;;  %v8632_v27 = vld [vmem:[%s9570_s27 + $0x18] sm:$0x3f]  }
 0x30c   : > { %v2381_v58 = vmul.f32 %v8573_v40, %v2367_v20  ;;  %v2372_v57 = vadd.f32 %v7532_v50, %v2270_v47  ;;  %v7523_v26 = vpop.f32.mrf.mxu0  ;;  %vm2402_vm14 = vcmp.gt.f32.partialorder %v2394_v10, 0.0 }
 0x30d   : > { %vm2405_vm13 = vcmp.gt.f32.partialorder %v2397_v56, 0.0  ;;  %v2414_v63 = vmul.f32 %v8585_v38, %v2397_v56  ;;  %v2370_v59 = vadd.f32 %v2351_v8, %v2268_v35  ;;  %v2271_v60 = vadd.f32 %v7523_v26, %v2169_v51 }
 0x30e   : > { %v2395_v44 = vadd.f32 %v8579_v36, %v2381_v58  ;;  %v2386_v39 = vmul.f32 %v8573_v40, %v2372_v57  ;;  %v2252_v30 = vpop.f32.mrf.mxu0  ;;  %v2419_v55 = vsel %vm2402_vm14, %v2394_v10, %v2411_v25 }
 0x30f   : > { %v2422_v42 = vsel %vm2405_vm13, %v2397_v56, %v2414_v63  ;;  %v2384_v62 = vmul.f32 %v8573_v40, %v2370_v59  ;;  %v2373_v28 = vadd.f32 %v7533_v37, %v2271_v60  ;;  %v2269_v31 = vadd.f32 %v2252_v30, %v2167_v22 }
 0x310   : > { %v2437_v13 = vpack.c.bf16 %v2422_v42, %v2421_v12  ;;  %v2412_v15 = vmul.f32 %v8585_v38, %v2395_v44  ;;  %v2400_v2 = vadd.f32 %v8579_v36, %v2386_v39  ;;  %vm2403_vm15 = vcmp.gt.f32.partialorder %v2395_v44, 0.0 }
 0x311   : > { %v2398_v1 = vadd.f32 %v8579_v36, %v2384_v62  ;;  %v2387_v61 = vmul.f32 %v8573_v40, %v2373_v28  ;;  %v2371_v48 = vadd.f32 %v2354_v45, %v2269_v31  ;;  %v8642_v28 = vld [vmem:[#allocation2] sm:$0xff] }
 0x312   : > { %v2420_v0 = vsel %vm2403_vm15, %v2395_v44, %v2412_v15  ;;  %v2417_v17 = vmul.f32 %v8585_v38, %v2400_v2  ;;  %vm2408_vm2 = vcmp.gt.f32.partialorder %v2400_v2, 0.0  ;;  %9573 = vst [vmem:[#allocation25_spill] sm:$0xff] %v8642_v28 }
 0x313   : > { %v2401_v19 = vadd.f32 %v8579_v36, %v2387_v61  ;;  %v2385_v34 = vmul.f32 %v8573_v40, %v2371_v48  ;;  %v2436_v43 = vpack.c.bf16 %v2420_v0, %v2419_v55  ;;  %v2415_v3 = vmul.f32 %v8585_v38, %v2398_v1 }
 0x314   : > { %vm2406_vm4 = vcmp.gt.f32.partialorder %v2398_v1, 0.0  ;;  %v2425_v40 = vsel %vm2408_vm2, %v2400_v2, %v2417_v17  ;;  %v8022_v17 = vld [vmem:[%s9570_s27 + $0x20] sm:$0x3f]  }
 0x315   : > { %v2418_v53 = vmul.f32 %v8585_v38, %v2401_v19  ;;  %v2399_v50 = vadd.f32 %v8579_v36, %v2385_v34  ;;  %7538 = vmatprep.mubr.msk.bf16.mxu0 %vm2458_vm1, %v2436_v43  ;;  %vm2409_vm3 = vcmp.gt.f32.partialorder %v2401_v19, 0.0  ;;  %v2423_v52 = vsel %vm2406_vm4, %v2398_v1, %v2415_v3  ;;  %v8018_v36 = vld [vmem:[%s9570_s27 + $0x8] sm:$0x3f]  }
 0x316   : > { %7539 = vmatmul.mubr.msk.bf16.vlgmr.msra.gmra.mxu0 %vm2458_vm1, %v2437_v13  ;;  %7942 = vmatprep.subr.msk.bf16.mxu1 %vm2609_vm6, %v8018_v36  ;;  %v2611_v14 = vsel %vm2609_vm6, %v8018_v36, 0  ;;  %v2904_v34 = vsel %vm2609_vm6, %v8632_v27, 0  ;;  %v8023_v43 = vld [vmem:[%s9570_s27 + $0x28] sm:$0x3f]  }
 0x317   : > { %v2416_v4 = vmul.f32 %v8585_v38, %v2399_v50  ;;  %vm2407_vm5 = vcmp.gt.f32.partialorder %v2399_v50, 0.0  ;;  %v2426_v5 = vsel %vm2409_vm3, %v2401_v19, %v2418_v53  ;;  %7547 = vmatpush3.bf16.msra.mxu1 %v2611_v14  ;;  %v8625_v38 = vld [vmem:[%s9570_s27 + $0x10] sm:$0x3f]   ;;  %7557 = vmatpush3.bf16.msra.mxu0 %v2696_v41 }
 0x318   : > { %v2439_v21 = vpack.c.bf16 %v2426_v5, %v2425_v40  ;;  %7944 = vmatprep.subr.msk.bf16.mxu1 %vm2609_vm6, %v8625_v38  ;;  %7945 = vmatprep.subr.msk.bf16.mxu0 %vm2609_vm6, %v8632_v27  ;;  %v2796_v0 = vsel %vm2609_vm6, %v8625_v38, 0 }
 0x319   : > { %v2424_v7 = vsel %vm2407_vm5, %v2399_v50, %v2416_v4  ;;  %vm3835_vm5 = vcmask 523264  }
 0x31a   : > { %v2438_v23 = vpack.c.bf16 %v2424_v7, %v2423_v52 }
 0x31c   : > { %7542 = vmatprep.mubr.msk.bf16.mxu0 %vm2458_vm1, %v2438_v23 }
 0x31e   : > { %7543 = vmatmul.mubr.msk.bf16.gmra.mxu0 %vm2458_vm1, %v2439_v21 }
 0x31f   : > { %7558 = vmatprep.mubr.msk.bf16.mxu0 %vm2561_vm7, %v9572_v9 }
 0x3d6   : > { %v7540_v11 = vpop.f32.mrf.mxu0 }
 0x3d7   : > { %v2514_v32 = vadd.f32 %v7540_v11, %v6824_v16 }
 0x3d8   : > { %v2505_v8 = vpop.f32.mrf.mxu0 }
 0x3d9   : > { %vm2538_vm8 = vcmp.gt.f32.partialorder %v2514_v32, 0.0  ;;  %v2547_v54 = vmul.f32 %v2544_v6, %v2514_v32  ;;  %v2506_v46 = vadd.f32 %v6824_v16, %v2505_v8 }
 0x3da   : > { %v7541_v33 = vpop.f32.mrf.mxu0 }
 0x3db   : > { %v2555_v18 = vsel %vm2538_vm8, %v2514_v32, %v2547_v54  ;;  %vm2536_vm9 = vcmp.gt.f32.partialorder %v2506_v46, 0.0  ;;  %v2545_v49 = vmul.f32 %v2544_v6, %v2506_v46  ;;  %v2517_v10 = vadd.f32 %v7541_v33, %v6824_v16 }
 0x3dc   : > { %v2508_v20 = vpop.f32.mrf.mxu0  ;;  %2564 = vst.msk [vmem:[#allocation2 + $0x20] sm:$0xff] %vm2561_vm7, %v2555_v18  ;;  %v3012_v32 = vsel %vm2609_vm6, %v8022_v17, 0  ;;  %v3120_v33 = vsel %vm2609_vm6, %v8023_v43, 0  ;;  %v8024_v18 = vld [vmem:[%s9570_s27 + $0x30] sm:$0x3f]  }
 0x3dd   : > { %v2553_v47 = vsel %vm2536_vm9, %v2506_v46, %v2545_v49  ;;  %vm2539_vm10 = vcmp.gt.f32.partialorder %v2517_v10, 0.0  ;;  %v2548_v29 = vmul.f32 %v2544_v6, %v2517_v10  ;;  %v2509_v56 = vadd.f32 %v6824_v16, %v2508_v20  ;;  %v8025_v49 = vld [vmem:[%s9570_s27 + $0x38] sm:$0x3f]  }
 0x3de   : > { %v7544_v35 = vpop.f32.mrf.mxu0  ;;  %2562 = vst.msk [vmem:[#allocation2 + $0x10] sm:$0xff] %vm2561_vm7, %v2553_v47 }
 0x3df   : > { %v2556_v51 = vsel %vm2539_vm10, %v2517_v10, %v2548_v29  ;;  %vm2537_vm11 = vcmp.gt.f32.partialorder %v2509_v56, 0.0  ;;  %v2546_v12 = vmul.f32 %v2544_v6, %v2509_v56  ;;  %v2530_v58 = vadd.f32 %v7544_v35, %v6824_v16 }
 0x3e0   : > { %v2521_v57 = vpop.f32.mrf.mxu0  ;;  %2565 = vst.msk [vmem:[#allocation2 + $0x28] sm:$0xff] %vm2561_vm7, %v2556_v51 }
 0x3e1   : > { %v2554_v37 = vsel %vm2537_vm11, %v2509_v56, %v2546_v12  ;;  %vm2542_vm12 = vcmp.gt.f32.partialorder %v2530_v58, 0.0  ;;  %v2551_v26 = vmul.f32 %v2544_v6, %v2530_v58  ;;  %v2522_v22 = vadd.f32 %v6824_v16, %v2521_v57 }
 0x3e2   : > { %v7545_v63 = vpop.f32.mrf.mxu0  ;;  %2563 = vst.msk [vmem:[#allocation2 + $0x18] sm:$0xff] %vm2561_vm7, %v2554_v37 }
 0x3e3   : > { %v2559_v59 = vsel %vm2542_vm12, %v2530_v58, %v2551_v26  ;;  %vm2540_vm13 = vcmp.gt.f32.partialorder %v2522_v22, 0.0  ;;  %v2549_v60 = vmul.f32 %v2544_v6, %v2522_v22  ;;  %v2533_v25 = vadd.f32 %v7545_v63, %v6824_v16  ;;  %v2574_v61 = vld [vmem:[#allocation2 + $0x20] sm:$0xff] }
 0x3e4   : > { %v2524_v44 = vpop.f32.mrf.mxu0  ;;  %2568 = vst.msk [vmem:[#allocation2 + $0x40] sm:$0xff] %vm2561_vm7, %v2559_v59  ;;  %v3228_v59 = vsel %vm2609_vm6, %v8024_v18, 0 }
 0x3e5   : > { %v2557_v39 = vsel %vm2540_vm13, %v2522_v22, %v2549_v60  ;;  %vm2543_vm14 = vcmp.gt.f32.partialorder %v2533_v25, 0.0  ;;  %v2552_v30 = vmul.f32 %v2544_v6, %v2533_v25  ;;  %v2525_v42 = vadd.f32 %v6824_v16, %v2524_v44  ;;  %v2572_v62 = vld [vmem:[#allocation2 + $0x10] sm:$0xff] }
 0x3e6   : > { %v2585_v31 = vpack.c.bf16 %v2572_v62, %v8642_v28  ;;  %2566 = vst.msk [vmem:[#allocation2 + $0x30] sm:$0xff] %vm2561_vm7, %v2557_v39  ;;  %v2763_v7 = vld [vmem:[#allocation2 + $0xc] sm:$0xff]  ;;  %v3336_v44 = vsel %vm2609_vm6, %v8025_v49, 0  ;;  %v8026_v39 = vld [vmem:[%s9570_s27 + $0x40] sm:$0x3f]  }
 0x3e7   : > { %v2560_v13 = vsel %vm2543_vm14, %v2533_v25, %v2552_v30  ;;  %vm2541_vm15 = vcmp.gt.f32.partialorder %v2525_v42, 0.0  ;;  %v2550_v15 = vmul.f32 %v2544_v6, %v2525_v42  ;;  %v2575_v2 = vld [vmem:[#allocation2 + $0x28] sm:$0xff] }
 0x3e8   : > { %7548 = vmatprep.mubr.msk.bf16.mxu1 %vm2561_vm7, %v2585_v31  ;;  %2569 = vst.msk [vmem:[#allocation2 + $0x48] sm:$0xff] %vm2561_vm7, %v2560_v13  ;;  %v8656_v19 = vpack.c.bf16 %v2575_v2, %v2574_v61  ;;  %v2871_v23 = vld [vmem:[#allocation2 + $0xe] sm:$0xff]  ;;  %v8693_v41 = vld [vmem:[#allocation2 + $0x24] sm:$0xff] }
 0x3e9   : > { %v2558_v45 = vsel %vm2541_vm15, %v2525_v42, %v2550_v15  ;;  %v2573_v1 = vld [vmem:[#allocation2 + $0x18] sm:$0xff]  ;;  %v2874_v27 = vld [vmem:[#allocation2 + $0x26] sm:$0xff]  ;;  %v2979_v58 = vld [vmem:[#allocation2 + $0xf] sm:$0xff] }
 0x3ea   : > { %v8648_v48 = vpack.c.bf16 %v2573_v1, %v2572_v62  ;;  %v8650_v55 = vpack.c.bf16 %v2574_v61, %v2573_v1  ;;  %2567 = vst.msk [vmem:[#allocation2 + $0x38] sm:$0xff] %vm2561_vm7, %v2558_v45  ;;  %v8673_v50 = vld [vmem:[#allocation2 + $0x14] sm:$0xff]  ;;  %v8689_v9 = vld [vmem:[#allocation2 + $0x1c] sm:$0xff]  ;;  %v2982_v22 = vld [vmem:[#allocation2 + $0x27] sm:$0xff] }
 0x3eb   : > { %v2872_v4 = vld [vmem:[#allocation2 + $0x16] sm:$0xff]  ;;  %v8675_v5 = vld [vmem:[#allocation2 + $0x40] sm:$0xff]  ;;  %v2771_v36 = vpack.c.bf16 %v8673_v50, %v2763_v7  ;;  %v2772_v11 = vpack.c.bf16 %v8693_v41, %v8689_v9  ;;  %v8027_v30 = vld [vmem:[%s9570_s27 + $0x48] sm:$0x3f]  }
 0x3ec   : > { %7549 = vmatmul.mubr.msk.bf16.vlgmr.msra.gmra.mxu1 %vm2561_vm7, %v8650_v55  ;;  %7559 = vmatmul.mubr.msk.bf16.vlgmr.msra.gmra.mxu0 %vm2561_vm7, %v8648_v48  ;;  %v2879_v14 = vpack.c.bf16 %v2872_v4, %v2871_v23  ;;  %v2873_v24 = vld [vmem:[#allocation2 + $0x1e] sm:$0xff]  ;;  %v3195_v31 = vld [vmem:[#allocation2 + $0x11] sm:$0xff] }
 0x3ed   : > { %7567 = vmatpush3.bf16.msra.mxu1 %v2796_v0  ;;  %7562 = vmatprep.mubr.msk.bf16.mxu0 %vm2561_vm7, %v8656_v19  ;;  %v2576_v3 = vld [vmem:[#allocation2 + $0x30] sm:$0xff]  ;;  %v2880_v6 = vpack.c.bf16 %v2874_v27, %v2873_v24  ;;  %v2981_v37 = vld [vmem:[#allocation2 + $0x1f] sm:$0xff]  ;;  %v3552_v27 = vsel %vm2609_vm6, %v8027_v30, 0 }
 0x3ee   : > { %v8667_v53 = vpack.c.bf16 %v2576_v3, %v2575_v2  ;;  %7577 = vmatpush3.bf16.msra.mxu0 %v2904_v34  ;;  %7946 = vmatprep.subr.msk.bf16.mxu1 %vm2609_vm6, %v8022_v17  ;;  %v8698_v8 = vld [vmem:[#allocation2 + $0x2c] sm:$0xff]  ;;  %v2980_v29 = vld [vmem:[#allocation2 + $0x17] sm:$0xff]  ;;  %v2988_v63 = vpack.c.bf16 %v2982_v22, %v2981_v37 }
 0x3ef   : > { %7947 = vmatprep.subr.msk.bf16.mxu0 %vm2609_vm6, %v8023_v43  ;;  %v2875_v46 = vld [vmem:[#allocation2 + $0x2e] sm:$0xff]  ;;  %v8713_v56 = vld [vmem:[#allocation2 + $0x44] sm:$0xff]  ;;  %v2987_v57 = vpack.c.bf16 %v2980_v29, %v2979_v58  ;;  %v3196_v13 = vld [vmem:[#allocation2 + $0x19] sm:$0xff] }
 0x3f0   : > { %7552 = vmatprep.mubr.msk.bf16.mxu1 %vm2561_vm7, %v8667_v53  ;;  %v2878_v35 = vld [vmem:[#allocation2 + $0x46] sm:$0xff]  ;;  %v2983_v60 = vld [vmem:[#allocation2 + $0x2f] sm:$0xff]  ;;  %v3304_v2 = vld [vmem:[#allocation2 + $0x1a] sm:$0xff] }
 0x3f1   : > { %v2577_v40 = vld [vmem:[#allocation2 + $0x38] sm:$0xff]  ;;  %v3094_v62 = vld [vmem:[#allocation2 + $0x48] sm:$0xff] }
 0x3f2   : > { %v8678_v21 = vpack.c.bf16 %v8675_v5, %v2577_v40  ;;  %v8680_v52 = vpack.c.bf16 %v2577_v40, %v2576_v3  ;;  %v8691_v38 = vld [vmem:[#allocation2 + $0x34] sm:$0xff]  ;;  %v8709_v20 = vld [vmem:[#allocation2 + $0x3c] sm:$0xff]  ;;  %v2986_v45 = vld [vmem:[#allocation2 + $0x47] sm:$0xff]  ;;  %v3098_v61 = vpack.c.bf16 %v3094_v62, %v8675_v5 }
 0x3f3   : > { %v2876_v16 = vld [vmem:[#allocation2 + $0x36] sm:$0xff]  ;;  %v2773_v54 = vpack.c.bf16 %v8691_v38, %v8698_v8  ;;  %v2877_v47 = vld [vmem:[#allocation2 + $0x3e] sm:$0xff]  ;;  %v2774_v51 = vpack.c.bf16 %v8713_v56, %v8709_v20  ;;  %v3198_v17 = vld [vmem:[#allocation2 + $0x29] sm:$0xff]  ;;  %v3421_v29 = vpack.c.bf16 %v8709_v20, %v8691_v38 }
 0x3f4   : > { %7553 = vmatmul.mubr.msk.bf16.gmra.mxu1 %vm2561_vm7, %v8678_v21  ;;  %7563 = vmatmul.mubr.msk.bf16.gmra.mxu0 %vm2561_vm7, %v8680_v52  ;;  %v2881_v10 = vpack.c.bf16 %v2876_v16, %v2875_v46  ;;  %v2882_v12 = vpack.c.bf16 %v2878_v35, %v2877_v47  ;;  %v2984_v26 = vld [vmem:[#allocation2 + $0x37] sm:$0xff]  ;;  %v2985_v42 = vld [vmem:[#allocation2 + $0x3f] sm:$0xff]  ;;  %v3306_v34 = vld [vmem:[#allocation2 + $0x2a] sm:$0xff] }
 0x3f5   : > { %7568 = vmatprep.mubr.msk.bf16.mxu1 %vm2561_vm7, %v2771_v36  ;;  %7578 = vmatprep.mubr.msk.bf16.mxu0 %vm2561_vm7, %v2879_v14  ;;  %v2989_v25 = vpack.c.bf16 %v2984_v26, %v2983_v60  ;;  %v3303_v15 = vld [vmem:[#allocation2 + $0x12] sm:$0xff]  ;;  %v2990_v1 = vpack.c.bf16 %v2986_v45, %v2985_v42  ;;  %v3197_v43 = vld [vmem:[#allocation2 + $0x21] sm:$0xff]  ;;  %v3444_v14 = vsel %vm2609_vm6, %v8026_v39, 0  ;;  %v3310_v46 = vld [vmem:[#allocation2 + $0x4a] sm:$0xff] }
 0x3f6   : > { %v3311_v0 = vpack.c.bf16 %v3304_v2, %v3303_v15  ;;  %v3199_v3 = vld [vmem:[#allocation2 + $0x31] sm:$0xff]  ;;  %v3200_v4 = vld [vmem:[#allocation2 + $0x39] sm:$0xff]  ;;  %v3305_v40 = vld [vmem:[#allocation2 + $0x22] sm:$0xff]  ;;  %v3204_v5 = vpack.c.bf16 %v3198_v17, %v3197_v43 }
 0x3f7   : > { %v3307_v7 = vld [vmem:[#allocation2 + $0x32] sm:$0xff]  ;;  %v3308_v23 = vld [vmem:[#allocation2 + $0x3a] sm:$0xff]  ;;  %v3312_v36 = vpack.c.bf16 %v3306_v34, %v3305_v40  ;;  %v3205_v24 = vpack.c.bf16 %v3200_v4, %v3199_v3 }
 0x3f8   : > { %v8028_v16 = vld [vmem:[%s9570_s27 + $0x50] sm:$0x3f]  }
 0x3f9   : > { %v3660_v47 = vsel %vm2609_vm6, %v8028_v16, 0  ;;  %v8030_v38 = vld [vmem:[%s9574_s16 + $0x10] sm:$0xff]  }
 0x3fc   : > { %7569 = vmatmul.mubr.msk.bf16.vlgmr.msra.gmra.mxu1 %vm2561_vm7, %v2772_v11  ;;  %7579 = vmatmul.mubr.msk.bf16.vlgmr.msra.gmra.mxu0 %vm2561_vm7, %v2880_v6  ;;  %v3313_v11 = vpack.c.bf16 %v3308_v23, %v3307_v7  ;;  %v3201_v6 = vld [vmem:[#allocation2 + $0x41] sm:$0xff] }
 0x3fd   : > { %7587 = vmatpush3.bf16.msra.mxu1 %v3012_v32  ;;  %7572 = vmatprep.mubr.msk.bf16.mxu1 %vm2561_vm7, %v2773_v54  ;;  %v3202_v32 = vld [vmem:[#allocation2 + $0x49] sm:$0xff] }
 0x3fe   : > { %7582 = vmatprep.mubr.msk.bf16.mxu0 %vm2561_vm7, %v2881_v10  ;;  %7597 = vmatpush3.bf16.msra.mxu0 %v3120_v33  ;;  %v3309_v54 = vld [vmem:[#allocation2 + $0x42] sm:$0xff]  ;;  %v3206_v33 = vpack.c.bf16 %v3202_v32, %v3201_v6  ;;  %v3420_v10 = vpack.c.bf16 %v8698_v8, %v8693_v41 }
 0x3ff   : > { %7948 = vmatprep.subr.msk.bf16.mxu1 %vm2609_vm6, %v8024_v18  ;;  %7949 = vmatprep.subr.msk.bf16.mxu0 %vm2609_vm6, %v8025_v49  ;;  %v3314_v18 = vpack.c.bf16 %v3310_v46, %v3309_v54  ;;  %v3419_v49 = vpack.c.bf16 %v8689_v9, %v8673_v50  ;;  %v3530_v9 = vpack.c.bf16 %v8642_v28, %v3094_v62  ;;  %v8031_v41 = vld [vmem:[%s9574_s16 + $0x8] sm:$0xff]  }
 0x404   : > { %7573 = vmatmul.mubr.msk.bf16.gmra.mxu1 %vm2561_vm7, %v2774_v51  ;;  %7583 = vmatmul.mubr.msk.bf16.gmra.mxu0 %vm2561_vm7, %v2882_v12 }
 0x405   : > { %7588 = vmatprep.mubr.msk.bf16.mxu1 %vm2561_vm7, %v2987_v57  ;;  %7598 = vmatprep.mubr.msk.bf16.mxu0 %vm2561_vm7, %v8648_v48  ;;  %v3203_v48 = vpack.c.bf16 %v3196_v13, %v3195_v31 }
 0x40c   : > { %7589 = vmatmul.mubr.msk.bf16.vlgmr.msra.gmra.mxu1 %vm2561_vm7, %v2988_v63  ;;  %7599 = vmatmul.mubr.msk.bf16.vlgmr.msra.gmra.mxu0 %vm2561_vm7, %v8656_v19 }
 0x40d   : > { %7607 = vmatpush3.bf16.msra.mxu1 %v3228_v59  ;;  %7592 = vmatprep.mubr.msk.bf16.mxu1 %vm2561_vm7, %v2989_v25 }
 0x40e   : > { %7602 = vmatprep.mubr.msk.bf16.mxu0 %vm2561_vm7, %v8680_v52  ;;  %7617 = vmatpush3.bf16.msra.mxu0 %v3336_v44 }
 0x40f   : > { %7950 = vmatprep.subr.msk.bf16.mxu1 %vm2609_vm6, %v8026_v39  ;;  %7951 = vmatprep.subr.msk.bf16.mxu0 %vm2609_vm6, %v8027_v30 }
 0x414   : > { %7593 = vmatmul.mubr.msk.bf16.gmra.mxu1 %vm2561_vm7, %v2990_v1  ;;  %7603 = vmatmul.mubr.msk.bf16.gmra.mxu0 %vm2561_vm7, %v3098_v61 }
 0x415   : > { %7608 = vmatprep.mubr.msk.bf16.mxu1 %vm2561_vm7, %v3203_v48  ;;  %7618 = vmatprep.mubr.msk.bf16.mxu0 %vm2561_vm7, %v3311_v0 }
 0x41c   : > { %7609 = vmatmul.mubr.msk.bf16.vlgmr.msra.gmra.mxu1 %vm2561_vm7, %v3204_v5  ;;  %7619 = vmatmul.mubr.msk.bf16.vlgmr.msra.gmra.mxu0 %vm2561_vm7, %v3312_v36 }
 0x41d   : > { %7627 = vmatpush3.bf16.msra.mxu1 %v3444_v14  ;;  %7612 = vmatprep.mubr.msk.bf16.mxu1 %vm2561_vm7, %v3205_v24 }
 0x41e   : > { %7622 = vmatprep.mubr.msk.bf16.mxu0 %vm2561_vm7, %v3313_v11  ;;  %7637 = vmatpush3.bf16.msra.mxu0 %v3552_v27 }
 0x41f   : > { %7952 = vmatprep.subr.msk.bf16.mxu1 %vm2609_vm6, %v8028_v16 }
 0x424   : > { %7613 = vmatmul.mubr.msk.bf16.gmra.mxu1 %vm2561_vm7, %v3206_v33  ;;  %7623 = vmatmul.mubr.msk.bf16.gmra.mxu0 %vm2561_vm7, %v3314_v18 }
 0x425   : > { %7628 = vmatprep.mubr.msk.bf16.mxu1 %vm2561_vm7, %v3419_v49  ;;  %7638 = vmatprep.mubr.msk.bf16.mxu0 %vm2561_vm7, %v8650_v55  ;;  %v3418_v55 = vld [vmem:[#allocation2 + $0x4c] sm:$0xff] }
 0x426   : > { %v3422_v50 = vpack.c.bf16 %v3418_v55, %v8713_v56 }
 0x42c   : > { %7629 = vmatmul.mubr.msk.bf16.vlgmr.msra.gmra.mxu1 %vm2561_vm7, %v3420_v10  ;;  %7639 = vmatmul.mubr.msk.bf16.vlgmr.msra.gmra.mxu0 %vm2561_vm7, %v8667_v53  ;;  %v3638_v53 = vpack.c.bf16 %v8642_v28, %v8642_v28 }
 0x42d   : > { %7647 = vmatpush3.bf16.msra.mxu1 %v3660_v47  ;;  %7632 = vmatprep.mubr.msk.bf16.mxu1 %vm2561_vm7, %v3421_v29 }
 0x42e   : > { %7642 = vmatprep.mubr.msk.bf16.mxu0 %vm2561_vm7, %v8678_v21  ;;  %v8029_v21 = vld [vmem:[%s9574_s16 + $0x18] sm:$0xff]  }
 0x42f   : > { %7656 = vmatprep.subr.bf16.mxu0 %v8029_v21 }
 0x430   : > { %7657 = vmatpush3.bf16.msra.mxu0 %v8029_v21 }
 0x431   : > { %7658 = vmatprep.subr.bf16.mxu0 %v8030_v38 }
 0x434   : > { %7633 = vmatmul.mubr.msk.bf16.gmra.mxu1 %vm2561_vm7, %v3422_v50  ;;  %7643 = vmatmul.mubr.msk.bf16.gmra.mxu0 %vm2561_vm7, %v3530_v9 }
 0x435   : > { %7648 = vmatprep.mubr.msk.bf16.mxu1 %vm2561_vm7, %v8656_v19  ;;  %7659 = vmatpush3.bf16.msra.mxu0 %v8030_v38  ;;  %v8032_v19 = vld [vmem:[%s9574_s16] sm:$0xff]  }
 0x436   : > { %7660 = vmatprep.subr.bf16.mxu0 %v8031_v41 }
 0x439   : > { %7661 = vmatpush3.bf16.msra.mxu0 %v8031_v41 }
 0x43a   : > { %7662 = vmatprep.subr.bf16.mxu0 %v8032_v19 }
 0x43c   : > { %7649 = vmatmul.mubr.msk.bf16.vlgmr.msra.gmra.mxu1 %vm2561_vm7, %v8680_v52 }
 0x43d   : > { %7652 = vmatprep.mubr.msk.bf16.mxu1 %vm2561_vm7, %v3098_v61  ;;  %7663 = vmatpush3.bf16.msra.mxu0 %v8032_v19 }
 0x444   : > { %7653 = vmatmul.mubr.msk.bf16.gmra.mxu1 %vm2561_vm7, %v3638_v53 }
 0x445   : > { %7674 = vmatprep.mubr.msk.bf16.mxu1 %vm2561_vm7, %v3638_v53 }
 0x4ac   : > { %v7550_v52 = vpop.f32.mrf.mxu1  ;;  %v7560_v8 = vpop.f32.mrf.mxu0 }
 0x4ad   : > { %v2741_v50 = vadd.f32 %v7560_v8, %v7550_v52 }
 0x4ae   : > { %v2647_v20 = vpop.f32.mrf.mxu1  ;;  %v2732_v56 = vpop.f32.mrf.mxu0 }
 0x4af   : > { %v2733_v21 = vadd.f32 %v2732_v56, %v2647_v20 }
 0x4b0   : > { %v7551_v35 = vpop.f32.mrf.mxu1  ;;  %v7561_v51 = vpop.f32.mrf.mxu0 }
 0x4b1   : > { %v2744_v28 = vadd.f32 %v7561_v51, %v7551_v35 }
 0x4b2   : > { %v8782_v12 = vpop.f32.mrf.mxu1  ;;  %v2735_v58 = vpop.f32.mrf.mxu0 }
 0x4b3   : > { %v2736_v52 = vadd.f32 %v2735_v58, %v8782_v12 }
 0x4b4   : > { %v8784_v57 = vpop.f32.mrf.mxu1  ;;  %v8786_v37 = vpop.f32.mrf.mxu0 }
 0x4b6   : > { %v8788_v26 = vpop.f32.mrf.mxu1  ;;  %v8790_v22 = vpop.f32.mrf.mxu0 }
 0x4b8   : > { %v8792_v63 = vpop.f32.mrf.mxu1  ;;  %v8794_v59 = vpop.f32.mrf.mxu0 }
 0x4b9   : > { %v2760_v12 = vadd.f32 %v8794_v59, %v8792_v63 }
 0x4ba   : > { %v8796_v60 = vpop.f32.mrf.mxu1  ;;  %v8798_v25 = vpop.f32.mrf.mxu0 }
 0x4bc   : > { %v7570_v44 = vpop.f32.mrf.mxu1  ;;  %v7580_v39 = vpop.f32.mrf.mxu0 }
 0x4bd   : > { %v2865_v38 = vadd.f32 %v7570_v44, %v2741_v50  ;;  %v2757_v44 = vadd.f32 %v8786_v37, %v8784_v57  ;;  %v2752_v57 = vadd.f32 %v8798_v25, %v8796_v60 }
 0x4be   : > { %v2832_v30 = vpop.f32.mrf.mxu1  ;;  %v2940_v42 = vpop.f32.mrf.mxu0 }
 0x4c0   : > { %v7571_v62 = vpop.f32.mrf.mxu1  ;;  %v7581_v31 = vpop.f32.mrf.mxu0 }
 0x4c2   : > { %v2835_v13 = vpop.f32.mrf.mxu1  ;;  %v8800_v15 = vpop.f32.mrf.mxu0 }
 0x4c3   : > { %v2864_v50 = vadd.f32 %v2835_v13, %v2736_v52 }
 0x4c4   : > { %v7574_v2 = vpop.f32.mrf.mxu1  ;;  %v8802_v45 = vpop.f32.mrf.mxu0 }
 0x4c5   : > { %v2972_v37 = vadd.f32 %v8800_v15, %v2864_v50 }
 0x4c6   : > { %v2848_v1 = vpop.f32.mrf.mxu1  ;;  %v8804_v61 = vpop.f32.mrf.mxu0 }
 0x4c8   : > { %v8806_v48 = vpop.f32.mrf.mxu1  ;;  %v8808_v0 = vpop.f32.mrf.mxu0 }
 0x4ca   : > { %v8810_v17 = vpop.f32.mrf.mxu1  ;;  %v8812_v34 = vpop.f32.mrf.mxu0 }
 0x4cc   : > { %v7590_v43 = vpop.f32.mrf.mxu1  ;;  %v7600_v3 = vpop.f32.mrf.mxu0 }
 0x4ce   : > { %v3048_v4 = vpop.f32.mrf.mxu1  ;;  %v3156_v40 = vpop.f32.mrf.mxu0 }
 0x4d0   : > { %v7591_v7 = vpop.f32.mrf.mxu1  ;;  %v7601_v23 = vpop.f32.mrf.mxu0 }
 0x4d2   : > { %v3051_v5 = vpop.f32.mrf.mxu1  ;;  %v8814_v36 = vpop.f32.mrf.mxu0 }
 0x4d4   : > { %v7594_v14 = vpop.f32.mrf.mxu1  ;;  %v8816_v24 = vpop.f32.mrf.mxu0 }
 0x4d6   : > { %v8818_v27 = vpop.f32.mrf.mxu1  ;;  %v8820_v16 = vpop.f32.mrf.mxu0 }
 0x4d7   : > { %9575 = vst [vmem:[#allocation30_spill] sm:$0xff] %v8820_v16  ;;  %v2973_v16 = vadd.f32 %v7580_v39, %v2865_v38 }
 0x4d8   : > { %v8822_v11 = vpop.f32.mrf.mxu1  ;;  %v8824_v6 = vpop.f32.mrf.mxu0 }
 0x4d9   : > { %9576 = vst [vmem:[#allocation26_spill] sm:$0xff] %v8824_v6  ;;  %v3081_v56 = vadd.f32 %v7590_v43, %v2973_v16  ;;  %v2870_v16 = vadd.f32 %v8806_v48, %v2760_v12 }
 0x4da   : > { %v8826_v32 = vpop.f32.mrf.mxu1  ;;  %v8828_v54 = vpop.f32.mrf.mxu0 }
 0x4db   : > { %9577 = vst [vmem:[#allocation27_spill] sm:$0xff] %v8828_v54  ;;  %v2863_v54 = vadd.f32 %v2832_v30, %v2733_v21  ;;  %v2749_v30 = vadd.f32 %v8790_v22, %v8788_v26  ;;  %v3189_v38 = vadd.f32 %v7600_v3, %v3081_v56  ;;  %v2978_v25 = vadd.f32 %v8808_v0, %v2870_v16 }
 0x4dc   : > { %v7610_v46 = vpop.f32.mrf.mxu1  ;;  %v7620_v33 = vpop.f32.mrf.mxu0 }
 0x4dd   : > { %v2971_v20 = vadd.f32 %v2940_v42, %v2863_v54  ;;  %v2867_v58 = vadd.f32 %v2848_v1, %v2749_v30  ;;  %v3297_v22 = vadd.f32 %v7610_v46, %v3189_v38 }
 0x4de   : > { %v3264_v18 = vpop.f32.mrf.mxu1  ;;  %v3372_v49 = vpop.f32.mrf.mxu0 }
 0x4df   : > { %v3079_v39 = vadd.f32 %v3048_v4, %v2971_v20  ;;  %v3080_v4 = vadd.f32 %v3051_v5, %v2972_v37  ;;  %v2975_v59 = vadd.f32 %v8804_v61, %v2867_v58  ;;  %v3405_v48 = vadd.f32 %v7620_v33, %v3297_v22 }
 0x4e0   : > { %v7611_v10 = vpop.f32.mrf.mxu1  ;;  %v8830_v47 = vpop.f32.mrf.mxu0  ;;  %v3086_v5 = vadd.f32 %v8822_v11, %v2978_v25  ;;  %v9585_v11 = vld [vmem:[#allocation26_spill] sm:$0xff] }
 0x4e1   : > { %9578 = vst [vmem:[#allocation31_spill] sm:$0xff] %v8830_v47  ;;  %v3187_v26 = vadd.f32 %v3156_v40, %v3079_v39  ;;  %v3083_v15 = vadd.f32 %v8818_v27, %v2975_v59  ;;  %v9582_v27 = vld [vmem:[#allocation30_spill] sm:$0xff] }
 0x4e2   : > { %v8832_v29 = vpop.f32.mrf.mxu1  ;;  %v8834_v55 = vpop.f32.mrf.mxu0 }
 0x4e3   : > { %9579 = vst [vmem:[#allocation28_spill] sm:$0xff] %v8832_v29  ;;  %9580 = vst [vmem:[#allocation32_spill] sm:$0xff] %v8834_v55  ;;  %v2866_v29 = vadd.f32 %v7571_v62, %v2744_v28  ;;  %v2869_v28 = vadd.f32 %v7574_v2, %v2757_v44  ;;  %v2868_v2 = vadd.f32 %v8810_v17, %v2752_v57 }
 0x4e4   : > { %v8836_v9 = vpop.f32.mrf.mxu1  ;;  %v8838_v53 = vpop.f32.mrf.mxu0  ;;  %v3295_v3 = vadd.f32 %v3264_v18, %v3187_v26  ;;  %v3191_v33 = vadd.f32 %v9582_v27, %v3083_v15 }
 0x4e5   : > { %v2974_v21 = vadd.f32 %v7581_v31, %v2866_v29  ;;  %v2977_v31 = vadd.f32 %v8802_v45, %v2869_v28  ;;  %v2976_v46 = vadd.f32 %v8812_v34, %v2868_v2  ;;  %v3188_v45 = vadd.f32 %v8814_v36, %v3080_v4  ;;  %v6907_v4 = vld [vmem:[%s9588_s1] ss:$0 sm:$0xff] }
 0x4e6   : > { %v8840_v41 = vpop.f32.mrf.mxu1  ;;  %v8842_v19 = vpop.f32.mrf.mxu0  ;;  %v3403_v29 = vadd.f32 %v3372_v49, %v3295_v3  ;;  %v3194_v49 = vadd.f32 %v9585_v11, %v3086_v5 }
 0x4e7   : > { %v3082_v42 = vadd.f32 %v7591_v7, %v2974_v21  ;;  %v3085_v54 = vadd.f32 %v7594_v14, %v2977_v31  ;;  %v3084_v14 = vadd.f32 %v8826_v32, %v2976_v46  ;;  %v3299_v50 = vadd.f32 %v8840_v41, %v3191_v33  ;;  %v9586_v32 = vld [vmem:[#allocation27_spill] sm:$0xff] }
 0x4e8   : > { %v8844_v6 = vpop.f32.mrf.mxu1  ;;  %v8846_v47 = vpop.f32.mrf.mxu0  ;;  %v3771_v46 = vstv %s2435_s2 }
 0x4e9   : > { %v3190_v1 = vadd.f32 %v7601_v23, %v3082_v42  ;;  %v3193_v18 = vadd.f32 %v8816_v24, %v3085_v54  ;;  %v3192_v21 = vadd.f32 %v9586_v32, %v3084_v14  ;;  %v3302_v58 = vadd.f32 %v8844_v6, %v3194_v49  ;;  %v6906_v42 = vld [vmem:[%s9583_s26] ss:$0 sm:$0xff] }
 0x4ea   : > { %v8849_v8 = vpop.f32.mrf.mxu1  ;;  %v8851_v55 = vpop.f32.mrf.mxu0  ;;  %v9581_v52 = vld [vmem:[#allocation28_spill] sm:$0xff]  ;;  %v3407_v37 = vadd.f32 %v8842_v19, %v3299_v50 }
 0x4eb   : > { %v3298_v40 = vadd.f32 %v7611_v10, %v3190_v1  ;;  %v3296_v0 = vadd.f32 %v9581_v52, %v3188_v45  ;;  %v9584_v10 = vld [vmem:[#allocation31_spill] sm:$0xff]  ;;  %v3301_v36 = vadd.f32 %v8836_v9, %v3193_v18  ;;  %v9587_v39 = vld [vmem:[#allocation32_spill] sm:$0xff]  ;;  %v3300_v57 = vadd.f32 %v8849_v8, %v3192_v21 }
 0x4ec   : > { %v7630_v35 = vpop.f32.mrf.mxu1  ;;  %v7640_v51 = vpop.f32.mrf.mxu0  ;;  %v3410_v6 = vadd.f32 %v8846_v47, %v3302_v58 }
 0x4ed   : > { %v3513_v61 = vadd.f32 %v7630_v35, %v3405_v48  ;;  %v3406_v34 = vadd.f32 %v9584_v10, %v3298_v40  ;;  %v3404_v28 = vadd.f32 %v9587_v39, %v3296_v0 }
 0x4ee   : > { %v3480_v62 = vpop.f32.mrf.mxu1  ;;  %v3588_v43 = vpop.f32.mrf.mxu0 }
 0x4ef   : > { %v3511_v56 = vadd.f32 %v3480_v62, %v3403_v29  ;;  %v3621_v35 = vadd.f32 %v7640_v51, %v3513_v61  ;;  %v3409_v62 = vadd.f32 %v8838_v53, %v3301_v36  ;;  %v3408_v53 = vadd.f32 %v8851_v55, %v3300_v57 }
 0x4f0   : > { %v7631_v13 = vpop.f32.mrf.mxu1  ;;  %v7641_v7 = vpop.f32.mrf.mxu0 }
 0x4f1   : > { %v3514_v24 = vadd.f32 %v7631_v13, %v3406_v34  ;;  %v3619_v38 = vadd.f32 %v3588_v43, %v3511_v56 }
 0x4f2   : > { %v3483_v63 = vpop.f32.mrf.mxu1  ;;  %v3591_v23 = vpop.f32.mrf.mxu0 }
 0x4f3   : > { %v3512_v41 = vadd.f32 %v3483_v63, %v3404_v28  ;;  %v3622_v13 = vadd.f32 %v7641_v7, %v3514_v24 }
 0x4f4   : > { %v7634_v60 = vpop.f32.mrf.mxu1  ;;  %v7644_v30 = vpop.f32.mrf.mxu0 }
 0x4f5   : > { %v3517_v22 = vadd.f32 %v7634_v60, %v3409_v62  ;;  %v3620_v3 = vadd.f32 %v3591_v23, %v3512_v41 }
 0x4f6   : > { %v3496_v17 = vpop.f32.mrf.mxu1  ;;  %v3604_v16 = vpop.f32.mrf.mxu0 }
 0x4f7   : > { %v3515_v43 = vadd.f32 %v3496_v17, %v3407_v37  ;;  %v3625_v19 = vadd.f32 %v7644_v30, %v3517_v22 }
 0x4f8   : > { %v7635_v20 = vpop.f32.mrf.mxu1  ;;  %v7645_v54 = vpop.f32.mrf.mxu0 }
 0x4f9   : > { %v3518_v63 = vadd.f32 %v7635_v20, %v3410_v6  ;;  %v3623_v40 = vadd.f32 %v3604_v16, %v3515_v43  ;;  %v8929_v43 = vld [vmem:[%s9589_s11 + $0x18] sm:$0x3f]  }
 0x4fa   : > { %v3499_v44 = vpop.f32.mrf.mxu1  ;;  %v3607_v18 = vpop.f32.mrf.mxu0 }
 0x4fb   : > { %v3516_v7 = vadd.f32 %v3499_v44, %v3408_v53  ;;  %v3626_v61 = vadd.f32 %v7645_v54, %v3518_v63 }
 0x4fc   : > { %v7650_v12 = vpop.f32.mrf.mxu1 }
 0x4fd   : > { %v3729_v9 = vadd.f32 %v7650_v12, %v3621_v35  ;;  %v3624_v23 = vadd.f32 %v3607_v18, %v3516_v7 }
 0x4fe   : > { %v3696_v51 = vpop.f32.mrf.mxu1 }
 0x4ff   : > { %v3727_v26 = vadd.f32 %v3696_v51, %v3619_v38  ;;  %v3743_v31 = vmul.f32 %v6906_v42, %v3729_v9 }
 0x500   : > { %v7651_v2 = vpop.f32.mrf.mxu1 }
 0x501   : > { %v3741_v59 = vmul.f32 %v6906_v42, %v3727_v26  ;;  %v3730_v1 = vadd.f32 %v7651_v2, %v3622_v13  ;;  %v3757_v15 = vadd.f32 %v6907_v4, %v3743_v31  ;;  %v8033_v26 = vld [vmem:[%s9589_s11] sm:$0x3f]   ;;  %v8034_v31 = vld [vmem:[%s9589_s11 + $0x8] sm:$0x3f]   ;;  %v8922_v2 = vld [vmem:[%s9589_s11 + $0x10] sm:$0x3f]  }
 0x502   : > { %v3699_v8 = vpop.f32.mrf.mxu1  ;;  %7953 = vmatprep.subr.msk.bf16.mxu1 %vm2609_vm6, %v8033_v26  ;;  %v3978_v22 = vsel %vm2609_vm6, %v8033_v26, 0  ;;  %7954 = vmatprep.subr.msk.bf16.mxu0 %vm2609_vm6, %v8034_v31  ;;  %v4086_v6 = vsel %vm2609_vm6, %v8034_v31, 0 }
 0x503   : > { %v3744_v25 = vmul.f32 %v6906_v42, %v3730_v1  ;;  %v3728_v48 = vadd.f32 %v3699_v8, %v3620_v3  ;;  %v3755_v45 = vadd.f32 %v6907_v4, %v3741_v59  ;;  %v3774_v14 = vmul.f32 %v3771_v46, %v3757_v15  ;;  %7673 = vmatpush3.bf16.msra.mxu1 %v3978_v22 }
 0x504   : > { %v7654_v60 = vpop.f32.mrf.mxu1  ;;  %vm3765_vm4 = vcmp.gt.f32.partialorder %v3757_v15, 0.0  ;;  %7955 = vmatprep.subr.msk.bf16.mxu1 %vm2609_vm6, %v8922_v2  ;;  %v3921_v1 = vstv %s3797_s15 }
 0x505   : > { %v3758_v47 = vadd.f32 %v6907_v4, %v3744_v25  ;;  %v3742_v17 = vmul.f32 %v6906_v42, %v3728_v48  ;;  %v3733_v5 = vadd.f32 %v7654_v60, %v3625_v19  ;;  %v3772_v27 = vmul.f32 %v3771_v46, %v3755_v45 }
 0x506   : > { %v3712_v29 = vpop.f32.mrf.mxu1  ;;  %vm3763_vm2 = vcmp.gt.f32.partialorder %v3755_v45, 0.0  ;;  %v8895_v21 = vsel %vm3765_vm4, %v3757_v15, %v3774_v14 }
 0x507   : > { %v3731_v55 = vadd.f32 %v3712_v29, %v3623_v40  ;;  %v3775_v52 = vmul.f32 %v3771_v46, %v3758_v47  ;;  %v3756_v0 = vadd.f32 %v6907_v4, %v3742_v17  ;;  %vm3766_vm1 = vcmp.gt.f32.partialorder %v3758_v47, 0.0 }
 0x508   : > { %v7655_v20 = vpop.f32.mrf.mxu1  ;;  %v3747_v56 = vmul.f32 %v6906_v42, %v3733_v5  ;;  %v8893_v32 = vsel %vm3763_vm2, %v3755_v45, %v3772_v27 }
 0x509   : > { %v3745_v33 = vmul.f32 %v6906_v42, %v3731_v55  ;;  %v3734_v10 = vadd.f32 %v7655_v20, %v3626_v61  ;;  %vm3764_vm3 = vcmp.gt.f32.partialorder %v3756_v0, 0.0  ;;  %v3773_v34 = vmul.f32 %v3771_v46, %v3756_v0 }
 0x50a   : > { %v3715_v36 = vpop.f32.mrf.mxu1  ;;  %v8889_v50 = vsel %vm3766_vm1, %v3758_v47, %v3775_v52  ;;  %v3761_v39 = vadd.f32 %v6907_v4, %v3747_v56 }
 0x50b   : > { %v3759_v44 = vadd.f32 %v6907_v4, %v3745_v33  ;;  %v3748_v11 = vmul.f32 %v6906_v42, %v3734_v10  ;;  %v3732_v49 = vadd.f32 %v3715_v36, %v3624_v23  ;;  %v8891_v35 = vsel %vm3764_vm3, %v3756_v0, %v3773_v34  ;;  %v9591_v34 = vld [vmem:[#allocation25_spill] sm:$0xff] }
 0x50c   : > { %v3801_v28 = vpack.c.bf16 %v8891_v35, %v8893_v32  ;;  %v3802_v12 = vpack.c.bf16 %v8889_v50, %v8895_v21  ;;  %v3778_v62 = vmul.f32 %v3771_v46, %v3761_v39  ;;  %vm3769_vm11 = vcmp.gt.f32.partialorder %v3761_v39, 0.0 }
 0x50d   : > { %v3762_v24 = vadd.f32 %v6907_v4, %v3748_v11  ;;  %v3746_v30 = vmul.f32 %v6906_v42, %v3732_v49  ;;  %v3776_v58 = vmul.f32 %v3771_v46, %v3759_v44  ;;  %vm3767_vm8 = vcmp.gt.f32.partialorder %v3759_v44, 0.0 }
 0x50e   : > { %7664 = vmatprep.mubr.msk.bf16.mxu0 %vm3835_vm5, %v3801_v28  ;;  %v8912_v13 = vsel %vm3769_vm11, %v3761_v39, %v3778_v62 }
 0x50f   : > { %v3760_v38 = vadd.f32 %v6907_v4, %v3746_v30  ;;  %v3779_v9 = vmul.f32 %v3771_v46, %v3762_v24  ;;  %vm3770_vm9 = vcmp.gt.f32.partialorder %v3762_v24, 0.0  ;;  %7665 = vmatmul.mubr.msk.bf16.vlgmr.msra.gmra.mxu0 %vm3835_vm5, %v3802_v12  ;;  %v8903_v57 = vsel %vm3767_vm8, %v3759_v44, %v3776_v58  ;;  %v6908_v4 = vld [vmem:[%s9590_s7] ss:$0 sm:$0xff] }
 0x510   : > { %7683 = vmatpush3.bf16.msra.mxu0 %v4086_v6  ;;  %v4194_v12 = vsel %vm2609_vm6, %v8922_v2, 0  ;;  %v8037_v58 = vld [vmem:[%s9589_s11 + $0x20] sm:$0x3f]  }
 0x511   : > { %vm3768_vm10 = vcmp.gt.f32.partialorder %v3760_v38, 0.0  ;;  %v3777_v42 = vmul.f32 %v3771_v46, %v3760_v38  ;;  %v8909_v37 = vsel %vm3770_vm9, %v3762_v24, %v3779_v9  ;;  %7956 = vmatprep.subr.msk.bf16.mxu0 %vm2609_vm6, %v8929_v43  ;;  %v4302_v9 = vsel %vm2609_vm6, %v8929_v43, 0 }
 0x512   : > { %v3804_v16 = vpack.c.bf16 %v8909_v37, %v8912_v13 }
 0x513   : > { %v8905_v41 = vsel %vm3768_vm10, %v3760_v38, %v3777_v42  ;;  %v8038_v42 = vld [vmem:[%s9589_s11 + $0x28] sm:$0x3f]  }
 0x514   : > { %v3803_v51 = vpack.c.bf16 %v8905_v41, %v8903_v57 }
 0x516   : > { %7668 = vmatprep.mubr.msk.bf16.mxu0 %vm3835_vm5, %v3803_v51 }
 0x517   : > { %7669 = vmatmul.mubr.msk.bf16.gmra.mxu0 %vm3835_vm5, %v3804_v16 }
 0x5cf   : > { %v7666_v59 = vpop.f32.mrf.mxu0 }
 0x5d0   : > { %v3891_v53 = vadd.f32 %v7666_v59, %v6908_v4 }
 0x5d1   : > { %v3882_v3 = vpop.f32.mrf.mxu0 }
 0x5d2   : > { %vm3915_vm12 = vcmp.gt.f32.partialorder %v3891_v53, 0.0  ;;  %v3924_v8 = vmul.f32 %v3921_v1, %v3891_v53  ;;  %v3883_v63 = vadd.f32 %v6908_v4, %v3882_v3 }
 0x5d3   : > { %v7667_v54 = vpop.f32.mrf.mxu0 }
 0x5d4   : > { %v3932_v25 = vsel %vm3915_vm12, %v3891_v53, %v3924_v8  ;;  %vm3913_vm13 = vcmp.gt.f32.partialorder %v3883_v63, 0.0  ;;  %v3922_v19 = vmul.f32 %v3921_v1, %v3883_v63  ;;  %v3894_v7 = vadd.f32 %v7667_v54, %v6908_v4 }
 0x5d5   : > { %3940 = vst.msk [vmem:[#allocation2 + $0x20] sm:$0xff] %vm2561_vm7, %v3932_v25  ;;  %v3885_v15 = vpop.f32.mrf.mxu0 }
 0x5d6   : > { %v3930_v48 = vsel %vm3913_vm13, %v3883_v63, %v3922_v19  ;;  %vm3916_vm14 = vcmp.gt.f32.partialorder %v3894_v7, 0.0  ;;  %v3925_v60 = vmul.f32 %v3921_v1, %v3894_v7  ;;  %v3886_v40 = vadd.f32 %v6908_v4, %v3885_v15 }
 0x5d7   : > { %3938 = vst.msk [vmem:[#allocation2 + $0x10] sm:$0xff] %vm2561_vm7, %v3930_v48  ;;  %v7670_v46 = vpop.f32.mrf.mxu0  ;;  %v4410_v15 = vsel %vm2609_vm6, %v8037_v58, 0 }
 0x5d8   : > { %v3933_v45 = vsel %vm3916_vm14, %v3894_v7, %v3925_v60  ;;  %vm3914_vm15 = vcmp.gt.f32.partialorder %v3886_v40, 0.0  ;;  %v3923_v47 = vmul.f32 %v3921_v1, %v3886_v40  ;;  %v3907_v17 = vadd.f32 %v7670_v46, %v6908_v4 }
 0x5d9   : > { %3941 = vst.msk [vmem:[#allocation2 + $0x28] sm:$0xff] %vm2561_vm7, %v3933_v45  ;;  %v3898_v5 = vpop.f32.mrf.mxu0  ;;  %v4518_v46 = vsel %vm2609_vm6, %v8038_v42, 0  ;;  %v8039_v45 = vld [vmem:[%s9589_s11 + $0x30] sm:$0x3f]   ;;  %vm5393_vm14 = vcmask 1044480  }
 0x5da   : > { %v3931_v29 = vsel %vm3914_vm15, %v3886_v40, %v3923_v47  ;;  %vm3919_vm1 = vcmp.gt.f32.partialorder %v3907_v17, 0.0  ;;  %v3928_v61 = vmul.f32 %v3921_v1, %v3907_v17  ;;  %v3899_v18 = vadd.f32 %v6908_v4, %v3898_v5  ;;  %v8040_v47 = vld [vmem:[%s9589_s11 + $0x38] sm:$0x3f]  }
 0x5db   : > { %3939 = vst.msk [vmem:[#allocation2 + $0x18] sm:$0xff] %vm2561_vm7, %v3931_v29  ;;  %v7671_v55 = vpop.f32.mrf.mxu0  ;;  %vm5335_vm15 = vcmask 203776  }
 0x5dc   : > { %v3936_v23 = vsel %vm3919_vm1, %v3907_v17, %v3928_v61  ;;  %vm3917_vm2 = vcmp.gt.f32.partialorder %v3899_v18, 0.0  ;;  %v3926_v14 = vmul.f32 %v3921_v1, %v3899_v18  ;;  %v3910_v52 = vadd.f32 %v7671_v55, %v6908_v4  ;;  %v4056_v30 = vld [vmem:[#allocation2 + $0x20] sm:$0xff] }
 0x5dd   : > { %3944 = vst.msk [vmem:[#allocation2 + $0x40] sm:$0xff] %vm2561_vm7, %v3936_v23  ;;  %v3901_v0 = vpop.f32.mrf.mxu0 }
 0x5de   : > { %v3934_v20 = vsel %vm3917_vm2, %v3899_v18, %v3926_v14  ;;  %vm3920_vm3 = vcmp.gt.f32.partialorder %v3910_v52, 0.0  ;;  %v3929_v27 = vmul.f32 %v3921_v1, %v3910_v52  ;;  %v3902_v33 = vadd.f32 %v6908_v4, %v3901_v0  ;;  %v4054_v10 = vld [vmem:[#allocation2 + $0x10] sm:$0xff] }
 0x5df   : > { %3942 = vst.msk [vmem:[#allocation2 + $0x30] sm:$0xff] %vm2561_vm7, %v3934_v20  ;;  %v4061_v56 = vpack.c.bf16 %v4054_v10, %v9591_v34  ;;  %v4161_v43 = vld [vmem:[#allocation2 + $0xc] sm:$0xff]  ;;  %v4626_v34 = vsel %vm2609_vm6, %v8039_v45, 0 }
 0x5e0   : > { %v3937_v36 = vsel %vm3920_vm3, %v3910_v52, %v3929_v27  ;;  %vm3918_vm4 = vcmp.gt.f32.partialorder %v3902_v33, 0.0  ;;  %v3927_v44 = vmul.f32 %v3921_v1, %v3902_v33  ;;  %v3951_v11 = vld [vmem:[#allocation2 + $0x28] sm:$0xff] }
 0x5e1   : > { %3945 = vst.msk [vmem:[#allocation2 + $0x48] sm:$0xff] %vm2561_vm7, %v3937_v36  ;;  %7684 = vmatprep.mubr.msk.bf16.mxu0 %vm2561_vm7, %v4061_v56  ;;  %v8951_v38 = vpack.c.bf16 %v3951_v11, %v4056_v30  ;;  %v4269_v4 = vld [vmem:[#allocation2 + $0xe] sm:$0xff]  ;;  %v8988_v63 = vld [vmem:[#allocation2 + $0x24] sm:$0xff] }
 0x5e2   : > { %v3935_v49 = vsel %vm3918_vm4, %v3902_v33, %v3927_v44  ;;  %v3949_v24 = vld [vmem:[#allocation2 + $0x18] sm:$0xff]  ;;  %v4272_v54 = vld [vmem:[#allocation2 + $0x26] sm:$0xff]  ;;  %v4377_v52 = vld [vmem:[#allocation2 + $0xf] sm:$0xff]  ;;  %v4734_v44 = vsel %vm2609_vm6, %v8040_v47, 0 }
 0x5e3   : > { %3943 = vst.msk [vmem:[#allocation2 + $0x38] sm:$0xff] %vm2561_vm7, %v3935_v49  ;;  %v8944_v39 = vpack.c.bf16 %v3949_v24, %v4054_v10  ;;  %v8946_v28 = vpack.c.bf16 %v4056_v30, %v3949_v24  ;;  %v8968_v16 = vld [vmem:[#allocation2 + $0x14] sm:$0xff]  ;;  %v8984_v53 = vld [vmem:[#allocation2 + $0x1c] sm:$0xff]  ;;  %v4380_v33 = vld [vmem:[#allocation2 + $0x27] sm:$0xff] }
 0x5e4   : > { %v4270_v26 = vld [vmem:[#allocation2 + $0x16] sm:$0xff]  ;;  %v8970_v31 = vld [vmem:[#allocation2 + $0x40] sm:$0xff]  ;;  %v4169_v59 = vpack.c.bf16 %v8968_v16, %v4161_v43  ;;  %v4170_v19 = vpack.c.bf16 %v8988_v63, %v8984_v53  ;;  %v8042_v49 = vld [vmem:[%s9589_s11 + $0x48] sm:$0x3f]  }
 0x5e5   : > { %7675 = vmatmul.mubr.msk.bf16.vlgmr.msra.gmra.mxu1 %vm2561_vm7, %v8944_v39  ;;  %7685 = vmatmul.mubr.msk.bf16.vlgmr.msra.gmra.mxu0 %vm2561_vm7, %v8946_v28  ;;  %v4277_v1 = vpack.c.bf16 %v4270_v26, %v4269_v4  ;;  %v4271_v3 = vld [vmem:[#allocation2 + $0x1e] sm:$0xff] }
 0x5e6   : > { %7693 = vmatpush3.bf16.msra.mxu1 %v4194_v12  ;;  %7678 = vmatprep.mubr.msk.bf16.mxu1 %vm2561_vm7, %v8951_v38  ;;  %v4058_v62 = vld [vmem:[#allocation2 + $0x30] sm:$0xff]  ;;  %v4278_v7 = vpack.c.bf16 %v4272_v54, %v4271_v3  ;;  %v4379_v20 = vld [vmem:[#allocation2 + $0x1f] sm:$0xff] }
 0x5e7   : > { %v8962_v51 = vpack.c.bf16 %v4058_v62, %v3951_v11  ;;  %7703 = vmatpush3.bf16.msra.mxu0 %v4302_v9  ;;  %7957 = vmatprep.subr.msk.bf16.mxu1 %vm2609_vm6, %v8037_v58  ;;  %v8993_v48 = vld [vmem:[#allocation2 + $0x2c] sm:$0xff]  ;;  %v4378_v61 = vld [vmem:[#allocation2 + $0x17] sm:$0xff]  ;;  %v4386_v10 = vpack.c.bf16 %v4380_v33, %v4379_v20  ;;  %v8041_v11 = vld [vmem:[%s9589_s11 + $0x40] sm:$0x3f]  }
 0x5e8   : > { %7958 = vmatprep.subr.msk.bf16.mxu0 %vm2609_vm6, %v8038_v42  ;;  %v4273_v40 = vld [vmem:[#allocation2 + $0x2e] sm:$0xff]  ;;  %v9008_v18 = vld [vmem:[#allocation2 + $0x44] sm:$0xff]  ;;  %v4385_v0 = vpack.c.bf16 %v4378_v61, %v4377_v52  ;;  %v4594_v12 = vld [vmem:[#allocation2 + $0x19] sm:$0xff]  ;;  %v4817_v52 = vpack.c.bf16 %v8984_v53, %v8968_v16 }
 0x5e9   : > { %7688 = vmatprep.mubr.msk.bf16.mxu0 %vm2561_vm7, %v8962_v51  ;;  %v4276_v55 = vld [vmem:[#allocation2 + $0x46] sm:$0xff]  ;;  %v4381_v56 = vld [vmem:[#allocation2 + $0x2f] sm:$0xff]  ;;  %v4702_v9 = vld [vmem:[#allocation2 + $0x1a] sm:$0xff] }
 0x5ea   : > { %v3953_v22 = vld [vmem:[#allocation2 + $0x38] sm:$0xff]  ;;  %v9027_v30 = vld [vmem:[#allocation2 + $0x48] sm:$0xff]  ;;  %v9064_v53 = vld [vmem:[#allocation2] sm:$0xff] }
 0x5eb   : > { %v8972_v2 = vpack.c.bf16 %v3953_v22, %v4058_v62  ;;  %v8975_v6 = vpack.c.bf16 %v8970_v31, %v3953_v22  ;;  %v8986_v8 = vld [vmem:[#allocation2 + $0x34] sm:$0xff]  ;;  %v9004_v5 = vld [vmem:[#allocation2 + $0x3c] sm:$0xff]  ;;  %v4384_v42 = vld [vmem:[#allocation2 + $0x47] sm:$0xff]  ;;  %v4496_v26 = vpack.c.bf16 %v9027_v30, %v8970_v31  ;;  %9593 = vst [vmem:[#allocation29_spill] sm:$0xff] %v9064_v53 }
 0x5ec   : > { %v4274_v25 = vld [vmem:[#allocation2 + $0x36] sm:$0xff]  ;;  %v4171_v60 = vpack.c.bf16 %v8986_v8, %v8993_v48  ;;  %v4275_v29 = vld [vmem:[#allocation2 + $0x3e] sm:$0xff]  ;;  %v4172_v23 = vpack.c.bf16 %v9008_v18, %v9004_v5  ;;  %v4596_v4 = vld [vmem:[#allocation2 + $0x29] sm:$0xff] }
 0x5ed   : > { %7679 = vmatmul.mubr.msk.bf16.gmra.mxu1 %vm2561_vm7, %v8972_v2  ;;  %7689 = vmatmul.mubr.msk.bf16.gmra.mxu0 %vm2561_vm7, %v8975_v6  ;;  %v4279_v17 = vpack.c.bf16 %v4274_v25, %v4273_v40  ;;  %v4280_v14 = vpack.c.bf16 %v4276_v55, %v4275_v29  ;;  %v4382_v27 = vld [vmem:[#allocation2 + $0x37] sm:$0xff]  ;;  %v4383_v24 = vld [vmem:[#allocation2 + $0x3f] sm:$0xff]  ;;  %v4600_v29 = vld [vmem:[#allocation2 + $0x49] sm:$0xff] }
 0x5ee   : > { %7694 = vmatprep.mubr.msk.bf16.mxu1 %vm2561_vm7, %v4169_v59  ;;  %7704 = vmatprep.mubr.msk.bf16.mxu0 %vm2561_vm7, %v4277_v1  ;;  %v4387_v36 = vpack.c.bf16 %v4382_v27, %v4381_v56  ;;  %v4701_v58 = vld [vmem:[#allocation2 + $0x12] sm:$0xff]  ;;  %v4388_v62 = vpack.c.bf16 %v4384_v42, %v4383_v24  ;;  %v4704_v59 = vld [vmem:[#allocation2 + $0x2a] sm:$0xff]  ;;  %v4595_v1 = vld [vmem:[#allocation2 + $0x21] sm:$0xff]  ;;  %v4819_v27 = vpack.c.bf16 %v9004_v5, %v8986_v8 }
 0x5ef   : > { %v4709_v43 = vpack.c.bf16 %v4702_v9, %v4701_v58  ;;  %v4597_v3 = vld [vmem:[#allocation2 + $0x31] sm:$0xff]  ;;  %v4598_v54 = vld [vmem:[#allocation2 + $0x39] sm:$0xff]  ;;  %v4703_v25 = vld [vmem:[#allocation2 + $0x22] sm:$0xff]  ;;  %v4602_v31 = vpack.c.bf16 %v4596_v4, %v4595_v1  ;;  %v4928_v8 = vpack.c.bf16 %v9064_v53, %v9027_v30 }
 0x5f0   : > { %v4603_v40 = vpack.c.bf16 %v4598_v54, %v4597_v3  ;;  %v4707_v61 = vld [vmem:[#allocation2 + $0x42] sm:$0xff]  ;;  %v4708_v55 = vld [vmem:[#allocation2 + $0x4a] sm:$0xff] }
 0x5f5   : > { %7695 = vmatmul.mubr.msk.bf16.vlgmr.msra.gmra.mxu1 %vm2561_vm7, %v4170_v19  ;;  %7705 = vmatmul.mubr.msk.bf16.vlgmr.msra.gmra.mxu0 %vm2561_vm7, %v4278_v7  ;;  %v4705_v19 = vld [vmem:[#allocation2 + $0x32] sm:$0xff]  ;;  %v4706_v7 = vld [vmem:[#allocation2 + $0x3a] sm:$0xff] }
 0x5f6   : > { %7713 = vmatpush3.bf16.msra.mxu1 %v4410_v15  ;;  %7698 = vmatprep.mubr.msk.bf16.mxu1 %vm2561_vm7, %v4171_v60  ;;  %v4710_v15 = vpack.c.bf16 %v4704_v59, %v4703_v25  ;;  %v4842_v60 = vsel %vm2609_vm6, %v8041_v11, 0 }
 0x5f7   : > { %7708 = vmatprep.mubr.msk.bf16.mxu0 %vm2561_vm7, %v4279_v17  ;;  %7723 = vmatpush3.bf16.msra.mxu0 %v4518_v46  ;;  %v4950_v46 = vsel %vm2609_vm6, %v8042_v49, 0  ;;  %v4599_v17 = vld [vmem:[#allocation2 + $0x41] sm:$0xff] }
 0x5f8   : > { %7959 = vmatprep.subr.msk.bf16.mxu1 %vm2609_vm6, %v8039_v45  ;;  %7960 = vmatprep.subr.msk.bf16.mxu0 %vm2609_vm6, %v8040_v47  ;;  %v8043_v45 = vld [vmem:[%s9589_s11 + $0x50] sm:$0x3f]   ;;  %v4711_v47 = vpack.c.bf16 %v4706_v7, %v4705_v19 }
 0x5f9   : > { %v5058_v20 = vsel %vm2609_vm6, %v8043_v45, 0 }
 0x5fd   : > { %7699 = vmatmul.mubr.msk.bf16.gmra.mxu1 %vm2561_vm7, %v4172_v23  ;;  %7709 = vmatmul.mubr.msk.bf16.gmra.mxu0 %vm2561_vm7, %v4280_v14  ;;  %v4604_v23 = vpack.c.bf16 %v4600_v29, %v4599_v17  ;;  %v4712_v14 = vpack.c.bf16 %v4708_v55, %v4707_v61 }
 0x5fe   : > { %7714 = vmatprep.mubr.msk.bf16.mxu1 %vm2561_vm7, %v4385_v0  ;;  %7724 = vmatprep.mubr.msk.bf16.mxu0 %vm2561_vm7, %v8944_v39  ;;  %v4593_v39 = vld [vmem:[#allocation2 + $0x11] sm:$0xff]  ;;  %v4818_v0 = vpack.c.bf16 %v8993_v48, %v8988_v63  ;;  %v8046_v48 = vld [vmem:[%s9592_s12 + $0x8] sm:$0xff]  }
 0x5ff   : > { %v4601_v22 = vpack.c.bf16 %v4594_v12, %v4593_v39  ;;  %v8045_v63 = vld [vmem:[%s9592_s12 + $0x10] sm:$0xff]  }
 0x605   : > { %7715 = vmatmul.mubr.msk.bf16.vlgmr.msra.gmra.mxu1 %vm2561_vm7, %v4386_v10  ;;  %7725 = vmatmul.mubr.msk.bf16.vlgmr.msra.gmra.mxu0 %vm2561_vm7, %v8951_v38 }
 0x606   : > { %7733 = vmatpush3.bf16.msra.mxu1 %v4626_v34  ;;  %7718 = vmatprep.mubr.msk.bf16.mxu1 %vm2561_vm7, %v4387_v36 }
 0x607   : > { %7728 = vmatprep.mubr.msk.bf16.mxu0 %vm2561_vm7, %v8972_v2  ;;  %7743 = vmatpush3.bf16.msra.mxu0 %v4734_v44 }
 0x608   : > { %7961 = vmatprep.subr.msk.bf16.mxu1 %vm2609_vm6, %v8041_v11  ;;  %7962 = vmatprep.subr.msk.bf16.mxu0 %vm2609_vm6, %v8042_v49 }
 0x60d   : > { %7719 = vmatmul.mubr.msk.bf16.gmra.mxu1 %vm2561_vm7, %v4388_v62  ;;  %7729 = vmatmul.mubr.msk.bf16.gmra.mxu0 %vm2561_vm7, %v4496_v26 }
 0x60e   : > { %7734 = vmatprep.mubr.msk.bf16.mxu1 %vm2561_vm7, %v4601_v22  ;;  %7744 = vmatprep.mubr.msk.bf16.mxu0 %vm2561_vm7, %v4709_v43 }
 0x615   : > { %7735 = vmatmul.mubr.msk.bf16.vlgmr.msra.gmra.mxu1 %vm2561_vm7, %v4602_v31  ;;  %7745 = vmatmul.mubr.msk.bf16.vlgmr.msra.gmra.mxu0 %vm2561_vm7, %v4710_v15 }
 0x616   : > { %7753 = vmatpush3.bf16.msra.mxu1 %v4842_v60  ;;  %7738 = vmatprep.mubr.msk.bf16.mxu1 %vm2561_vm7, %v4603_v40 }
 0x617   : > { %7748 = vmatprep.mubr.msk.bf16.mxu0 %vm2561_vm7, %v4711_v47  ;;  %7763 = vmatpush3.bf16.msra.mxu0 %v4950_v46 }
 0x618   : > { %7963 = vmatprep.subr.msk.bf16.mxu1 %vm2609_vm6, %v8043_v45 }
 0x61d   : > { %7739 = vmatmul.mubr.msk.bf16.gmra.mxu1 %vm2561_vm7, %v4604_v23  ;;  %7749 = vmatmul.mubr.msk.bf16.gmra.mxu0 %vm2561_vm7, %v4712_v14 }
 0x61e   : > { %7754 = vmatprep.mubr.msk.bf16.mxu1 %vm2561_vm7, %v4817_v52  ;;  %7764 = vmatprep.mubr.msk.bf16.mxu0 %vm2561_vm7, %v8946_v28  ;;  %v4816_v28 = vld [vmem:[#allocation2 + $0x4c] sm:$0xff] }
 0x61f   : > { %v4820_v16 = vpack.c.bf16 %v4816_v28, %v9008_v18 }
 0x625   : > { %7755 = vmatmul.mubr.msk.bf16.vlgmr.msra.gmra.mxu1 %vm2561_vm7, %v4818_v0  ;;  %7765 = vmatmul.mubr.msk.bf16.vlgmr.msra.gmra.mxu0 %vm2561_vm7, %v8962_v51  ;;  %v9077_v51 = vpack.c.bf16 %v9064_v53, %v9064_v53 }
 0x626   : > { %7773 = vmatpush3.bf16.msra.mxu1 %v5058_v20  ;;  %7758 = vmatprep.mubr.msk.bf16.mxu1 %vm2561_vm7, %v4819_v27 }
 0x627   : > { %7768 = vmatprep.mubr.msk.bf16.mxu0 %vm2561_vm7, %v8975_v6  ;;  %9594 = vst [vmem:[#allocation28_spill] sm:$0xff] %v9077_v51  ;;  %v8044_v6 = vld [vmem:[%s9592_s12 + $0x18] sm:$0xff]  }
 0x628   : > { %7782 = vmatprep.subr.bf16.mxu0 %v8044_v6 }
 0x629   : > { %7783 = vmatpush3.bf16.msra.mxu0 %v8044_v6 }
 0x62a   : > { %7784 = vmatprep.subr.bf16.mxu0 %v8045_v63 }
 0x62d   : > { %7759 = vmatmul.mubr.msk.bf16.gmra.mxu1 %vm2561_vm7, %v4820_v16  ;;  %7769 = vmatmul.mubr.msk.bf16.gmra.mxu0 %vm2561_vm7, %v4928_v8 }
 0x62e   : > { %7774 = vmatprep.mubr.msk.bf16.mxu1 %vm2561_vm7, %v8951_v38  ;;  %7785 = vmatpush3.bf16.msra.mxu0 %v8045_v63  ;;  %v8047_v38 = vld [vmem:[%s9592_s12] sm:$0xff]  }
 0x62f   : > { %7786 = vmatprep.subr.bf16.mxu0 %v8046_v48 }
 0x632   : > { %7787 = vmatpush3.bf16.msra.mxu0 %v8046_v48 }
 0x633   : > { %7788 = vmatprep.subr.bf16.mxu0 %v8047_v38 }
 0x635   : > { %7775 = vmatmul.mubr.msk.bf16.vlgmr.msra.gmra.mxu1 %vm2561_vm7, %v8972_v2 }
 0x636   : > { %7778 = vmatprep.mubr.msk.bf16.mxu1 %vm2561_vm7, %v4496_v26  ;;  %7789 = vmatpush3.bf16.msra.mxu0 %v8047_v38 }
 0x63d   : > { %7779 = vmatmul.mubr.msk.bf16.gmra.mxu1 %vm2561_vm7, %v9077_v51 }
 0x6a5   : > { %v7676_v2 = vpop.f32.mrf.mxu1  ;;  %v7686_v5 = vpop.f32.mrf.mxu0 }
 0x6a6   : > { %v4047_v48 = vadd.f32 %v7676_v2, %v8895_v21 }
 0x6a7   : > { %v4014_v18 = vpop.f32.mrf.mxu1  ;;  %v4122_v33 = vpop.f32.mrf.mxu0 }
 0x6a8   : > { %v4045_v51 = vadd.f32 %v4014_v18, %v8893_v32 }
 0x6a9   : > { %v7677_v10 = vpop.f32.mrf.mxu1  ;;  %v7687_v34 = vpop.f32.mrf.mxu0 }
 0x6ab   : > { %v4017_v56 = vpop.f32.mrf.mxu1  ;;  %v9085_v36 = vpop.f32.mrf.mxu0 }
 0x6ac   : > { %v4046_v21 = vadd.f32 %v4017_v56, %v8891_v35 }
 0x6ad   : > { %v7680_v44 = vpop.f32.mrf.mxu1  ;;  %v9087_v11 = vpop.f32.mrf.mxu0 }
 0x6af   : > { %v4030_v49 = vpop.f32.mrf.mxu1  ;;  %v9089_v24 = vpop.f32.mrf.mxu0 }
 0x6b1   : > { %v9091_v30 = vpop.f32.mrf.mxu1  ;;  %v9093_v39 = vpop.f32.mrf.mxu0 }
 0x6b2   : > { %v4052_v35 = vadd.f32 %v9091_v30, %v8909_v37 }
 0x6b3   : > { %v9095_v12 = vpop.f32.mrf.mxu1  ;;  %v9097_v58 = vpop.f32.mrf.mxu0 }
 0x6b4   : > { %v4160_v37 = vadd.f32 %v9093_v39, %v4052_v35 }
 0x6b5   : > { %v7696_v9 = vpop.f32.mrf.mxu1  ;;  %v7706_v42 = vpop.f32.mrf.mxu0 }
 0x6b7   : > { %v4230_v62 = vpop.f32.mrf.mxu1  ;;  %v4338_v26 = vpop.f32.mrf.mxu0 }
 0x6b9   : > { %v7697_v22 = vpop.f32.mrf.mxu1  ;;  %v9099_v43 = vpop.f32.mrf.mxu0 }
 0x6bb   : > { %v4233_v4 = vpop.f32.mrf.mxu1  ;;  %v9101_v59 = vpop.f32.mrf.mxu0 }
 0x6bd   : > { %v9103_v1 = vpop.f32.mrf.mxu1  ;;  %v9105_v3 = vpop.f32.mrf.mxu0 }
 0x6bf   : > { %v9107_v54 = vpop.f32.mrf.mxu1  ;;  %v9109_v25 = vpop.f32.mrf.mxu0 }
 0x6c1   : > { %v9111_v19 = vpop.f32.mrf.mxu1  ;;  %v9113_v7 = vpop.f32.mrf.mxu0 }
 0x6c3   : > { %v9115_v31 = vpop.f32.mrf.mxu1  ;;  %v9117_v15 = vpop.f32.mrf.mxu0 }
 0x6c5   : > { %v7716_v60 = vpop.f32.mrf.mxu1  ;;  %v7726_v40 = vpop.f32.mrf.mxu0 }
 0x6c7   : > { %v4446_v46 = vpop.f32.mrf.mxu1  ;;  %v9119_v45 = vpop.f32.mrf.mxu0 }
 0x6c9   : > { %v7717_v47 = vpop.f32.mrf.mxu1  ;;  %v9121_v17 = vpop.f32.mrf.mxu0 }
 0x6cb   : > { %v9123_v29 = vpop.f32.mrf.mxu1  ;;  %v9125_v61 = vpop.f32.mrf.mxu0 }
 0x6cc   : > { %9595 = vst [vmem:[#allocation30_spill] sm:$0xff] %v9125_v61 }
 0x6cd   : > { %v9127_v55 = vpop.f32.mrf.mxu1  ;;  %v9129_v23 = vpop.f32.mrf.mxu0 }
 0x6ce   : > { %9596 = vst [vmem:[#allocation31_spill] sm:$0xff] %v9129_v23  ;;  %v4155_v23 = vadd.f32 %v7686_v5, %v4047_v48 }
 0x6cf   : > { %v9131_v14 = vpop.f32.mrf.mxu1  ;;  %v9133_v52 = vpop.f32.mrf.mxu0 }
 0x6d0   : > { %9597 = vst [vmem:[#allocation26_spill] sm:$0xff] %v9133_v52  ;;  %v4263_v61 = vadd.f32 %v7696_v9, %v4155_v23  ;;  %v4268_v23 = vadd.f32 %v9111_v19, %v4160_v37 }
 0x6d1   : > { %v9135_v0 = vpop.f32.mrf.mxu1  ;;  %v9137_v20 = vpop.f32.mrf.mxu0 }
 0x6d2   : > { %9598 = vst [vmem:[#allocation27_spill] sm:$0xff] %v9135_v0  ;;  %9599 = vst [vmem:[#allocation32_spill] sm:$0xff] %v9137_v20 }
 0x6d3   : > { %v9139_v27 = vpop.f32.mrf.mxu1  ;;  %v9141_v28 = vpop.f32.mrf.mxu0 }
 0x6d4   : > { %9600 = vst [vmem:[#allocation25_spill] sm:$0xff] %v9139_v27  ;;  %9601 = vst [vmem:[#allocation33_spill] sm:$0xff] %v9141_v28  ;;  %v4048_v28 = vadd.f32 %v7677_v10, %v8889_v50  ;;  %v4049_v50 = vadd.f32 %v4030_v49, %v8903_v57  ;;  %v4371_v10 = vadd.f32 %v7706_v42, %v4263_v61 }
 0x6d5   : > { %v7736_v16 = vpop.f32.mrf.mxu1  ;;  %v9143_v8 = vpop.f32.mrf.mxu0 }
 0x6d6   : > { %v4156_v32 = vadd.f32 %v7687_v34, %v4048_v28  ;;  %v4157_v42 = vadd.f32 %v9089_v24, %v4049_v50 }
 0x6d7   : > { %v4662_v6 = vpop.f32.mrf.mxu1  ;;  %v9145_v63 = vpop.f32.mrf.mxu0 }
 0x6d8   : > { %9602 = vst [vmem:[#allocation34_spill] sm:$0xff] %v9145_v63  ;;  %v4153_v63 = vadd.f32 %v4122_v33, %v4045_v51  ;;  %v4264_v48 = vadd.f32 %v7697_v22, %v4156_v32  ;;  %v4154_v51 = vadd.f32 %v9085_v36, %v4046_v21  ;;  %v4050_v33 = vadd.f32 %v9095_v12, %v8905_v41 }
 0x6d9   : > { %v9148_v38 = vpop.f32.mrf.mxu1  ;;  %v9150_v53 = vpop.f32.mrf.mxu0  ;;  %v9607_v32 = vld [vmem:[#allocation27_spill] sm:$0xff] }
 0x6da   : > { %9603 = vst [vmem:[#allocation35_spill] sm:$0xff] %v9150_v53  ;;  %v4261_v18 = vadd.f32 %v4230_v62, %v4153_v63  ;;  %v4262_v62 = vadd.f32 %v4233_v4, %v4154_v51  ;;  %v4372_v36 = vadd.f32 %v9099_v43, %v4264_v48  ;;  %v4158_v41 = vadd.f32 %v9097_v58, %v4050_v33  ;;  %v9610_v48 = vld [vmem:[#allocation31_spill] sm:$0xff] }
 0x6db   : > { %v9153_v52 = vpop.f32.mrf.mxu1  ;;  %v9155_v20 = vpop.f32.mrf.mxu0 }
 0x6dc   : > { %9604 = vst [vmem:[#allocation36_spill] sm:$0xff] %v9153_v52  ;;  %9605 = vst [vmem:[#allocation37_spill] sm:$0xff] %v9155_v20  ;;  %v4051_v52 = vadd.f32 %v7680_v44, %v8912_v13  ;;  %v4369_v13 = vadd.f32 %v4338_v26, %v4261_v18  ;;  %v4479_v44 = vadd.f32 %v7716_v60, %v4371_v10  ;;  %v9608_v18 = vld [vmem:[#allocation25_spill] sm:$0xff] }
 0x6dd   : > { %v9158_v27 = vpop.f32.mrf.mxu1  ;;  %v9160_v0 = vpop.f32.mrf.mxu0  ;;  %v4265_v26 = vadd.f32 %v9107_v54, %v4157_v42  ;;  %v4370_v4 = vadd.f32 %v9101_v59, %v4262_v62  ;;  %v4266_v24 = vadd.f32 %v9115_v31, %v4158_v41  ;;  %v4376_v59 = vadd.f32 %v9113_v7, %v4268_v23  ;;  %v9616_v42 = vld [vmem:[#allocation33_spill] sm:$0xff] }
 0x6de   : > { %v4159_v9 = vadd.f32 %v9087_v11, %v4051_v52  ;;  %v4477_v22 = vadd.f32 %v4446_v46, %v4369_v13  ;;  %v4587_v60 = vadd.f32 %v7726_v40, %v4479_v44  ;;  %v4480_v11 = vadd.f32 %v7717_v47, %v4372_v36 }
 0x6df   : > { %v9163_v2 = vpop.f32.mrf.mxu1  ;;  %v9165_v53 = vpop.f32.mrf.mxu0  ;;  %v4373_v54 = vadd.f32 %v9109_v25, %v4265_v26  ;;  %v4374_v19 = vadd.f32 %v9117_v15, %v4266_v24  ;;  %v4484_v25 = vadd.f32 %v9607_v32, %v4376_v59  ;;  %v9609_v7 = vld [vmem:[#allocation34_spill] sm:$0xff] }
 0x6e0   : > { %v4267_v30 = vadd.f32 %v9103_v1, %v4159_v9  ;;  %v4585_v46 = vadd.f32 %v9119_v45, %v4477_v22  ;;  %v4695_v39 = vadd.f32 %v7736_v16, %v4587_v60  ;;  %v4478_v1 = vadd.f32 %v9123_v29, %v4370_v4  ;;  %v9606_v16 = vld [vmem:[#allocation30_spill] sm:$0xff]  ;;  %v9615_v9 = vld [vmem:[#allocation32_spill] sm:$0xff] }
 0x6e1   : > { %v9168_v20 = vpop.f32.mrf.mxu1  ;;  %v9170_v5 = vpop.f32.mrf.mxu0  ;;  %v4588_v40 = vadd.f32 %v9121_v17, %v4480_v11  ;;  %v4481_v45 = vadd.f32 %v9131_v14, %v4373_v54  ;;  %v4482_v17 = vadd.f32 %v9608_v18, %v4374_v19  ;;  %v9614_v33 = vld [vmem:[#allocation35_spill] sm:$0xff]  ;;  %v4592_v62 = vadd.f32 %v9615_v9, %v4484_v25  ;;  %v9225_v54 = vld [vmem:[%s9617_s25] ss:$0 sm:$0xff] }
 0x6e2   : > { %v4375_v58 = vadd.f32 %v9105_v3, %v4267_v30  ;;  %v4693_v47 = vadd.f32 %v4662_v6, %v4585_v46  ;;  %v4803_v3 = vadd.f32 %v9143_v8, %v4695_v39  ;;  %v4586_v21 = vadd.f32 %v9606_v16, %v4478_v1  ;;  %v9613_v8 = vld [vmem:[#allocation26_spill] sm:$0xff] }
 0x6e3   : > { %v9178_v34 = vpop.f32.mrf.mxu1  ;;  %v9180_v56 = vpop.f32.mrf.mxu0  ;;  %v4696_v29 = vadd.f32 %v9148_v38, %v4588_v40  ;;  %v9611_v51 = vld [vmem:[#allocation36_spill] sm:$0xff]  ;;  %v4589_v38 = vadd.f32 %v9613_v8, %v4481_v45  ;;  %v4590_v36 = vadd.f32 %v9616_v42, %v4482_v17  ;;  %v9618_v60 = vld [vmem:[#allocation37_spill] sm:$0xff]  ;;  %v4700_v4 = vadd.f32 %v9168_v20, %v4592_v62 }
 0x6e4   : > { %v4483_v31 = vadd.f32 %v9127_v55, %v4375_v58  ;;  %v4801_v10 = vadd.f32 %v9609_v7, %v4693_v47  ;;  %v4694_v35 = vadd.f32 %v9611_v51, %v4586_v21 }
 0x6e5   : > { %v7756_v57 = vpop.f32.mrf.mxu1  ;;  %v7766_v49 = vpop.f32.mrf.mxu0  ;;  %v4804_v13 = vadd.f32 %v9614_v33, %v4696_v29  ;;  %v4697_v41 = vadd.f32 %v9163_v2, %v4589_v38  ;;  %v4698_v23 = vadd.f32 %v9178_v34, %v4590_v36  ;;  %v4808_v34 = vadd.f32 %v9170_v5, %v4700_v4 }
 0x6e6   : > { %v4911_v15 = vadd.f32 %v7756_v57, %v4803_v3  ;;  %v4591_v55 = vadd.f32 %v9610_v48, %v4483_v31  ;;  %v4802_v11 = vadd.f32 %v9618_v60, %v4694_v35 }
 0x6e7   : > { %v4878_v12 = vpop.f32.mrf.mxu1  ;;  %v4986_v61 = vpop.f32.mrf.mxu0  ;;  %v4806_v47 = vadd.f32 %v9180_v56, %v4698_v23 }
 0x6e8   : > { %v4909_v44 = vadd.f32 %v4878_v12, %v4801_v10  ;;  %v4699_v22 = vadd.f32 %v9158_v27, %v4591_v55  ;;  %v5019_v30 = vadd.f32 %v7766_v49, %v4911_v15  ;;  %v9221_v12 = vld [vmem:[%s9612_s18] ss:$0 sm:$0xff]  ;;  %v4805_v49 = vadd.f32 %v9165_v53, %v4697_v41 }
 0x6e9   : > { %v7757_v43 = vpop.f32.mrf.mxu1  ;;  %v7767_v52 = vpop.f32.mrf.mxu0 }
 0x6ea   : > { %v4912_v26 = vadd.f32 %v7757_v43, %v4804_v13  ;;  %v5017_v46 = vadd.f32 %v4986_v61, %v4909_v44  ;;  %v4807_v27 = vadd.f32 %v9160_v0, %v4699_v22  ;;  %v5169_v61 = vstv %s9209_s23 }
 0x6eb   : > { %v4881_v28 = vpop.f32.mrf.mxu1  ;;  %v4989_v6 = vpop.f32.mrf.mxu0 }
 0x6ec   : > { %v4910_v58 = vadd.f32 %v4881_v28, %v4802_v11  ;;  %v5020_v43 = vadd.f32 %v7767_v52, %v4912_v26 }
 0x6ed   : > { %v7760_v63 = vpop.f32.mrf.mxu1  ;;  %v7770_v57 = vpop.f32.mrf.mxu0 }
 0x6ee   : > { %v4915_v59 = vadd.f32 %v7760_v63, %v4807_v27  ;;  %v5018_v3 = vadd.f32 %v4989_v6, %v4910_v58 }
 0x6ef   : > { %v4894_v50 = vpop.f32.mrf.mxu1  ;;  %v5002_v1 = vpop.f32.mrf.mxu0 }
 0x6f0   : > { %v4913_v31 = vadd.f32 %v4894_v50, %v4805_v49  ;;  %v5023_v32 = vadd.f32 %v7770_v57, %v4915_v59 }
 0x6f1   : > { %v7761_v14 = vpop.f32.mrf.mxu1  ;;  %v7771_v53 = vpop.f32.mrf.mxu0 }
 0x6f2   : > { %v4916_v29 = vadd.f32 %v7761_v14, %v4808_v34  ;;  %v5021_v18 = vadd.f32 %v5002_v1, %v4913_v31  ;;  %v8048_v34 = vld [vmem:[%s9619_s3 + $0x18] sm:$0x1f]   ;;  %v8049_v31 = vld [vmem:[%s9619_s3 + $0x10] sm:$0xff]  }
 0x6f3   : > { %v4897_v37 = vpop.f32.mrf.mxu1  ;;  %v5005_v7 = vpop.f32.mrf.mxu0 }
 0x6f4   : > { %v4914_v16 = vadd.f32 %v4897_v37, %v4806_v47  ;;  %v5024_v50 = vadd.f32 %v7771_v53, %v4916_v29  ;;  %v9620_v47 = vld [vmem:[#allocation28_spill] sm:$0xff]  ;;  %v6994_v53 = vld [vmem:[%s9621_s14] ss:$0 sm:$0xff] }
 0x6f5   : > { %v7776_v24 = vpop.f32.mrf.mxu1 }
 0x6f6   : > { %v5127_v39 = vadd.f32 %v7776_v24, %v5019_v30  ;;  %v5022_v48 = vadd.f32 %v5005_v7, %v4914_v16  ;;  %v5318_v16 = vstv %s5195_s30 }
 0x6f7   : > { %v5094_v2 = vpop.f32.mrf.mxu1 }
 0x6f8   : > { %v5141_v20 = vmul.f32 %v9221_v12, %v5127_v39  ;;  %v5125_v40 = vadd.f32 %v5094_v2, %v5017_v46 }
 0x6f9   : > { %v7777_v19 = vpop.f32.mrf.mxu1 }
 0x6fa   : > { %v5155_v0 = vadd.f32 %v9225_v54, %v5141_v20  ;;  %v5139_v28 = vmul.f32 %v9221_v12, %v5125_v40  ;;  %v5128_v45 = vadd.f32 %v7777_v19, %v5020_v43 }
 0x6fb   : > { %v5097_v52 = vpop.f32.mrf.mxu1 }
 0x6fc   : > { %v5142_v21 = vmul.f32 %v9221_v12, %v5128_v45  ;;  %v5172_v5 = vmul.f32 %v5169_v61, %v5155_v0  ;;  %v5153_v56 = vadd.f32 %v9225_v54, %v5139_v28  ;;  %v5126_v63 = vadd.f32 %v5097_v52, %v5018_v3  ;;  %v8052_v28 = vld [vmem:[%s9619_s3 + $0x28] sm:$0x1f]   ;;  %v8054_v3 = vld [vmem:[%s9619_s3 + $0x38] sm:$0x1f]  }
 0x6fd   : > { %v7780_v25 = vpop.f32.mrf.mxu1  ;;  %vm5163_vm6 = vcmp.gt.f32.partialorder %v5155_v0, 0.0 }
 0x6fe   : > { %v5156_v17 = vadd.f32 %v9225_v54, %v5142_v21  ;;  %v5140_v6 = vmul.f32 %v9221_v12, %v5126_v63  ;;  %v5131_v10 = vadd.f32 %v7780_v25, %v5023_v32  ;;  %v5180_v35 = vsel %vm5163_vm6, %v5155_v0, %v5172_v5  ;;  %v8051_v0 = vld [vmem:[%s9619_s3] sm:$0xff]  }
 0x6ff   : > { %v5110_v15 = vpop.f32.mrf.mxu1  ;;  %vm5161_vm8 = vcmp.gt.f32.partialorder %v5153_v56, 0.0  ;;  %v5170_v33 = vmul.f32 %v5169_v61, %v5153_v56 }
 0x700   : > { %vm5164_vm7 = vcmp.gt.f32.partialorder %v5156_v17, 0.0  ;;  %v5173_v55 = vmul.f32 %v5169_v61, %v5156_v17  ;;  %v5129_v51 = vadd.f32 %v5110_v15, %v5021_v18  ;;  %v5154_v14 = vadd.f32 %v9225_v54, %v5140_v6 }
 0x701   : > { %v5145_v8 = vmul.f32 %v9221_v12, %v5131_v10  ;;  %v7781_v38 = vpop.f32.mrf.mxu1  ;;  %v5178_v4 = vsel %vm5161_vm8, %v5153_v56, %v5170_v33 }
 0x702   : > { %v5181_v13 = vsel %vm5164_vm7, %v5156_v17, %v5173_v55  ;;  %v5143_v44 = vmul.f32 %v9221_v12, %v5129_v51  ;;  %v5132_v9 = vadd.f32 %v7781_v38, %v5024_v50  ;;  %vm5162_vm9 = vcmp.gt.f32.partialorder %v5154_v14, 0.0 }
 0x703   : > { %v5200_v62 = vpack.c.bf16 %v5181_v13, %v5180_v35  ;;  %v5171_v42 = vmul.f32 %v5169_v61, %v5154_v14  ;;  %v5159_v36 = vadd.f32 %v9225_v54, %v5145_v8  ;;  %v5113_v22 = vpop.f32.mrf.mxu1 }
 0x704   : > { %v5157_v57 = vadd.f32 %v9225_v54, %v5143_v44  ;;  %v5146_v37 = vmul.f32 %v9221_v12, %v5132_v9  ;;  %v5130_v41 = vadd.f32 %v5113_v22, %v5022_v48 }
 0x705   : > { %v5179_v30 = vsel %vm5162_vm9, %v5154_v14, %v5171_v42  ;;  %v5176_v26 = vmul.f32 %v5169_v61, %v5159_v36  ;;  %vm5167_vm10 = vcmp.gt.f32.partialorder %v5159_v36, 0.0 }
 0x706   : > { %v5160_v60 = vadd.f32 %v9225_v54, %v5146_v37  ;;  %v5144_v11 = vmul.f32 %v9221_v12, %v5130_v41  ;;  %v5199_v23 = vpack.c.bf16 %v5179_v30, %v5178_v4  ;;  %v5174_v24 = vmul.f32 %v5169_v61, %v5157_v57  ;;  %v9622_v37 = vld [vmem:[#allocation29_spill] sm:$0xff] }
 0x707   : > { %vm5165_vm12 = vcmp.gt.f32.partialorder %v5157_v57, 0.0  ;;  %v5184_v27 = vsel %vm5167_vm10, %v5159_v36, %v5176_v26 }
 0x708   : > { %vm5168_vm11 = vcmp.gt.f32.partialorder %v5160_v60, 0.0  ;;  %v5177_v46 = vmul.f32 %v5169_v61, %v5160_v60  ;;  %v5158_v39 = vadd.f32 %v9225_v54, %v5144_v11  ;;  %7790 = vmatprep.mubr.msk.bf16.mxu0 %vm3835_vm5, %v5199_v23  ;;  %v5182_v2 = vsel %vm5165_vm12, %v5157_v57, %v5174_v24 }
 0x709   : > { %7791 = vmatmul.mubr.msk.bf16.vlgmr.msra.gmra.mxu0 %vm3835_vm5, %v5200_v62  ;;  %v8113_v54 = vmov 65535  }
 0x70a   : > { %v5185_v58 = vsel %vm5168_vm11, %v5160_v60, %v5177_v46  ;;  %vm5166_vm13 = vcmp.gt.f32.partialorder %v5158_v39, 0.0  ;;  %v5175_v1 = vmul.f32 %v5169_v61, %v5158_v39  ;;  %v5394_v20 = vsel %vm1028_vm0, 4294967295, %v8113_v54  ;;  %v8050_v61 = vld [vmem:[%s9619_s3 + $0x8] sm:$0x1f]  }
 0x70b   : > { %v5202_v12 = vpack.c.bf16 %v5185_v58, %v5184_v27  ;;  %v9253_v40 = vsel %vm5393_vm14, %v5394_v20, 0  ;;  %v8056_v27 = vld [vmem:[%s9619_s3 + $0x48] sm:$0x1f]  }
 0x70c   : > { %v5183_v49 = vsel %vm5166_vm13, %v5158_v39, %v5175_v1  ;;  %v5397_v59 = vand.u32 %v8048_v34, %v9253_v40  ;;  %v5488_v19 = vand.u32 %v8050_v61, %v9253_v40  ;;  %v9265_v45 = vand.u32 %v8052_v28, %v9253_v40  ;;  %v8053_v39 = vld [vmem:[%s9619_s3 + $0x20] sm:$0xff]   ;;  %v8055_v1 = vld [vmem:[%s9619_s3 + $0x30] sm:$0xff]  }
 0x70d   : > { %v5201_v43 = vpack.c.bf16 %v5183_v49, %v5182_v2  ;;  %v9270_v29 = vand.u32 %v8054_v3, %v9253_v40 }
 0x70e   : > { %7798 = vmatprep.subr.bf16.mxu1 %v5397_v59  ;;  %7810 = vmatprep.subr.bf16.mxu0 %v5488_v19 }
 0x70f   : > { %7794 = vmatprep.mubr.msk.bf16.mxu0 %vm3835_vm5, %v5201_v43  ;;  %7799 = vmatpush3.bf16.msra.mxu1 %v5397_v59  ;;  %v5828_v43 = vand.u32 %v8056_v27, %v9253_v40 }
 0x710   : > { %7800 = vmatprep.subr.bf16.mxu1 %v8049_v31  ;;  %7811 = vmatpush3.bf16.msra.mxu0 %v5488_v19 }
 0x711   : > { %7795 = vmatmul.mubr.msk.bf16.gmra.mxu0 %vm3835_vm5, %v5202_v12  ;;  %7812 = vmatprep.subr.bf16.mxu0 %v8051_v0  ;;  %v8058_v12 = vld [vmem:[%s9619_s3 + $0x58] sm:$0x1f]  }
 0x712   : > { %7814 = vmatprep.mubr.msk.bf16.mxu0 %vm5335_vm15, %v9620_v47  ;;  %v5944_v54 = vand.u32 %v8058_v12, %v9253_v40 }
 0x713   : > { %7801 = vmatpush3.bf16.msra.mxu1 %v8049_v31 }
 0x714   : > { %7813 = vmatpush3.bf16.msra.mxu0 %v8051_v0  ;;  %7822 = vmatprep.subr.bf16.mxu1 %v9265_v45 }
 0x715   : > { %7834 = vmatprep.subr.bf16.mxu0 %v9270_v29 }
 0x7c9   : > { %v7792_v52 = vpop.f32.mrf.mxu0 }
 0x7ca   : > { %v5288_v21 = vadd.f32 %v7792_v52, %v6994_v53 }
 0x7cb   : > { %v5279_v32 = vpop.f32.mrf.mxu0 }
 0x7cc   : > { %vm5312_vm0 = vcmp.gt.f32.partialorder %v5288_v21, 0.0  ;;  %v5321_v5 = vmul.f32 %v5318_v16, %v5288_v21  ;;  %v5280_v56 = vadd.f32 %v6994_v53, %v5279_v32 }
 0x7cd   : > { %v7793_v63 = vpop.f32.mrf.mxu0 }
 0x7ce   : > { %v5329_v25 = vsel %vm5312_vm0, %v5288_v21, %v5321_v5  ;;  %vm5310_vm5 = vcmp.gt.f32.partialorder %v5280_v56, 0.0  ;;  %v5319_v18 = vmul.f32 %v5318_v16, %v5280_v56  ;;  %v5291_v17 = vadd.f32 %v7793_v63, %v6994_v53 }
 0x7cf   : > { %v5282_v50 = vpop.f32.mrf.mxu0  ;;  %5338 = vst.msk [vmem:[#allocation2 + $0x20] sm:$0xff] %vm5335_vm15, %v5329_v25  ;;  %v8057_v25 = vld [vmem:[%s9619_s3 + $0x40] sm:$0xff]  }
 0x7d0   : > { %v5327_v7 = vsel %vm5310_vm5, %v5280_v56, %v5319_v18  ;;  %vm5313_vm1 = vcmp.gt.f32.partialorder %v5291_v17, 0.0  ;;  %v5322_v6 = vmul.f32 %v5318_v16, %v5291_v17  ;;  %v5283_v10 = vadd.f32 %v6994_v53, %v5282_v50  ;;  %v8060_v18 = vld [vmem:[%s9619_s3 + $0x68] sm:$0x1f]  }
 0x7d1   : > { %v7796_v15 = vpop.f32.mrf.mxu0  ;;  %5336 = vst.msk [vmem:[#allocation2 + $0x10] sm:$0xff] %vm5335_vm15, %v5327_v7 }
 0x7d2   : > { %v5330_v48 = vsel %vm5313_vm1, %v5291_v17, %v5322_v6  ;;  %vm5311_vm2 = vcmp.gt.f32.partialorder %v5283_v10, 0.0  ;;  %v5320_v55 = vmul.f32 %v5318_v16, %v5283_v10  ;;  %v5304_v51 = vadd.f32 %v7796_v15, %v6994_v53  ;;  %v8059_v6 = vld [vmem:[%s9619_s3 + $0x50] sm:$0xff]   ;;  %v8062_v15 = vld [vmem:[%s9619_s3 + $0x78] sm:$0x1f]  }
 0x7d3   : > { %v5295_v35 = vpop.f32.mrf.mxu0  ;;  %5339 = vst.msk [vmem:[#allocation2 + $0x28] sm:$0xff] %vm5335_vm15, %v5330_v48 }
 0x7d4   : > { %v5328_v14 = vsel %vm5311_vm2, %v5283_v10, %v5320_v55  ;;  %vm5316_vm3 = vcmp.gt.f32.partialorder %v5304_v51, 0.0  ;;  %v5325_v8 = vmul.f32 %v5318_v16, %v5304_v51  ;;  %v5296_v38 = vadd.f32 %v6994_v53, %v5295_v35 }
 0x7d5   : > { %v7797_v33 = vpop.f32.mrf.mxu0  ;;  %5337 = vst.msk [vmem:[#allocation2 + $0x18] sm:$0xff] %vm5335_vm15, %v5328_v14  ;;  %v6060_v10 = vand.u32 %v8060_v18, %v9253_v40  ;;  %v8068_v18 = vld [vmem:[%s9619_s3 + $0xa8] sm:$0x1f]  }
 0x7d6   : > { %v5333_v13 = vsel %vm5316_vm3, %v5304_v51, %v5325_v8  ;;  %vm5314_vm4 = vcmp.gt.f32.partialorder %v5296_v38, 0.0  ;;  %v5323_v44 = vmul.f32 %v5318_v16, %v5296_v38  ;;  %v5307_v9 = vadd.f32 %v7797_v33, %v6994_v53  ;;  %v5348_v23 = vld [vmem:[#allocation2 + $0x20] sm:$0xff] }
 0x7d7   : > { %v5298_v62 = vpop.f32.mrf.mxu0  ;;  %5342 = vst.msk [vmem:[#allocation2 + $0x40] sm:$0xff] %vm5335_vm15, %v5333_v13  ;;  %v6176_v13 = vand.u32 %v8062_v15, %v9253_v40 }
 0x7d8   : > { %v5331_v42 = vsel %vm5314_vm4, %v5296_v38, %v5323_v44  ;;  %vm5317_vm6 = vcmp.gt.f32.partialorder %v5307_v9, 0.0  ;;  %v5326_v36 = vmul.f32 %v5318_v16, %v5307_v9  ;;  %v5299_v22 = vadd.f32 %v6994_v53, %v5298_v62  ;;  %v5346_v57 = vld [vmem:[#allocation2 + $0x10] sm:$0xff] }
 0x7d9   : > { %v5361_v41 = vpack.c.bf16 %v5346_v57, %v9622_v37  ;;  %5340 = vst.msk [vmem:[#allocation2 + $0x30] sm:$0xff] %vm5335_vm15, %v5331_v42  ;;  %v5555_v0 = vld [vmem:[#allocation2 + $0xc] sm:$0xff] }
 0x7da   : > { %v5334_v30 = vsel %vm5317_vm6, %v5307_v9, %v5326_v36  ;;  %vm5315_vm7 = vcmp.gt.f32.partialorder %v5299_v22, 0.0  ;;  %v5324_v26 = vmul.f32 %v5318_v16, %v5299_v22  ;;  %v5349_v60 = vld [vmem:[#allocation2 + $0x28] sm:$0xff] }
 0x7db   : > { %7802 = vmatprep.mubr.msk.bf16.mxu1 %vm5335_vm15, %v5361_v41  ;;  %5343 = vst.msk [vmem:[#allocation2 + $0x48] sm:$0xff] %vm5335_vm15, %v5334_v30  ;;  %v9290_v58 = vpack.c.bf16 %v5349_v60, %v5348_v23  ;;  %v5671_v28 = vld [vmem:[#allocation2 + $0xe] sm:$0xff]  ;;  %v9328_v16 = vld [vmem:[#allocation2 + $0x24] sm:$0xff] }
 0x7dc   : > { %v5332_v11 = vsel %vm5315_vm7, %v5299_v22, %v5324_v26  ;;  %v5347_v4 = vld [vmem:[#allocation2 + $0x18] sm:$0xff]  ;;  %v5674_v21 = vld [vmem:[#allocation2 + $0x26] sm:$0xff]  ;;  %v5787_v33 = vld [vmem:[#allocation2 + $0xf] sm:$0xff] }
 0x7dd   : > { %v9283_v24 = vpack.c.bf16 %v5347_v4, %v5346_v57  ;;  %v9285_v46 = vpack.c.bf16 %v5348_v23, %v5347_v4  ;;  %5341 = vst.msk [vmem:[#allocation2 + $0x38] sm:$0xff] %vm5335_vm15, %v5332_v11  ;;  %v9308_v20 = vld [vmem:[#allocation2 + $0x14] sm:$0xff]  ;;  %v5673_v53 = vld [vmem:[#allocation2 + $0x1e] sm:$0xff]  ;;  %v5790_v42 = vld [vmem:[#allocation2 + $0x27] sm:$0xff] }
 0x7de   : > { %v5672_v34 = vld [vmem:[#allocation2 + $0x16] sm:$0xff]  ;;  %v9310_v61 = vld [vmem:[#allocation2 + $0x40] sm:$0xff]  ;;  %v5680_v56 = vpack.c.bf16 %v5674_v21, %v5673_v53  ;;  %v8064_v41 = vld [vmem:[%s9619_s3 + $0x88] sm:$0x1f]  }
 0x7df   : > { %7803 = vmatmul.mubr.msk.bf16.vlgmr.msra.gmra.mxu1 %vm5335_vm15, %v9285_v46  ;;  %7815 = vmatmul.mubr.msk.bf16.vlgmr.msra.gmra.mxu0 %vm5335_vm15, %v9283_v24  ;;  %v5679_v3 = vpack.c.bf16 %v5672_v34, %v5671_v28  ;;  %v5788_v51 = vld [vmem:[#allocation2 + $0x17] sm:$0xff]  ;;  %v5789_v9 = vld [vmem:[#allocation2 + $0x1f] sm:$0xff] }
 0x7e0   : > { %7823 = vmatpush3.bf16.msra.mxu1 %v9265_v45  ;;  %7818 = vmatprep.mubr.msk.bf16.mxu0 %vm5335_vm15, %v9290_v58  ;;  %v5350_v2 = vld [vmem:[#allocation2 + $0x30] sm:$0xff]  ;;  %v5563_v45 = vpack.c.bf16 %v9308_v20, %v5555_v0  ;;  %v5795_v44 = vpack.c.bf16 %v5788_v51, %v5787_v33  ;;  %v5796_v36 = vpack.c.bf16 %v5790_v42, %v5789_v9  ;;  %v8061_v57 = vld [vmem:[%s9619_s3 + $0x60] sm:$0xff]   ;;  %v8066_v11 = vld [vmem:[%s9619_s3 + $0x98] sm:$0x1f]  }
 0x7e1   : > { %v9301_v49 = vpack.c.bf16 %v5350_v2, %v5349_v60  ;;  %7824 = vmatprep.subr.bf16.mxu1 %v8053_v39  ;;  %7835 = vmatpush3.bf16.msra.mxu0 %v9270_v29  ;;  %v9324_v29 = vld [vmem:[#allocation2 + $0x1c] sm:$0xff]  ;;  %v9332_v63 = vld [vmem:[#allocation2 + $0x2c] sm:$0xff]  ;;  %v6292_v60 = vand.u32 %v8064_v41, %v9253_v40 }
 0x7e2   : > { %7836 = vmatprep.subr.bf16.mxu0 %v8055_v1  ;;  %v5564_v5 = vpack.c.bf16 %v9328_v16, %v9324_v29  ;;  %v5675_v50 = vld [vmem:[#allocation2 + $0x2e] sm:$0xff]  ;;  %v9347_v35 = vld [vmem:[#allocation2 + $0x44] sm:$0xff] }
 0x7e3   : > { %7806 = vmatprep.mubr.msk.bf16.mxu1 %vm5335_vm15, %v9301_v49  ;;  %v5678_v14 = vld [vmem:[#allocation2 + $0x46] sm:$0xff]  ;;  %v5791_v22 = vld [vmem:[#allocation2 + $0x2f] sm:$0xff] }
 0x7e4   : > { %v5351_v59 = vld [vmem:[#allocation2 + $0x38] sm:$0xff]  ;;  %7825 = vmatpush3.bf16.msra.mxu1 %v8053_v39  ;;  %v8063_v26 = vld [vmem:[%s9619_s3 + $0x70] sm:$0xff]   ;;  %v9368_v23 = vld [vmem:[#allocation2 + $0x48] sm:$0xff] }
 0x7e5   : > { %v9312_v19 = vpack.c.bf16 %v5351_v59, %v5350_v2  ;;  %v9315_v31 = vpack.c.bf16 %v9310_v61, %v5351_v59  ;;  %7837 = vmatpush3.bf16.msra.mxu0 %v8055_v1  ;;  %7846 = vmatprep.subr.bf16.mxu1 %v5828_v43  ;;  %v9326_v52 = vld [vmem:[#allocation2 + $0x34] sm:$0xff]  ;;  %v9345_v48 = vld [vmem:[#allocation2 + $0x3c] sm:$0xff]  ;;  %v5794_v12 = vld [vmem:[#allocation2 + $0x47] sm:$0xff] }
 0x7e6   : > { %7858 = vmatprep.subr.bf16.mxu0 %v5944_v54  ;;  %v5676_v32 = vld [vmem:[#allocation2 + $0x36] sm:$0xff]  ;;  %v5565_v17 = vpack.c.bf16 %v9326_v52, %v9332_v63  ;;  %v5677_v55 = vld [vmem:[#allocation2 + $0x3e] sm:$0xff]  ;;  %v5566_v8 = vpack.c.bf16 %v9347_v35, %v9345_v48  ;;  %v6138_v0 = vld [vmem:[#allocation2 + $0x2a] sm:$0xff] }
 0x7e7   : > { %7807 = vmatmul.mubr.msk.bf16.gmra.mxu1 %vm5335_vm15, %v9315_v31  ;;  %7819 = vmatmul.mubr.msk.bf16.gmra.mxu0 %vm5335_vm15, %v9312_v19  ;;  %v5681_v7 = vpack.c.bf16 %v5676_v32, %v5675_v50  ;;  %v5682_v38 = vpack.c.bf16 %v5678_v14, %v5677_v55  ;;  %v5792_v62 = vld [vmem:[#allocation2 + $0x37] sm:$0xff]  ;;  %v5793_v4 = vld [vmem:[#allocation2 + $0x3f] sm:$0xff]  ;;  %v6026_v15 = vld [vmem:[#allocation2 + $0x49] sm:$0xff] }
 0x7e8   : > { %7826 = vmatprep.mubr.msk.bf16.mxu1 %vm5335_vm15, %v5563_v45  ;;  %7838 = vmatprep.mubr.msk.bf16.mxu0 %vm5335_vm15, %v5679_v3  ;;  %v5797_v30 = vpack.c.bf16 %v5792_v62, %v5791_v22  ;;  %v6020_v39 = vld [vmem:[#allocation2 + $0x19] sm:$0xff]  ;;  %v5798_v2 = vpack.c.bf16 %v5794_v12, %v5793_v4  ;;  %v6021_v28 = vld [vmem:[#allocation2 + $0x21] sm:$0xff]  ;;  %v6023_v45 = vld [vmem:[#allocation2 + $0x31] sm:$0xff] }
 0x7e9   : > { %v6135_v27 = vld [vmem:[#allocation2 + $0x12] sm:$0xff]  ;;  %v6136_v1 = vld [vmem:[#allocation2 + $0x1a] sm:$0xff]  ;;  %v6137_v53 = vld [vmem:[#allocation2 + $0x22] sm:$0xff] }
 0x7ea   : > { %v6143_v59 = vpack.c.bf16 %v6136_v1, %v6135_v27  ;;  %v6024_v3 = vld [vmem:[#allocation2 + $0x39] sm:$0xff]  ;;  %v6141_v55 = vld [vmem:[#allocation2 + $0x42] sm:$0xff]  ;;  %v6142_v51 = vld [vmem:[#allocation2 + $0x4a] sm:$0xff] }
 0x7eb   : > { %v6139_v21 = vld [vmem:[#allocation2 + $0x32] sm:$0xff]  ;;  %v6140_v32 = vld [vmem:[#allocation2 + $0x3a] sm:$0xff] }
 0x7ec   : > { %v6145_v50 = vpack.c.bf16 %v6140_v32, %v6139_v21  ;;  %v8069_v33 = vld [vmem:[%s9619_s3 + $0xa0] sm:$0xff]  }
 0x7ef   : > { %7827 = vmatmul.mubr.msk.bf16.vlgmr.msra.gmra.mxu1 %vm5335_vm15, %v5564_v5  ;;  %7839 = vmatmul.mubr.msk.bf16.vlgmr.msra.gmra.mxu0 %vm5335_vm15, %v5680_v56  ;;  %v6144_v56 = vpack.c.bf16 %v6138_v0, %v6137_v53 }
 0x7f0   : > { %7847 = vmatpush3.bf16.msra.mxu1 %v5828_v43  ;;  %7830 = vmatprep.mubr.msk.bf16.mxu1 %vm5335_vm15, %v5565_v17  ;;  %v9372_v43 = vpack.c.bf16 %v9368_v23, %v9310_v61  ;;  %v6022_v61 = vld [vmem:[#allocation2 + $0x29] sm:$0xff]  ;;  %v6029_v17 = vpack.c.bf16 %v6024_v3, %v6023_v45 }
 0x7f1   : > { %7842 = vmatprep.mubr.msk.bf16.mxu0 %vm5335_vm15, %v5681_v7  ;;  %7848 = vmatprep.subr.bf16.mxu1 %v8057_v25  ;;  %v6028_v5 = vpack.c.bf16 %v6022_v61, %v6021_v28  ;;  %v8067_v7 = vld [vmem:[%s9619_s3 + $0x90] sm:$0xff]  }
 0x7f2   : > { %7859 = vmatpush3.bf16.msra.mxu0 %v5944_v54  ;;  %v6408_v54 = vand.u32 %v8066_v11, %v9253_v40 }
 0x7f3   : > { %7860 = vmatprep.subr.bf16.mxu0 %v8059_v6 }
 0x7f4   : > { %7849 = vmatpush3.bf16.msra.mxu1 %v8057_v25  ;;  %v8065_v25 = vld [vmem:[%s9619_s3 + $0x80] sm:$0xff]  }
 0x7f5   : > { %7870 = vmatprep.subr.bf16.mxu1 %v6060_v10 }
 0x7f6   : > { %7861 = vmatpush3.bf16.msra.mxu0 %v8059_v6  ;;  %v6025_v6 = vld [vmem:[#allocation2 + $0x41] sm:$0xff] }
 0x7f7   : > { %7831 = vmatmul.mubr.msk.bf16.gmra.mxu1 %vm5335_vm15, %v5566_v8  ;;  %7843 = vmatmul.mubr.msk.bf16.gmra.mxu0 %vm5335_vm15, %v5682_v38  ;;  %v6030_v14 = vpack.c.bf16 %v6026_v15, %v6025_v6  ;;  %v6146_v8 = vpack.c.bf16 %v6142_v51, %v6141_v55  ;;  %v6259_v38 = vpack.c.bf16 %v9324_v29, %v9308_v20 }
 0x7f8   : > { %7850 = vmatprep.mubr.msk.bf16.mxu1 %vm5335_vm15, %v5795_v44  ;;  %7862 = vmatprep.mubr.msk.bf16.mxu0 %vm5335_vm15, %v9283_v24  ;;  %v6019_v24 = vld [vmem:[#allocation2 + $0x11] sm:$0xff]  ;;  %v6378_v29 = vpack.c.bf16 %v9622_v37, %v9368_v23 }
 0x7f9   : > { %7882 = vmatprep.subr.bf16.mxu0 %v6176_v13  ;;  %v6027_v34 = vpack.c.bf16 %v6020_v39, %v6019_v24 }
 0x7ff   : > { %7851 = vmatmul.mubr.msk.bf16.vlgmr.msra.gmra.mxu1 %vm5335_vm15, %v5796_v36  ;;  %7863 = vmatmul.mubr.msk.bf16.vlgmr.msra.gmra.mxu0 %vm5335_vm15, %v9290_v58 }
 0x800   : > { %7871 = vmatpush3.bf16.msra.mxu1 %v6060_v10  ;;  %7854 = vmatprep.mubr.msk.bf16.mxu1 %vm5335_vm15, %v5797_v30  ;;  %v6524_v10 = vand.u32 %v8068_v18, %v9253_v40  ;;  %v6260_v40 = vpack.c.bf16 %v9332_v63, %v9328_v16 }
 0x801   : > { %7866 = vmatprep.mubr.msk.bf16.mxu0 %vm5335_vm15, %v9312_v19  ;;  %7872 = vmatprep.subr.bf16.mxu1 %v8061_v57 }
 0x802   : > { %7883 = vmatpush3.bf16.msra.mxu0 %v6176_v13  ;;  %v6261_v13 = vpack.c.bf16 %v9345_v48, %v9326_v52 }
 0x803   : > { %7884 = vmatprep.subr.bf16.mxu0 %v8063_v26 }
 0x804   : > { %7873 = vmatpush3.bf16.msra.mxu1 %v8061_v57 }
 0x805   : > { %7894 = vmatprep.subr.bf16.mxu1 %v6292_v60 }
 0x806   : > { %7885 = vmatpush3.bf16.msra.mxu0 %v8063_v26 }
 0x807   : > { %7855 = vmatmul.mubr.msk.bf16.gmra.mxu1 %vm5335_vm15, %v5798_v2  ;;  %7867 = vmatmul.mubr.msk.bf16.gmra.mxu0 %vm5335_vm15, %v9372_v43 }
 0x808   : > { %7874 = vmatprep.mubr.msk.bf16.mxu1 %vm5335_vm15, %v6027_v34  ;;  %7886 = vmatprep.mubr.msk.bf16.mxu0 %vm5335_vm15, %v6143_v59 }
 0x809   : > { %7906 = vmatprep.subr.bf16.mxu0 %v6408_v54 }
 0x80f   : > { %7875 = vmatmul.mubr.msk.bf16.vlgmr.msra.gmra.mxu1 %vm5335_vm15, %v6028_v5  ;;  %7887 = vmatmul.mubr.msk.bf16.vlgmr.msra.gmra.mxu0 %vm5335_vm15, %v6144_v56 }
 0x810   : > { %7895 = vmatpush3.bf16.msra.mxu1 %v6292_v60  ;;  %7878 = vmatprep.mubr.msk.bf16.mxu1 %vm5335_vm15, %v6029_v17 }
 0x811   : > { %7890 = vmatprep.mubr.msk.bf16.mxu0 %vm5335_vm15, %v6145_v50  ;;  %7896 = vmatprep.subr.bf16.mxu1 %v8065_v25 }
 0x812   : > { %7907 = vmatpush3.bf16.msra.mxu0 %v6408_v54 }
 0x813   : > { %7908 = vmatprep.subr.bf16.mxu0 %v8067_v7 }
 0x814   : > { %7897 = vmatpush3.bf16.msra.mxu1 %v8065_v25 }
 0x815   : > { %7918 = vmatprep.subr.bf16.mxu1 %v6524_v10 }
 0x816   : > { %7909 = vmatpush3.bf16.msra.mxu0 %v8067_v7 }
 0x817   : > { %7879 = vmatmul.mubr.msk.bf16.gmra.mxu1 %vm5335_vm15, %v6030_v14  ;;  %7891 = vmatmul.mubr.msk.bf16.gmra.mxu0 %vm5335_vm15, %v6146_v8 }
 0x818   : > { %7898 = vmatprep.mubr.msk.bf16.mxu1 %vm5335_vm15, %v6259_v38  ;;  %7910 = vmatprep.mubr.msk.bf16.mxu0 %vm5335_vm15, %v9285_v46  ;;  %v6258_v46 = vld [vmem:[#allocation2 + $0x4c] sm:$0xff] }
 0x819   : > { %v6262_v20 = vpack.c.bf16 %v6258_v46, %v9347_v35 }
 0x81f   : > { %7899 = vmatmul.mubr.msk.bf16.vlgmr.msra.gmra.mxu1 %vm5335_vm15, %v6260_v40  ;;  %7911 = vmatmul.mubr.msk.bf16.vlgmr.msra.gmra.mxu0 %vm5335_vm15, %v9301_v49 }
 0x820   : > { %7919 = vmatpush3.bf16.msra.mxu1 %v6524_v10  ;;  %7902 = vmatprep.mubr.msk.bf16.mxu1 %vm5335_vm15, %v6261_v13 }
 0x821   : > { %7914 = vmatprep.mubr.msk.bf16.mxu0 %vm5335_vm15, %v9315_v31  ;;  %7920 = vmatprep.subr.bf16.mxu1 %v8069_v33 }
 0x824   : > { %7921 = vmatpush3.bf16.msra.mxu1 %v8069_v33 }
 0x827   : > { %7903 = vmatmul.mubr.msk.bf16.gmra.mxu1 %vm5335_vm15, %v6262_v20  ;;  %7915 = vmatmul.mubr.msk.bf16.gmra.mxu0 %vm5335_vm15, %v6378_v29 }
 0x828   : > { %7922 = vmatprep.mubr.msk.bf16.mxu1 %vm5335_vm15, %v9290_v58 }
 0x82f   : > { %7923 = vmatmul.mubr.msk.bf16.vlgmr.msra.gmra.mxu1 %vm5335_vm15, %v9312_v19 }
 0x830   : > { %7926 = vmatprep.mubr.msk.bf16.mxu1 %vm5335_vm15, %v9372_v43 }
 0x837   : > { %7927 = vmatmul.mubr.msk.bf16.gmra.mxu1 %vm5335_vm15, %v9620_v47 }
 0x89f   : > { %v7804_v49 = vpop.f32.mrf.mxu1  ;;  %v7816_v31 = vpop.f32.mrf.mxu0 }
 0x8a0   : > { %v5533_v8 = vadd.f32 %v7816_v31, %v7804_v49 }
 0x8a1   : > { %v5433_v52 = vpop.f32.mrf.mxu1  ;;  %v5524_v37 = vpop.f32.mrf.mxu0 }
 0x8a2   : > { %v5525_v33 = vadd.f32 %v5524_v37, %v5433_v52 }
 0x8a3   : > { %v7805_v16 = vpop.f32.mrf.mxu1  ;;  %v7817_v63 = vpop.f32.mrf.mxu0 }
 0x8a4   : > { %v5536_v29 = vadd.f32 %v7817_v63, %v7805_v16 }
 0x8a5   : > { %v5436_v48 = vpop.f32.mrf.mxu1  ;;  %v5527_v35 = vpop.f32.mrf.mxu0 }
 0x8a7   : > { %v9419_v44 = vpop.f32.mrf.mxu1  ;;  %v9421_v58 = vpop.f32.mrf.mxu0 }
 0x8a8   : > { %v5549_v52 = vadd.f32 %v9421_v58, %v9419_v44 }
 0x8a9   : > { %v9423_v9 = vpop.f32.mrf.mxu1  ;;  %v9425_v19 = vpop.f32.mrf.mxu0 }
 0x8aa   : > { %v5541_v63 = vadd.f32 %v9425_v19, %v9423_v9 }
 0x8ab   : > { %v9427_v62 = vpop.f32.mrf.mxu1  ;;  %v9429_v42 = vpop.f32.mrf.mxu0 }
 0x8ad   : > { %v9431_v47 = vpop.f32.mrf.mxu1  ;;  %v9433_v36 = vpop.f32.mrf.mxu0 }
 0x8af   : > { %v7828_v22 = vpop.f32.mrf.mxu1  ;;  %v7840_v57 = vpop.f32.mrf.mxu0 }
 0x8b0   : > { %v5665_v13 = vadd.f32 %v7828_v22, %v5533_v8 }
 0x8b1   : > { %v5632_v41 = vpop.f32.mrf.mxu1  ;;  %v5748_v30 = vpop.f32.mrf.mxu0 }
 0x8b3   : > { %v7829_v26 = vpop.f32.mrf.mxu1  ;;  %v7841_v60 = vpop.f32.mrf.mxu0 }
 0x8b5   : > { %v5635_v11 = vpop.f32.mrf.mxu1  ;;  %v9435_v4 = vpop.f32.mrf.mxu0 }
 0x8b7   : > { %v7832_v23 = vpop.f32.mrf.mxu1  ;;  %v9437_v24 = vpop.f32.mrf.mxu0 }
 0x8b9   : > { %v5648_v39 = vpop.f32.mrf.mxu1  ;;  %v9439_v27 = vpop.f32.mrf.mxu0 }
 0x8bb   : > { %v9441_v1 = vpop.f32.mrf.mxu1  ;;  %v9443_v12 = vpop.f32.mrf.mxu0 }
 0x8bd   : > { %v9445_v2 = vpop.f32.mrf.mxu1  ;;  %v9447_v43 = vpop.f32.mrf.mxu0 }
 0x8bf   : > { %v7852_v54 = vpop.f32.mrf.mxu1  ;;  %v7864_v34 = vpop.f32.mrf.mxu0 }
 0x8c1   : > { %v5864_v59 = vpop.f32.mrf.mxu1  ;;  %v5980_v61 = vpop.f32.mrf.mxu0 }
 0x8c3   : > { %v7853_v0 = vpop.f32.mrf.mxu1  ;;  %v7865_v28 = vpop.f32.mrf.mxu0 }
 0x8c5   : > { %v5867_v45 = vpop.f32.mrf.mxu1  ;;  %v9449_v3 = vpop.f32.mrf.mxu0 }
 0x8c7   : > { %v7856_v53 = vpop.f32.mrf.mxu1  ;;  %v9451_v21 = vpop.f32.mrf.mxu0 }
 0x8c9   : > { %v9453_v32 = vpop.f32.mrf.mxu1  ;;  %v9455_v5 = vpop.f32.mrf.mxu0 }
 0x8ca   : > { %9623 = vst [vmem:[#allocation30_spill] sm:$0xff] %v9455_v5  ;;  %v5528_v5 = vadd.f32 %v5527_v35, %v5436_v48  ;;  %v5552_v35 = vadd.f32 %v9429_v42, %v9427_v62 }
 0x8cb   : > { %v9457_v56 = vpop.f32.mrf.mxu1  ;;  %v9459_v25 = vpop.f32.mrf.mxu0 }
 0x8cc   : > { %9624 = vst [vmem:[#allocation27_spill] sm:$0xff] %v9459_v25  ;;  %v5664_v37 = vadd.f32 %v5635_v11, %v5528_v5  ;;  %v5544_v11 = vadd.f32 %v9433_v36, %v9431_v47 }
 0x8cd   : > { %v9461_v18 = vpop.f32.mrf.mxu1  ;;  %v9463_v17 = vpop.f32.mrf.mxu0 }
 0x8ce   : > { %9625 = vst [vmem:[#allocation25_spill] sm:$0xff] %v9461_v18  ;;  %9626 = vst [vmem:[#allocation34_spill] sm:$0xff] %v9463_v17  ;;  %v5663_v17 = vadd.f32 %v5632_v41, %v5525_v33  ;;  %v5668_v42 = vadd.f32 %v9445_v2, %v5544_v11 }
 0x8cf   : > { %v7876_v50 = vpop.f32.mrf.mxu1  ;;  %v7888_v7 = vpop.f32.mrf.mxu0 }
 0x8d1   : > { %v6096_v6 = vpop.f32.mrf.mxu1  ;;  %v6212_v10 = vpop.f32.mrf.mxu0 }
 0x8d3   : > { %v7877_v15 = vpop.f32.mrf.mxu1  ;;  %v9465_v55 = vpop.f32.mrf.mxu0 }
 0x8d4   : > { %9627 = vst [vmem:[#allocation31_spill] sm:$0xff] %v9465_v55  ;;  %v5666_v55 = vadd.f32 %v7829_v26, %v5536_v29  ;;  %v5669_v26 = vadd.f32 %v7832_v23, %v5549_v52 }
 0x8d5   : > { %v6099_v51 = vpop.f32.mrf.mxu1  ;;  %v9467_v14 = vpop.f32.mrf.mxu0  ;;  %v9631_v29 = vld [vmem:[#allocation25_spill] sm:$0xff] }
 0x8d6   : > { %9628 = vst [vmem:[#allocation36_spill] sm:$0xff] %v9467_v14  ;;  %v5781_v14 = vadd.f32 %v7840_v57, %v5665_v13  ;;  %v5782_v41 = vadd.f32 %v7841_v60, %v5666_v55  ;;  %v5667_v57 = vadd.f32 %v5648_v39, %v5541_v63  ;;  %v5785_v19 = vadd.f32 %v9437_v24, %v5669_v26 }
 0x8d7   : > { %v9469_v38 = vpop.f32.mrf.mxu1  ;;  %v9471_v40 = vpop.f32.mrf.mxu0 }
 0x8d8   : > { %9629 = vst [vmem:[#allocation26_spill] sm:$0xff] %v9471_v40  ;;  %v5779_v40 = vadd.f32 %v5748_v30, %v5663_v17  ;;  %v5897_v22 = vadd.f32 %v7852_v54, %v5781_v14  ;;  %v5898_v13 = vadd.f32 %v7853_v0, %v5782_v41  ;;  %v5780_v30 = vadd.f32 %v9435_v4, %v5664_v37 }
 0x8d9   : > { %v9473_v46 = vpop.f32.mrf.mxu1  ;;  %v9475_v20 = vpop.f32.mrf.mxu0  ;;  %v5670_v54 = vadd.f32 %v9441_v1, %v5552_v35  ;;  %v5783_v62 = vadd.f32 %v9439_v27, %v5667_v57 }
 0x8da   : > { %v5895_v33 = vadd.f32 %v5864_v59, %v5779_v40  ;;  %v6013_v17 = vadd.f32 %v7864_v34, %v5897_v22  ;;  %v5896_v60 = vadd.f32 %v5867_v45, %v5780_v30  ;;  %v6014_v39 = vadd.f32 %v7865_v28, %v5898_v13  ;;  %v9630_v40 = vld [vmem:[#allocation30_spill] sm:$0xff] }
 0x8db   : > { %v9477_v25 = vpop.f32.mrf.mxu1  ;;  %v9479_v18 = vpop.f32.mrf.mxu0  ;;  %v5901_v34 = vadd.f32 %v7856_v53, %v5785_v19  ;;  %v5786_v55 = vadd.f32 %v9443_v12, %v5670_v54  ;;  %v5899_v47 = vadd.f32 %v9453_v32, %v5783_v62  ;;  %v5784_v45 = vadd.f32 %v9447_v43, %v5668_v42  ;;  %v9633_v43 = vld [vmem:[#allocation27_spill] sm:$0xff]  ;;  %v7109_v54 = vld [vmem:[%s8256_s28] ss:$0 sm:$0xff] }
 0x8dc   : > { %v6011_v9 = vadd.f32 %v5980_v61, %v5895_v33  ;;  %v6129_v23 = vadd.f32 %v7876_v50, %v6013_v17  ;;  %v6130_v36 = vadd.f32 %v7877_v15, %v6014_v39  ;;  %v6012_v1 = vadd.f32 %v9449_v3, %v5896_v60  ;;  %v9632_v15 = vld [vmem:[#allocation31_spill] sm:$0xff]  ;;  %v9635_v33 = vld [vmem:[#allocation34_spill] sm:$0xff] }
 0x8dd   : > { %v9481_v49 = vpop.f32.mrf.mxu1  ;;  %v9483_v31 = vpop.f32.mrf.mxu0  ;;  %v5902_v27 = vadd.f32 %v9457_v56, %v5786_v55  ;;  %v6017_v2 = vadd.f32 %v9451_v21, %v5901_v34  ;;  %v6015_v12 = vadd.f32 %v9630_v40, %v5899_v47  ;;  %v5900_v32 = vadd.f32 %v9631_v29, %v5784_v45 }
 0x8de   : > { %v6127_v4 = vadd.f32 %v6096_v6, %v6011_v9  ;;  %v6245_v24 = vadd.f32 %v7888_v7, %v6129_v23  ;;  %v6128_v28 = vadd.f32 %v6099_v51, %v6012_v1  ;;  %v6246_v52 = vadd.f32 %v9632_v15, %v6130_v36 }
 0x8df   : > { %v7900_v8 = vpop.f32.mrf.mxu1  ;;  %v7912_v16 = vpop.f32.mrf.mxu0  ;;  %v6133_v7 = vadd.f32 %v9469_v38, %v6017_v2  ;;  %v6018_v22 = vadd.f32 %v9633_v43, %v5902_v27  ;;  %v6131_v56 = vadd.f32 %v9473_v46, %v6015_v12  ;;  %v6016_v26 = vadd.f32 %v9635_v33, %v5900_v32 }
 0x8e0   : > { %v6243_v50 = vadd.f32 %v6212_v10, %v6127_v4  ;;  %v6361_v53 = vadd.f32 %v7900_v8, %v6245_v24  ;;  %v9634_v10 = vld [vmem:[#allocation36_spill] sm:$0xff] }
 0x8e1   : > { %v6328_v48 = vpop.f32.mrf.mxu1  ;;  %v6444_v44 = vpop.f32.mrf.mxu0  ;;  %v6244_v51 = vadd.f32 %v9634_v10, %v6128_v28  ;;  %v6134_v35 = vadd.f32 %v9477_v25, %v6018_v22  ;;  %v6247_v11 = vadd.f32 %v9475_v20, %v6131_v56  ;;  %v6132_v46 = vadd.f32 %v9481_v49, %v6016_v26  ;;  %v7110_v49 = vld [vmem:[%s8261_s8] ss:$0 sm:$0xff] }
 0x8e2   : > { %v6359_v3 = vadd.f32 %v6328_v48, %v6243_v50  ;;  %v6477_v8 = vadd.f32 %v7912_v16, %v6361_v53  ;;  %v9636_v48 = vld [vmem:[#allocation26_spill] sm:$0xff]  ;;  %v6635_v50 = vstv %s5198_s6 }
 0x8e3   : > { %v7901_v58 = vpop.f32.mrf.mxu1  ;;  %v7913_v0 = vpop.f32.mrf.mxu0  ;;  %v6249_v13 = vadd.f32 %v9636_v48, %v6133_v7  ;;  %v6250_v25 = vadd.f32 %v9479_v18, %v6134_v35  ;;  %v6248_v20 = vadd.f32 %v9483_v31, %v6132_v46 }
 0x8e4   : > { %v6362_v21 = vadd.f32 %v7901_v58, %v6246_v52  ;;  %v6475_v57 = vadd.f32 %v6444_v44, %v6359_v3 }
 0x8e5   : > { %v6331_v59 = vpop.f32.mrf.mxu1  ;;  %v6447_v6 = vpop.f32.mrf.mxu0 }
 0x8e6   : > { %v6360_v38 = vadd.f32 %v6331_v59, %v6244_v51  ;;  %v6478_v58 = vadd.f32 %v7913_v0, %v6362_v21 }
 0x8e7   : > { %v7904_v5 = vpop.f32.mrf.mxu1  ;;  %v7916_v63 = vpop.f32.mrf.mxu0 }
 0x8e8   : > { %v6365_v9 = vadd.f32 %v7904_v5, %v6249_v13  ;;  %v6476_v62 = vadd.f32 %v6447_v6, %v6360_v38 }
 0x8e9   : > { %v6344_v61 = vpop.f32.mrf.mxu1  ;;  %v6460_v19 = vpop.f32.mrf.mxu0 }
 0x8ea   : > { %v6363_v44 = vadd.f32 %v6344_v61, %v6247_v11  ;;  %v6481_v34 = vadd.f32 %v7916_v63, %v6365_v9 }
 0x8eb   : > { %v7905_v14 = vpop.f32.mrf.mxu1  ;;  %v7917_v0 = vpop.f32.mrf.mxu0 }
 0x8ec   : > { %v6366_v4 = vadd.f32 %v7905_v14, %v6250_v25  ;;  %v6479_v5 = vadd.f32 %v6460_v19, %v6363_v44 }
 0x8ed   : > { %v6347_v37 = vpop.f32.mrf.mxu1  ;;  %v6463_v28 = vpop.f32.mrf.mxu0 }
 0x8ee   : > { %v6364_v1 = vadd.f32 %v6347_v37, %v6248_v20  ;;  %v6482_v27 = vadd.f32 %v7917_v0, %v6366_v4 }
 0x8ef   : > { %v7924_v41 = vpop.f32.mrf.mxu1 }
 0x8f0   : > { %v6593_v30 = vadd.f32 %v7924_v41, %v6477_v8  ;;  %v6480_v40 = vadd.f32 %v6463_v28, %v6364_v1 }
 0x8f1   : > { %v6560_v17 = vpop.f32.mrf.mxu1 }
 0x8f2   : > { %v6591_v16 = vadd.f32 %v6560_v17, %v6475_v57  ;;  %v6607_v59 = vmul.f32 %v7109_v54, %v6593_v30 }
 0x8f3   : > { %v7925_v60 = vpop.f32.mrf.mxu1 }
 0x8f4   : > { %v6594_v23 = vadd.f32 %v7925_v60, %v6478_v58  ;;  %v6605_v42 = vmul.f32 %v7109_v54, %v6591_v16  ;;  %v6621_v24 = vadd.f32 %v7110_v49, %v6607_v59 }
 0x8f5   : > { %v6563_v39 = vpop.f32.mrf.mxu1 }
 0x8f6   : > { %v6608_v55 = vmul.f32 %v7109_v54, %v6594_v23  ;;  %v6592_v47 = vadd.f32 %v6563_v39, %v6476_v62  ;;  %v6619_v45 = vadd.f32 %v7110_v49, %v6605_v42  ;;  %vm6629_vm8 = vcmp.gt.f32.partialorder %v6621_v24, 0.0 }
 0x8f7   : > { %v7928_v36 = vpop.f32.mrf.mxu1  ;;  %v6638_v32 = vmul.f32 %v6635_v50, %v6621_v24 }
 0x8f8   : > { %v6597_v18 = vadd.f32 %v7928_v36, %v6481_v34  ;;  %v6622_v53 = vadd.f32 %v7110_v49, %v6608_v55  ;;  %v6606_v6 = vmul.f32 %v7109_v54, %v6592_v47  ;;  %v6636_v15 = vmul.f32 %v6635_v50, %v6619_v45 }
 0x8f9   : > { %v6576_v61 = vpop.f32.mrf.mxu1  ;;  %vm6627_vm9 = vcmp.gt.f32.partialorder %v6619_v45, 0.0  ;;  %v6646_v63 = vsel %vm6629_vm8, %v6621_v24, %v6638_v32 }
 0x8fa   : > { %v6595_v2 = vadd.f32 %v6576_v61, %v6479_v5  ;;  %v6611_v31 = vmul.f32 %v7109_v54, %v6597_v18  ;;  %v6639_v22 = vmul.f32 %v6635_v50, %v6622_v53  ;;  %v6620_v56 = vadd.f32 %v7110_v49, %v6606_v6 }
 0x8fb   : > { %v7929_v14 = vpop.f32.mrf.mxu1  ;;  %v6644_v41 = vsel %vm6627_vm9, %v6619_v45, %v6636_v15  ;;  %vm6630_vm12 = vcmp.gt.f32.partialorder %v6622_v53, 0.0 }
 0x8fc   : > { %v6609_v12 = vmul.f32 %v7109_v54, %v6595_v2  ;;  %v6598_v29 = vadd.f32 %v7929_v14, %v6482_v27  ;;  %v6625_v52 = vadd.f32 %v7110_v49, %v6611_v31  ;;  %v6637_v48 = vmul.f32 %v6635_v50, %v6620_v56 }
 0x8fd   : > { %v6579_v3 = vpop.f32.mrf.mxu1  ;;  %v6647_v30 = vsel %vm6630_vm12, %v6622_v53, %v6639_v22  ;;  %vm6628_vm14 = vcmp.gt.f32.partialorder %v6620_v56, 0.0 }
 0x8fe   : > { %v6623_v7 = vadd.f32 %v7110_v49, %v6609_v12  ;;  %v6612_v37 = vmul.f32 %v7109_v54, %v6598_v29  ;;  %v6596_v43 = vadd.f32 %v6579_v3, %v6480_v40  ;;  %vm6633_vm10 = vcmp.gt.f32.partialorder %v6625_v52, 0.0 }
 0x8ff   : > { %v6642_v21 = vmul.f32 %v6635_v50, %v6625_v52  ;;  %v6645_v58 = vsel %vm6628_vm14, %v6620_v56, %v6637_v48 }
 0x900   : > { %vm6631_vm11 = vcmp.gt.f32.partialorder %v6623_v7, 0.0  ;;  %v6640_v10 = vmul.f32 %v6635_v50, %v6623_v7  ;;  %v6626_v51 = vadd.f32 %v7110_v49, %v6612_v37  ;;  %v6610_v8 = vmul.f32 %v7109_v54, %v6596_v43 }
 0x901   : > { %v6650_v33 = vsel %vm6633_vm10, %v6625_v52, %v6642_v21 }
 0x902   : > { %v6654_v26 = vmax.f32 %v6646_v63, %v6650_v33  ;;  %v6648_v35 = vsel %vm6631_vm11, %v6623_v7, %v6640_v10  ;;  %vm6634_vm13 = vcmp.gt.f32.partialorder %v6626_v51, 0.0  ;;  %v6643_v57 = vmul.f32 %v6635_v50, %v6626_v51 }
 0x903   : > { %v6652_v13 = vmax.f32 %v6644_v41, %v6648_v35  ;;  %v6624_v38 = vadd.f32 %v7110_v49, %v6610_v8 }
 0x904   : > { %v6651_v17 = vsel %vm6634_vm13, %v6626_v51, %v6643_v57 }
 0x905   : > { %v6655_v11 = vmax.f32 %v6647_v30, %v6651_v17  ;;  %vm6632_vm15 = vcmp.gt.f32.partialorder %v6624_v38, 0.0  ;;  %v6641_v46 = vmul.f32 %v6635_v50, %v6624_v38 }
 0x907   : > { %v6657_v54 = vmax.f32 %v6654_v26, %v6655_v11  ;;  %v6649_v16 = vsel %vm6632_vm15, %v6624_v38, %v6641_v46 }
 0x908   : > { %v6653_v9 = vmax.f32 %v6645_v58, %v6649_v16 }
 0x90a   : > { %v6656_v19 = vmax.f32 %v6652_v13, %v6653_v9 }
 0x90c   : > { %v6658_v60 = vmax.f32 %v6656_v19, %v6657_v54 }
 0x90e   : > { %v6659_v25 = vrot.slane %v6658_v60, 4 }
 0x910   : > { %v6660_v44 = vmax.f32 %v6658_v60, %v6659_v25 }
 0x912   : > { %v6661_v23 = vrot.slane %v6660_v44, 2 }
 0x914   : > { %v6662_v62 = vmax.f32 %v6660_v44, %v6661_v23 }
 0x916   : > { %v6663_v59 = vrot.slane %v6662_v62, 1 }
 0x918   : > { %v6664_v42 = vmax.f32 %v6662_v62, %v6663_v59 }
 0x91a   : > { %6665 = vst [vmem:[%s962_s20] sm:$0x1] %v6664_v42 }
 0x91b PF: > { %s81_s24 = sadd.s32 1, %s8078_s24  }
 0x91c   : > { %p78_p4 = scmp.ge.s32.totalorder %s81_s24, 4  }
 0x91e   :  { %80 = sbr.rel (!%p78_p4) target bundleno = 55 (0x37), region = 245 }

</bundles_post_ra>
